<compile_context>
chip_gen: v6e
topology: v6e:2x2x1
jax: 0.10.0
libtpu: 0.0.40
codegen_flags: <defaults>
</compile_context>

<pallas_src>
import functools

import jax
import jax.numpy as jnp
from jax.experimental import pallas as pl
from jax.experimental.pallas import tpu as pltpu


# -----------------------------------------------------------------------------
# Kernel 1: 3x3 stride-1 conv with in-VMEM im2col  +  folded-BN bias  +  ReLU
# -----------------------------------------------------------------------------
def _conv3x3_s1_kernel(x_ref, w_ref, b_ref, o_ref, *, th, wo, cin, cout):
    # x_ref: (1, Hp, Wp, Cin)  zero-padded input (bf16), resident per batch elem
    # w_ref: (9, Cin, Cout)    bf16 weights, BN scale pre-folded, tap = ky*3+kx
    # b_ref: (1, Cout)         f32 folded BN bias
    # o_ref: (1, th, Wo, Cout) output row-tile
    r0 = pl.program_id(1) * th
    acc = jnp.zeros((th * wo, cout), jnp.float32)
    for ky in range(3):
        for kx in range(3):
            patch = x_ref[0, pl.ds(r0 + ky, th), pl.ds(kx, wo), :]
            # reshape in f32 (8-sublane tiles) to keep the merge layout-trivial,
            # then feed the MXU in bf16.
            patch = patch.astype(jnp.float32).reshape(th * wo, cin)
            acc = acc + jnp.dot(patch.astype(jnp.bfloat16),
                                w_ref[ky * 3 + kx],
                                preferred_element_type=jnp.float32)
    res = jnp.maximum(acc + b_ref[...], 0.0)
    o_ref[...] = res.reshape(1, th, wo, cout).astype(o_ref.dtype)


def conv3x3_s1_fused(x_nhwc, w_taps, bias, out_dtype=jnp.bfloat16,
                     rows_target=1024):
    """3x3 conv, stride 1, padding 1, fused BN(bias)+ReLU.  No HBM im2col."""
    Nb, H, W, Cin = x_nhwc.shape
    Cout = w_taps.shape[-1]
    Ho, Wo = H, W
    xp = jnp.pad(x_nhwc.astype(jnp.bfloat16), ((0, 0), (1, 1), (1, 1), (0, 0)))

    # largest divisor of Ho so that the patch tile is <= rows_target rows
    th = 1
    for d in range(1, Ho + 1):
        if Ho % d == 0 and d * Wo <= rows_target:
            th = d

    kernel = functools.partial(_conv3x3_s1_kernel,
                               th=th, wo=Wo, cin=Cin, cout=Cout)
    # TODO(synk): for very large BEV maps (e.g. 496x432xC) the whole padded
    # image no longer fits the scoped VMEM double-buffer; row-tile the input
    # with a 1-row halo (pl.Element) or raise vmem_limit_bytes in that regime.
    out = pl.pallas_call(
        kernel,
        out_shape=jax.ShapeDtypeStruct((Nb, Ho, Wo, Cout), out_dtype),
        grid_spec=pl.GridSpec(
            grid=(Nb, Ho // th),
            in_specs=[
                pl.BlockSpec((1, H + 2, W + 2, Cin), lambda b, r: (b, 0, 0, 0)),
                pl.BlockSpec((9, Cin, Cout), lambda b, r: (0, 0, 0)),
                pl.BlockSpec((1, Cout), lambda b, r: (0, 0)),
            ],
            out_specs=pl.BlockSpec((1, th, Wo, Cout), lambda b, r: (b, r, 0, 0)),
        ),
        compiler_params=pltpu.CompilerParams(
            dimension_semantics=("parallel", "parallel")),
    )(xp, w_taps, bias.reshape(1, Cout).astype(jnp.float32))
    return out


# -----------------------------------------------------------------------------
# Kernel 2: generic fused  relu( (P @ W) + bias )   (BN scale folded into W)
# -----------------------------------------------------------------------------
def _matmul_bias_relu_kernel(p_ref, w_ref, b_ref, o_ref):
    acc = jnp.dot(p_ref[...], w_ref[...], preferred_element_type=jnp.float32)
    o_ref[...] = jnp.maximum(acc + b_ref[...], 0.0).astype(o_ref.dtype)


def fused_matmul_bias_relu(P, W2d, bias, out_dtype=jnp.float32, tm=512):
    """P: (M, K), W2d: (K, N) bf16, bias: (N,) f32.  Returns (M, N)."""
    M, K = P.shape
    Kw, N = W2d.shape
    assert K == Kw
    tm_eff = max(8, (min(tm, M) // 8) * 8)
    M_pad = pl.cdiv(M, tm_eff) * tm_eff
    Pb = P.astype(jnp.bfloat16)
    if M_pad != M:
        Pb = jnp.pad(Pb, ((0, M_pad - M), (0, 0)))

    out = pl.pallas_call(
        _matmul_bias_relu_kernel,
        out_shape=jax.ShapeDtypeStruct((M_pad, N), out_dtype),
        grid_spec=pl.GridSpec(
            grid=(M_pad // tm_eff,),
            in_specs=[
                pl.BlockSpec((tm_eff, K), lambda i: (i, 0)),
                pl.BlockSpec((K, N), lambda i: (0, 0)),
                pl.BlockSpec((1, N), lambda i: (0, 0)),
            ],
            out_specs=pl.BlockSpec((tm_eff, N), lambda i: (i, 0)),
        ),
        compiler_params=pltpu.CompilerParams(dimension_semantics=("parallel",)),
    )(Pb, W2d.astype(jnp.bfloat16), bias.reshape(1, N).astype(jnp.float32))
    return out[:M] if M_pad != M else out


# -----------------------------------------------------------------------------
# Conv / ConvTranspose lowering glue
# -----------------------------------------------------------------------------
def _im2col_3x3(x_nhwc, stride):
    """3x3 conv, padding=1 (ZeroPad2d(1) + Conv2d pad=0).  bf16 patches."""
    Nb, H, W, C = x_nhwc.shape
    xp = jnp.pad(x_nhwc, ((0, 0), (1, 1), (1, 1), (0, 0)))
    Ho = (H + 2 - 3) // stride + 1
    Wo = (W + 2 - 3) // stride + 1
    cols = []
    for ky in range(3):
        for kx in range(3):
            cols.append(xp[:, ky:ky + stride * Ho:stride,
                           kx:kx + stride * Wo:stride, :])
    P = jnp.concatenate(cols, axis=-1)          # (N, Ho, Wo, 9*C), (ky,kx,c)
    return P.reshape(Nb * Ho * Wo, 9 * C), (Nb, Ho, Wo)


def conv3x3_bn_relu(x_nhwc, layer, out_dtype=jnp.bfloat16):
    w_taps = layer["w_taps"]                    # (9, Cin, Cout), scale folded
    bias = layer["bias"]
    stride = layer["stride"]
    Cin, Cout = w_taps.shape[1], w_taps.shape[2]
    if stride == 1 and x_nhwc.shape[2] % 8 == 0:
        return conv3x3_s1_fused(x_nhwc, w_taps, bias, out_dtype=out_dtype)
    # strided (or odd-width) conv: bf16 wrapper im2col + fused matmul kernel
    P, (Nb, Ho, Wo) = _im2col_3x3(x_nhwc.astype(jnp.bfloat16), stride)
    W2d = w_taps.reshape(9 * Cin, Cout)
    out = fused_matmul_bias_relu(P, W2d, bias, out_dtype=out_dtype)
    return out.reshape(Nb, Ho, Wo, Cout)


def deconv_bn_relu(x_nhwc, deblock, out_dtype=jnp.float32):
    """ConvTranspose2d(kernel=stride, stride=stride) + BN + ReLU (no overlap)."""
    s = deblock["stride"]
    W2d = deblock["w2d"]                        # (Cin, s*s*Cout), scale folded
    bias_t = deblock["bias_t"]                  # (s*s*Cout,)
    Cout = deblock["cout"]
    Nb, H, W, Cin = x_nhwc.shape
    X2d = x_nhwc.reshape(Nb * H * W, Cin)
    out = fused_matmul_bias_relu(X2d, W2d, bias_t, out_dtype=out_dtype)
    if s == 1:
        return out.reshape(Nb, H, W, Cout)
    # TODO(synk): fold this pixel-shuffle transpose into the kernel out_spec to
    # avoid the extra XLA transpose pass at the highest resolution.
    out = out.reshape(Nb, H, W, s, s, Cout)
    out = out.transpose(0, 1, 3, 2, 4, 5).reshape(Nb, H * s, W * s, Cout)
    return out


# -----------------------------------------------------------------------------
# Deterministic parameter construction (matches BaseBEVBackbone.__init__ shapes)
# -----------------------------------------------------------------------------
def _fold_bn(key, C, eps=1e-3):
    k1, k2, k3, k4 = jax.random.split(key, 4)
    gamma = 1.0 + 0.1 * jax.random.normal(k1, (C,), jnp.float32)
    beta = 0.1 * jax.random.normal(k2, (C,), jnp.float32)
    mean = 0.05 * jax.random.normal(k3, (C,), jnp.float32)
    var = 1.0 + 0.1 * jax.random.uniform(k4, (C,), jnp.float32)
    scale = gamma / jnp.sqrt(var + eps)
    bias = beta - mean * scale
    return scale, bias


def _pack_conv(w, scale, bias, stride):
    """Fold BN scale into the conv weights at param-build time; bf16 taps."""
    cin, cout = w.shape[2], w.shape[3]
    wf = (w * scale.reshape(1, 1, 1, cout)).reshape(9, cin, cout)
    return dict(w_taps=wf.astype(jnp.bfloat16),
                bias=bias.astype(jnp.float32), stride=stride)


def _pack_deconv(w, scale, bias, stride, cout):
    cin, s = w.shape[0], w.shape[1]
    wf = (w * scale.reshape(1, 1, 1, cout)).reshape(cin, s * s * cout)
    bias_t = jnp.tile(bias, s * s)              # columns ordered (dy, dx, cout)
    return dict(w2d=wf.astype(jnp.bfloat16),
                bias_t=bias_t.astype(jnp.float32), stride=stride, cout=cout)


def make_backbone_params(key, input_channels, layer_nums, layer_strides,
                         num_filters, upsample_strides, num_upsample_filters):
    c_in_list = [input_channels, *num_filters[:-1]]
    blocks, deblocks = [], []
    for idx in range(len(layer_nums)):
        cur = []
        cin = c_in_list[idx]
        cout = num_filters[idx]
        key, kw, kb = jax.random.split(key, 3)
        w = jax.random.normal(kw, (3, 3, cin, cout), jnp.float32) / jnp.sqrt(9.0 * cin)
        scale, bias = _fold_bn(kb, cout)
        cur.append(_pack_conv(w, scale, bias, layer_strides[idx]))
        for _ in range(layer_nums[idx]):
            key, kw, kb = jax.random.split(key, 3)
            w = jax.random.normal(kw, (3, 3, cout, cout), jnp.float32) / jnp.sqrt(9.0 * cout)
            scale, bias = _fold_bn(kb, cout)
            cur.append(_pack_conv(w, scale, bias, 1))
        blocks.append(cur)
        if len(upsample_strides) > 0:
            s = upsample_strides[idx]
            up_c = num_upsample_filters[idx]
            key, kw, kb = jax.random.split(key, 3)
            # TODO(synk): fractional upsample_strides (<1 -> strided Conv2d) not
            # exercised by this config; only the ConvTranspose2d branch is built.
            w = jax.random.normal(kw, (cout, s, s, up_c), jnp.float32) / jnp.sqrt(float(cout))
            scale, bias = _fold_bn(kb, up_c)
            deblocks.append(_pack_deconv(w, scale, bias, s, up_c))
    return dict(blocks=blocks, deblocks=deblocks)


# -----------------------------------------------------------------------------
# Forward pass (mirrors BaseBEVBackbone.forward)
# -----------------------------------------------------------------------------
def backbone_forward(params, spatial_features_nchw):
    x = jnp.transpose(spatial_features_nchw, (0, 2, 3, 1))   # NCHW -> NHWC
    x = x.astype(jnp.bfloat16)
    in_H = spatial_features_nchw.shape[2]
    ups = []
    ret = {}
    for i, block in enumerate(params["blocks"]):
        for layer in block:
            x = conv3x3_bn_relu(x, layer)
        stride = in_H // x.shape[1]
        ret["spatial_features_%dx" % stride] = (
            jnp.transpose(x, (0, 3, 1, 2)).astype(jnp.float32))
        if len(params["deblocks"]) > 0:
            ups.append(deconv_bn_relu(x, params["deblocks"][i]))
        else:
            ups.append(x)
    if len(ups) > 1:
        x = jnp.concatenate(ups, axis=-1)        # cat along channels (NHWC last)
    elif len(ups) == 1:
        x = ups[0]
    if len(params["deblocks"]) > len(params["blocks"]):
        x = deconv_bn_relu(x, params["deblocks"][-1])
    ret["spatial_features_2d"] = (
        jnp.transpose(x, (0, 3, 1, 2)).astype(jnp.float32))  # back to NCHW
    return ret


if __name__ == "__main__":
    # Small, SPG-like config: 2 levels, strides [1, 2], upsample back to 1x.
    input_channels = 4
    layer_nums = [2, 2]
    layer_strides = [1, 2]
    num_filters = [32, 64]
    upsample_strides = [1, 2]
    num_upsample_filters = [32, 32]

    key = jax.random.PRNGKey(0)
    kx, kp = jax.random.split(key)
    x = jax.random.normal(kx, (2, input_channels, 16, 16), jnp.float32)  # NCHW

    params = make_backbone_params(kp, input_channels, layer_nums, layer_strides,
                                  num_filters, upsample_strides,
                                  num_upsample_filters)

    fwd = jax.jit(lambda inp: backbone_forward(params, inp))
    out = fwd(x)
    feat2d = jax.block_until_ready(out["spatial_features_2d"])

    expected_c = sum(num_upsample_filters)
    assert feat2d.shape == (2, expected_c, 16, 16), feat2d.shape
    assert out["spatial_features_1x"].shape == (2, 32, 16, 16)
    assert out["spatial_features_2x"].shape == (2, 64, 8, 8)
    assert bool(jnp.all(jnp.isfinite(feat2d)))
    assert bool(jnp.all(feat2d >= 0.0))  # ReLU output

    print("KERNEL_OK")
</pallas_src>

<mosaic_0001>
module attributes {stable_mosaic.version = 11 : i64} {
  func.func @_conv3x3_s1_kernel(%arg0: i32, %arg1: i32, %arg2: memref<1x18x18x4xbf16, #tpu.memory_space<vmem>>, %arg3: memref<9x4x32xbf16, #tpu.memory_space<vmem>>, %arg4: memref<1x32xf32, #tpu.memory_space<vmem>>, %arg5: memref<1x16x16x32xbf16, #tpu.memory_space<vmem>>) attributes {dimension_semantics = [#tpu.dimension_semantics<parallel>, #tpu.dimension_semantics<parallel>], iteration_bounds = array<i64: 2, 1>, scalar_prefetch = 0 : i64, scratch_operands = 0 : i64, tpu.core_type = #tpu.core_type<tc>, window_params = [{transform_indices = @transform_0, window_bounds = array<i64: 1, 18, 18, 4>}, {pipeline_mode = #tpu.pipeline_mode<synchronous>, transform_indices = @transform_1, window_bounds = array<i64: 9, 4, 32>}, {pipeline_mode = #tpu.pipeline_mode<synchronous>, transform_indices = @transform_2, window_bounds = array<i64: 1, 32>}, {transform_indices = @transform_3, window_bounds = array<i64: 1, 16, 16, 32>}]} {
    %c16_i32 = arith.constant 16 : i32
    %0 = arith.muli %arg1, %c16_i32 : i32
    %cst = arith.constant 0.000000e+00 : f32
    %1 = vector.broadcast %cst : f32 to vector<256x32xf32>
    %c0_i32 = arith.constant 0 : i32
    %2 = arith.addi %0, %c0_i32 : i32
    %c0 = arith.constant 0 : index
    %3 = arith.index_cast %2 : i32 to index
    %c0_0 = arith.constant 0 : index
    %c0_1 = arith.constant 0 : index
    %4 = vector.load %arg2[%c0, %3, %c0_0, %c0_1] : memref<1x18x18x4xbf16, #tpu.memory_space<vmem>>, vector<1x16x16x4xbf16>
    %5 = vector.shape_cast %4 : vector<1x16x16x4xbf16> to vector<16x16x4xbf16>
    %6 = arith.extf %5 : vector<16x16x4xbf16> to vector<16x16x4xf32>
    %7 = vector.shape_cast %6 : vector<16x16x4xf32> to vector<256x4xf32>
    %8 = arith.truncf %7 : vector<256x4xf32> to vector<256x4xbf16>
    %c0_2 = arith.constant 0 : index
    %c0_3 = arith.constant 0 : index
    %c0_4 = arith.constant 0 : index
    %9 = vector.load %arg3[%c0_2, %c0_3, %c0_4] : memref<9x4x32xbf16, #tpu.memory_space<vmem>>, vector<1x4x32xbf16>
    %10 = vector.shape_cast %9 : vector<1x4x32xbf16> to vector<4x32xbf16>
    %cst_5 = arith.constant dense<0.000000e+00> : vector<256x32xf32>
    %11 = tpu.matmul %8, %10, %cst_5 {dimension_numbers = #tpu.dot_dimension_numbers<[1], [0], [0], [1], [0, 0, 1, 1], [], []>} : vector<256x4xbf16>, vector<4x32xbf16>, vector<256x32xf32> -> vector<256x32xf32>
    %12 = arith.addf %1, %11 : vector<256x32xf32>
    %c0_i32_6 = arith.constant 0 : i32
    %13 = arith.addi %0, %c0_i32_6 : i32
    %c0_7 = arith.constant 0 : index
    %14 = arith.index_cast %13 : i32 to index
    %c1 = arith.constant 1 : index
    %c0_8 = arith.constant 0 : index
    %15 = vector.load %arg2[%c0_7, %14, %c1, %c0_8] : memref<1x18x18x4xbf16, #tpu.memory_space<vmem>>, vector<1x16x16x4xbf16>
    %16 = vector.shape_cast %15 : vector<1x16x16x4xbf16> to vector<16x16x4xbf16>
    %17 = arith.extf %16 : vector<16x16x4xbf16> to vector<16x16x4xf32>
    %18 = vector.shape_cast %17 : vector<16x16x4xf32> to vector<256x4xf32>
    %19 = arith.truncf %18 : vector<256x4xf32> to vector<256x4xbf16>
    %c1_9 = arith.constant 1 : index
    %c0_10 = arith.constant 0 : index
    %c0_11 = arith.constant 0 : index
    %20 = vector.load %arg3[%c1_9, %c0_10, %c0_11] : memref<9x4x32xbf16, #tpu.memory_space<vmem>>, vector<1x4x32xbf16>
    %21 = vector.shape_cast %20 : vector<1x4x32xbf16> to vector<4x32xbf16>
    %cst_12 = arith.constant dense<0.000000e+00> : vector<256x32xf32>
    %22 = tpu.matmul %19, %21, %cst_12 {dimension_numbers = #tpu.dot_dimension_numbers<[1], [0], [0], [1], [0, 0, 1, 1], [], []>} : vector<256x4xbf16>, vector<4x32xbf16>, vector<256x32xf32> -> vector<256x32xf32>
    %23 = arith.addf %12, %22 : vector<256x32xf32>
    %c0_i32_13 = arith.constant 0 : i32
    %24 = arith.addi %0, %c0_i32_13 : i32
    %c0_14 = arith.constant 0 : index
    %25 = arith.index_cast %24 : i32 to index
    %c2 = arith.constant 2 : index
    %c0_15 = arith.constant 0 : index
    %26 = vector.load %arg2[%c0_14, %25, %c2, %c0_15] : memref<1x18x18x4xbf16, #tpu.memory_space<vmem>>, vector<1x16x16x4xbf16>
    %27 = vector.shape_cast %26 : vector<1x16x16x4xbf16> to vector<16x16x4xbf16>
    %28 = arith.extf %27 : vector<16x16x4xbf16> to vector<16x16x4xf32>
    %29 = vector.shape_cast %28 : vector<16x16x4xf32> to vector<256x4xf32>
    %30 = arith.truncf %29 : vector<256x4xf32> to vector<256x4xbf16>
    %c2_16 = arith.constant 2 : index
    %c0_17 = arith.constant 0 : index
    %c0_18 = arith.constant 0 : index
    %31 = vector.load %arg3[%c2_16, %c0_17, %c0_18] : memref<9x4x32xbf16, #tpu.memory_space<vmem>>, vector<1x4x32xbf16>
    %32 = vector.shape_cast %31 : vector<1x4x32xbf16> to vector<4x32xbf16>
    %cst_19 = arith.constant dense<0.000000e+00> : vector<256x32xf32>
    %33 = tpu.matmul %30, %32, %cst_19 {dimension_numbers = #tpu.dot_dimension_numbers<[1], [0], [0], [1], [0, 0, 1, 1], [], []>} : vector<256x4xbf16>, vector<4x32xbf16>, vector<256x32xf32> -> vector<256x32xf32>
    %34 = arith.addf %23, %33 : vector<256x32xf32>
    %c1_i32 = arith.constant 1 : i32
    %35 = arith.addi %0, %c1_i32 : i32
    %c0_20 = arith.constant 0 : index
    %36 = arith.index_cast %35 : i32 to index
    %c0_21 = arith.constant 0 : index
    %c0_22 = arith.constant 0 : index
    %37 = vector.load %arg2[%c0_20, %36, %c0_21, %c0_22] : memref<1x18x18x4xbf16, #tpu.memory_space<vmem>>, vector<1x16x16x4xbf16>
    %38 = vector.shape_cast %37 : vector<1x16x16x4xbf16> to vector<16x16x4xbf16>
    %39 = arith.extf %38 : vector<16x16x4xbf16> to vector<16x16x4xf32>
    %40 = vector.shape_cast %39 : vector<16x16x4xf32> to vector<256x4xf32>
    %41 = arith.truncf %40 : vector<256x4xf32> to vector<256x4xbf16>
    %c3 = arith.constant 3 : index
    %c0_23 = arith.constant 0 : index
    %c0_24 = arith.constant 0 : index
    %42 = vector.load %arg3[%c3, %c0_23, %c0_24] : memref<9x4x32xbf16, #tpu.memory_space<vmem>>, vector<1x4x32xbf16>
    %43 = vector.shape_cast %42 : vector<1x4x32xbf16> to vector<4x32xbf16>
    %cst_25 = arith.constant dense<0.000000e+00> : vector<256x32xf32>
    %44 = tpu.matmul %41, %43, %cst_25 {dimension_numbers = #tpu.dot_dimension_numbers<[1], [0], [0], [1], [0, 0, 1, 1], [], []>} : vector<256x4xbf16>, vector<4x32xbf16>, vector<256x32xf32> -> vector<256x32xf32>
    %45 = arith.addf %34, %44 : vector<256x32xf32>
    %c1_i32_26 = arith.constant 1 : i32
    %46 = arith.addi %0, %c1_i32_26 : i32
    %c0_27 = arith.constant 0 : index
    %47 = arith.index_cast %46 : i32 to index
    %c1_28 = arith.constant 1 : index
    %c0_29 = arith.constant 0 : index
    %48 = vector.load %arg2[%c0_27, %47, %c1_28, %c0_29] : memref<1x18x18x4xbf16, #tpu.memory_space<vmem>>, vector<1x16x16x4xbf16>
    %49 = vector.shape_cast %48 : vector<1x16x16x4xbf16> to vector<16x16x4xbf16>
    %50 = arith.extf %49 : vector<16x16x4xbf16> to vector<16x16x4xf32>
    %51 = vector.shape_cast %50 : vector<16x16x4xf32> to vector<256x4xf32>
    %52 = arith.truncf %51 : vector<256x4xf32> to vector<256x4xbf16>
    %c4 = arith.constant 4 : index
    %c0_30 = arith.constant 0 : index
    %c0_31 = arith.constant 0 : index
    %53 = vector.load %arg3[%c4, %c0_30, %c0_31] : memref<9x4x32xbf16, #tpu.memory_space<vmem>>, vector<1x4x32xbf16>
    %54 = vector.shape_cast %53 : vector<1x4x32xbf16> to vector<4x32xbf16>
    %cst_32 = arith.constant dense<0.000000e+00> : vector<256x32xf32>
    %55 = tpu.matmul %52, %54, %cst_32 {dimension_numbers = #tpu.dot_dimension_numbers<[1], [0], [0], [1], [0, 0, 1, 1], [], []>} : vector<256x4xbf16>, vector<4x32xbf16>, vector<256x32xf32> -> vector<256x32xf32>
    %56 = arith.addf %45, %55 : vector<256x32xf32>
    %c1_i32_33 = arith.constant 1 : i32
    %57 = arith.addi %0, %c1_i32_33 : i32
    %c0_34 = arith.constant 0 : index
    %58 = arith.index_cast %57 : i32 to index
    %c2_35 = arith.constant 2 : index
    %c0_36 = arith.constant 0 : index
    %59 = vector.load %arg2[%c0_34, %58, %c2_35, %c0_36] : memref<1x18x18x4xbf16, #tpu.memory_space<vmem>>, vector<1x16x16x4xbf16>
    %60 = vector.shape_cast %59 : vector<1x16x16x4xbf16> to vector<16x16x4xbf16>
    %61 = arith.extf %60 : vector<16x16x4xbf16> to vector<16x16x4xf32>
    %62 = vector.shape_cast %61 : vector<16x16x4xf32> to vector<256x4xf32>
    %63 = arith.truncf %62 : vector<256x4xf32> to vector<256x4xbf16>
    %c5 = arith.constant 5 : index
    %c0_37 = arith.constant 0 : index
    %c0_38 = arith.constant 0 : index
    %64 = vector.load %arg3[%c5, %c0_37, %c0_38] : memref<9x4x32xbf16, #tpu.memory_space<vmem>>, vector<1x4x32xbf16>
    %65 = vector.shape_cast %64 : vector<1x4x32xbf16> to vector<4x32xbf16>
    %cst_39 = arith.constant dense<0.000000e+00> : vector<256x32xf32>
    %66 = tpu.matmul %63, %65, %cst_39 {dimension_numbers = #tpu.dot_dimension_numbers<[1], [0], [0], [1], [0, 0, 1, 1], [], []>} : vector<256x4xbf16>, vector<4x32xbf16>, vector<256x32xf32> -> vector<256x32xf32>
    %67 = arith.addf %56, %66 : vector<256x32xf32>
    %c2_i32 = arith.constant 2 : i32
    %68 = arith.addi %0, %c2_i32 : i32
    %c0_40 = arith.constant 0 : index
    %69 = arith.index_cast %68 : i32 to index
    %c0_41 = arith.constant 0 : index
    %c0_42 = arith.constant 0 : index
    %70 = vector.load %arg2[%c0_40, %69, %c0_41, %c0_42] : memref<1x18x18x4xbf16, #tpu.memory_space<vmem>>, vector<1x16x16x4xbf16>
    %71 = vector.shape_cast %70 : vector<1x16x16x4xbf16> to vector<16x16x4xbf16>
    %72 = arith.extf %71 : vector<16x16x4xbf16> to vector<16x16x4xf32>
    %73 = vector.shape_cast %72 : vector<16x16x4xf32> to vector<256x4xf32>
    %74 = arith.truncf %73 : vector<256x4xf32> to vector<256x4xbf16>
    %c6 = arith.constant 6 : index
    %c0_43 = arith.constant 0 : index
    %c0_44 = arith.constant 0 : index
    %75 = vector.load %arg3[%c6, %c0_43, %c0_44] : memref<9x4x32xbf16, #tpu.memory_space<vmem>>, vector<1x4x32xbf16>
    %76 = vector.shape_cast %75 : vector<1x4x32xbf16> to vector<4x32xbf16>
    %cst_45 = arith.constant dense<0.000000e+00> : vector<256x32xf32>
    %77 = tpu.matmul %74, %76, %cst_45 {dimension_numbers = #tpu.dot_dimension_numbers<[1], [0], [0], [1], [0, 0, 1, 1], [], []>} : vector<256x4xbf16>, vector<4x32xbf16>, vector<256x32xf32> -> vector<256x32xf32>
    %78 = arith.addf %67, %77 : vector<256x32xf32>
    %c2_i32_46 = arith.constant 2 : i32
    %79 = arith.addi %0, %c2_i32_46 : i32
    %c0_47 = arith.constant 0 : index
    %80 = arith.index_cast %79 : i32 to index
    %c1_48 = arith.constant 1 : index
    %c0_49 = arith.constant 0 : index
    %81 = vector.load %arg2[%c0_47, %80, %c1_48, %c0_49] : memref<1x18x18x4xbf16, #tpu.memory_space<vmem>>, vector<1x16x16x4xbf16>
    %82 = vector.shape_cast %81 : vector<1x16x16x4xbf16> to vector<16x16x4xbf16>
    %83 = arith.extf %82 : vector<16x16x4xbf16> to vector<16x16x4xf32>
    %84 = vector.shape_cast %83 : vector<16x16x4xf32> to vector<256x4xf32>
    %85 = arith.truncf %84 : vector<256x4xf32> to vector<256x4xbf16>
    %c7 = arith.constant 7 : index
    %c0_50 = arith.constant 0 : index
    %c0_51 = arith.constant 0 : index
    %86 = vector.load %arg3[%c7, %c0_50, %c0_51] : memref<9x4x32xbf16, #tpu.memory_space<vmem>>, vector<1x4x32xbf16>
    %87 = vector.shape_cast %86 : vector<1x4x32xbf16> to vector<4x32xbf16>
    %cst_52 = arith.constant dense<0.000000e+00> : vector<256x32xf32>
    %88 = tpu.matmul %85, %87, %cst_52 {dimension_numbers = #tpu.dot_dimension_numbers<[1], [0], [0], [1], [0, 0, 1, 1], [], []>} : vector<256x4xbf16>, vector<4x32xbf16>, vector<256x32xf32> -> vector<256x32xf32>
    %89 = arith.addf %78, %88 : vector<256x32xf32>
    %c2_i32_53 = arith.constant 2 : i32
    %90 = arith.addi %0, %c2_i32_53 : i32
    %c0_54 = arith.constant 0 : index
    %91 = arith.index_cast %90 : i32 to index
    %c2_55 = arith.constant 2 : index
    %c0_56 = arith.constant 0 : index
    %92 = vector.load %arg2[%c0_54, %91, %c2_55, %c0_56] : memref<1x18x18x4xbf16, #tpu.memory_space<vmem>>, vector<1x16x16x4xbf16>
    %93 = vector.shape_cast %92 : vector<1x16x16x4xbf16> to vector<16x16x4xbf16>
    %94 = arith.extf %93 : vector<16x16x4xbf16> to vector<16x16x4xf32>
    %95 = vector.shape_cast %94 : vector<16x16x4xf32> to vector<256x4xf32>
    %96 = arith.truncf %95 : vector<256x4xf32> to vector<256x4xbf16>
    %c8 = arith.constant 8 : index
    %c0_57 = arith.constant 0 : index
    %c0_58 = arith.constant 0 : index
    %97 = vector.load %arg3[%c8, %c0_57, %c0_58] : memref<9x4x32xbf16, #tpu.memory_space<vmem>>, vector<1x4x32xbf16>
    %98 = vector.shape_cast %97 : vector<1x4x32xbf16> to vector<4x32xbf16>
    %cst_59 = arith.constant dense<0.000000e+00> : vector<256x32xf32>
    %99 = tpu.matmul %96, %98, %cst_59 {dimension_numbers = #tpu.dot_dimension_numbers<[1], [0], [0], [1], [0, 0, 1, 1], [], []>} : vector<256x4xbf16>, vector<4x32xbf16>, vector<256x32xf32> -> vector<256x32xf32>
    %100 = arith.addf %89, %99 : vector<256x32xf32>
    %c0_60 = arith.constant 0 : index
    %c0_61 = arith.constant 0 : index
    %101 = vector.load %arg4[%c0_60, %c0_61] : memref<1x32xf32, #tpu.memory_space<vmem>>, vector<1x32xf32>
    %102 = vector.broadcast %101 : vector<1x32xf32> to vector<256x32xf32>
    %103 = arith.addf %100, %102 : vector<256x32xf32>
    %cst_62 = arith.constant 0.000000e+00 : f32
    %104 = vector.broadcast %cst_62 : f32 to vector<256x32xf32>
    %105 = arith.maximumf %103, %104 : vector<256x32xf32>
    %106 = vector.shape_cast %105 : vector<256x32xf32> to vector<1x16x16x32xf32>
    %107 = arith.truncf %106 : vector<1x16x16x32xf32> to vector<1x16x16x32xbf16>
    %c0_63 = arith.constant 0 : index
    %c0_64 = arith.constant 0 : index
    %c0_65 = arith.constant 0 : index
    %c0_66 = arith.constant 0 : index
    %108 = vector.load %arg5[%c0_63, %c0_64, %c0_65, %c0_66] : memref<1x16x16x32xbf16, #tpu.memory_space<vmem>>, vector<1x16x16x32xbf16>
    tpu.vector_store %arg5[%c0_63, %c0_64, %c0_65, %c0_66], %107 {strides = array<i32>} : memref<1x16x16x32xbf16, #tpu.memory_space<vmem>>, vector<1x16x16x32xbf16>,
    return
  }
  func.func @transform_0(%arg0: i32, %arg1: i32) -> (i32, i32, i32, i32) {
    %c0_i32 = arith.constant 0 : i32
    %c0_i32_0 = arith.constant 0 : i32
    %c0_i32_1 = arith.constant 0 : i32
    %c0_i32_2 = arith.constant 0 : i32
    return %arg0, %c0_i32, %c0_i32_0, %c0_i32_1 : i32, i32, i32, i32
  }
  func.func @transform_1(%arg0: i32, %arg1: i32) -> (i32, i32, i32) {
    %c0_i32 = arith.constant 0 : i32
    %c0_i32_0 = arith.constant 0 : i32
    %c0_i32_1 = arith.constant 0 : i32
    %c0_i32_2 = arith.constant 0 : i32
    return %c0_i32, %c0_i32_0, %c0_i32_1 : i32, i32, i32
  }
  func.func @transform_2(%arg0: i32, %arg1: i32) -> (i32, i32) {
    %c0_i32 = arith.constant 0 : i32
    %c0_i32_0 = arith.constant 0 : i32
    %c0_i32_1 = arith.constant 0 : i32
    return %c0_i32, %c0_i32_0 : i32, i32
  }
  func.func @transform_3(%arg0: i32, %arg1: i32) -> (i32, i32, i32, i32) {
    %c0_i32 = arith.constant 0 : i32
    %c0_i32_0 = arith.constant 0 : i32
    %c0_i32_1 = arith.constant 0 : i32
    return %arg0, %arg1, %c0_i32, %c0_i32_0 : i32, i32, i32, i32
  }
}

module attributes {stable_mosaic.version = 11 : i64} {
  func.func @_conv3x3_s1_kernel(%arg0: i32, %arg1: i32, %arg2: memref<1x18x18x32xbf16, #tpu.memory_space<vmem>>, %arg3: memref<9x32x32xbf16, #tpu.memory_space<vmem>>, %arg4: memref<1x32xf32, #tpu.memory_space<vmem>>, %arg5: memref<1x16x16x32xbf16, #tpu.memory_space<vmem>>) attributes {dimension_semantics = [#tpu.dimension_semantics<parallel>, #tpu.dimension_semantics<parallel>], iteration_bounds = array<i64: 2, 1>, scalar_prefetch = 0 : i64, scratch_operands = 0 : i64, tpu.core_type = #tpu.core_type<tc>, window_params = [{transform_indices = @transform_0, window_bounds = array<i64: 1, 18, 18, 32>}, {pipeline_mode = #tpu.pipeline_mode<synchronous>, transform_indices = @transform_1, window_bounds = array<i64: 9, 32, 32>}, {pipeline_mode = #tpu.pipeline_mode<synchronous>, transform_indices = @transform_2, window_bounds = array<i64: 1, 32>}, {transform_indices = @transform_3, window_bounds = array<i64: 1, 16, 16, 32>}]} {
    %c16_i32 = arith.constant 16 : i32
    %0 = arith.muli %arg1, %c16_i32 : i32
    %cst = arith.constant 0.000000e+00 : f32
    %1 = vector.broadcast %cst : f32 to vector<256x32xf32>
    %c0_i32 = arith.constant 0 : i32
    %2 = arith.addi %0, %c0_i32 : i32
    %c0 = arith.constant 0 : index
    %3 = arith.index_cast %2 : i32 to index
    %c0_0 = arith.constant 0 : index
    %c0_1 = arith.constant 0 : index
    %4 = vector.load %arg2[%c0, %3, %c0_0, %c0_1] : memref<1x18x18x32xbf16, #tpu.memory_space<vmem>>, vector<1x16x16x32xbf16>
    %5 = vector.shape_cast %4 : vector<1x16x16x32xbf16> to vector<16x16x32xbf16>
    %6 = arith.extf %5 : vector<16x16x32xbf16> to vector<16x16x32xf32>
    %7 = vector.shape_cast %6 : vector<16x16x32xf32> to vector<256x32xf32>
    %8 = arith.truncf %7 : vector<256x32xf32> to vector<256x32xbf16>
    %c0_2 = arith.constant 0 : index
    %c0_3 = arith.constant 0 : index
    %c0_4 = arith.constant 0 : index
    %9 = vector.load %arg3[%c0_2, %c0_3, %c0_4] : memref<9x32x32xbf16, #tpu.memory_space<vmem>>, vector<1x32x32xbf16>
    %10 = vector.shape_cast %9 : vector<1x32x32xbf16> to vector<32x32xbf16>
    %cst_5 = arith.constant dense<0.000000e+00> : vector<256x32xf32>
    %11 = tpu.matmul %8, %10, %cst_5 {dimension_numbers = #tpu.dot_dimension_numbers<[1], [0], [0], [1], [0, 0, 1, 1], [], []>} : vector<256x32xbf16>, vector<32x32xbf16>, vector<256x32xf32> -> vector<256x32xf32>
    %12 = arith.addf %1, %11 : vector<256x32xf32>
    %c0_i32_6 = arith.constant 0 : i32
    %13 = arith.addi %0, %c0_i32_6 : i32
    %c0_7 = arith.constant 0 : index
    %14 = arith.index_cast %13 : i32 to index
    %c1 = arith.constant 1 : index
    %c0_8 = arith.constant 0 : index
    %15 = vector.load %arg2[%c0_7, %14, %c1, %c0_8] : memref<1x18x18x32xbf16, #tpu.memory_space<vmem>>, vector<1x16x16x32xbf16>
    %16 = vector.shape_cast %15 : vector<1x16x16x32xbf16> to vector<16x16x32xbf16>
    %17 = arith.extf %16 : vector<16x16x32xbf16> to vector<16x16x32xf32>
    %18 = vector.shape_cast %17 : vector<16x16x32xf32> to vector<256x32xf32>
    %19 = arith.truncf %18 : vector<256x32xf32> to vector<256x32xbf16>
    %c1_9 = arith.constant 1 : index
    %c0_10 = arith.constant 0 : index
    %c0_11 = arith.constant 0 : index
    %20 = vector.load %arg3[%c1_9, %c0_10, %c0_11] : memref<9x32x32xbf16, #tpu.memory_space<vmem>>, vector<1x32x32xbf16>
    %21 = vector.shape_cast %20 : vector<1x32x32xbf16> to vector<32x32xbf16>
    %cst_12 = arith.constant dense<0.000000e+00> : vector<256x32xf32>
    %22 = tpu.matmul %19, %21, %cst_12 {dimension_numbers = #tpu.dot_dimension_numbers<[1], [0], [0], [1], [0, 0, 1, 1], [], []>} : vector<256x32xbf16>, vector<32x32xbf16>, vector<256x32xf32> -> vector<256x32xf32>
    %23 = arith.addf %12, %22 : vector<256x32xf32>
    %c0_i32_13 = arith.constant 0 : i32
    %24 = arith.addi %0, %c0_i32_13 : i32
    %c0_14 = arith.constant 0 : index
    %25 = arith.index_cast %24 : i32 to index
    %c2 = arith.constant 2 : index
    %c0_15 = arith.constant 0 : index
    %26 = vector.load %arg2[%c0_14, %25, %c2, %c0_15] : memref<1x18x18x32xbf16, #tpu.memory_space<vmem>>, vector<1x16x16x32xbf16>
    %27 = vector.shape_cast %26 : vector<1x16x16x32xbf16> to vector<16x16x32xbf16>
    %28 = arith.extf %27 : vector<16x16x32xbf16> to vector<16x16x32xf32>
    %29 = vector.shape_cast %28 : vector<16x16x32xf32> to vector<256x32xf32>
    %30 = arith.truncf %29 : vector<256x32xf32> to vector<256x32xbf16>
    %c2_16 = arith.constant 2 : index
    %c0_17 = arith.constant 0 : index
    %c0_18 = arith.constant 0 : index
    %31 = vector.load %arg3[%c2_16, %c0_17, %c0_18] : memref<9x32x32xbf16, #tpu.memory_space<vmem>>, vector<1x32x32xbf16>
    %32 = vector.shape_cast %31 : vector<1x32x32xbf16> to vector<32x32xbf16>
    %cst_19 = arith.constant dense<0.000000e+00> : vector<256x32xf32>
    %33 = tpu.matmul %30, %32, %cst_19 {dimension_numbers = #tpu.dot_dimension_numbers<[1], [0], [0], [1], [0, 0, 1, 1], [], []>} : vector<256x32xbf16>, vector<32x32xbf16>, vector<256x32xf32> -> vector<256x32xf32>
    %34 = arith.addf %23, %33 : vector<256x32xf32>
    %c1_i32 = arith.constant 1 : i32
    %35 = arith.addi %0, %c1_i32 : i32
    %c0_20 = arith.constant 0 : index
    %36 = arith.index_cast %35 : i32 to index
    %c0_21 = arith.constant 0 : index
    %c0_22 = arith.constant 0 : index
    %37 = vector.load %arg2[%c0_20, %36, %c0_21, %c0_22] : memref<1x18x18x32xbf16, #tpu.memory_space<vmem>>, vector<1x16x16x32xbf16>
    %38 = vector.shape_cast %37 : vector<1x16x16x32xbf16> to vector<16x16x32xbf16>
    %39 = arith.extf %38 : vector<16x16x32xbf16> to vector<16x16x32xf32>
    %40 = vector.shape_cast %39 : vector<16x16x32xf32> to vector<256x32xf32>
    %41 = arith.truncf %40 : vector<256x32xf32> to vector<256x32xbf16>
    %c3 = arith.constant 3 : index
    %c0_23 = arith.constant 0 : index
    %c0_24 = arith.constant 0 : index
    %42 = vector.load %arg3[%c3, %c0_23, %c0_24] : memref<9x32x32xbf16, #tpu.memory_space<vmem>>, vector<1x32x32xbf16>
    %43 = vector.shape_cast %42 : vector<1x32x32xbf16> to vector<32x32xbf16>
    %cst_25 = arith.constant dense<0.000000e+00> : vector<256x32xf32>
    %44 = tpu.matmul %41, %43, %cst_25 {dimension_numbers = #tpu.dot_dimension_numbers<[1], [0], [0], [1], [0, 0, 1, 1], [], []>} : vector<256x32xbf16>, vector<32x32xbf16>, vector<256x32xf32> -> vector<256x32xf32>
    %45 = arith.addf %34, %44 : vector<256x32xf32>
    %c1_i32_26 = arith.constant 1 : i32
    %46 = arith.addi %0, %c1_i32_26 : i32
    %c0_27 = arith.constant 0 : index
    %47 = arith.index_cast %46 : i32 to index
    %c1_28 = arith.constant 1 : index
    %c0_29 = arith.constant 0 : index
    %48 = vector.load %arg2[%c0_27, %47, %c1_28, %c0_29] : memref<1x18x18x32xbf16, #tpu.memory_space<vmem>>, vector<1x16x16x32xbf16>
    %49 = vector.shape_cast %48 : vector<1x16x16x32xbf16> to vector<16x16x32xbf16>
    %50 = arith.extf %49 : vector<16x16x32xbf16> to vector<16x16x32xf32>
    %51 = vector.shape_cast %50 : vector<16x16x32xf32> to vector<256x32xf32>
    %52 = arith.truncf %51 : vector<256x32xf32> to vector<256x32xbf16>
    %c4 = arith.constant 4 : index
    %c0_30 = arith.constant 0 : index
    %c0_31 = arith.constant 0 : index
    %53 = vector.load %arg3[%c4, %c0_30, %c0_31] : memref<9x32x32xbf16, #tpu.memory_space<vmem>>, vector<1x32x32xbf16>
    %54 = vector.shape_cast %53 : vector<1x32x32xbf16> to vector<32x32xbf16>
    %cst_32 = arith.constant dense<0.000000e+00> : vector<256x32xf32>
    %55 = tpu.matmul %52, %54, %cst_32 {dimension_numbers = #tpu.dot_dimension_numbers<[1], [0], [0], [1], [0, 0, 1, 1], [], []>} : vector<256x32xbf16>, vector<32x32xbf16>, vector<256x32xf32> -> vector<256x32xf32>
    %56 = arith.addf %45, %55 : vector<256x32xf32>
    %c1_i32_33 = arith.constant 1 : i32
    %57 = arith.addi %0, %c1_i32_33 : i32
    %c0_34 = arith.constant 0 : index
    %58 = arith.index_cast %57 : i32 to index
    %c2_35 = arith.constant 2 : index
    %c0_36 = arith.constant 0 : index
    %59 = vector.load %arg2[%c0_34, %58, %c2_35, %c0_36] : memref<1x18x18x32xbf16, #tpu.memory_space<vmem>>, vector<1x16x16x32xbf16>
    %60 = vector.shape_cast %59 : vector<1x16x16x32xbf16> to vector<16x16x32xbf16>
    %61 = arith.extf %60 : vector<16x16x32xbf16> to vector<16x16x32xf32>
    %62 = vector.shape_cast %61 : vector<16x16x32xf32> to vector<256x32xf32>
    %63 = arith.truncf %62 : vector<256x32xf32> to vector<256x32xbf16>
    %c5 = arith.constant 5 : index
    %c0_37 = arith.constant 0 : index
    %c0_38 = arith.constant 0 : index
    %64 = vector.load %arg3[%c5, %c0_37, %c0_38] : memref<9x32x32xbf16, #tpu.memory_space<vmem>>, vector<1x32x32xbf16>
    %65 = vector.shape_cast %64 : vector<1x32x32xbf16> to vector<32x32xbf16>
    %cst_39 = arith.constant dense<0.000000e+00> : vector<256x32xf32>
    %66 = tpu.matmul %63, %65, %cst_39 {dimension_numbers = #tpu.dot_dimension_numbers<[1], [0], [0], [1], [0, 0, 1, 1], [], []>} : vector<256x32xbf16>, vector<32x32xbf16>, vector<256x32xf32> -> vector<256x32xf32>
    %67 = arith.addf %56, %66 : vector<256x32xf32>
    %c2_i32 = arith.constant 2 : i32
    %68 = arith.addi %0, %c2_i32 : i32
    %c0_40 = arith.constant 0 : index
    %69 = arith.index_cast %68 : i32 to index
    %c0_41 = arith.constant 0 : index
    %c0_42 = arith.constant 0 : index
    %70 = vector.load %arg2[%c0_40, %69, %c0_41, %c0_42] : memref<1x18x18x32xbf16, #tpu.memory_space<vmem>>, vector<1x16x16x32xbf16>
    %71 = vector.shape_cast %70 : vector<1x16x16x32xbf16> to vector<16x16x32xbf16>
    %72 = arith.extf %71 : vector<16x16x32xbf16> to vector<16x16x32xf32>
    %73 = vector.shape_cast %72 : vector<16x16x32xf32> to vector<256x32xf32>
    %74 = arith.truncf %73 : vector<256x32xf32> to vector<256x32xbf16>
    %c6 = arith.constant 6 : index
    %c0_43 = arith.constant 0 : index
    %c0_44 = arith.constant 0 : index
    %75 = vector.load %arg3[%c6, %c0_43, %c0_44] : memref<9x32x32xbf16, #tpu.memory_space<vmem>>, vector<1x32x32xbf16>
    %76 = vector.shape_cast %75 : vector<1x32x32xbf16> to vector<32x32xbf16>
    %cst_45 = arith.constant dense<0.000000e+00> : vector<256x32xf32>
    %77 = tpu.matmul %74, %76, %cst_45 {dimension_numbers = #tpu.dot_dimension_numbers<[1], [0], [0], [1], [0, 0, 1, 1], [], []>} : vector<256x32xbf16>, vector<32x32xbf16>, vector<256x32xf32> -> vector<256x32xf32>
    %78 = arith.addf %67, %77 : vector<256x32xf32>
    %c2_i32_46 = arith.constant 2 : i32
    %79 = arith.addi %0, %c2_i32_46 : i32
    %c0_47 = arith.constant 0 : index
    %80 = arith.index_cast %79 : i32 to index
    %c1_48 = arith.constant 1 : index
    %c0_49 = arith.constant 0 : index
    %81 = vector.load %arg2[%c0_47, %80, %c1_48, %c0_49] : memref<1x18x18x32xbf16, #tpu.memory_space<vmem>>, vector<1x16x16x32xbf16>
    %82 = vector.shape_cast %81 : vector<1x16x16x32xbf16> to vector<16x16x32xbf16>
    %83 = arith.extf %82 : vector<16x16x32xbf16> to vector<16x16x32xf32>
    %84 = vector.shape_cast %83 : vector<16x16x32xf32> to vector<256x32xf32>
    %85 = arith.truncf %84 : vector<256x32xf32> to vector<256x32xbf16>
    %c7 = arith.constant 7 : index
    %c0_50 = arith.constant 0 : index
    %c0_51 = arith.constant 0 : index
    %86 = vector.load %arg3[%c7, %c0_50, %c0_51] : memref<9x32x32xbf16, #tpu.memory_space<vmem>>, vector<1x32x32xbf16>
    %87 = vector.shape_cast %86 : vector<1x32x32xbf16> to vector<32x32xbf16>
    %cst_52 = arith.constant dense<0.000000e+00> : vector<256x32xf32>
    %88 = tpu.matmul %85, %87, %cst_52 {dimension_numbers = #tpu.dot_dimension_numbers<[1], [0], [0], [1], [0, 0, 1, 1], [], []>} : vector<256x32xbf16>, vector<32x32xbf16>, vector<256x32xf32> -> vector<256x32xf32>
    %89 = arith.addf %78, %88 : vector<256x32xf32>
    %c2_i32_53 = arith.constant 2 : i32
    %90 = arith.addi %0, %c2_i32_53 : i32
    %c0_54 = arith.constant 0 : index
    %91 = arith.index_cast %90 : i32 to index
    %c2_55 = arith.constant 2 : index
    %c0_56 = arith.constant 0 : index
    %92 = vector.load %arg2[%c0_54, %91, %c2_55, %c0_56] : memref<1x18x18x32xbf16, #tpu.memory_space<vmem>>, vector<1x16x16x32xbf16>
    %93 = vector.shape_cast %92 : vector<1x16x16x32xbf16> to vector<16x16x32xbf16>
    %94 = arith.extf %93 : vector<16x16x32xbf16> to vector<16x16x32xf32>
    %95 = vector.shape_cast %94 : vector<16x16x32xf32> to vector<256x32xf32>
    %96 = arith.truncf %95 : vector<256x32xf32> to vector<256x32xbf16>
    %c8 = arith.constant 8 : index
    %c0_57 = arith.constant 0 : index
    %c0_58 = arith.constant 0 : index
    %97 = vector.load %arg3[%c8, %c0_57, %c0_58] : memref<9x32x32xbf16, #tpu.memory_space<vmem>>, vector<1x32x32xbf16>
    %98 = vector.shape_cast %97 : vector<1x32x32xbf16> to vector<32x32xbf16>
    %cst_59 = arith.constant dense<0.000000e+00> : vector<256x32xf32>
    %99 = tpu.matmul %96, %98, %cst_59 {dimension_numbers = #tpu.dot_dimension_numbers<[1], [0], [0], [1], [0, 0, 1, 1], [], []>} : vector<256x32xbf16>, vector<32x32xbf16>, vector<256x32xf32> -> vector<256x32xf32>
    %100 = arith.addf %89, %99 : vector<256x32xf32>
    %c0_60 = arith.constant 0 : index
    %c0_61 = arith.constant 0 : index
    %101 = vector.load %arg4[%c0_60, %c0_61] : memref<1x32xf32, #tpu.memory_space<vmem>>, vector<1x32xf32>
    %102 = vector.broadcast %101 : vector<1x32xf32> to vector<256x32xf32>
    %103 = arith.addf %100, %102 : vector<256x32xf32>
    %cst_62 = arith.constant 0.000000e+00 : f32
    %104 = vector.broadcast %cst_62 : f32 to vector<256x32xf32>
    %105 = arith.maximumf %103, %104 : vector<256x32xf32>
    %106 = vector.shape_cast %105 : vector<256x32xf32> to vector<1x16x16x32xf32>
    %107 = arith.truncf %106 : vector<1x16x16x32xf32> to vector<1x16x16x32xbf16>
    %c0_63 = arith.constant 0 : index
    %c0_64 = arith.constant 0 : index
    %c0_65 = arith.constant 0 : index
    %c0_66 = arith.constant 0 : index
    %108 = vector.load %arg5[%c0_63, %c0_64, %c0_65, %c0_66] : memref<1x16x16x32xbf16, #tpu.memory_space<vmem>>, vector<1x16x16x32xbf16>
    tpu.vector_store %arg5[%c0_63, %c0_64, %c0_65, %c0_66], %107 {strides = array<i32>} : memref<1x16x16x32xbf16, #tpu.memory_space<vmem>>, vector<1x16x16x32xbf16>,
    return
  }
  func.func @transform_0(%arg0: i32, %arg1: i32) -> (i32, i32, i32, i32) {
    %c0_i32 = arith.constant 0 : i32
    %c0_i32_0 = arith.constant 0 : i32
    %c0_i32_1 = arith.constant 0 : i32
    %c0_i32_2 = arith.constant 0 : i32
    return %arg0, %c0_i32, %c0_i32_0, %c0_i32_1 : i32, i32, i32, i32
  }
  func.func @transform_1(%arg0: i32, %arg1: i32) -> (i32, i32, i32) {
    %c0_i32 = arith.constant 0 : i32
    %c0_i32_0 = arith.constant 0 : i32
    %c0_i32_1 = arith.constant 0 : i32
    %c0_i32_2 = arith.constant 0 : i32
    return %c0_i32, %c0_i32_0, %c0_i32_1 : i32, i32, i32
  }
  func.func @transform_2(%arg0: i32, %arg1: i32) -> (i32, i32) {
    %c0_i32 = arith.constant 0 : i32
    %c0_i32_0 = arith.constant 0 : i32
    %c0_i32_1 = arith.constant 0 : i32
    return %c0_i32, %c0_i32_0 : i32, i32
  }
  func.func @transform_3(%arg0: i32, %arg1: i32) -> (i32, i32, i32, i32) {
    %c0_i32 = arith.constant 0 : i32
    %c0_i32_0 = arith.constant 0 : i32
    %c0_i32_1 = arith.constant 0 : i32
    return %arg0, %arg1, %c0_i32, %c0_i32_0 : i32, i32, i32, i32
  }
}

module attributes {stable_mosaic.version = 11 : i64} {
  func.func @_matmul_bias_relu_kernel(%arg0: i32, %arg1: memref<128x288xbf16, #tpu.memory_space<vmem>>, %arg2: memref<288x64xbf16, #tpu.memory_space<vmem>>, %arg3: memref<1x64xf32, #tpu.memory_space<vmem>>, %arg4: memref<128x64xbf16, #tpu.memory_space<vmem>>) attributes {dimension_semantics = [#tpu.dimension_semantics<parallel>], iteration_bounds = array<i64: 1>, scalar_prefetch = 0 : i64, scratch_operands = 0 : i64, tpu.core_type = #tpu.core_type<tc>, window_params = [{transform_indices = @transform_0, window_bounds = array<i64: 128, 288>}, {pipeline_mode = #tpu.pipeline_mode<synchronous>, transform_indices = @transform_1, window_bounds = array<i64: 288, 64>}, {pipeline_mode = #tpu.pipeline_mode<synchronous>, transform_indices = @transform_2, window_bounds = array<i64: 1, 64>}, {transform_indices = @transform_3, window_bounds = array<i64: 128, 64>}]} {
    %c0 = arith.constant 0 : index
    %c0_0 = arith.constant 0 : index
    %0 = vector.load %arg1[%c0, %c0_0] : memref<128x288xbf16, #tpu.memory_space<vmem>>, vector<128x288xbf16>
    %c0_1 = arith.constant 0 : index
    %c0_2 = arith.constant 0 : index
    %1 = vector.load %arg2[%c0_1, %c0_2] : memref<288x64xbf16, #tpu.memory_space<vmem>>, vector<288x64xbf16>
    %cst = arith.constant dense<0.000000e+00> : vector<128x64xf32>
    %2 = tpu.matmul %0, %1, %cst {dimension_numbers = #tpu.dot_dimension_numbers<[1], [0], [0], [1], [0, 0, 1, 1], [], []>} : vector<128x288xbf16>, vector<288x64xbf16>, vector<128x64xf32> -> vector<128x64xf32>
    %c0_3 = arith.constant 0 : index
    %c0_4 = arith.constant 0 : index
    %3 = vector.load %arg3[%c0_3, %c0_4] : memref<1x64xf32, #tpu.memory_space<vmem>>, vector<1x64xf32>
    %4 = vector.broadcast %3 : vector<1x64xf32> to vector<128x64xf32>
    %5 = arith.addf %2, %4 : vector<128x64xf32>
    %cst_5 = arith.constant 0.000000e+00 : f32
    %6 = vector.broadcast %cst_5 : f32 to vector<128x64xf32>
    %7 = arith.maximumf %5, %6 : vector<128x64xf32>
    %8 = arith.truncf %7 : vector<128x64xf32> to vector<128x64xbf16>
    %c0_6 = arith.constant 0 : index
    %c0_7 = arith.constant 0 : index
    %9 = vector.load %arg4[%c0_6, %c0_7] : memref<128x64xbf16, #tpu.memory_space<vmem>>, vector<128x64xbf16>
    tpu.vector_store %arg4[%c0_6, %c0_7], %8 {strides = array<i32>} : memref<128x64xbf16, #tpu.memory_space<vmem>>, vector<128x64xbf16>,
    return
  }
  func.func @transform_0(%arg0: i32) -> (i32, i32) {
    %c0_i32 = arith.constant 0 : i32
    %c0_i32_0 = arith.constant 0 : i32
    return %arg0, %c0_i32 : i32, i32
  }
  func.func @transform_1(%arg0: i32) -> (i32, i32) {
    %c0_i32 = arith.constant 0 : i32
    %c0_i32_0 = arith.constant 0 : i32
    %c0_i32_1 = arith.constant 0 : i32
    return %c0_i32, %c0_i32_0 : i32, i32
  }
  func.func @transform_2(%arg0: i32) -> (i32, i32) {
    %c0_i32 = arith.constant 0 : i32
    %c0_i32_0 = arith.constant 0 : i32
    %c0_i32_1 = arith.constant 0 : i32
    return %c0_i32, %c0_i32_0 : i32, i32
  }
  func.func @transform_3(%arg0: i32) -> (i32, i32) {
    %c0_i32 = arith.constant 0 : i32
    %c0_i32_0 = arith.constant 0 : i32
    return %arg0, %c0_i32 : i32, i32
  }
}

module attributes {stable_mosaic.version = 11 : i64} {
  func.func @_matmul_bias_relu_kernel(%arg0: i32, %arg1: memref<128x64xbf16, #tpu.memory_space<vmem>>, %arg2: memref<64x128xbf16, #tpu.memory_space<vmem>>, %arg3: memref<1x128xf32, #tpu.memory_space<vmem>>, %arg4: memref<128x128xf32, #tpu.memory_space<vmem>>) attributes {dimension_semantics = [#tpu.dimension_semantics<parallel>], iteration_bounds = array<i64: 1>, scalar_prefetch = 0 : i64, scratch_operands = 0 : i64, tpu.core_type = #tpu.core_type<tc>, window_params = [{transform_indices = @transform_0, window_bounds = array<i64: 128, 64>}, {pipeline_mode = #tpu.pipeline_mode<synchronous>, transform_indices = @transform_1, window_bounds = array<i64: 64, 128>}, {pipeline_mode = #tpu.pipeline_mode<synchronous>, transform_indices = @transform_2, window_bounds = array<i64: 1, 128>}, {transform_indices = @transform_3, window_bounds = array<i64: 128, 128>}]} {
    %c0 = arith.constant 0 : index
    %c0_0 = arith.constant 0 : index
    %0 = vector.load %arg1[%c0, %c0_0] : memref<128x64xbf16, #tpu.memory_space<vmem>>, vector<128x64xbf16>
    %c0_1 = arith.constant 0 : index
    %c0_2 = arith.constant 0 : index
    %1 = vector.load %arg2[%c0_1, %c0_2] : memref<64x128xbf16, #tpu.memory_space<vmem>>, vector<64x128xbf16>
    %cst = arith.constant dense<0.000000e+00> : vector<128x128xf32>
    %2 = tpu.matmul %0, %1, %cst {dimension_numbers = #tpu.dot_dimension_numbers<[1], [0], [0], [1], [0, 0, 1, 1], [], []>} : vector<128x64xbf16>, vector<64x128xbf16>, vector<128x128xf32> -> vector<128x128xf32>
    %c0_3 = arith.constant 0 : index
    %c0_4 = arith.constant 0 : index
    %3 = vector.load %arg3[%c0_3, %c0_4] : memref<1x128xf32, #tpu.memory_space<vmem>>, vector<1x128xf32>
    %4 = vector.broadcast %3 : vector<1x128xf32> to vector<128x128xf32>
    %5 = arith.addf %2, %4 : vector<128x128xf32>
    %cst_5 = arith.constant 0.000000e+00 : f32
    %6 = vector.broadcast %cst_5 : f32 to vector<128x128xf32>
    %7 = arith.maximumf %5, %6 : vector<128x128xf32>
    %c0_6 = arith.constant 0 : index
    %c0_7 = arith.constant 0 : index
    %8 = vector.load %arg4[%c0_6, %c0_7] : memref<128x128xf32, #tpu.memory_space<vmem>>, vector<128x128xf32>
    tpu.vector_store %arg4[%c0_6, %c0_7], %7 {strides = array<i32>} : memref<128x128xf32, #tpu.memory_space<vmem>>, vector<128x128xf32>,
    return
  }
  func.func @transform_0(%arg0: i32) -> (i32, i32) {
    %c0_i32 = arith.constant 0 : i32
    %c0_i32_0 = arith.constant 0 : i32
    return %arg0, %c0_i32 : i32, i32
  }
  func.func @transform_1(%arg0: i32) -> (i32, i32) {
    %c0_i32 = arith.constant 0 : i32
    %c0_i32_0 = arith.constant 0 : i32
    %c0_i32_1 = arith.constant 0 : i32
    return %c0_i32, %c0_i32_0 : i32, i32
  }
  func.func @transform_2(%arg0: i32) -> (i32, i32) {
    %c0_i32 = arith.constant 0 : i32
    %c0_i32_0 = arith.constant 0 : i32
    %c0_i32_1 = arith.constant 0 : i32
    return %c0_i32, %c0_i32_0 : i32, i32
  }
  func.func @transform_3(%arg0: i32) -> (i32, i32) {
    %c0_i32 = arith.constant 0 : i32
    %c0_i32_0 = arith.constant 0 : i32
    return %arg0, %c0_i32 : i32, i32
  }
}

module attributes {stable_mosaic.version = 11 : i64} {
  func.func @_conv3x3_s1_kernel(%arg0: i32, %arg1: i32, %arg2: memref<1x10x10x64xbf16, #tpu.memory_space<vmem>>, %arg3: memref<9x64x64xbf16, #tpu.memory_space<vmem>>, %arg4: memref<1x64xf32, #tpu.memory_space<vmem>>, %arg5: memref<1x8x8x64xbf16, #tpu.memory_space<vmem>>) attributes {dimension_semantics = [#tpu.dimension_semantics<parallel>, #tpu.dimension_semantics<parallel>], iteration_bounds = array<i64: 2, 1>, scalar_prefetch = 0 : i64, scratch_operands = 0 : i64, tpu.core_type = #tpu.core_type<tc>, window_params = [{transform_indices = @transform_0, window_bounds = array<i64: 1, 10, 10, 64>}, {pipeline_mode = #tpu.pipeline_mode<synchronous>, transform_indices = @transform_1, window_bounds = array<i64: 9, 64, 64>}, {pipeline_mode = #tpu.pipeline_mode<synchronous>, transform_indices = @transform_2, window_bounds = array<i64: 1, 64>}, {transform_indices = @transform_3, window_bounds = array<i64: 1, 8, 8, 64>}]} {
    %c8_i32 = arith.constant 8 : i32
    %0 = arith.muli %arg1, %c8_i32 : i32
    %cst = arith.constant 0.000000e+00 : f32
    %1 = vector.broadcast %cst : f32 to vector<64x64xf32>
    %c0_i32 = arith.constant 0 : i32
    %2 = arith.addi %0, %c0_i32 : i32
    %c0 = arith.constant 0 : index
    %3 = arith.index_cast %2 : i32 to index
    %c0_0 = arith.constant 0 : index
    %c0_1 = arith.constant 0 : index
    %4 = vector.load %arg2[%c0, %3, %c0_0, %c0_1] : memref<1x10x10x64xbf16, #tpu.memory_space<vmem>>, vector<1x8x8x64xbf16>
    %5 = vector.shape_cast %4 : vector<1x8x8x64xbf16> to vector<8x8x64xbf16>
    %6 = arith.extf %5 : vector<8x8x64xbf16> to vector<8x8x64xf32>
    %7 = vector.shape_cast %6 : vector<8x8x64xf32> to vector<64x64xf32>
    %8 = arith.truncf %7 : vector<64x64xf32> to vector<64x64xbf16>
    %c0_2 = arith.constant 0 : index
    %c0_3 = arith.constant 0 : index
    %c0_4 = arith.constant 0 : index
    %9 = vector.load %arg3[%c0_2, %c0_3, %c0_4] : memref<9x64x64xbf16, #tpu.memory_space<vmem>>, vector<1x64x64xbf16>
    %10 = vector.shape_cast %9 : vector<1x64x64xbf16> to vector<64x64xbf16>
    %cst_5 = arith.constant dense<0.000000e+00> : vector<64x64xf32>
    %11 = tpu.matmul %8, %10, %cst_5 {dimension_numbers = #tpu.dot_dimension_numbers<[1], [0], [0], [1], [0, 0, 1, 1], [], []>} : vector<64x64xbf16>, vector<64x64xbf16>, vector<64x64xf32> -> vector<64x64xf32>
    %12 = arith.addf %1, %11 : vector<64x64xf32>
    %c0_i32_6 = arith.constant 0 : i32
    %13 = arith.addi %0, %c0_i32_6 : i32
    %c0_7 = arith.constant 0 : index
    %14 = arith.index_cast %13 : i32 to index
    %c1 = arith.constant 1 : index
    %c0_8 = arith.constant 0 : index
    %15 = vector.load %arg2[%c0_7, %14, %c1, %c0_8] : memref<1x10x10x64xbf16, #tpu.memory_space<vmem>>, vector<1x8x8x64xbf16>
    %16 = vector.shape_cast %15 : vector<1x8x8x64xbf16> to vector<8x8x64xbf16>
    %17 = arith.extf %16 : vector<8x8x64xbf16> to vector<8x8x64xf32>
    %18 = vector.shape_cast %17 : vector<8x8x64xf32> to vector<64x64xf32>
    %19 = arith.truncf %18 : vector<64x64xf32> to vector<64x64xbf16>
    %c1_9 = arith.constant 1 : index
    %c0_10 = arith.constant 0 : index
    %c0_11 = arith.constant 0 : index
    %20 = vector.load %arg3[%c1_9, %c0_10, %c0_11] : memref<9x64x64xbf16, #tpu.memory_space<vmem>>, vector<1x64x64xbf16>
    %21 = vector.shape_cast %20 : vector<1x64x64xbf16> to vector<64x64xbf16>
    %cst_12 = arith.constant dense<0.000000e+00> : vector<64x64xf32>
    %22 = tpu.matmul %19, %21, %cst_12 {dimension_numbers = #tpu.dot_dimension_numbers<[1], [0], [0], [1], [0, 0, 1, 1], [], []>} : vector<64x64xbf16>, vector<64x64xbf16>, vector<64x64xf32> -> vector<64x64xf32>
    %23 = arith.addf %12, %22 : vector<64x64xf32>
    %c0_i32_13 = arith.constant 0 : i32
    %24 = arith.addi %0, %c0_i32_13 : i32
    %c0_14 = arith.constant 0 : index
    %25 = arith.index_cast %24 : i32 to index
    %c2 = arith.constant 2 : index
    %c0_15 = arith.constant 0 : index
    %26 = vector.load %arg2[%c0_14, %25, %c2, %c0_15] : memref<1x10x10x64xbf16, #tpu.memory_space<vmem>>, vector<1x8x8x64xbf16>
    %27 = vector.shape_cast %26 : vector<1x8x8x64xbf16> to vector<8x8x64xbf16>
    %28 = arith.extf %27 : vector<8x8x64xbf16> to vector<8x8x64xf32>
    %29 = vector.shape_cast %28 : vector<8x8x64xf32> to vector<64x64xf32>
    %30 = arith.truncf %29 : vector<64x64xf32> to vector<64x64xbf16>
    %c2_16 = arith.constant 2 : index
    %c0_17 = arith.constant 0 : index
    %c0_18 = arith.constant 0 : index
    %31 = vector.load %arg3[%c2_16, %c0_17, %c0_18] : memref<9x64x64xbf16, #tpu.memory_space<vmem>>, vector<1x64x64xbf16>
    %32 = vector.shape_cast %31 : vector<1x64x64xbf16> to vector<64x64xbf16>
    %cst_19 = arith.constant dense<0.000000e+00> : vector<64x64xf32>
    %33 = tpu.matmul %30, %32, %cst_19 {dimension_numbers = #tpu.dot_dimension_numbers<[1], [0], [0], [1], [0, 0, 1, 1], [], []>} : vector<64x64xbf16>, vector<64x64xbf16>, vector<64x64xf32> -> vector<64x64xf32>
    %34 = arith.addf %23, %33 : vector<64x64xf32>
    %c1_i32 = arith.constant 1 : i32
    %35 = arith.addi %0, %c1_i32 : i32
    %c0_20 = arith.constant 0 : index
    %36 = arith.index_cast %35 : i32 to index
    %c0_21 = arith.constant 0 : index
    %c0_22 = arith.constant 0 : index
    %37 = vector.load %arg2[%c0_20, %36, %c0_21, %c0_22] : memref<1x10x10x64xbf16, #tpu.memory_space<vmem>>, vector<1x8x8x64xbf16>
    %38 = vector.shape_cast %37 : vector<1x8x8x64xbf16> to vector<8x8x64xbf16>
    %39 = arith.extf %38 : vector<8x8x64xbf16> to vector<8x8x64xf32>
    %40 = vector.shape_cast %39 : vector<8x8x64xf32> to vector<64x64xf32>
    %41 = arith.truncf %40 : vector<64x64xf32> to vector<64x64xbf16>
    %c3 = arith.constant 3 : index
    %c0_23 = arith.constant 0 : index
    %c0_24 = arith.constant 0 : index
    %42 = vector.load %arg3[%c3, %c0_23, %c0_24] : memref<9x64x64xbf16, #tpu.memory_space<vmem>>, vector<1x64x64xbf16>
    %43 = vector.shape_cast %42 : vector<1x64x64xbf16> to vector<64x64xbf16>
    %cst_25 = arith.constant dense<0.000000e+00> : vector<64x64xf32>
    %44 = tpu.matmul %41, %43, %cst_25 {dimension_numbers = #tpu.dot_dimension_numbers<[1], [0], [0], [1], [0, 0, 1, 1], [], []>} : vector<64x64xbf16>, vector<64x64xbf16>, vector<64x64xf32> -> vector<64x64xf32>
    %45 = arith.addf %34, %44 : vector<64x64xf32>
    %c1_i32_26 = arith.constant 1 : i32
    %46 = arith.addi %0, %c1_i32_26 : i32
    %c0_27 = arith.constant 0 : index
    %47 = arith.index_cast %46 : i32 to index
    %c1_28 = arith.constant 1 : index
    %c0_29 = arith.constant 0 : index
    %48 = vector.load %arg2[%c0_27, %47, %c1_28, %c0_29] : memref<1x10x10x64xbf16, #tpu.memory_space<vmem>>, vector<1x8x8x64xbf16>
    %49 = vector.shape_cast %48 : vector<1x8x8x64xbf16> to vector<8x8x64xbf16>
    %50 = arith.extf %49 : vector<8x8x64xbf16> to vector<8x8x64xf32>
    %51 = vector.shape_cast %50 : vector<8x8x64xf32> to vector<64x64xf32>
    %52 = arith.truncf %51 : vector<64x64xf32> to vector<64x64xbf16>
    %c4 = arith.constant 4 : index
    %c0_30 = arith.constant 0 : index
    %c0_31 = arith.constant 0 : index
    %53 = vector.load %arg3[%c4, %c0_30, %c0_31] : memref<9x64x64xbf16, #tpu.memory_space<vmem>>, vector<1x64x64xbf16>
    %54 = vector.shape_cast %53 : vector<1x64x64xbf16> to vector<64x64xbf16>
    %cst_32 = arith.constant dense<0.000000e+00> : vector<64x64xf32>
    %55 = tpu.matmul %52, %54, %cst_32 {dimension_numbers = #tpu.dot_dimension_numbers<[1], [0], [0], [1], [0, 0, 1, 1], [], []>} : vector<64x64xbf16>, vector<64x64xbf16>, vector<64x64xf32> -> vector<64x64xf32>
    %56 = arith.addf %45, %55 : vector<64x64xf32>
    %c1_i32_33 = arith.constant 1 : i32
    %57 = arith.addi %0, %c1_i32_33 : i32
    %c0_34 = arith.constant 0 : index
    %58 = arith.index_cast %57 : i32 to index
    %c2_35 = arith.constant 2 : index
    %c0_36 = arith.constant 0 : index
    %59 = vector.load %arg2[%c0_34, %58, %c2_35, %c0_36] : memref<1x10x10x64xbf16, #tpu.memory_space<vmem>>, vector<1x8x8x64xbf16>
    %60 = vector.shape_cast %59 : vector<1x8x8x64xbf16> to vector<8x8x64xbf16>
    %61 = arith.extf %60 : vector<8x8x64xbf16> to vector<8x8x64xf32>
    %62 = vector.shape_cast %61 : vector<8x8x64xf32> to vector<64x64xf32>
    %63 = arith.truncf %62 : vector<64x64xf32> to vector<64x64xbf16>
    %c5 = arith.constant 5 : index
    %c0_37 = arith.constant 0 : index
    %c0_38 = arith.constant 0 : index
    %64 = vector.load %arg3[%c5, %c0_37, %c0_38] : memref<9x64x64xbf16, #tpu.memory_space<vmem>>, vector<1x64x64xbf16>
    %65 = vector.shape_cast %64 : vector<1x64x64xbf16> to vector<64x64xbf16>
    %cst_39 = arith.constant dense<0.000000e+00> : vector<64x64xf32>
    %66 = tpu.matmul %63, %65, %cst_39 {dimension_numbers = #tpu.dot_dimension_numbers<[1], [0], [0], [1], [0, 0, 1, 1], [], []>} : vector<64x64xbf16>, vector<64x64xbf16>, vector<64x64xf32> -> vector<64x64xf32>
    %67 = arith.addf %56, %66 : vector<64x64xf32>
    %c2_i32 = arith.constant 2 : i32
    %68 = arith.addi %0, %c2_i32 : i32
    %c0_40 = arith.constant 0 : index
    %69 = arith.index_cast %68 : i32 to index
    %c0_41 = arith.constant 0 : index
    %c0_42 = arith.constant 0 : index
    %70 = vector.load %arg2[%c0_40, %69, %c0_41, %c0_42] : memref<1x10x10x64xbf16, #tpu.memory_space<vmem>>, vector<1x8x8x64xbf16>
    %71 = vector.shape_cast %70 : vector<1x8x8x64xbf16> to vector<8x8x64xbf16>
    %72 = arith.extf %71 : vector<8x8x64xbf16> to vector<8x8x64xf32>
    %73 = vector.shape_cast %72 : vector<8x8x64xf32> to vector<64x64xf32>
    %74 = arith.truncf %73 : vector<64x64xf32> to vector<64x64xbf16>
    %c6 = arith.constant 6 : index
    %c0_43 = arith.constant 0 : index
    %c0_44 = arith.constant 0 : index
    %75 = vector.load %arg3[%c6, %c0_43, %c0_44] : memref<9x64x64xbf16, #tpu.memory_space<vmem>>, vector<1x64x64xbf16>
    %76 = vector.shape_cast %75 : vector<1x64x64xbf16> to vector<64x64xbf16>
    %cst_45 = arith.constant dense<0.000000e+00> : vector<64x64xf32>
    %77 = tpu.matmul %74, %76, %cst_45 {dimension_numbers = #tpu.dot_dimension_numbers<[1], [0], [0], [1], [0, 0, 1, 1], [], []>} : vector<64x64xbf16>, vector<64x64xbf16>, vector<64x64xf32> -> vector<64x64xf32>
    %78 = arith.addf %67, %77 : vector<64x64xf32>
    %c2_i32_46 = arith.constant 2 : i32
    %79 = arith.addi %0, %c2_i32_46 : i32
    %c0_47 = arith.constant 0 : index
    %80 = arith.index_cast %79 : i32 to index
    %c1_48 = arith.constant 1 : index
    %c0_49 = arith.constant 0 : index
    %81 = vector.load %arg2[%c0_47, %80, %c1_48, %c0_49] : memref<1x10x10x64xbf16, #tpu.memory_space<vmem>>, vector<1x8x8x64xbf16>
    %82 = vector.shape_cast %81 : vector<1x8x8x64xbf16> to vector<8x8x64xbf16>
    %83 = arith.extf %82 : vector<8x8x64xbf16> to vector<8x8x64xf32>
    %84 = vector.shape_cast %83 : vector<8x8x64xf32> to vector<64x64xf32>
    %85 = arith.truncf %84 : vector<64x64xf32> to vector<64x64xbf16>
    %c7 = arith.constant 7 : index
    %c0_50 = arith.constant 0 : index
    %c0_51 = arith.constant 0 : index
    %86 = vector.load %arg3[%c7, %c0_50, %c0_51] : memref<9x64x64xbf16, #tpu.memory_space<vmem>>, vector<1x64x64xbf16>
    %87 = vector.shape_cast %86 : vector<1x64x64xbf16> to vector<64x64xbf16>
    %cst_52 = arith.constant dense<0.000000e+00> : vector<64x64xf32>
    %88 = tpu.matmul %85, %87, %cst_52 {dimension_numbers = #tpu.dot_dimension_numbers<[1], [0], [0], [1], [0, 0, 1, 1], [], []>} : vector<64x64xbf16>, vector<64x64xbf16>, vector<64x64xf32> -> vector<64x64xf32>
    %89 = arith.addf %78, %88 : vector<64x64xf32>
    %c2_i32_53 = arith.constant 2 : i32
    %90 = arith.addi %0, %c2_i32_53 : i32
    %c0_54 = arith.constant 0 : index
    %91 = arith.index_cast %90 : i32 to index
    %c2_55 = arith.constant 2 : index
    %c0_56 = arith.constant 0 : index
    %92 = vector.load %arg2[%c0_54, %91, %c2_55, %c0_56] : memref<1x10x10x64xbf16, #tpu.memory_space<vmem>>, vector<1x8x8x64xbf16>
    %93 = vector.shape_cast %92 : vector<1x8x8x64xbf16> to vector<8x8x64xbf16>
    %94 = arith.extf %93 : vector<8x8x64xbf16> to vector<8x8x64xf32>
    %95 = vector.shape_cast %94 : vector<8x8x64xf32> to vector<64x64xf32>
    %96 = arith.truncf %95 : vector<64x64xf32> to vector<64x64xbf16>
    %c8 = arith.constant 8 : index
    %c0_57 = arith.constant 0 : index
    %c0_58 = arith.constant 0 : index
    %97 = vector.load %arg3[%c8, %c0_57, %c0_58] : memref<9x64x64xbf16, #tpu.memory_space<vmem>>, vector<1x64x64xbf16>
    %98 = vector.shape_cast %97 : vector<1x64x64xbf16> to vector<64x64xbf16>
    %cst_59 = arith.constant dense<0.000000e+00> : vector<64x64xf32>
    %99 = tpu.matmul %96, %98, %cst_59 {dimension_numbers = #tpu.dot_dimension_numbers<[1], [0], [0], [1], [0, 0, 1, 1], [], []>} : vector<64x64xbf16>, vector<64x64xbf16>, vector<64x64xf32> -> vector<64x64xf32>
    %100 = arith.addf %89, %99 : vector<64x64xf32>
    %c0_60 = arith.constant 0 : index
    %c0_61 = arith.constant 0 : index
    %101 = vector.load %arg4[%c0_60, %c0_61] : memref<1x64xf32, #tpu.memory_space<vmem>>, vector<1x64xf32>
    %102 = vector.broadcast %101 : vector<1x64xf32> to vector<64x64xf32>
    %103 = arith.addf %100, %102 : vector<64x64xf32>
    %cst_62 = arith.constant 0.000000e+00 : f32
    %104 = vector.broadcast %cst_62 : f32 to vector<64x64xf32>
    %105 = arith.maximumf %103, %104 : vector<64x64xf32>
    %106 = vector.shape_cast %105 : vector<64x64xf32> to vector<1x8x8x64xf32>
    %107 = arith.truncf %106 : vector<1x8x8x64xf32> to vector<1x8x8x64xbf16>
    %c0_63 = arith.constant 0 : index
    %c0_64 = arith.constant 0 : index
    %c0_65 = arith.constant 0 : index
    %c0_66 = arith.constant 0 : index
    %108 = vector.load %arg5[%c0_63, %c0_64, %c0_65, %c0_66] : memref<1x8x8x64xbf16, #tpu.memory_space<vmem>>, vector<1x8x8x64xbf16>
    tpu.vector_store %arg5[%c0_63, %c0_64, %c0_65, %c0_66], %107 {strides = array<i32>} : memref<1x8x8x64xbf16, #tpu.memory_space<vmem>>, vector<1x8x8x64xbf16>,
    return
  }
  func.func @transform_0(%arg0: i32, %arg1: i32) -> (i32, i32, i32, i32) {
    %c0_i32 = arith.constant 0 : i32
    %c0_i32_0 = arith.constant 0 : i32
    %c0_i32_1 = arith.constant 0 : i32
    %c0_i32_2 = arith.constant 0 : i32
    return %arg0, %c0_i32, %c0_i32_0, %c0_i32_1 : i32, i32, i32, i32
  }
  func.func @transform_1(%arg0: i32, %arg1: i32) -> (i32, i32, i32) {
    %c0_i32 = arith.constant 0 : i32
    %c0_i32_0 = arith.constant 0 : i32
    %c0_i32_1 = arith.constant 0 : i32
    %c0_i32_2 = arith.constant 0 : i32
    return %c0_i32, %c0_i32_0, %c0_i32_1 : i32, i32, i32
  }
  func.func @transform_2(%arg0: i32, %arg1: i32) -> (i32, i32) {
    %c0_i32 = arith.constant 0 : i32
    %c0_i32_0 = arith.constant 0 : i32
    %c0_i32_1 = arith.constant 0 : i32
    return %c0_i32, %c0_i32_0 : i32, i32
  }
  func.func @transform_3(%arg0: i32, %arg1: i32) -> (i32, i32, i32, i32) {
    %c0_i32 = arith.constant 0 : i32
    %c0_i32_0 = arith.constant 0 : i32
    %c0_i32_1 = arith.constant 0 : i32
    return %arg0, %arg1, %c0_i32, %c0_i32_0 : i32, i32, i32, i32
  }
}

module attributes {stable_mosaic.version = 11 : i64} {
  func.func @_matmul_bias_relu_kernel(%arg0: i32, %arg1: memref<512x32xbf16, #tpu.memory_space<vmem>>, %arg2: memref<32x32xbf16, #tpu.memory_space<vmem>>, %arg3: memref<1x32xf32, #tpu.memory_space<vmem>>, %arg4: memref<512x32xf32, #tpu.memory_space<vmem>>) attributes {dimension_semantics = [#tpu.dimension_semantics<parallel>], iteration_bounds = array<i64: 1>, scalar_prefetch = 0 : i64, scratch_operands = 0 : i64, tpu.core_type = #tpu.core_type<tc>, window_params = [{transform_indices = @transform_0, window_bounds = array<i64: 512, 32>}, {pipeline_mode = #tpu.pipeline_mode<synchronous>, transform_indices = @transform_1, window_bounds = array<i64: 32, 32>}, {pipeline_mode = #tpu.pipeline_mode<synchronous>, transform_indices = @transform_2, window_bounds = array<i64: 1, 32>}, {transform_indices = @transform_3, window_bounds = array<i64: 512, 32>}]} {
    %c0 = arith.constant 0 : index
    %c0_0 = arith.constant 0 : index
    %0 = vector.load %arg1[%c0, %c0_0] : memref<512x32xbf16, #tpu.memory_space<vmem>>, vector<512x32xbf16>
    %c0_1 = arith.constant 0 : index
    %c0_2 = arith.constant 0 : index
    %1 = vector.load %arg2[%c0_1, %c0_2] : memref<32x32xbf16, #tpu.memory_space<vmem>>, vector<32x32xbf16>
    %cst = arith.constant dense<0.000000e+00> : vector<512x32xf32>
    %2 = tpu.matmul %0, %1, %cst {dimension_numbers = #tpu.dot_dimension_numbers<[1], [0], [0], [1], [0, 0, 1, 1], [], []>} : vector<512x32xbf16>, vector<32x32xbf16>, vector<512x32xf32> -> vector<512x32xf32>
    %c0_3 = arith.constant 0 : index
    %c0_4 = arith.constant 0 : index
    %3 = vector.load %arg3[%c0_3, %c0_4] : memref<1x32xf32, #tpu.memory_space<vmem>>, vector<1x32xf32>
    %4 = vector.broadcast %3 : vector<1x32xf32> to vector<512x32xf32>
    %5 = arith.addf %2, %4 : vector<512x32xf32>
    %cst_5 = arith.constant 0.000000e+00 : f32
    %6 = vector.broadcast %cst_5 : f32 to vector<512x32xf32>
    %7 = arith.maximumf %5, %6 : vector<512x32xf32>
    %c0_6 = arith.constant 0 : index
    %c0_7 = arith.constant 0 : index
    %8 = vector.load %arg4[%c0_6, %c0_7] : memref<512x32xf32, #tpu.memory_space<vmem>>, vector<512x32xf32>
    tpu.vector_store %arg4[%c0_6, %c0_7], %7 {strides = array<i32>} : memref<512x32xf32, #tpu.memory_space<vmem>>, vector<512x32xf32>,
    return
  }
  func.func @transform_0(%arg0: i32) -> (i32, i32) {
    %c0_i32 = arith.constant 0 : i32
    %c0_i32_0 = arith.constant 0 : i32
    return %arg0, %c0_i32 : i32, i32
  }
  func.func @transform_1(%arg0: i32) -> (i32, i32) {
    %c0_i32 = arith.constant 0 : i32
    %c0_i32_0 = arith.constant 0 : i32
    %c0_i32_1 = arith.constant 0 : i32
    return %c0_i32, %c0_i32_0 : i32, i32
  }
  func.func @transform_2(%arg0: i32) -> (i32, i32) {
    %c0_i32 = arith.constant 0 : i32
    %c0_i32_0 = arith.constant 0 : i32
    %c0_i32_1 = arith.constant 0 : i32
    return %c0_i32, %c0_i32_0 : i32, i32
  }
  func.func @transform_3(%arg0: i32) -> (i32, i32) {
    %c0_i32 = arith.constant 0 : i32
    %c0_i32_0 = arith.constant 0 : i32
    return %arg0, %c0_i32 : i32, i32
  }
}

</mosaic_0001>

<bundles_post_ra>
// kernel: _lambda_.12
= control target key start
LH: loop header
LB: loop body
LE: loop exit
PB: predicated region body
PF: predicated region fallthrough
CT: control target
= control target key end

     0   :  { %vm318_vm0 = vcmask 261120   ;;  %vm617_vm1 = vcmask 519168   ;;  %s1144_s1 = inlined_call_operand.vmem [shape: bf16[288,64], index: 1, kind: input, shape index: {}]   ;;  %s1145_s0 = inlined_call_operand.vmem [shape: bf16[128,288], index: 0, kind: input, shape index: {}]   ;;  %s1146_s2 = inlined_call_operand.vmem [shape: f32[1,64], index: 2, kind: input, shape index: {}]   ;;  %s1147_s3 = inlined_call_operand.vmem [shape: bf16[128,64], index: 3, kind: output, shape index: {}]  }
   0x1   :  { %v831_v0 = vld [vmem:[%s1144_s1 + $0x78] sm:$0xff]   ;;  %v833_v2 = vld [vmem:[%s1144_s1 + $0x70] sm:$0xff]   ;;  %v835_v4 = vld [vmem:[%s1144_s1 + $0x68] sm:$0xff]  }
   0x2   :  { %v832_v1 = vld [vmem:[%s1144_s1 + $0x38] sm:$0xff]   ;;  %721 = vmatprep.subr.bf16.mxu0 %v831_v0  ;;  %815 = vmatprep.subr.bf16.mxu1 %v831_v0  ;;  %v834_v3 = vld [vmem:[%s1144_s1 + $0x30] sm:$0xff]   ;;  %v836_v5 = vld [vmem:[%s1144_s1 + $0x28] sm:$0xff]  }
   0x3   :  { %722 = vmatpush3.bf16.msra.mxu0 %v832_v1  ;;  %823 = vmatpush3.bf16.msra.mxu1 %v832_v1  ;;  %v837_v6 = vld [vmem:[%s1144_s1 + $0x60] sm:$0xff]   ;;  %v839_v8 = vld [vmem:[%s1144_s1 + $0x58] sm:$0xff]   ;;  %v841_v10 = vld [vmem:[%s1144_s1 + $0x50] sm:$0xff]  }
   0x4   :  { %723 = vmatprep.subr.bf16.mxu0 %v833_v2  ;;  %816 = vmatprep.subr.bf16.mxu1 %v833_v2  ;;  %v838_v7 = vld [vmem:[%s1144_s1 + $0x20] sm:$0xff]   ;;  %v840_v9 = vld [vmem:[%s1144_s1 + $0x18] sm:$0xff]   ;;  %v842_v13 = vld [vmem:[%s1144_s1 + $0x10] sm:$0xff]  }
   0x5   :  { %v849_v11 = vld [vmem:[%s1145_s0 + $0x4] ss:$12 sps:$4 sm:$0xff]   ;;  %v852_v12 = vld [vmem:[%s1145_s0 + $0x94] ss:$12 sps:$4 sm:$0xff]   ;;  %v843_v14 = vld [vmem:[%s1144_s1 + $0x48] sm:$0xff]  }
   0x6   :  { %375 = vmatprep.mubr.bf16.mxu0 %v849_v11  ;;  %423 = vmatprep.mubr.bf16.mxu1 %v852_v12  ;;  %v844_v15 = vld [vmem:[%s1144_s1 + $0x8] sm:$0xff]   ;;  %v845_v16 = vld [vmem:[%s1144_s1 + $0x40] sm:$0xff]   ;;  %v850_v20 = vld [vmem:[%s1145_s0 + $0x90] ss:$12 sps:$4 sm:$0xff]  }
   0x7   :  { %724 = vmatpush3.bf16.msra.mxu0 %v834_v3  ;;  %824 = vmatpush3.bf16.msra.mxu1 %v834_v3  ;;  %v846_v17 = vld [vmem:[%s1144_s1] sm:$0xff]   ;;  %v853_v19 = vld [vmem:[%s1144_s1 + $0x88] sm:$0xff]   ;;  %v864_v28 = vld [vmem:[%s1145_s0 + $0x30] ss:$12 sps:$4 sm:$0xff]  }
   0x8   :  { %725 = vmatprep.subr.bf16.mxu0 %v835_v4  ;;  %817 = vmatprep.subr.bf16.mxu1 %v835_v4  ;;  %v847_v18 = vld [vmem:[%s1145_s0] ss:$12 sps:$4 sm:$0xff]   ;;  %v854_v21 = vld [vmem:[%s1145_s0 + $0x1c] ss:$12 sps:$4 sm:$0xff]   ;;  %v858_v24 = vld [vmem:[%s1145_s0 + $0x18] ss:$12 sps:$4 sm:$0xff]  }
   0x9   :  { %v856_v22 = vld [vmem:[%s1145_s0 + $0xac] ss:$12 sps:$4 sm:$0xff]   ;;  %v860_v23 = vld [vmem:[%s1144_s1 + $0x80] sm:$0xff]   ;;  %v859_v25 = vld [vmem:[%s1145_s0 + $0xa8] ss:$12 sps:$4 sm:$0xff]  }
   0xa   :  { %v861_v26 = vld [vmem:[%s1145_s0 + $0x34] ss:$12 sps:$4 sm:$0xff]   ;;  %v866_v30 = vld [vmem:[%s1145_s0 + $0x4c] ss:$12 sps:$4 sm:$0xff]   ;;  %v870_v33 = vld [vmem:[%s1145_s0 + $0x50] ss:$12 sps:$4 sm:$0xff]  }
   0xb   :  { %726 = vmatpush3.bf16.msra.mxu0 %v836_v5  ;;  %825 = vmatpush3.bf16.msra.mxu1 %v836_v5  ;;  %v863_v27 = vld [vmem:[%s1145_s0 + $0x8] ss:$12 sps:$4 sm:$0xff]   ;;  %v865_v29 = vld [vmem:[%s1145_s0 + $0x20] ss:$12 sps:$4 sm:$0xff]   ;;  %v868_v31 = vld [vmem:[%s1145_s0 + $0x38] ss:$12 sps:$4 sm:$0xff]  }
   0xc   :  { %727 = vmatprep.subr.bf16.mxu0 %v837_v6  ;;  %818 = vmatprep.subr.bf16.mxu1 %v837_v6  ;;  %v869_v32 = vld [vmem:[%s1145_s0 + $0x48] ss:$12 sps:$4 sm:$0xff]   ;;  %v871_v34 = vld [vmem:[%s1145_s0 + $0x64] ss:$12 sps:$4 sm:$0xff]   ;;  %v874_v36 = vld [vmem:[%s1145_s0 + $0x60] ss:$12 sps:$4 sm:$0xff]  }
   0xd   :  { %v873_v35 = vld [vmem:[%s1145_s0 + $0x68] ss:$12 sps:$4 sm:$0xff]   ;;  %v875_v37 = vld [vmem:[%s1145_s0 + $0x80] ss:$12 sps:$4 sm:$0xff]   ;;  %v878_v39 = vld [vmem:[%s1145_s0 + $0x98] ss:$12 sps:$4 sm:$0xff]  }
   0xe   :  { %v876_v38 = vld [vmem:[%s1145_s0 + $0x7c] ss:$12 sps:$4 sm:$0xff]   ;;  %v879_v40 = vld [vmem:[%s1145_s0 + $0x78] ss:$12 sps:$4 sm:$0xff]   ;;  %v1054_v60 = vld [vmem:[%s1146_s2] ss:$0 sm:$0xff] }
   0xf   :  { %728 = vmatpush3.bf16.msra.mxu0 %v838_v7  ;;  %826 = vmatpush3.bf16.msra.mxu1 %v838_v7  ;;  %v880_v41 = vld [vmem:[%s1145_s0 + $0xb0] ss:$12 sps:$4 sm:$0xff]  }
  0x10   :  { %729 = vmatprep.subr.bf16.mxu0 %v839_v8  ;;  %819 = vmatprep.subr.bf16.mxu1 %v839_v8 }
  0x13   :  { %730 = vmatpush3.bf16.msra.mxu0 %v840_v9  ;;  %827 = vmatpush3.bf16.msra.mxu1 %v840_v9 }
  0x14   :  { %731 = vmatprep.subr.bf16.mxu0 %v841_v10  ;;  %820 = vmatprep.subr.bf16.mxu1 %v841_v10 }
  0x17   :  { %732 = vmatpush3.bf16.msra.mxu0 %v842_v13  ;;  %828 = vmatpush3.bf16.msra.mxu1 %v842_v13 }
  0x18   :  { %733 = vmatprep.subr.bf16.mxu0 %v843_v14  ;;  %821 = vmatprep.subr.bf16.mxu1 %v843_v14 }
  0x1b   :  { %734 = vmatpush3.bf16.msra.mxu0 %v844_v15  ;;  %829 = vmatpush3.bf16.msra.mxu1 %v844_v15 }
  0x1c   :  { %735 = vmatprep.subr.bf16.mxu0 %v845_v16  ;;  %822 = vmatprep.subr.bf16.mxu1 %v845_v16 }
  0x1f   :  { %736 = vmatpush3.bf16.msra.mxu0 %v846_v17  ;;  %830 = vmatpush3.bf16.msra.mxu1 %v846_v17 }
  0x20   :  { %795 = vmatprep.subr.bf16.mxu1 %v853_v19 }
  0x22   :  { %376 = vmatmul.mubr.bf16.vlgmr.msra.gmra.mxu0 %v847_v18  ;;  %424 = vmatmul.mubr.bf16.vlgmr.msra.gmra.mxu1 %v850_v20 }
  0x23   :  { %796 = vmatpush3.bf16.msra.mxu1 %v853_v19  ;;  %383 = vmatprep.mubr.bf16.mxu0 %v854_v21 }
  0x24   :  { %431 = vmatprep.mubr.bf16.mxu1 %v856_v22  ;;  %797 = vmatprep.subr.bf16.mxu1 %v860_v23 }
  0x27   :  { %798 = vmatpush3.bf16.msra.mxu1 %v860_v23 }
  0x2a   :  { %384 = vmatmul.mubr.bf16.gmra.mxu0 %v858_v24  ;;  %432 = vmatmul.mubr.bf16.gmra.mxu1 %v859_v25 }
  0x2b   :  { %391 = vmatprep.mubr.bf16.mxu0 %v861_v26  ;;  %799 = vmatprep.mubr.msk.bf16.mxu1 %vm318_vm0, %v863_v27 }
  0x32   :  { %392 = vmatmul.mubr.bf16.gmra.mxu0 %v864_v28  ;;  %800 = vmatmul.mubr.msk.bf16.vlgmr.msra.gmra.mxu1 %vm318_vm0, %v865_v29 }
  0x33   :  { %399 = vmatprep.mubr.bf16.mxu0 %v866_v30  ;;  %803 = vmatprep.mubr.msk.bf16.mxu1 %vm318_vm0, %v868_v31 }
  0x3a   :  { %400 = vmatmul.mubr.bf16.gmra.mxu0 %v869_v32  ;;  %804 = vmatmul.mubr.msk.bf16.gmra.mxu1 %vm318_vm0, %v870_v33 }
  0x3b   :  { %407 = vmatprep.mubr.bf16.mxu0 %v871_v34  ;;  %807 = vmatprep.mubr.msk.bf16.mxu1 %vm318_vm0, %v873_v35 }
  0x42   :  { %408 = vmatmul.mubr.bf16.gmra.mxu0 %v874_v36  ;;  %808 = vmatmul.mubr.msk.bf16.gmra.mxu1 %vm318_vm0, %v875_v37 }
  0x43   :  { %415 = vmatprep.mubr.bf16.mxu0 %v876_v38  ;;  %811 = vmatprep.mubr.msk.bf16.mxu1 %vm318_vm0, %v878_v39 }
  0x4a   :  { %416 = vmatmul.mubr.bf16.gmra.mxu0 %v879_v40  ;;  %812 = vmatmul.mubr.msk.bf16.gmra.mxu1 %vm318_vm0, %v880_v41 }
  0xe2   :  { %v737_v42 = vpop.f32.mrf.mxu0  ;;  %v1035_v43 = vpop.f32.mrf.mxu1 }
  0xe4   :  { %v738_v44 = vpop.f32.mrf.mxu0  ;;  %v1037_v45 = vpop.f32.mrf.mxu1 }
  0xe5   :  { %v739_v57 = vadd.f32 %v738_v44, %v737_v42 }
  0xe6   :  { %v740_v46 = vpop.f32.mrf.mxu0  ;;  %v1039_v47 = vpop.f32.mrf.mxu1 }
  0xe7   :  { %v378_v3 = vadd.f32 %v739_v57, %v1054_v60 }
  0xe8   :  { %v741_v48 = vpop.f32.mrf.mxu0  ;;  %v1041_v49 = vpop.f32.mrf.mxu1 }
  0xe9   :  { %v742_v63 = vadd.f32 %v741_v48, %v740_v46 }
  0xea   :  { %v743_v50 = vpop.f32.mrf.mxu0  ;;  %v1043_v51 = vpop.f32.mrf.mxu1 }
  0xeb   :  { %v381_v11 = vadd.f32 %v742_v63, %v1054_v60 }
  0xec   :  { %v744_v52 = vpop.f32.mrf.mxu0  ;;  %v1045_v53 = vpop.f32.mrf.mxu1 }
  0xed   :  { %v745_v54 = vadd.f32 %v744_v52, %v743_v50 }
  0xee   :  { %v746_v55 = vpop.f32.mrf.mxu0  ;;  %v1047_v56 = vpop.f32.mrf.mxu1 }
  0xef   :  { %v386_v62 = vadd.f32 %v745_v54, %v1054_v60  ;;  %v781_v54 = vadd.f32 %v1045_v53, %v1043_v51  ;;  %v775_v53 = vadd.f32 %v1037_v45, %v1035_v43 }
  0xf0   :  { %v747_v58 = vpop.f32.mrf.mxu0  ;;  %v1049_v59 = vpop.f32.mrf.mxu1 }
  0xf1   :  { %v748_v61 = vadd.f32 %v747_v58, %v746_v55 }
  0xf2   :  { %v749_v0 = vpop.f32.mrf.mxu0  ;;  %v801_v1 = vpop.f32.mrf.mxu1 }
  0xf3   :  { %v483_v2 = vadd.f32 %v801_v1, %v386_v62  ;;  %v389_v8 = vadd.f32 %v748_v61, %v1054_v60 }
  0xf4   :  { %v750_v4 = vpop.f32.mrf.mxu0  ;;  %v474_v5 = vpop.f32.mrf.mxu1 }
  0xf5   :  { %v539_v6 = vmax.f32 %v483_v2, 0.0  ;;  %v475_v7 = vadd.f32 %v474_v5, %v378_v3  ;;  %v751_v13 = vadd.f32 %v750_v4, %v749_v0  ;;  %v784_v3 = vadd.f32 %v1049_v59, %v1047_v56 }
  0xf6   :  { %v752_v9 = vpop.f32.mrf.mxu0  ;;  %v802_v10 = vpop.f32.mrf.mxu1  ;;  %v778_v56 = vadd.f32 %v1041_v49, %v1039_v47 }
  0xf7   :  { %v707_v12 = vpack.c.bf16 %v539_v6, %v539_v6  ;;  %v537_v14 = vmax.f32 %v475_v7, 0.0  ;;  %v486_v15 = vadd.f32 %v802_v10, %v389_v8  ;;  %v394_v26 = vadd.f32 %v751_v13, %v1054_v60 }
  0xf8   :  { %v753_v16 = vpop.f32.mrf.mxu0  ;;  %v477_v17 = vpop.f32.mrf.mxu1  ;;  %v426_v13 = vadd.f32 %v775_v53, %v1054_v60 }
  0xf9   :  { %620 = vst.msk [vmem:[%s1147_s3 + $0x8] sm:$0xf] %vm617_vm1, %v707_v12  ;;  %v705_v18 = vpack.c.bf16 %v537_v14, %v537_v14  ;;  %v540_v19 = vmax.f32 %v486_v15, 0.0  ;;  %v478_v20 = vadd.f32 %v477_v17, %v381_v11  ;;  %v754_v24 = vadd.f32 %v753_v16, %v752_v9 }
  0xfa   :  { %v755_v21 = vpop.f32.mrf.mxu0  ;;  %v805_v22 = vpop.f32.mrf.mxu1  ;;  %v434_v9 = vadd.f32 %v781_v54, %v1054_v60  ;;  %v437_v15 = vadd.f32 %v784_v3, %v1054_v60 }
  0xfb   :  { %618 = vst.msk [vmem:[%s1147_s3] sm:$0xf] %vm617_vm1, %v705_v18  ;;  %v708_v23 = vpack.c.bf16 %v540_v19, %v540_v19  ;;  %v538_v25 = vmax.f32 %v478_v20, 0.0  ;;  %v397_v36 = vadd.f32 %v754_v24, %v1054_v60 }
  0xfc   :  { %v756_v27 = vpop.f32.mrf.mxu0  ;;  %v490_v28 = vpop.f32.mrf.mxu1 }
  0xfd   :  { %621 = vst.msk [vmem:[%s1147_s3 + $0xc] sm:$0xf] %vm617_vm1, %v708_v23  ;;  %v706_v29 = vpack.c.bf16 %v538_v25, %v538_v25  ;;  %v757_v30 = vadd.f32 %v756_v27, %v755_v21  ;;  %v491_v31 = vadd.f32 %v490_v28, %v394_v26  ;;  %v429_v27 = vadd.f32 %v778_v56, %v1054_v60 }
  0xfe   :  { %v758_v32 = vpop.f32.mrf.mxu0  ;;  %v806_v33 = vpop.f32.mrf.mxu1 }
  0xff   :  { %619 = vst.msk [vmem:[%s1147_s3 + $0x4] sm:$0xf] %vm617_vm1, %v706_v29  ;;  %v402_v34 = vadd.f32 %v757_v30, %v1054_v60  ;;  %v541_v35 = vmax.f32 %v491_v31, 0.0 }
 0x100   :  { %v759_v37 = vpop.f32.mrf.mxu0  ;;  %v493_v38 = vpop.f32.mrf.mxu1 }
 0x101   :  { %v499_v39 = vadd.f32 %v805_v22, %v402_v34  ;;  %v709_v40 = vpack.c.bf16 %v541_v35, %v541_v35  ;;  %v760_v41 = vadd.f32 %v759_v37, %v758_v32  ;;  %v494_v42 = vadd.f32 %v493_v38, %v397_v36 }
 0x102   :  { %v761_v44 = vpop.f32.mrf.mxu0  ;;  %v809_v46 = vpop.f32.mrf.mxu1 }
 0x103   :  { %v543_v48 = vmax.f32 %v499_v39, 0.0  ;;  %622 = vst.msk [vmem:[%s1147_s3 + $0x10] sm:$0xf] %vm617_vm1, %v709_v40  ;;  %v405_v50 = vadd.f32 %v760_v41, %v1054_v60  ;;  %v542_v52 = vmax.f32 %v494_v42, 0.0 }
 0x104   :  { %v762_v55 = vpop.f32.mrf.mxu0  ;;  %v506_v57 = vpop.f32.mrf.mxu1 }
 0x105   :  { %v711_v58 = vpack.c.bf16 %v543_v48, %v543_v48  ;;  %v502_v61 = vadd.f32 %v806_v33, %v405_v50  ;;  %v710_v62 = vpack.c.bf16 %v542_v52, %v542_v52  ;;  %v763_v63 = vadd.f32 %v762_v55, %v761_v44 }
 0x106   :  { %v764_v0 = vpop.f32.mrf.mxu0  ;;  %v810_v1 = vpop.f32.mrf.mxu1 }
 0x107   :  { %624 = vst.msk [vmem:[%s1147_s3 + $0x18] sm:$0xf] %vm617_vm1, %v711_v58  ;;  %v544_v2 = vmax.f32 %v502_v61, 0.0  ;;  %623 = vst.msk [vmem:[%s1147_s3 + $0x14] sm:$0xf] %vm617_vm1, %v710_v62  ;;  %v410_v51 = vadd.f32 %v763_v63, %v1054_v60 }
 0x108   :  { %v765_v4 = vpop.f32.mrf.mxu0  ;;  %v509_v5 = vpop.f32.mrf.mxu1 }
 0x109   :  { %v712_v6 = vpack.c.bf16 %v544_v2, %v544_v2  ;;  %v507_v7 = vadd.f32 %v506_v57, %v410_v51  ;;  %v766_v8 = vadd.f32 %v765_v4, %v764_v0 }
 0x10a   :  { %v767_v10 = vpop.f32.mrf.mxu0  ;;  %v813_v11 = vpop.f32.mrf.mxu1 }
 0x10b   :  { %625 = vst.msk [vmem:[%s1147_s3 + $0x1c] sm:$0xf] %vm617_vm1, %v712_v6  ;;  %v545_v12 = vmax.f32 %v507_v7, 0.0  ;;  %v413_v43 = vadd.f32 %v766_v8, %v1054_v60  ;;  %v531_v45 = vadd.f32 %v813_v11, %v434_v9 }
 0x10c   :  { %v768_v59 = vpop.f32.mrf.mxu0  ;;  %v522_v14 = vpop.f32.mrf.mxu1 }
 0x10d   :  { %v713_v16 = vpack.c.bf16 %v545_v12, %v545_v12  ;;  %v510_v17 = vadd.f32 %v509_v5, %v413_v43  ;;  %v551_v18 = vmax.f32 %v531_v45, 0.0  ;;  %v769_v19 = vadd.f32 %v768_v59, %v767_v10 }
 0x10e   :  { %v523_v20 = vadd.f32 %v522_v14, %v426_v13  ;;  %v770_v21 = vpop.f32.mrf.mxu0  ;;  %v814_v22 = vpop.f32.mrf.mxu1 }
 0x10f   :  { %626 = vst.msk [vmem:[%s1147_s3 + $0x20] sm:$0xf] %vm617_vm1, %v713_v16  ;;  %v546_v23 = vmax.f32 %v510_v17, 0.0  ;;  %v719_v47 = vpack.c.bf16 %v551_v18, %v551_v18  ;;  %v418_v49 = vadd.f32 %v769_v19, %v1054_v60  ;;  %v534_v24 = vadd.f32 %v814_v22, %v437_v15 }
 0x110   :  { %v549_v25 = vmax.f32 %v523_v20, 0.0  ;;  %v771_v26 = vpop.f32.mrf.mxu0  ;;  %v525_v28 = vpop.f32.mrf.mxu1 }
 0x111   :  { %v714_v29 = vpack.c.bf16 %v546_v23, %v546_v23  ;;  %632 = vst.msk [vmem:[%s1147_s3 + $0x38] sm:$0xf] %vm617_vm1, %v719_v47  ;;  %v515_v30 = vadd.f32 %v809_v46, %v418_v49  ;;  %v552_v31 = vmax.f32 %v534_v24, 0.0  ;;  %v772_v32 = vadd.f32 %v771_v26, %v770_v21 }
 0x112   :  { %v717_v33 = vpack.c.bf16 %v549_v25, %v549_v25  ;;  %v526_v34 = vadd.f32 %v525_v28, %v429_v27 }
 0x113   :  { %627 = vst.msk [vmem:[%s1147_s3 + $0x24] sm:$0xf] %vm617_vm1, %v714_v29  ;;  %v547_v35 = vmax.f32 %v515_v30, 0.0  ;;  %v720_v36 = vpack.c.bf16 %v552_v31, %v552_v31  ;;  %v421_v37 = vadd.f32 %v772_v32, %v1054_v60 }
 0x114   :  { %630 = vst.msk [vmem:[%s1147_s3 + $0x30] sm:$0xf] %vm617_vm1, %v717_v33  ;;  %v550_v38 = vmax.f32 %v526_v34, 0.0 }
 0x115   :  { %v715_v39 = vpack.c.bf16 %v547_v35, %v547_v35  ;;  %633 = vst.msk [vmem:[%s1147_s3 + $0x3c] sm:$0xf] %vm617_vm1, %v720_v36  ;;  %v518_v40 = vadd.f32 %v810_v1, %v421_v37 }
 0x116   :  { %v718_v41 = vpack.c.bf16 %v550_v38, %v550_v38 }
 0x117   :  { %628 = vst.msk [vmem:[%s1147_s3 + $0x28] sm:$0xf] %vm617_vm1, %v715_v39  ;;  %v548_v60 = vmax.f32 %v518_v40, 0.0 }
 0x118   :  { %631 = vst.msk [vmem:[%s1147_s3 + $0x34] sm:$0xf] %vm617_vm1, %v718_v41 }
 0x119   :  { %v716_v42 = vpack.c.bf16 %v548_v60, %v548_v60 }
 0x11b   :  { %629 = vst.msk [vmem:[%s1147_s3 + $0x2c] sm:$0xf] %vm617_vm1, %v716_v42 }

// kernel: _lambda_.15
= control target key start
LH: loop header
LB: loop body
LE: loop exit
PB: predicated region body
PF: predicated region fallthrough
CT: control target
= control target key end

     0   :  { %vm110_vm0 = vcmask 523264   ;;  %s460_s1 = inlined_call_operand.vmem [shape: bf16[64,128], index: 1, kind: input, shape index: {}]   ;;  %s461_s0 = inlined_call_operand.vmem [shape: bf16[128,64], index: 0, kind: input, shape index: {}]   ;;  %s462_s2 = inlined_call_operand.vmem [shape: f32[1,128], index: 2, kind: input, shape index: {}]   ;;  %s463_s3 = inlined_call_operand.vmem [shape: f32[128,128], index: 3, kind: output, shape index: {}]  }
   0x1   :  { %v333_v0 = vld [vmem:[%s460_s1 + $0x18] sm:$0xff]   ;;  %v334_v1 = vld [vmem:[%s460_s1 + $0x10] sm:$0xff]   ;;  %v335_v2 = vld [vmem:[%s460_s1 + $0x8] sm:$0xff]  }
   0x2   :  { %301 = vmatprep.subr.bf16.mxu0 %v333_v0  ;;  %325 = vmatprep.subr.bf16.mxu1 %v333_v0  ;;  %v337_v3 = vld [vmem:[%s461_s0] sm:$0xff]   ;;  %v339_v6 = vld [vmem:[%s461_s0 + $0x8] sm:$0xff]   ;;  %v341_v8 = vld [vmem:[%s461_s0 + $0x10] sm:$0xff]  }
   0x3   :  { %302 = vmatpush3.bf16.msra.mxu0 %v333_v0  ;;  %329 = vmatpush3.bf16.msra.mxu1 %v333_v0  ;;  %v338_v4 = vld [vmem:[%s461_s0 + $0x20] sm:$0xff]   ;;  %v340_v7 = vld [vmem:[%s461_s0 + $0x28] sm:$0xff]   ;;  %v342_v9 = vld [vmem:[%s461_s0 + $0x30] sm:$0xff]  }
   0x4   :  { %303 = vmatprep.subr.bf16.mxu0 %v334_v1  ;;  %326 = vmatprep.subr.bf16.mxu1 %v334_v1  ;;  %v336_v5 = vld [vmem:[%s460_s1] sm:$0xff]   ;;  %v343_v10 = vld [vmem:[%s461_s0 + $0x18] sm:$0xff]  }
   0x5   :  { %309 = vmatprep.mubr.msk.bf16.mxu0 %vm110_vm0, %v337_v3  ;;  %317 = vmatprep.mubr.msk.bf16.mxu1 %vm110_vm0, %v338_v4  ;;  %v344_v11 = vld [vmem:[%s461_s0 + $0x38] sm:$0xff]   ;;  %v268_v12 = vld [vmem:[%s462_s2] ss:$0 sm:$0xff] }
   0x7   :  { %304 = vmatpush3.bf16.msra.mxu0 %v334_v1  ;;  %330 = vmatpush3.bf16.msra.mxu1 %v334_v1 }
   0x8   :  { %305 = vmatprep.subr.bf16.mxu0 %v335_v2  ;;  %327 = vmatprep.subr.bf16.mxu1 %v335_v2 }
   0xb   :  { %306 = vmatpush3.bf16.msra.mxu0 %v335_v2  ;;  %331 = vmatpush3.bf16.msra.mxu1 %v335_v2 }
   0xc   :  { %307 = vmatprep.subr.bf16.mxu0 %v336_v5  ;;  %328 = vmatprep.subr.bf16.mxu1 %v336_v5 }
   0xf   :  { %308 = vmatpush3.bf16.msra.mxu0 %v336_v5  ;;  %332 = vmatpush3.bf16.msra.mxu1 %v336_v5 }
  0x12   :  { %310 = vmatmul.mubr.msk.bf16.vlgmr.msra.gmra.mxu0 %vm110_vm0, %v339_v6  ;;  %318 = vmatmul.mubr.msk.bf16.vlgmr.msra.gmra.mxu1 %vm110_vm0, %v340_v7 }
  0x13   :  { %313 = vmatprep.mubr.msk.bf16.mxu0 %vm110_vm0, %v341_v8  ;;  %321 = vmatprep.mubr.msk.bf16.mxu1 %vm110_vm0, %v342_v9 }
  0x1a   :  { %314 = vmatmul.mubr.msk.bf16.gmra.mxu0 %vm110_vm0, %v343_v10  ;;  %322 = vmatmul.mubr.msk.bf16.gmra.mxu1 %vm110_vm0, %v344_v11 }
  0xd2   :  { %v311_v13 = vpop.f32.mrf.mxu0  ;;  %v319_v14 = vpop.f32.mrf.mxu1 }
  0xd3   :  { %v178_v15 = vadd.f32 %v311_v13, %v268_v12  ;;  %v210_v16 = vadd.f32 %v319_v14, %v268_v12 }
  0xd4   :  { %v169_v17 = vpop.f32.mrf.mxu0  ;;  %v201_v18 = vpop.f32.mrf.mxu1 }
  0xd5   :  { %v234_v19 = vmax.f32 %v178_v15, 0.0  ;;  %v242_v20 = vmax.f32 %v210_v16, 0.0  ;;  %v170_v21 = vadd.f32 %v268_v12, %v169_v17  ;;  %v202_v22 = vadd.f32 %v268_v12, %v201_v18 }
  0xd6   :  { %v312_v23 = vpop.f32.mrf.mxu0  ;;  %v320_v24 = vpop.f32.mrf.mxu1 }
  0xd7   :  { %250 = vst [vmem:[%s463_s3 + $0x10] sm:$0xff] %v234_v19  ;;  %258 = vst [vmem:[%s463_s3 + $0x50] sm:$0xff] %v242_v20  ;;  %v232_v25 = vmax.f32 %v170_v21, 0.0  ;;  %v240_v26 = vmax.f32 %v202_v22, 0.0  ;;  %v181_v27 = vadd.f32 %v312_v23, %v268_v12  ;;  %v213_v28 = vadd.f32 %v320_v24, %v268_v12 }
  0xd8   :  { %v172_v29 = vpop.f32.mrf.mxu0  ;;  %v204_v30 = vpop.f32.mrf.mxu1 }
  0xd9   :  { %248 = vst [vmem:[%s463_s3] sm:$0xff] %v232_v25  ;;  %256 = vst [vmem:[%s463_s3 + $0x40] sm:$0xff] %v240_v26  ;;  %v235_v31 = vmax.f32 %v181_v27, 0.0  ;;  %v243_v32 = vmax.f32 %v213_v28, 0.0  ;;  %v173_v33 = vadd.f32 %v268_v12, %v172_v29  ;;  %v205_v34 = vadd.f32 %v268_v12, %v204_v30 }
  0xda   :  { %v315_v35 = vpop.f32.mrf.mxu0  ;;  %v323_v36 = vpop.f32.mrf.mxu1 }
  0xdb   :  { %251 = vst [vmem:[%s463_s3 + $0x18] sm:$0xff] %v235_v31  ;;  %259 = vst [vmem:[%s463_s3 + $0x58] sm:$0xff] %v243_v32  ;;  %v233_v37 = vmax.f32 %v173_v33, 0.0  ;;  %v241_v38 = vmax.f32 %v205_v34, 0.0  ;;  %v194_v39 = vadd.f32 %v315_v35, %v268_v12  ;;  %v226_v40 = vadd.f32 %v323_v36, %v268_v12 }
  0xdc   :  { %v185_v41 = vpop.f32.mrf.mxu0  ;;  %v217_v42 = vpop.f32.mrf.mxu1 }
  0xdd   :  { %249 = vst [vmem:[%s463_s3 + $0x8] sm:$0xff] %v233_v37  ;;  %257 = vst [vmem:[%s463_s3 + $0x48] sm:$0xff] %v241_v38  ;;  %v238_v43 = vmax.f32 %v194_v39, 0.0  ;;  %v246_v44 = vmax.f32 %v226_v40, 0.0  ;;  %v186_v45 = vadd.f32 %v268_v12, %v185_v41  ;;  %v218_v46 = vadd.f32 %v268_v12, %v217_v42 }
  0xde   :  { %v316_v47 = vpop.f32.mrf.mxu0  ;;  %v324_v48 = vpop.f32.mrf.mxu1 }
  0xdf   :  { %254 = vst [vmem:[%s463_s3 + $0x30] sm:$0xff] %v238_v43  ;;  %262 = vst [vmem:[%s463_s3 + $0x70] sm:$0xff] %v246_v44  ;;  %v236_v49 = vmax.f32 %v186_v45, 0.0  ;;  %v244_v50 = vmax.f32 %v218_v46, 0.0  ;;  %v197_v51 = vadd.f32 %v316_v47, %v268_v12  ;;  %v229_v52 = vadd.f32 %v324_v48, %v268_v12 }
  0xe0   :  { %v188_v53 = vpop.f32.mrf.mxu0  ;;  %v220_v54 = vpop.f32.mrf.mxu1 }
  0xe1   :  { %252 = vst [vmem:[%s463_s3 + $0x20] sm:$0xff] %v236_v49  ;;  %260 = vst [vmem:[%s463_s3 + $0x60] sm:$0xff] %v244_v50  ;;  %v239_v55 = vmax.f32 %v197_v51, 0.0  ;;  %v247_v56 = vmax.f32 %v229_v52, 0.0  ;;  %v189_v57 = vadd.f32 %v268_v12, %v188_v53  ;;  %v221_v58 = vadd.f32 %v268_v12, %v220_v54 }
  0xe3   :  { %255 = vst [vmem:[%s463_s3 + $0x38] sm:$0xff] %v239_v55  ;;  %263 = vst [vmem:[%s463_s3 + $0x78] sm:$0xff] %v247_v56  ;;  %v237_v59 = vmax.f32 %v189_v57, 0.0  ;;  %v245_v60 = vmax.f32 %v221_v58, 0.0 }
  0xe5   :  { %253 = vst [vmem:[%s463_s3 + $0x28] sm:$0xff] %v237_v59  ;;  %261 = vst [vmem:[%s463_s3 + $0x68] sm:$0xff] %v245_v60 }

// kernel: _lambda_.8
= control target key start
LH: loop header
LB: loop body
LE: loop exit
PB: predicated region body
PF: predicated region fallthrough
CT: control target
= control target key end

     0   :  { %s5363_s12 = smov 0   ;;  %s5365_s13 = smov 0   ;;  %s7538_s0 = inlined_call_operand.vmem [shape: bf16[2,18,18,4], index: 0, kind: input, shape index: {}]   ;;  %s7539_s1 = inlined_call_operand.vmem [shape: bf16[9,4,32], index: 1, kind: input, shape index: {}]   ;;  %s7540_s2 = inlined_call_operand.vmem [shape: f32[1,32], index: 2, kind: input, shape index: {}]   ;;  %s7541_s3 = inlined_call_operand.vmem [shape: bf16[2,16,16,32], index: 3, kind: output, shape index: {}]  }
   0x1   :  { %s5367_s14 = smov 0  }
   0x2 LB: > { %s25_s15 = sadd.s32 1, %s5337_s13  ;;  %p4215_p0 = scmp.ge.s32.totalorder %s5341_s14, 1  ;;  %s5341_s14 = sphi %s5367_s14, %s13_s14   ;;  %s5337_s13 = sphi %s5365_s13, %s7816_s13   ;;  %s5333_s12 = sphi %s5363_s12, %s7815_s12  }
   0x3   : > { %p27_p1 = scmp.ge.s32.totalorder %s25_s15, 2  ;;  %p151_p2 = scmp.lt.s32.totalorder %s5341_s14, 3 }
   0x5   : > { %s7818_s15 = smov (%p27_p1, %s25_s15), 0  ;;  %p152_p3 = pnand %p4215_p0, %p151_p2 }
   0x7   : > { %155 = sbr.rel (%p152_p3) target bundleno = 530 (0x212), region = 32 }
   0xc   : > { %v4235_v0 = vld [vmem:[%s7539_s1 + $0x2] sm:$0x3]  ;;  %vm542_vm0 = vcmask 1041408   ;;  %p180_p4 = scmp.lt.s32.totalorder %s5333_s12, 1  ;;  %v281_v2 = vld [vmem:[%s7539_s1] sm:$0x3] }
   0xd   : > { %5221 = vmatprep.subr.msk.bf16.mxu1 %vm542_vm0, %v4235_v0  ;;  %5220 = vmatprep.subr.msk.bf16.mxu0 %vm542_vm0, %v4235_v0  ;;  %v544_v1 = vsel %vm542_vm0, %v4235_v0, 0  ;;  %v4268_v3 = vld [vmem:[%s7539_s1 + $0x4] sm:$0x3]  ;;  %vm362_vm1 = vcmask 1046528   ;;  %vm493_vm2 = vcmask 31744   ;;  %v756_v24 = vsel %vm542_vm0, %v281_v2, 0 }
   0xe   : > { %5219 = vmatpush3.bf16.msra.mxu1 %v544_v1  ;;  %4913 = vmatpush3.bf16.msra.mxu0 %v544_v1  ;;  %s7820_s12 = smov (!%p180_p4, %s5333_s12), 1  ;;  %v1147_v30 = vsel %vm542_vm0, %v4268_v3, 0  ;;  %vm967_vm3 = vcmask 1045504   ;;  %vm4081_vm4 = vcmask 257024  }
   0xf   : > { %5222 = vmatprep.subr.msk.bf16.mxu1 %vm542_vm0, %v281_v2  ;;  %5223 = vmatprep.subr.msk.bf16.mxu0 %vm542_vm0, %v4268_v3  ;;  %s5230_s22 = smul.u32 216, %s7820_s12  ;;  %s4646_s17 = sshll.u32 %s7820_s12, 7 }
  0x10   : > { %s7359_s19 = scalar_lea.vmem %s7541_s3, %s4646_s17 }
  0x11   : > { %s5401_s25 = scalar_lea.vmem %s7538_s0, %s5230_s22 }
  0x12   : > { %v5404_v4 = vld [vmem:[%s5401_s25] sm:$0xff]   ;;  %v282_v5 = vld [vmem:[%s5401_s25 + $0x8] sm:$0x1]  ;;  %v5417_v12 = vld [vmem:[%s5401_s25 + $0xc] sm:$0xff]  }
  0x13   : > { %v5408_v6 = vld [vmem:[%s5401_s25 + $0x60] sm:$0xff]   ;;  %v233_v7 = vunpack.c.l.bf16 %v5404_v4  ;;  %v234_v8 = vunpack.c.h.bf16 %v5404_v4  ;;  %v298_v9 = vunpack.c.l.bf16 %v282_v5  ;;  %v5414_v11 = vld [vmem:[%s5401_s25 + $0x68] sm:$0x1]  ;;  %v235_v15 = vunpack.c.l.bf16 %v5417_v12  ;;  %v283_v23 = vld [vmem:[%s5401_s25 + $0x14] sm:$0x1] }
  0x14   : > { %v249_v10 = vunpack.c.l.bf16 %v5408_v6  ;;  %v250_v13 = vunpack.c.h.bf16 %v5408_v6  ;;  %v306_v14 = vunpack.c.l.bf16 %v5414_v11  ;;  %v236_v19 = vunpack.c.h.bf16 %v5417_v12  ;;  %v5434_v28 = vld [vmem:[%s5401_s25 + $0x6c] sm:$0xff]   ;;  %v5437_v29 = vld [vmem:[%s5401_s25 + $0x74] sm:$0x1]  ;;  %v5445_v35 = vld [vmem:[%s5401_s25 + $0x18] sm:$0xff]  }
  0x15   : > { %v363_v16 = vrot.slane %v233_v7, 1  ;;  %v364_v17 = vrot.slane %v234_v8, 1  ;;  %v366_v18 = vrot.slane %v298_v9, 1  ;;  %v5431_v27 = vrot.slane %v234_v8, 2  ;;  %v5454_v44 = vld [vmem:[%s5401_s25 + $0x20] sm:$0x1] }
  0x16   : > { %v403_v20 = vrot.slane %v249_v10, 1  ;;  %v404_v21 = vrot.slane %v250_v13, 1  ;;  %v406_v22 = vrot.slane %v306_v14, 1  ;;  %v5440_v32 = vrot.slane %v298_v9, 2  ;;  %v5457_v45 = vld [vmem:[%s5401_s25 + $0x78] sm:$0xff]   ;;  %v5476_v59 = vld [vmem:[%s5401_s25 + $0x24] sm:$0xff]  }
  0x17   : > { %v365_v25 = vsel %vm362_vm1, %v363_v16, %v364_v17  ;;  %v367_v26 = vsel %vm362_vm1, %v364_v17, %v366_v18  ;;  %v299_v37 = vunpack.c.l.bf16 %v283_v23  ;;  %v368_v38 = vrot.slane %v235_v15, 1  ;;  %v5470_v54 = vld [vmem:[%s5401_s25 + $0x80] sm:$0x1]  ;;  %v5483_v0 = vld [vmem:[%s5401_s25 + $0x2c] sm:$0x1]  ;;  %v5490_v7 = vld [vmem:[%s5401_s25 + $0x84] sm:$0xff]  }
  0x18   : > { %v475_v31 = vpack.c.bf16 %v367_v26, %v365_v25  ;;  %v405_v33 = vsel %vm362_vm1, %v403_v20, %v404_v21  ;;  %v407_v34 = vsel %vm362_vm1, %v404_v21, %v406_v22  ;;  %v369_v39 = vrot.slane %v236_v19, 1  ;;  %v5495_v8 = vld [vmem:[%s7539_s1 + $0x8] sm:$0x3]  ;;  %v5504_v17 = vld [vmem:[%s7539_s1 + $0x6] sm:$0x3] }
  0x19   : > { %v483_v36 = vpack.c.bf16 %v407_v34, %v405_v33  ;;  %v5448_v40 = vrot.slane %v236_v19, 2  ;;  %v251_v41 = vunpack.c.l.bf16 %v5434_v28  ;;  %v7551_v42 = vunpack.c.h.bf16 %v5434_v28  ;;  %v5514_v22 = vld [vmem:[%s5401_s25 + $0x8c] sm:$0x1] }
  0x1a   : > { %4914 = vmatprep.mubr.msk.bf16.mxu0 %vm493_vm2, %v475_v31  ;;  %v7550_v43 = vunpack.c.l.bf16 %v5437_v29  ;;  %v370_v46 = vsel %vm362_vm1, %v368_v38, %v369_v39  ;;  %v371_v47 = vrot.slane %v299_v37, 1  ;;  %v5461_v48 = vrot.slane %v299_v37, 2  ;;  %v5520_v31 = vld [vmem:[%s5401_s25 + $0x30] sm:$0xff]   ;;  %v5530_v37 = vld [vmem:[%s5401_s25 + $0x38] sm:$0x1] }
  0x1b   : > { %4930 = vmatprep.mubr.msk.bf16.mxu1 %vm493_vm2, %v483_v36  ;;  %v237_v49 = vunpack.c.l.bf16 %v5445_v35  ;;  %v408_v50 = vrot.slane %v251_v41, 1  ;;  %v409_v51 = vrot.slane %v7551_v42, 1  ;;  %v238_v53 = vunpack.c.h.bf16 %v5445_v35  ;;  %v5533_v38 = vld [vmem:[%s5401_s25 + $0x90] sm:$0xff]  }
  0x1c   : > { %v411_v52 = vrot.slane %v7550_v43, 1  ;;  %v372_v55 = vsel %vm362_vm1, %v369_v39, %v371_v47  ;;  %v300_v56 = vunpack.c.l.bf16 %v5454_v44  ;;  %v253_v58 = vunpack.c.l.bf16 %v5457_v45 }
  0x1d   : > { %v373_v57 = vrot.slane %v237_v49, 1  ;;  %v476_v60 = vpack.c.bf16 %v372_v55, %v370_v46  ;;  %v410_v61 = vsel %vm362_vm1, %v408_v50, %v409_v51  ;;  %v374_v63 = vrot.slane %v238_v53, 1  ;;  %v5546_v55 = vld [vmem:[%s5401_s25 + $0x98] sm:$0x1] }
  0x1e   : > { %v412_v62 = vsel %vm362_vm1, %v409_v51, %v411_v52  ;;  %v376_v2 = vrot.slane %v300_v56, 1  ;;  %v7546_v3 = vunpack.c.h.bf16 %v5457_v45  ;;  %v7544_v5 = vunpack.c.l.bf16 %v5470_v54 }
  0x1f   : > { %v484_v1 = vpack.c.bf16 %v412_v62, %v410_v61  ;;  %4915 = vmatmul.mubr.msk.bf16.vlgmr.msra.gmra.mxu0 %vm493_vm2, %v476_v60  ;;  %v375_v9 = vsel %vm362_vm1, %v373_v57, %v374_v63  ;;  %v413_v10 = vrot.slane %v253_v58, 1  ;;  %v239_v15 = vunpack.c.l.bf16 %v5476_v59  ;;  %v5554_v62 = vld [vmem:[%s5401_s25 + $0x3c] sm:$0xff]  }
  0x20   : > { %v240_v16 = vunpack.c.h.bf16 %v5476_v59  ;;  %4981 = vmatpush3.bf16.msra.mxu0 %v1147_v30  ;;  %v377_v18 = vsel %vm362_vm1, %v374_v63, %v376_v2  ;;  %v414_v19 = vrot.slane %v7546_v3, 1  ;;  %v416_v20 = vrot.slane %v7544_v5, 1  ;;  %v5557_v63 = vld [vmem:[%s5401_s25 + $0x44] sm:$0x1]  ;;  %v5625_v3 = vld [vmem:[%s5401_s25 + $0x5c] sm:$0x1] }
  0x21   : > { %4931 = vmatmul.mubr.msk.bf16.vlgmr.msra.gmra.mxu1 %vm493_vm2, %v484_v1  ;;  %v301_v21 = vunpack.c.l.bf16 %v5483_v0  ;;  %v477_v23 = vpack.c.bf16 %v377_v18, %v375_v9  ;;  %v378_v25 = vrot.slane %v239_v15, 1  ;;  %v255_v30 = vunpack.c.l.bf16 %v5490_v7  ;;  %5225 = vmatprep.subr.msk.bf16.mxu0 %vm542_vm0, %v5495_v8  ;;  %v5564_v15 = vld [vmem:[%s5401_s25 + $0x9c] sm:$0xff]   ;;  %v5708_v0 = vld [vmem:[%s7539_s1 + $0xc] sm:$0x3] }
  0x22   : > { %4947 = vmatpush3.bf16.msra.mxu1 %v756_v24  ;;  %v379_v26 = vrot.slane %v240_v16, 1  ;;  %v415_v33 = vsel %vm362_vm1, %v413_v10, %v414_v19  ;;  %v417_v34 = vsel %vm362_vm1, %v414_v19, %v416_v20  ;;  %v7549_v36 = vunpack.c.h.bf16 %v5490_v7 }
  0x23   : > { %v381_v24 = vrot.slane %v301_v21, 1  ;;  %5224 = vmatprep.subr.msk.bf16.mxu1 %vm542_vm0, %v5504_v17  ;;  %4918 = vmatprep.mubr.msk.bf16.mxu0 %vm493_vm2, %v477_v23  ;;  %v485_v39 = vpack.c.bf16 %v417_v34, %v415_v33  ;;  %v7548_v46 = vunpack.c.l.bf16 %v5514_v22  ;;  %v418_v47 = vrot.slane %v255_v30, 1 }
  0x24   : > { %v380_v41 = vsel %vm362_vm1, %v378_v25, %v379_v26  ;;  %v419_v50 = vrot.slane %v7549_v36, 1  ;;  %v241_v51 = vunpack.c.l.bf16 %v5520_v31  ;;  %v242_v52 = vunpack.c.h.bf16 %v5520_v31 }
  0x25   : > { %v382_v49 = vsel %vm362_vm1, %v379_v26, %v381_v24  ;;  %4934 = vmatprep.mubr.msk.bf16.mxu1 %vm493_vm2, %v485_v39  ;;  %v421_v58 = vrot.slane %v7548_v46, 1  ;;  %v302_v60 = vunpack.c.l.bf16 %v5530_v37  ;;  %v257_v61 = vunpack.c.l.bf16 %v5533_v38 }
  0x26   : > { %v478_v57 = vpack.c.bf16 %v382_v49, %v380_v41  ;;  %v420_v1 = vsel %vm362_vm1, %v418_v47, %v419_v50  ;;  %v383_v2 = vrot.slane %v241_v51, 1  ;;  %v384_v9 = vrot.slane %v242_v52, 1  ;;  %v5581_v47 = vld [vmem:[%s5401_s25 + $0xa4] sm:$0x1]  ;;  %v5584_v49 = vld [vmem:[%s5401_s25 + $0x48] sm:$0xff]  }
  0x27   : > { %v7543_v10 = vunpack.c.h.bf16 %v5533_v38  ;;  %v422_v18 = vsel %vm362_vm1, %v419_v50, %v421_v58  ;;  %v386_v19 = vrot.slane %v302_v60, 1  ;;  %v7542_v20 = vunpack.c.l.bf16 %v5546_v55 }
  0x28   : > { %4919 = vmatmul.mubr.msk.bf16.gmra.mxu0 %vm493_vm2, %v478_v57  ;;  %v423_v23 = vrot.slane %v257_v61, 1  ;;  %v486_v25 = vpack.c.bf16 %v422_v18, %v420_v1  ;;  %v385_v26 = vsel %vm362_vm1, %v383_v2, %v384_v9  ;;  %v243_v33 = vunpack.c.l.bf16 %v5554_v62  ;;  %v5596_v18 = vld [vmem:[%s5401_s25 + $0x50] sm:$0x1] }
  0x29   : > { %v424_v30 = vrot.slane %v7543_v10, 1  ;;  %v387_v34 = vsel %vm362_vm1, %v384_v9, %v386_v19  ;;  %v426_v24 = vrot.slane %v7542_v20, 1  ;;  %v244_v39 = vunpack.c.h.bf16 %v5554_v62 }
  0x2a   : > { %v7556_v41 = vunpack.c.l.bf16 %v5557_v63  ;;  %4935 = vmatmul.mubr.msk.bf16.gmra.mxu1 %vm493_vm2, %v486_v25  ;;  %v479_v50 = vpack.c.bf16 %v387_v34, %v385_v26  ;;  %v388_v57 = vrot.slane %v243_v33, 1  ;;  %v259_v58 = vunpack.c.l.bf16 %v5564_v15  ;;  %v5605_v33 = vld [vmem:[%s5401_s25 + $0xb0] sm:$0x1] }
  0x2b   : > { %v425_v51 = vsel %vm362_vm1, %v423_v23, %v424_v30  ;;  %v427_v61 = vsel %vm362_vm1, %v424_v30, %v426_v24  ;;  %v389_v1 = vrot.slane %v244_v39, 1  ;;  %v7545_v9 = vunpack.c.h.bf16 %v5564_v15  ;;  %v5602_v30 = vld [vmem:[%s5401_s25 + $0xa8] sm:$0xff]  }
  0x2c   : > { %v391_v2 = vrot.slane %v7556_v41, 1  ;;  %4922 = vmatprep.mubr.msk.bf16.mxu0 %vm493_vm2, %v479_v50  ;;  %v487_v19 = vpack.c.bf16 %v427_v61, %v425_v51  ;;  %v7547_v23 = vunpack.c.l.bf16 %v5581_v47  ;;  %v428_v25 = vrot.slane %v259_v58, 1  ;;  %v5613_v51 = vld [vmem:[%s5401_s25 + $0x54] sm:$0xff]  }
  0x2d   : > { %v245_v26 = vunpack.c.l.bf16 %v5584_v49  ;;  %v390_v34 = vsel %vm362_vm1, %v388_v57, %v389_v1  ;;  %v429_v20 = vrot.slane %v7545_v9, 1  ;;  %v7553_v50 = vunpack.c.h.bf16 %v5584_v49 }
  0x2e   : > { %v392_v24 = vsel %vm362_vm1, %v389_v1, %v391_v2  ;;  %4938 = vmatprep.mubr.msk.bf16.mxu1 %vm493_vm2, %v487_v19  ;;  %v431_v61 = vrot.slane %v7547_v23, 1  ;;  %v7552_v10 = vunpack.c.l.bf16 %v5596_v18  ;;  %v261_v2 = vunpack.c.l.bf16 %v5602_v30 }
  0x2f   : > { %v480_v58 = vpack.c.bf16 %v392_v24, %v390_v34  ;;  %v393_v5 = vrot.slane %v245_v26, 1  ;;  %v430_v57 = vsel %vm362_vm1, %v428_v25, %v429_v20  ;;  %v394_v1 = vrot.slane %v7553_v50, 1  ;;  %v5634_v24 = vld [vmem:[%s5401_s25 + $0xb4] sm:$0xff]   ;;  %v919_v50 = vld [vmem:[%s5401_s25] sm:$0xe] }
  0x30   : > { %v7554_v9 = vunpack.c.h.bf16 %v5602_v30  ;;  %v432_v19 = vsel %vm362_vm1, %v429_v20, %v431_v61  ;;  %v396_v26 = vrot.slane %v7552_v10, 1  ;;  %v7555_v34 = vunpack.c.l.bf16 %v5605_v33 }
  0x31   : > { %4923 = vmatmul.mubr.msk.bf16.gmra.mxu0 %vm493_vm2, %v480_v58  ;;  %v247_v25 = vunpack.c.l.bf16 %v5613_v51  ;;  %v488_v23 = vpack.c.bf16 %v432_v19, %v430_v57  ;;  %v395_v46 = vsel %vm362_vm1, %v393_v5, %v394_v1  ;;  %v433_v36 = vrot.slane %v261_v2, 1  ;;  %v5640_v58 = vld [vmem:[%s5401_s25 + $0xbc] sm:$0x1] }
  0x32   : > { %v434_v43 = vrot.slane %v7554_v9, 1  ;;  %v397_v20 = vsel %vm362_vm1, %v394_v1, %v396_v26  ;;  %v436_v61 = vrot.slane %v7555_v34, 1  ;;  %v7557_v42 = vunpack.c.h.bf16 %v5613_v51  ;;  %v920_v9 = vld [vmem:[%s5401_s25 + $0xc] sm:$0xe] }
  0x33   : > { %v7558_v10 = vunpack.c.l.bf16 %v5625_v3  ;;  %4939 = vmatmul.mubr.msk.bf16.gmra.mxu1 %vm493_vm2, %v488_v23  ;;  %v481_v57 = vpack.c.bf16 %v397_v20, %v395_v46  ;;  %v398_v2 = vrot.slane %v247_v25, 1  ;;  %v263_v19 = vunpack.c.l.bf16 %v5634_v24 }
  0x34   : > { %v435_v5 = vsel %vm362_vm1, %v433_v36, %v434_v43  ;;  %v437_v1 = vsel %vm362_vm1, %v434_v43, %v436_v61  ;;  %v399_v26 = vrot.slane %v7557_v42, 1  ;;  %v264_v41 = vunpack.c.h.bf16 %v5634_v24  ;;  %v921_v42 = vld [vmem:[%s5401_s25 + $0x18] sm:$0xe] }
  0x35   : > { %v401_v34 = vrot.slane %v7558_v10, 1  ;;  %4926 = vmatprep.mubr.msk.bf16.mxu0 %vm493_vm2, %v481_v57  ;;  %v489_v46 = vpack.c.bf16 %v437_v1, %v435_v5  ;;  %v313_v36 = vunpack.c.l.bf16 %v5640_v58  ;;  %v438_v23 = vrot.slane %v263_v19, 1 }
  0x36   : > { %v400_v25 = vsel %vm362_vm1, %v398_v2, %v399_v26  ;;  %v439_v20 = vrot.slane %v264_v41, 1  ;;  %v935_v61 = vunpack.c.l.bf16 %v919_v50  ;;  %v936_v5 = vunpack.c.l.bf16 %v920_v9  ;;  %v922_v2 = vld [vmem:[%s5401_s25 + $0x24] sm:$0xe] }
  0x37   : > { %v402_v43 = vsel %vm362_vm1, %v399_v26, %v401_v34  ;;  %4942 = vmatprep.mubr.msk.bf16.mxu1 %vm493_vm2, %v489_v46  ;;  %v441_v57 = vrot.slane %v313_v36, 1  ;;  %v972_v34 = vsel %vm967_vm3, %v5431_v27, %v5440_v32  ;;  %v977_v50 = vsel %vm967_vm3, %v5448_v40, %v5461_v48 }
  0x38   : > { %v482_v10 = vpack.c.bf16 %v402_v43, %v400_v25  ;;  %v440_v19 = vsel %vm362_vm1, %v438_v23, %v439_v20  ;;  %v968_v1 = vrot.slane %v935_v61, 2  ;;  %v973_v46 = vrot.slane %v936_v5, 2  ;;  %v923_v61 = vld [vmem:[%s5401_s25 + $0x30] sm:$0xe] }
  0x39   : > { %v442_v26 = vsel %vm362_vm1, %v439_v20, %v441_v57  ;;  %v937_v25 = vunpack.c.l.bf16 %v921_v42  ;;  %v979_v9 = vrot.slane %v238_v53, 2  ;;  %v981_v32 = vrot.slane %v300_v56, 2 }
  0x3a   : > { %4927 = vmatmul.mubr.msk.bf16.gmra.mxu0 %vm493_vm2, %v482_v10  ;;  %v490_v23 = vpack.c.bf16 %v442_v26, %v440_v19  ;;  %v970_v43 = vsel %vm967_vm3, %v968_v1, %v5431_v27  ;;  %v975_v10 = vsel %vm967_vm3, %v973_v46, %v5448_v40  ;;  %v938_v57 = vunpack.c.l.bf16 %v922_v2  ;;  %v924_v1 = vld [vmem:[%s5401_s25 + $0x3c] sm:$0xe] }
  0x3b   : > { %v1080_v48 = vpack.c.bf16 %v972_v34, %v970_v43  ;;  %v978_v20 = vrot.slane %v937_v25, 2  ;;  %v1081_v42 = vpack.c.bf16 %v977_v50, %v975_v10  ;;  %v982_v53 = vsel %vm967_vm3, %v979_v9, %v981_v32  ;;  %v925_v34 = vld [vmem:[%s5401_s25 + $0x48] sm:$0xe]  ;;  %v927_v25 = vld [vmem:[%s5401_s25 + $0x60] sm:$0xe] }
  0x3c   : > { %4943 = vmatmul.mubr.msk.bf16.gmra.mxu1 %vm493_vm2, %v490_v23  ;;  %v984_v27 = vrot.slane %v240_v16, 2  ;;  %v983_v56 = vrot.slane %v938_v57, 2  ;;  %v986_v40 = vrot.slane %v301_v21, 2  ;;  %v939_v5 = vunpack.c.l.bf16 %v923_v61 }
  0x3d   : > { %4948 = vmatprep.mubr.msk.bf16.mxu1 %vm493_vm2, %v5404_v4  ;;  %4982 = vmatprep.mubr.msk.bf16.mxu0 %vm493_vm2, %v1080_v48  ;;  %v980_v44 = vsel %vm967_vm3, %v978_v20, %v979_v9  ;;  %v1995_v50 = vsel %vm542_vm0, %v5495_v8, 0  ;;  %v989_v4 = vrot.slane %v242_v52, 2  ;;  %v991_v2 = vrot.slane %v302_v60, 2  ;;  %v926_v20 = vld [vmem:[%s5401_s25 + $0x54] sm:$0xe] }
  0x3e   : > { %v1082_v19 = vpack.c.bf16 %v982_v53, %v980_v44  ;;  %v988_v16 = vrot.slane %v939_v5, 2  ;;  %v985_v21 = vsel %vm967_vm3, %v983_v56, %v984_v27  ;;  %v987_v26 = vsel %vm967_vm3, %v984_v27, %v986_v40  ;;  %v930_v44 = vld [vmem:[%s5401_s25 + $0x84] sm:$0xe] }
  0x3f   : > { %v940_v8 = vunpack.c.l.bf16 %v924_v1  ;;  %v1009_v46 = vrot.slane %v250_v13, 2  ;;  %v1011_v37 = vrot.slane %v306_v14, 2  ;;  %v1477_v52 = vsel %vm542_vm0, %v5504_v17, 0  ;;  %v5726_v13 = vld [vmem:[%s7539_s1 + $0xa] sm:$0x3] }
  0x40   : > { %v941_v60 = vunpack.c.l.bf16 %v925_v34  ;;  %v990_v9 = vsel %vm967_vm3, %v988_v16, %v989_v4  ;;  %v992_v23 = vsel %vm967_vm3, %v989_v4, %v991_v2  ;;  %v1083_v11 = vpack.c.bf16 %v987_v26, %v985_v21  ;;  %v928_v17 = vld [vmem:[%s5401_s25 + $0x6c] sm:$0xe] }
  0x41   : > { %v994_v14 = vrot.slane %v244_v39, 2  ;;  %v993_v43 = vrot.slane %v940_v8, 2  ;;  %v7589_v32 = vunpack.c.l.bf16 %v5557_v63  ;;  %v7590_v48 = vunpack.c.h.bf16 %v5584_v49 }
  0x42   : > { %4983 = vmatmul.mubr.msk.bf16.vlgmr.msra.gmra.mxu0 %vm493_vm2, %v1081_v42  ;;  %v943_v57 = vunpack.c.l.bf16 %v927_v25  ;;  %v1084_v42 = vpack.c.bf16 %v992_v23, %v990_v9  ;;  %v7591_v53 = vunpack.c.l.bf16 %v5596_v18  ;;  %v1012_v39 = vsel %vm967_vm3, %v1009_v46, %v1011_v37 }
  0x43   : > { %5049 = vmatpush3.bf16.msra.mxu0 %v1995_v50  ;;  %4986 = vmatprep.mubr.msk.bf16.mxu0 %vm493_vm2, %v1082_v19  ;;  %v996_v61 = vrot.slane %v7589_v32, 2  ;;  %v999_v10 = vrot.slane %v7590_v48, 2  ;;  %v944_v56 = vunpack.c.l.bf16 %v928_v17  ;;  %v7592_v63 = vunpack.c.h.bf16 %v5434_v28 }
  0x44   : > { %5227 = vmatprep.subr.msk.bf16.mxu0 %vm542_vm0, %v5708_v0  ;;  %4949 = vmatmul.mubr.msk.bf16.vlgmr.msra.gmra.mxu1 %vm493_vm2, %v5417_v12  ;;  %v998_v12 = vrot.slane %v941_v60, 2  ;;  %v1001_v27 = vrot.slane %v7591_v53, 2  ;;  %v7593_v5 = vunpack.c.l.bf16 %v5437_v29  ;;  %v995_v1 = vsel %vm967_vm3, %v993_v43, %v994_v14 }
  0x45   : > { %5015 = vmatpush3.bf16.msra.mxu1 %v1477_v52  ;;  %4952 = vmatprep.mubr.msk.bf16.mxu1 %vm493_vm2, %v5445_v35  ;;  %v1008_v35 = vrot.slane %v943_v57, 2  ;;  %v1014_v40 = vrot.slane %v7592_v63, 2  ;;  %v997_v18 = vsel %vm967_vm3, %v994_v14, %v996_v61  ;;  %v1013_v50 = vrot.slane %v944_v56, 2  ;;  %v929_v14 = vld [vmem:[%s5401_s25 + $0x78] sm:$0xe] }
  0x46   : > { %5226 = vmatprep.subr.msk.bf16.mxu1 %vm542_vm0, %v5726_v13  ;;  %v1016_v19 = vrot.slane %v7593_v5, 2  ;;  %v1002_v16 = vsel %vm967_vm3, %v999_v10, %v1001_v27  ;;  %v942_v4 = vunpack.c.l.bf16 %v926_v20  ;;  %v1000_v29 = vsel %vm967_vm3, %v998_v12, %v999_v10  ;;  %v931_v57 = vld [vmem:[%s5401_s25 + $0x90] sm:$0xe]  ;;  %v933_v63 = vld [vmem:[%s5401_s25 + $0xa8] sm:$0xe] }
  0x47   : > { %v1010_v34 = vsel %vm967_vm3, %v1008_v35, %v1009_v46  ;;  %v5763_v26 = vsel %vm967_vm3, %v1013_v50, %v1014_v40  ;;  %v946_v8 = vunpack.c.l.bf16 %v930_v44  ;;  %v7594_v37 = vunpack.c.h.bf16 %v5490_v7  ;;  %v932_v35 = vld [vmem:[%s5401_s25 + $0x9c] sm:$0xe] }
  0x48   : > { %v1088_v2 = vpack.c.bf16 %v1012_v39, %v1010_v34  ;;  %v5759_v21 = vsel %vm967_vm3, %v1014_v40, %v1016_v19  ;;  %v7595_v60 = vunpack.c.l.bf16 %v5514_v22  ;;  %v1085_v9 = vpack.c.bf16 %v997_v18, %v995_v1  ;;  %v934_v40 = vld [vmem:[%s5401_s25 + $0xb4] sm:$0xe]  ;;  %v5817_v34 = vld [vmem:[%s5401_s25 + $0xc] sm:$0xff]  }
  0x49   : > { %v1024_v46 = vrot.slane %v7594_v37, 2  ;;  %v1089_v52 = vpack.c.bf16 %v5759_v21, %v5763_v26  ;;  %v7596_v23 = vunpack.c.h.bf16 %v5613_v51  ;;  %v1023_v17 = vrot.slane %v946_v8, 2 }
  0x4a   : > { %4987 = vmatmul.mubr.msk.bf16.gmra.mxu0 %vm493_vm2, %v1083_v11  ;;  %v1026_v25 = vrot.slane %v7595_v60, 2  ;;  %v1086_v43 = vpack.c.bf16 %v1002_v16, %v1000_v29  ;;  %v1003_v32 = vrot.slane %v942_v4, 2  ;;  %v7598_v12 = vunpack.c.h.bf16 %v5457_v45 }
  0x4b   : > { %4990 = vmatprep.mubr.msk.bf16.mxu0 %vm493_vm2, %v1084_v42  ;;  %v1004_v11 = vrot.slane %v7596_v23, 2  ;;  %v5784_v22 = vsel %vm967_vm3, %v1023_v17, %v1024_v46  ;;  %v7599_v27 = vunpack.c.l.bf16 %v5470_v54  ;;  %v947_v56 = vunpack.c.l.bf16 %v931_v57 }
  0x4c   : > { %4953 = vmatmul.mubr.msk.bf16.gmra.mxu1 %vm493_vm2, %v5476_v59  ;;  %v7597_v59 = vunpack.c.l.bf16 %v5625_v3  ;;  %v5781_v48 = vsel %vm967_vm3, %v1024_v46, %v1026_v25  ;;  %v1019_v53 = vrot.slane %v7598_v12, 2  ;;  %v948_v19 = vunpack.c.l.bf16 %v932_v35  ;;  %v5827_v46 = vld [vmem:[%s5401_s25 + $0x18] sm:$0xff]  }
  0x4d   : > { %4956 = vmatprep.mubr.msk.bf16.mxu1 %vm493_vm2, %v5520_v31  ;;  %v945_v31 = vunpack.c.l.bf16 %v929_v14  ;;  %v1091_v10 = vpack.c.bf16 %v5781_v48, %v5784_v22  ;;  %v1005_v3 = vsel %vm967_vm3, %v1003_v32, %v1004_v11  ;;  %v1021_v39 = vrot.slane %v7599_v27, 2  ;;  %v5838_v14 = vld [vmem:[%s5401_s25 + $0x20] sm:$0x1] }
  0x4e   : > { %v1006_v61 = vrot.slane %v7597_v59, 2  ;;  %v949_v1 = vunpack.c.l.bf16 %v933_v63  ;;  %v950_v18 = vunpack.c.l.bf16 %v934_v40  ;;  %v1028_v16 = vrot.slane %v947_v56, 2  ;;  %v5894_v63 = vld [vmem:[%s5401_s25 + $0x2c] sm:$0x1] }
  0x4f   : > { %v1018_v42 = vrot.slane %v945_v31, 2  ;;  %v1022_v54 = vsel %vm967_vm3, %v1019_v53, %v1021_v39  ;;  %v7600_v4 = vunpack.c.h.bf16 %v5533_v38  ;;  %v7601_v8 = vunpack.c.l.bf16 %v5546_v55 }
  0x50   : > { %v1007_v20 = vsel %vm967_vm3, %v1004_v11, %v1006_v61  ;;  %v7603_v25 = vunpack.c.l.bf16 %v5581_v47  ;;  %v7604_v23 = vunpack.c.h.bf16 %v5602_v30  ;;  %v7605_v55 = vunpack.c.l.bf16 %v5605_v33 }
  0x51   : > { %v1087_v44 = vpack.c.bf16 %v1007_v20, %v1005_v3  ;;  %v1020_v5 = vsel %vm967_vm3, %v1018_v42, %v1019_v53  ;;  %v1029_v29 = vrot.slane %v7600_v4, 2  ;;  %v1031_v37 = vrot.slane %v7601_v8, 2  ;;  %v5855_v20 = vld [vmem:[%s5401_s25 + $0x24] sm:$0xff]   ;;  %v5920_v4 = vld [vmem:[%s5401_s25 + $0x3c] sm:$0xff]  }
  0x52   : > { %4991 = vmatmul.mubr.msk.bf16.gmra.mxu0 %vm493_vm2, %v1085_v9  ;;  %v1090_v50 = vpack.c.bf16 %v1022_v54, %v1020_v5  ;;  %v1036_v9 = vrot.slane %v7603_v25, 2  ;;  %v1039_v11 = vrot.slane %v7604_v23, 2  ;;  %v1041_v17 = vrot.slane %v7605_v55, 2  ;;  %v5898_v5 = vld [vmem:[%s5401_s25 + $0x30] sm:$0xff]   ;;  %v5926_v8 = vld [vmem:[%s5401_s25 + $0x48] sm:$0xff]  }
  0x53   : > { %4994 = vmatprep.mubr.msk.bf16.mxu0 %vm493_vm2, %v1086_v43  ;;  %v7572_v43 = vunpack.c.h.bf16 %v5817_v34  ;;  %v1038_v47 = vrot.slane %v949_v1, 2  ;;  %v1043_v59 = vrot.slane %v950_v18, 2  ;;  %v1044_v61 = vrot.slane %v264_v41, 2  ;;  %v5905_v1 = vld [vmem:[%s5401_s25 + $0x38] sm:$0x1] }
  0x54   : > { %4957 = vmatmul.mubr.msk.bf16.gmra.mxu1 %vm493_vm2, %v5554_v62  ;;  %v5806_v62 = vsel %vm542_vm0, %v5726_v13, 0  ;;  %v5820_v13 = vld [vmem:[%s5401_s25 + $0x14] sm:$0x1]  ;;  %v1046_v31 = vrot.slane %v313_v36, 2  ;;  %v4681_v3 = vunpack.c.l.bf16 %v5827_v46  ;;  %v7560_v33 = vunpack.c.l.bf16 %v5838_v14 }
  0x55   : > { %4960 = vmatprep.mubr.msk.bf16.mxu1 %vm493_vm2, %v5584_v49  ;;  %v5813_v49 = vsel %vm542_vm0, %v5708_v0, 0  ;;  %v1033_v0 = vrot.slane %v948_v19, 2  ;;  %v7566_v32 = vunpack.c.l.bf16 %v5820_v13  ;;  %v1030_v57 = vsel %vm967_vm3, %v1028_v16, %v1029_v29  ;;  %v5935_v25 = vld [vmem:[%s5401_s25 + $0x54] sm:$0xff]  }
  0x56   : > { %v1032_v42 = vsel %vm967_vm3, %v1029_v29, %v1031_v37  ;;  %v5870_v58 = vsel %vm967_vm3, %v1039_v11, %v1041_v17  ;;  %v1817_v53 = vrot.slane %v7572_v43, 1  ;;  %v5878_v39 = vsel %vm967_vm3, %v1038_v47, %v1039_v11  ;;  %v5923_v29 = vld [vmem:[%s5401_s25 + $0x44] sm:$0x1]  ;;  %v5949_v17 = vld [vmem:[%s5401_s25 + $0x5c] sm:$0x1] }
  0x57   : > { %v1819_v27 = vrot.slane %v7566_v32, 1  ;;  %v5881_v21 = vsel %vm967_vm3, %v1043_v59, %v1044_v61  ;;  %v5884_v26 = vsel %vm967_vm3, %v1044_v61, %v1046_v31  ;;  %v1824_v56 = vrot.slane %v7560_v33, 1  ;;  %v5956_v31 = vld [vmem:[%s5401_s25 + $0x60] sm:$0xff]   ;;  %v5981_v33 = vld [vmem:[%s5401_s25 + $0x6c] sm:$0xff]  }
  0x58   : > { %v7559_v40 = vunpack.c.h.bf16 %v5855_v20  ;;  %v1092_v54 = vpack.c.bf16 %v1032_v42, %v1030_v57  ;;  %v1094_v18 = vpack.c.bf16 %v5870_v58, %v5878_v39  ;;  %v7562_v55 = vunpack.c.l.bf16 %v5905_v1 }
  0x59   : > { %v5917_v16 = vsel %vm362_vm1, %v1817_v53, %v1819_v27  ;;  %v7565_v47 = vunpack.c.h.bf16 %v5920_v4  ;;  %v7567_v59 = vunpack.c.l.bf16 %v5923_v29  ;;  %v4689_v61 = vunpack.c.l.bf16 %v5926_v8 }
  0x5a   : > { %4995 = vmatmul.mubr.msk.bf16.gmra.mxu0 %vm493_vm2, %v1087_v44  ;;  %v1821_v44 = vrot.slane %v4681_v3, 1  ;;  %v1827_v11 = vrot.slane %v7559_v40, 1  ;;  %v5959_v3 = vld [vmem:[%s5401_s25 + $0x68] sm:$0x1]  ;;  %v7568_v57 = vunpack.c.h.bf16 %v5926_v8  ;;  %v7571_v22 = vunpack.c.l.bf16 %v5949_v17 }
  0x5b   : > { %4998 = vmatprep.mubr.msk.bf16.mxu0 %vm493_vm2, %v1088_v2  ;;  %v7602_v2 = vunpack.c.h.bf16 %v5564_v15  ;;  %v7573_v40 = vunpack.c.l.bf16 %v5959_v3 }
  0x5c   : > { %4961 = vmatmul.mubr.msk.bf16.gmra.mxu1 %vm493_vm2, %v5613_v51  ;;  %v1720_v51 = vunpack.c.l.bf16 %v5817_v34 }
  0x5d   : > { %v1034_v60 = vrot.slane %v7602_v2, 2  ;;  %4964 = vmatprep.mubr.msk.bf16.mxu1 %vm493_vm2, %v5408_v6  ;;  %v7564_v6 = vunpack.c.h.bf16 %v5827_v46  ;;  %v7561_v2 = vunpack.c.h.bf16 %v5898_v5 }
  0x5e   : > { %v1816_v36 = vrot.slane %v1720_v51, 1  ;;  %v1732_v51 = vunpack.c.l.bf16 %v5920_v4 }
  0x5f   : > { %v5860_v12 = vsel %vm967_vm3, %v1033_v0, %v1034_v60  ;;  %v5863_v41 = vsel %vm967_vm3, %v1034_v60, %v1036_v9  ;;  %v5889_v35 = vrot.slane %v7564_v6, 1  ;;  %v4685_v0 = vunpack.c.l.bf16 %v5898_v5  ;;  %v5932_v60 = vld [vmem:[%s5401_s25 + $0x50] sm:$0x1] }
  0x60   : > { %v1093_v19 = vpack.c.bf16 %v5863_v41, %v5860_v12  ;;  %v7569_v42 = vunpack.c.l.bf16 %v5932_v60  ;;  %v1832_v48 = vrot.slane %v7561_v2, 1  ;;  %v1839_v2 = vrot.slane %v7567_v59, 1 }
  0x61   : > { %7606 = vst [vmem:[#allocation2_spill] sm:$0xff] %v5889_v35  ;;  %v5939_v9 = vsel %vm362_vm1, %v1821_v44, %v5889_v35  ;;  %v5943_v23 = vsel %vm362_vm1, %v5889_v35, %v1824_v56  ;;  %v4693_v44 = vunpack.c.l.bf16 %v5956_v31  ;;  %v7576_v56 = vunpack.c.h.bf16 %v5956_v31  ;;  %v4417_v35 = vld [vmem:[%s5401_s25 + $0x24] sm:$0xe] }
  0x62   : > { %4999 = vmatmul.mubr.msk.bf16.gmra.mxu0 %vm493_vm2, %v1089_v52  ;;  %v1726_v52 = vunpack.c.l.bf16 %v5855_v20  ;;  %7607 = vst [vmem:[#allocation3_spill] sm:$0xff] %v5939_v9  ;;  %v1842_v6 = vrot.slane %v7568_v57, 1  ;;  %v1744_v59 = vunpack.c.l.bf16 %v5981_v33 }
  0x63   : > { %5002 = vmatprep.mubr.msk.bf16.mxu0 %vm493_vm2, %v1090_v50  ;;  %v1851_v50 = vrot.slane %v4693_v44, 1  ;;  %v1852_v57 = vrot.slane %v7576_v56, 1  ;;  %v6142_v56 = vld [vmem:[%s5401_s25 + $0xbc] sm:$0x1] }
  0x64   : > { %4965 = vmatmul.mubr.msk.bf16.gmra.mxu1 %vm493_vm2, %v5434_v28  ;;  %v5914_v28 = vsel %vm362_vm1, %v1816_v36, %v1817_v53  ;;  %v1826_v37 = vrot.slane %v1726_v52, 1  ;;  %v1738_v36 = vunpack.c.l.bf16 %v5935_v25  ;;  %v7570_v53 = vunpack.c.h.bf16 %v5935_v25 }
  0x65   : > { %4968 = vmatprep.mubr.msk.bf16.mxu1 %vm493_vm2, %v5457_v45  ;;  %v7563_v45 = vunpack.c.l.bf16 %v5894_v63  ;;  %v1831_v52 = vrot.slane %v4685_v0, 1  ;;  %v1837_v0 = vrot.slane %v7565_v47, 1  ;;  %v1856_v41 = vrot.slane %v1744_v59, 1 }
  0x66   : > { %v1847_v47 = vrot.slane %v7570_v53, 1  ;;  %v6001_v32 = vsel %vm362_vm1, %v1826_v37, %v1827_v11  ;;  %v6013_v53 = vld [vmem:[%s5401_s25 + $0x78] sm:$0xff]  }
  0x67   : > { %v1829_v27 = vrot.slane %v7563_v45, 1  ;;  %v5990_v45 = vld [vmem:[%s5401_s25 + $0x74] sm:$0x1] }
  0x69   : > { %v6016_v37 = vsel %vm362_vm1, %v1827_v11, %v1829_v27 }
  0x6a   : > { %5003 = vmatmul.mubr.msk.bf16.gmra.mxu0 %vm493_vm2, %v1091_v10  ;;  %v1834_v10 = vrot.slane %v7562_v55, 1  ;;  %v1841_v55 = vrot.slane %v4689_v61, 1  ;;  %v1849_v61 = vrot.slane %v7571_v22, 1  ;;  %v6019_v22 = vsel %vm362_vm1, %v1831_v52, %v1832_v48 }
  0x6b   : > { %5006 = vmatprep.mubr.msk.bf16.mxu0 %vm493_vm2, %v1092_v54  ;;  %v1836_v54 = vrot.slane %v1732_v51, 1  ;;  %v1846_v51 = vrot.slane %v1738_v36, 1  ;;  %v1854_v36 = vrot.slane %v7573_v40, 1  ;;  %v6032_v40 = vsel %vm362_vm1, %v1837_v0, %v1839_v2 }
  0x6c   : > { %4969 = vmatmul.mubr.msk.bf16.gmra.mxu1 %vm493_vm2, %v5490_v7  ;;  %v1844_v7 = vrot.slane %v7569_v42, 1  ;;  %v7574_v42 = vunpack.c.l.bf16 %v5990_v45  ;;  %v6022_v43 = vsel %vm362_vm1, %v1832_v48, %v1834_v10  ;;  %v6035_v11 = vsel %vm362_vm1, %v1841_v55, %v1842_v6  ;;  %v6079_v10 = vld [vmem:[%s5401_s25 + $0x8c] sm:$0x1] }
  0x6d   : > { %4972 = vmatprep.mubr.msk.bf16.mxu1 %vm493_vm2, %v5533_v38  ;;  %v7575_v38 = vunpack.c.h.bf16 %v5981_v33  ;;  %v6025_v44 = vsel %vm362_vm1, %v1836_v54, %v1837_v0  ;;  %v6041_v52 = vsel %vm362_vm1, %v1846_v51, %v1847_v47  ;;  %v6048_v12 = vsel %vm362_vm1, %v1847_v47, %v1849_v61  ;;  %v6066_v47 = vld [vmem:[%s5401_s25 + $0x84] sm:$0xff]   ;;  %v6091_v0 = vld [vmem:[%s5401_s25 + $0x90] sm:$0xff]   ;;  %v4415_v51 = vld [vmem:[%s5401_s25 + $0xc] sm:$0xe] }
  0x6e   : > { %v6038_v27 = vsel %vm362_vm1, %v1842_v6, %v1844_v7  ;;  %v4697_v2 = vunpack.c.l.bf16 %v6013_v53  ;;  %v6054_v6 = vld [vmem:[%s5401_s25 + $0x80] sm:$0x1]  ;;  %v6057_v55 = vsel %vm362_vm1, %v1851_v50, %v1852_v57  ;;  %v6060_v58 = vsel %vm362_vm1, %v1852_v57, %v1854_v36  ;;  %v6094_v7 = vld [vmem:[%s5401_s25 + $0x98] sm:$0x1]  ;;  %v6109_v54 = vld [vmem:[%s5401_s25 + $0xa4] sm:$0x1] }
  0x6f   : > { %7608 = vst [vmem:[#allocation4_spill] sm:$0xff] %v6057_v55  ;;  %7609 = vst [vmem:[#allocation5_spill] sm:$0xff] %v6060_v58  ;;  %v1859_v39 = vrot.slane %v7574_v42, 1  ;;  %v1928_v50 = vpack.c.bf16 %v5917_v16, %v5914_v28  ;;  %v6106_v28 = vld [vmem:[%s5401_s25 + $0x9c] sm:$0xff]   ;;  %v6122_v16 = vld [vmem:[%s5401_s25 + $0xa8] sm:$0xff]   ;;  %v2206_v57 = vunpack.c.l.bf16 %v4415_v51  ;;  %v7614_v51 = vunpack.c.l.bf16 %v5820_v13 }
  0x70   : > { %v6102_v36 = vrot.slane %v4697_v2, 1  ;;  %v6125_v42 = vld [vmem:[%s5401_s25 + $0xb0] sm:$0x1] }
  0x72   : > { %5007 = vmatmul.mubr.msk.bf16.gmra.mxu0 %vm493_vm2, %v1093_v19  ;;  %v1857_v19 = vrot.slane %v7575_v38, 1  ;;  %7610 = vst [vmem:[#allocation6_spill] sm:$0xff] %v6102_v36  ;;  %v5271_v38 = vld [vmem:[%s5401_s25 + $0xc] sm:$0xff]   ;;  %v7615_v36 = vunpack.c.h.bf16 %v5827_v46 }
  0x73   : > { %5010 = vmatprep.mubr.msk.bf16.mxu0 %vm493_vm2, %v1094_v18  ;;  %v7577_v18 = vunpack.c.h.bf16 %v6013_v53 }
  0x74   : > { %4973 = vmatmul.mubr.msk.bf16.gmra.mxu1 %vm493_vm2, %v5564_v15  ;;  %v6100_v61 = vsel %vm362_vm1, %v1856_v41, %v1857_v19  ;;  %v4416_v15 = vld [vmem:[%s5401_s25 + $0x18] sm:$0xe]  ;;  %v6113_v48 = vsel %vm362_vm1, %v1857_v19, %v1859_v39  ;;  %v7613_v41 = vpack.c.bf16 %v5884_v26, %v5881_v21  ;;  %v6145_v19 = vld [vmem:[%s5401_s25 + $0xc0] sm:$0xff]   ;;  %v6157_v2 = vrot.slane %v7615_v36, 2 }
  0x75   : > { %4976 = vmatprep.mubr.msk.bf16.mxu1 %vm493_vm2, %v5602_v30  ;;  %v6117_v30 = vrot.slane %v7577_v18, 1  ;;  %v6131_v39 = vld [vmem:[%s5401_s25 + $0xb4] sm:$0xff]   ;;  %v7612_v18 = vunpack.c.h.bf16 %v5817_v34  ;;  %v2241_v34 = vrot.slane %v7614_v51, 2  ;;  %v4418_v51 = vld [vmem:[%s5401_s25 + $0x30] sm:$0xe] }
  0x76   : > { %7616 = vst [vmem:[#allocation8_spill] sm:$0xff] %v6157_v2 }
  0x77   : > { %7611 = vst [vmem:[#allocation7_spill] sm:$0xff] %v6117_v30  ;;  %v2239_v59 = vrot.slane %v7612_v18, 2  ;;  %v6148_v30 = vld [vmem:[%s5401_s25 + $0xc8] sm:$0x1]  ;;  %v2207_v18 = vunpack.c.l.bf16 %v4416_v15  ;;  %v7617_v15 = vunpack.c.l.bf16 %v5838_v14  ;;  %v2209_v14 = vunpack.c.l.bf16 %v4418_v51 }
  0x79   : > { %v6162_v58 = vsel %vm967_vm3, %v2239_v59, %v2241_v34  ;;  %v2243_v13 = vrot.slane %v2207_v18, 2  ;;  %v4419_v34 = vld [vmem:[%s5401_s25 + $0x3c] sm:$0xe]  ;;  %v2253_v51 = vrot.slane %v2209_v14, 2 }
  0x7a   : > { %5011 = vmatmul.mubr.msk.bf16.gmra.mxu0 %vm493_vm2, %v7613_v41  ;;  %v2238_v41 = vrot.slane %v2206_v57, 2  ;;  %v4420_v57 = vld [vmem:[%s5401_s25 + $0x48] sm:$0xe] }
  0x7b   : > { %5050 = vmatprep.mubr.msk.bf16.mxu0 %vm493_vm2, %v1928_v50  ;;  %v2246_v50 = vrot.slane %v7617_v15, 2  ;;  %v6181_v18 = vsel %vm967_vm3, %v2243_v13, %v6157_v2  ;;  %v2208_v15 = vunpack.c.l.bf16 %v4417_v35  ;;  %v7621_v13 = vunpack.c.h.bf16 %v5898_v5 }
  0x7c   : > { %4977 = vmatmul.mubr.msk.bf16.gmra.mxu1 %vm493_vm2, %v5634_v24  ;;  %v6173_v55 = vsel %vm967_vm3, %v2238_v41, %v2239_v59  ;;  %v7619_v41 = vunpack.c.h.bf16 %v5855_v20  ;;  %v6202_v20 = vld [vmem:[%s7539_s1 + $0x10] sm:$0x3]  ;;  %v7666_v59 = vunpack.c.l.bf16 %v6094_v7 }
  0x7d   : > { %7618 = vst [vmem:[#allocation9_spill] sm:$0xff] %v6173_v55  ;;  %5016 = vmatprep.mubr.msk.bf16.mxu1 %vm493_vm2, %v5271_v38  ;;  %v6185_v24 = vsel %vm967_vm3, %v6157_v2, %v2246_v50  ;;  %v7620_v38 = vunpack.c.l.bf16 %v5894_v63  ;;  %v2248_v26 = vrot.slane %v2208_v15, 2  ;;  %v2254_v21 = vrot.slane %v7621_v13, 2  ;;  %v5272_v55 = vld [vmem:[%s5401_s25 + $0x18] sm:$0xff]  }
  0x7e   : > { %v2249_v36 = vrot.slane %v7619_v41, 2  ;;  %v7622_v50 = vunpack.c.l.bf16 %v5905_v1  ;;  %v2210_v2 = vunpack.c.l.bf16 %v4419_v34  ;;  %v7623_v15 = vunpack.c.h.bf16 %v5920_v4  ;;  %v5273_v34 = vld [vmem:[%s5401_s25 + $0x24] sm:$0xff]   ;;  %v4421_v4 = vld [vmem:[%s5401_s25 + $0x54] sm:$0xe] }
  0x7f   : > { %v2251_v46 = vrot.slane %v7620_v38, 2  ;;  %v7624_v41 = vunpack.c.l.bf16 %v5923_v29  ;;  %v7625_v1 = vpack.c.bf16 %v5943_v23, %v5939_v9  ;;  %v7626_v29 = vpack.c.bf16 %v6016_v37, %v6001_v32  ;;  %v4423_v32 = vld [vmem:[%s5401_s25 + $0x6c] sm:$0xe]  ;;  %v6392_v23 = vld [vmem:[%s5401_s25 + $0x20] sm:$0x1] }
  0x80   : > { %v2256_v35 = vrot.slane %v7622_v50, 2  ;;  %v2259_v5 = vrot.slane %v7623_v15, 2  ;;  %v6217_v13 = vsel %vm967_vm3, %v2248_v26, %v2249_v36  ;;  %v2258_v14 = vrot.slane %v2210_v2, 2 }
  0x81   : > { %v6205_v63 = vsel %vm967_vm3, %v2249_v36, %v2251_v46  ;;  %v2261_v38 = vrot.slane %v7624_v41, 2  ;;  %v2211_v50 = vunpack.c.l.bf16 %v4420_v57  ;;  %v6231_v26 = vsel %vm967_vm3, %v2253_v51, %v2254_v21 }
  0x82   : > { %5051 = vmatmul.mubr.msk.bf16.vlgmr.msra.gmra.mxu0 %vm493_vm2, %v7625_v1  ;;  %v6220_v46 = vsel %vm967_vm3, %v2254_v21, %v2256_v35  ;;  %v7627_v2 = vunpack.c.h.bf16 %v5926_v8  ;;  %v4422_v35 = vld [vmem:[%s5401_s25 + $0x60] sm:$0xe]  ;;  %v6249_v37 = vsel %vm967_vm3, %v2258_v14, %v2259_v5  ;;  %v7628_v8 = vunpack.c.l.bf16 %v5932_v60 }
  0x83   : > { %5117 = vmatpush3.bf16.msra.mxu0 %v5813_v49  ;;  %5054 = vmatprep.mubr.msk.bf16.mxu0 %vm493_vm2, %v7626_v29  ;;  %v6234_v36 = vsel %vm967_vm3, %v2259_v5, %v2261_v38  ;;  %v6242_v49 = vld [vmem:[%s7539_s1 + $0xe] sm:$0x3]  ;;  %v2263_v21 = vrot.slane %v2211_v50, 2  ;;  %v2212_v41 = vunpack.c.l.bf16 %v4421_v4  ;;  %v7629_v38 = vunpack.c.h.bf16 %v5935_v25  ;;  %v4424_v50 = vld [vmem:[%s5401_s25 + $0x78] sm:$0xe] }
  0x84   : > { %v2264_v57 = vrot.slane %v7627_v2, 2  ;;  %5229 = vmatprep.subr.msk.bf16.mxu0 %vm542_vm0, %v6202_v20  ;;  %v2266_v51 = vrot.slane %v7628_v8, 2  ;;  %5017 = vmatmul.mubr.msk.bf16.vlgmr.msra.gmra.mxu1 %vm493_vm2, %v5272_v55  ;;  %v7630_v29 = vunpack.c.l.bf16 %v5949_v17  ;;  %v2213_v5 = vunpack.c.l.bf16 %v4422_v35 }
  0x85   : > { %v2269_v1 = vrot.slane %v7629_v38, 2  ;;  %5083 = vmatpush3.bf16.msra.mxu1 %v5806_v62  ;;  %5020 = vmatprep.mubr.msk.bf16.mxu1 %vm493_vm2, %v5273_v34  ;;  %v7631_v25 = vunpack.c.h.bf16 %v5956_v31  ;;  %v2268_v17 = vrot.slane %v2212_v41, 2  ;;  %v7632_v4 = vunpack.c.l.bf16 %v5959_v3 }
  0x86   : > { %v2271_v2 = vrot.slane %v7630_v29, 2  ;;  %v6264_v60 = vsel %vm967_vm3, %v2263_v21, %v2264_v57  ;;  %v6267_v55 = vsel %vm967_vm3, %v2264_v57, %v2266_v51  ;;  %5228 = vmatprep.subr.msk.bf16.mxu1 %vm542_vm0, %v6242_v49  ;;  %v2273_v35 = vrot.slane %v2213_v5, 2  ;;  %v4425_v29 = vld [vmem:[%s5401_s25 + $0x84] sm:$0xe]  ;;  %v4426_v5 = vld [vmem:[%s5401_s25 + $0x90] sm:$0xe] }
  0x87   : > { %v2274_v14 = vrot.slane %v7631_v25, 2  ;;  %v2276_v57 = vrot.slane %v7632_v4, 2  ;;  %v2214_v21 = vunpack.c.l.bf16 %v4423_v32  ;;  %v7633_v31 = vunpack.c.h.bf16 %v5981_v33  ;;  %v5274_v25 = vld [vmem:[%s5401_s25 + $0x30] sm:$0xff]  }
  0x88   : > { %v6277_v34 = vsel %vm967_vm3, %v2269_v1, %v2271_v2  ;;  %v7634_v51 = vunpack.c.l.bf16 %v5990_v45  ;;  %v6288_v62 = vsel %vm967_vm3, %v2268_v17, %v2269_v1  ;;  %v2215_v2 = vunpack.c.l.bf16 %v4424_v50  ;;  %v5275_v45 = vld [vmem:[%s5401_s25 + $0x3c] sm:$0xff]  }
  0x89   : > { %v2279_v8 = vrot.slane %v7633_v31, 2  ;;  %v6291_v41 = vsel %vm967_vm3, %v2274_v14, %v2276_v57  ;;  %v7635_v3 = vunpack.c.h.bf16 %v6013_v53  ;;  %v7636_v33 = vpack.c.bf16 %v6022_v43, %v6019_v22 }
  0x8a   : > { %v2281_v38 = vrot.slane %v7634_v51, 2  ;;  %v6304_v1 = vsel %vm967_vm3, %v2273_v35, %v2274_v14  ;;  %v2278_v17 = vrot.slane %v2214_v21, 2  ;;  %v7637_v53 = vpack.c.bf16 %v6032_v40, %v6025_v44 }
  0x8b   : > { %v2284_v4 = vrot.slane %v7635_v3, 2  ;;  %5055 = vmatmul.mubr.msk.bf16.gmra.mxu0 %vm493_vm2, %v7636_v33  ;;  %v2283_v22 = vrot.slane %v2215_v2, 2  ;;  %v7638_v57 = vunpack.c.l.bf16 %v6054_v6  ;;  %v2216_v51 = vunpack.c.l.bf16 %v4425_v29  ;;  %v4427_v3 = vld [vmem:[%s5401_s25 + $0x9c] sm:$0xe] }
  0x8c   : > { %v6307_v50 = vsel %vm967_vm3, %v2279_v8, %v2281_v38  ;;  %5058 = vmatprep.mubr.msk.bf16.mxu0 %vm493_vm2, %v7637_v53  ;;  %v6318_v14 = vsel %vm967_vm3, %v2278_v17, %v2279_v8  ;;  %v7639_v35 = vunpack.c.h.bf16 %v6066_v47  ;;  %v7640_v38 = vunpack.c.l.bf16 %v6079_v10  ;;  %5021 = vmatmul.mubr.msk.bf16.gmra.mxu1 %vm493_vm2, %v5274_v25  ;;  %v4428_v17 = vld [vmem:[%s5401_s25 + $0xa8] sm:$0xe] }
  0x8d   : > { %v2286_v31 = vrot.slane %v7638_v57, 2  ;;  %v2217_v44 = vunpack.c.l.bf16 %v4426_v5  ;;  %v6329_v33 = vsel %vm967_vm3, %v2283_v22, %v2284_v4  ;;  %v2288_v29 = vrot.slane %v2216_v51, 2  ;;  %5024 = vmatprep.mubr.msk.bf16.mxu1 %vm493_vm2, %v5275_v45  ;;  %v4429_v5 = vld [vmem:[%s5401_s25 + $0xb4] sm:$0xe] }
  0x8e   : > { %v2289_v21 = vrot.slane %v7639_v35, 2  ;;  %v2291_v40 = vrot.slane %v7640_v38, 2  ;;  %v7641_v57 = vunpack.c.h.bf16 %v6091_v0  ;;  %v2218_v51 = vunpack.c.l.bf16 %v4427_v3 }
  0x8f   : > { %v6332_v8 = vsel %vm967_vm3, %v2284_v4, %v2286_v31  ;;  %v2293_v25 = vrot.slane %v2217_v44, 2  ;;  %v7642_v4 = vunpack.c.l.bf16 %v6094_v7  ;;  %v7643_v45 = vunpack.c.h.bf16 %v6106_v28 }
  0x90   : > { %v6339_v53 = vsel %vm967_vm3, %v2289_v21, %v2291_v40  ;;  %v2294_v22 = vrot.slane %v7641_v57, 2  ;;  %v6344_v35 = vsel %vm967_vm3, %v2288_v29, %v2289_v21  ;;  %v7644_v57 = vunpack.c.l.bf16 %v6109_v54  ;;  %v5276_v29 = vld [vmem:[%s5401_s25 + $0x48] sm:$0xff]   ;;  %v4430_v40 = vld [vmem:[%s5401_s25 + $0xc0] sm:$0xe] }
  0x91   : > { %v2296_v31 = vrot.slane %v7642_v4, 2  ;;  %v2299_v38 = vrot.slane %v7643_v45, 2  ;;  %v2219_v21 = vunpack.c.l.bf16 %v4428_v17  ;;  %v2298_v3 = vrot.slane %v2218_v51, 2 }
  0x92   : > { %v6354_v44 = vsel %vm967_vm3, %v2293_v25, %v2294_v22  ;;  %v2301_v2 = vrot.slane %v7644_v57, 2  ;;  %v7645_v4 = vunpack.c.h.bf16 %v6122_v16  ;;  %v7646_v32 = vunpack.c.l.bf16 %v6125_v42  ;;  %v5277_v57 = vld [vmem:[%s5401_s25 + $0x54] sm:$0xff]  }
  0x93   : > { %v6360_v43 = vsel %vm967_vm3, %v2294_v22, %v2296_v31  ;;  %v7647_v25 = vpack.c.bf16 %v6038_v27, %v6035_v11  ;;  %v2303_v31 = vrot.slane %v2219_v21, 2  ;;  %v2220_v51 = vunpack.c.l.bf16 %v4429_v5  ;;  %v7659_v5 = vld [vmem:[#allocation4_spill] sm:$0xff] }
  0x94   : > { %v2304_v45 = vrot.slane %v7645_v4, 2  ;;  %v2306_v15 = vrot.slane %v7646_v32, 2  ;;  %v6375_v22 = vsel %vm967_vm3, %v2299_v38, %v2301_v2  ;;  %v7648_v4 = vpack.c.bf16 %v6048_v12, %v6041_v52  ;;  %5025 = vmatmul.mubr.msk.bf16.gmra.mxu1 %vm493_vm2, %v5276_v29 }
  0x95   : > { %5059 = vmatmul.mubr.msk.bf16.gmra.mxu0 %vm493_vm2, %v7647_v25  ;;  %v6382_v32 = vsel %vm967_vm3, %v2298_v3, %v2299_v38  ;;  %v7649_v27 = vunpack.c.h.bf16 %v6131_v39  ;;  %v7650_v17 = vunpack.c.l.bf16 %v6142_v56  ;;  %v2308_v12 = vrot.slane %v2220_v51, 2  ;;  %5028 = vmatprep.mubr.msk.bf16.mxu1 %vm493_vm2, %v5277_v57 }
  0x96   : > { %5062 = vmatprep.mubr.msk.bf16.mxu0 %vm493_vm2, %v7648_v4  ;;  %v6385_v11 = vsel %vm967_vm3, %v2304_v45, %v2306_v15  ;;  %v6397_v52 = vsel %vm967_vm3, %v2303_v31, %v2304_v45  ;;  %v2221_v38 = vunpack.c.l.bf16 %v4430_v40  ;;  %v7651_v3 = vunpack.c.h.bf16 %v6145_v19 }
  0x97   : > { %v2309_v25 = vrot.slane %v7649_v27, 2  ;;  %v2311_v2 = vrot.slane %v7650_v17, 2  ;;  %v7652_v4 = vunpack.c.l.bf16 %v6148_v30  ;;  %v7653_v45 = vunpack.c.l.bf16 %v6054_v6 }
  0x98   : > { %v2314_v17 = vrot.slane %v7651_v3, 2  ;;  %v2313_v31 = vrot.slane %v2221_v38, 2  ;;  %v7585_v51 = vunpack.c.l.bf16 %v6392_v23  ;;  %v7654_v3 = vunpack.c.l.bf16 %v6066_v47 }
  0x99   : > { %v6403_v21 = vsel %vm967_vm3, %v2309_v25, %v2311_v2  ;;  %v2316_v27 = vrot.slane %v7652_v4, 2  ;;  %v1864_v40 = vrot.slane %v7653_v45, 1  ;;  %v6413_v29 = vsel %vm967_vm3, %v2308_v12, %v2309_v25  ;;  %v7658_v4 = vld [vmem:[#allocation5_spill] sm:$0xff] }
  0x9a   : > { %v1936_v2 = vpack.c.bf16 %v6113_v48, %v6100_v61  ;;  %v1866_v15 = vrot.slane %v7654_v3, 1  ;;  %v7655_v6 = vunpack.c.h.bf16 %v6066_v47  ;;  %v7656_v25 = vunpack.c.l.bf16 %v6079_v10  ;;  %v5278_v61 = vld [vmem:[%s5401_s25 + $0x60] sm:$0xff]   ;;  %v5279_v47 = vld [vmem:[%s5401_s25 + $0x6c] sm:$0xff]  }
  0x9b   : > { %v6423_v57 = vsel %vm967_vm3, %v2314_v17, %v2316_v27  ;;  %v6430_v38 = vsel %vm967_vm3, %v2313_v31, %v2314_v17  ;;  %v3089_v48 = vrot.slane %v7585_v51, 1  ;;  %v7660_v27 = vpack.c.bf16 %v7658_v4, %v7659_v5  ;;  %v7663_v17 = vld [vmem:[#allocation7_spill] sm:$0xff]  ;;  %v7664_v31 = vld [vmem:[#allocation6_spill] sm:$0xff] }
  0x9c   : > { %v1867_v45 = vrot.slane %v7655_v6, 1  ;;  %v1869_v12 = vrot.slane %v7656_v25, 1  ;;  %7657 = vst [vmem:[#allocation10_spill] sm:$0xff] %v6430_v38  ;;  %v7661_v6 = vld [vmem:[#allocation2_spill] sm:$0xff]  ;;  %v1863_v25 = vsel %vm362_vm1, %v7664_v31, %v7663_v17  ;;  %v1865_v51 = vsel %vm362_vm1, %v7663_v17, %v1864_v40  ;;  %5029 = vmatmul.mubr.msk.bf16.gmra.mxu1 %vm493_vm2, %v5278_v61  ;;  %v5280_v38 = vld [vmem:[%s5401_s25 + $0x78] sm:$0xff]  }
  0x9d   : > { %5063 = vmatmul.mubr.msk.bf16.gmra.mxu0 %vm493_vm2, %v7660_v27  ;;  %v6444_v10 = vsel %vm362_vm1, %v7661_v6, %v3089_v48  ;;  %v4701_v3 = vunpack.c.l.bf16 %v6091_v0  ;;  %5032 = vmatprep.mubr.msk.bf16.mxu1 %vm493_vm2, %v5279_v47  ;;  %v1937_v27 = vpack.c.bf16 %v1865_v51, %v1863_v25  ;;  %v7665_v17 = vunpack.c.h.bf16 %v6091_v0  ;;  %v5281_v61 = vld [vmem:[%s5401_s25 + $0x84] sm:$0xff]  }
  0x9e   : > { %7662 = vst [vmem:[#allocation5_spill] sm:$0xff] %v6444_v10  ;;  %5066 = vmatprep.mubr.msk.bf16.mxu0 %vm493_vm2, %v1936_v2  ;;  %v1868_v4 = vsel %vm362_vm1, %v1866_v15, %v1867_v45  ;;  %v1870_v48 = vsel %vm362_vm1, %v1867_v45, %v1869_v12  ;;  %v1756_v2 = vunpack.c.l.bf16 %v6106_v28  ;;  %v1874_v5 = vrot.slane %v7666_v59, 1 }
  0x9f   : > { %v1938_v6 = vpack.c.bf16 %v1870_v48, %v1868_v4  ;;  %v1871_v40 = vrot.slane %v4701_v3, 1  ;;  %v1872_v31 = vrot.slane %v7665_v17, 1  ;;  %v7667_v15 = vunpack.c.h.bf16 %v6106_v28  ;;  %v5282_v17 = vld [vmem:[%s5401_s25 + $0x90] sm:$0xff]  }
  0xa0   : > { %v1876_v9 = vrot.slane %v1756_v2, 1  ;;  %v7668_v45 = vunpack.c.l.bf16 %v6109_v54  ;;  %v4705_v7 = vunpack.c.l.bf16 %v6122_v16  ;;  %v1762_v54 = vunpack.c.l.bf16 %v6131_v39 }
  0xa1   : > { %v1877_v10 = vrot.slane %v7667_v15, 1  ;;  %v1873_v51 = vsel %vm362_vm1, %v1871_v40, %v1872_v31  ;;  %v1875_v0 = vsel %vm362_vm1, %v1872_v31, %v1874_v5  ;;  %v7669_v4 = vunpack.c.h.bf16 %v6122_v16 }
  0xa2   : > { %v1879_v12 = vrot.slane %v7668_v45, 1  ;;  %v1939_v3 = vpack.c.bf16 %v1875_v0, %v1873_v51  ;;  %v1881_v25 = vrot.slane %v4705_v7, 1  ;;  %v7670_v5 = vunpack.c.l.bf16 %v6125_v42 }
  0xa3   : > { %v1878_v28 = vsel %vm362_vm1, %v1876_v9, %v1877_v10  ;;  %v1882_v48 = vrot.slane %v7669_v4, 1  ;;  %v7671_v9 = vunpack.c.h.bf16 %v6131_v39  ;;  %v4709_v31 = vunpack.c.l.bf16 %v6145_v19 }
  0xa4   : > { %v1880_v59 = vsel %vm362_vm1, %v1877_v10, %v1879_v12  ;;  %5033 = vmatmul.mubr.msk.bf16.gmra.mxu1 %vm493_vm2, %v5280_v38  ;;  %v1884_v2 = vrot.slane %v7670_v5, 1  ;;  %v7672_v10 = vunpack.c.l.bf16 %v6142_v56  ;;  %v5283_v38 = vld [vmem:[%s5401_s25 + $0x9c] sm:$0xff]   ;;  %v7674_v0 = vunpack.c.l.bf16 %v6148_v30  ;;  %v5289_v5 = vld [vmem:[%s5401_s25 + $0x30] sm:$0xff]  }
  0xa5   : > { %5067 = vmatmul.mubr.msk.bf16.gmra.mxu0 %vm493_vm2, %v1937_v27  ;;  %5036 = vmatprep.mubr.msk.bf16.mxu1 %vm493_vm2, %v5281_v61  ;;  %v1940_v47 = vpack.c.bf16 %v1880_v59, %v1878_v28  ;;  %v1886_v27 = vrot.slane %v1762_v54, 1  ;;  %v1883_v16 = vsel %vm362_vm1, %v1881_v25, %v1882_v48  ;;  %v1891_v12 = vrot.slane %v4709_v31, 1  ;;  %v5284_v28 = vld [vmem:[%s5401_s25 + $0xa8] sm:$0xff]   ;;  %v5285_v59 = vld [vmem:[%s5401_s25 + $0xb4] sm:$0xff]   ;;  %v5286_v30 = vld [vmem:[%s5401_s25 + $0xc0] sm:$0xff]  }
  0xa6   : > { %5070 = vmatprep.mubr.msk.bf16.mxu0 %vm493_vm2, %v1938_v6  ;;  %v1887_v6 = vrot.slane %v7671_v9, 1  ;;  %v1889_v40 = vrot.slane %v7672_v10, 1  ;;  %v1885_v42 = vsel %vm362_vm1, %v1882_v48, %v1884_v2  ;;  %v7673_v61 = vunpack.c.h.bf16 %v6145_v19  ;;  %v7675_v25 = vld [vmem:[#allocation9_spill] sm:$0xff]  ;;  %v5288_v48 = vld [vmem:[%s5401_s25 + $0x24] sm:$0xff]  }
  0xa7   : > { %v1941_v56 = vpack.c.bf16 %v1885_v42, %v1883_v16  ;;  %v1894_v7 = vrot.slane %v7674_v0, 1  ;;  %v7676_v4 = vpack.c.bf16 %v6162_v58, %v7675_v25  ;;  %v3687_v2 = vsel %vm542_vm0, %v6202_v20, 0  ;;  %v5290_v20 = vld [vmem:[%s5401_s25 + $0x3c] sm:$0xff]   ;;  %v4578_v10 = vld [vmem:[%s5401_s25 + $0x18] sm:$0xe]  ;;  %v4752_v0 = vld [vmem:[%s5401_s25 + $0x30] sm:$0xff]  }
  0xa8   : > { %v1888_v39 = vsel %vm362_vm1, %v1886_v27, %v1887_v6  ;;  %v1890_v15 = vsel %vm362_vm1, %v1887_v6, %v1889_v40  ;;  %v1892_v51 = vrot.slane %v7673_v61, 1  ;;  %v3265_v27 = vsel %vm542_vm0, %v6242_v49, 0  ;;  %v5291_v6 = vld [vmem:[%s5401_s25 + $0x48] sm:$0xff]   ;;  %v5298_v31 = vld [vmem:[%s5401_s25 + $0x9c] sm:$0xff]  }
  0xa9   : > { %v1942_v45 = vpack.c.bf16 %v1890_v15, %v1888_v39  ;;  %v7677_v58 = vpack.c.bf16 %v6185_v24, %v6181_v18  ;;  %v7678_v9 = vpack.c.bf16 %v6205_v63, %v6217_v13  ;;  %v7679_v18 = vpack.c.bf16 %v6220_v46, %v6231_v26  ;;  %v5292_v63 = vld [vmem:[%s5401_s25 + $0x54] sm:$0xff]   ;;  %v5293_v13 = vld [vmem:[%s5401_s25 + $0x60] sm:$0xff]   ;;  %v5294_v26 = vld [vmem:[%s5401_s25 + $0x6c] sm:$0xff]  }
  0xaa   : > { %v1893_v54 = vsel %vm362_vm1, %v1891_v12, %v1892_v51  ;;  %v7680_v24 = vpack.c.bf16 %v6234_v36, %v6249_v37  ;;  %v7681_v49 = vpack.c.bf16 %v6267_v55, %v6264_v60  ;;  %v7682_v46 = vpack.c.bf16 %v6277_v34, %v6288_v62  ;;  %v5295_v36 = vld [vmem:[%s5401_s25 + $0x78] sm:$0xff]   ;;  %v5296_v55 = vld [vmem:[%s5401_s25 + $0x84] sm:$0xff]   ;;  %v5297_v62 = vld [vmem:[%s5401_s25 + $0x90] sm:$0xff]  }
  0xab   : > { %v7683_v37 = vpack.c.bf16 %v6291_v41, %v6304_v1  ;;  %v7684_v60 = vpack.c.bf16 %v6307_v50, %v6318_v14  ;;  %v3476_v50 = vunpack.c.l.bf16 %v4578_v10  ;;  %v7686_v42 = vpack.c.bf16 %v6339_v53, %v6344_v35  ;;  %v5299_v15 = vld [vmem:[%s5401_s25 + $0xa8] sm:$0xff]   ;;  %v4527_v10 = vld [vmem:[%s5401_s25 + $0x50] sm:$0x1] }
  0xac   : > { %5037 = vmatmul.mubr.msk.bf16.gmra.mxu1 %vm493_vm2, %v5282_v17  ;;  %v7685_v17 = vpack.c.bf16 %v6332_v8, %v6329_v33  ;;  %v4516_v8 = vld [vmem:[%s5401_s25 + $0x24] sm:$0xff]   ;;  %v4518_v12 = vld [vmem:[%s5401_s25 + $0x2c] sm:$0x1]  ;;  %v4717_v25 = vunpack.c.l.bf16 %v4752_v0 }
  0xad   : > { %5071 = vmatmul.mubr.msk.bf16.gmra.mxu0 %vm493_vm2, %v1939_v3  ;;  %5040 = vmatprep.mubr.msk.bf16.mxu1 %vm493_vm2, %v5283_v38  ;;  %v1895_v3 = vsel %vm362_vm1, %v1892_v51, %v1894_v7  ;;  %v4579_v51 = vld [vmem:[%s5401_s25 + $0x24] sm:$0xe]  ;;  %v4521_v7 = vld [vmem:[%s5401_s25 + $0x38] sm:$0x1]  ;;  %v2993_v35 = vunpack.c.l.bf16 %v4516_v8 }
  0xae   : > { %5074 = vmatprep.mubr.msk.bf16.mxu0 %vm493_vm2, %v1940_v47  ;;  %v1943_v19 = vpack.c.bf16 %v1895_v3, %v1893_v54  ;;  %v5287_v47 = vld [vmem:[%s5401_s25 + $0x18] sm:$0xff]   ;;  %v2995_v54 = vunpack.c.l.bf16 %v4518_v12  ;;  %v7688_v3 = vld [vmem:[#allocation8_spill] sm:$0xff] }
  0xb4   : > { %5041 = vmatmul.mubr.msk.bf16.gmra.mxu1 %vm493_vm2, %v5284_v28  ;;  %v4580_v28 = vld [vmem:[%s5401_s25 + $0x30] sm:$0xe] }
  0xb5   : > { %5075 = vmatmul.mubr.msk.bf16.gmra.mxu0 %vm493_vm2, %v1941_v56  ;;  %5044 = vmatprep.mubr.msk.bf16.mxu1 %vm493_vm2, %v5285_v59  ;;  %v3508_v56 = vrot.slane %v3476_v50, 2  ;;  %v2994_v59 = vunpack.c.h.bf16 %v4516_v8 }
  0xb6   : > { %5078 = vmatprep.mubr.msk.bf16.mxu0 %vm493_vm2, %v1942_v45  ;;  %v7687_v45 = vunpack.c.l.bf16 %v6392_v23 }
  0xb8   : > { %v3511_v33 = vrot.slane %v7687_v45, 2 }
  0xbc   : > { %5045 = vmatmul.mubr.msk.bf16.gmra.mxu1 %vm493_vm2, %v5286_v30  ;;  %v3477_v30 = vunpack.c.l.bf16 %v4579_v51 }
  0xbd   : > { %5079 = vmatmul.mubr.msk.bf16.gmra.mxu0 %vm493_vm2, %v1943_v19  ;;  %5084 = vmatprep.mubr.msk.bf16.mxu1 %vm493_vm2, %v7676_v4  ;;  %v6621_v19 = vsel %vm967_vm3, %v3508_v56, %v7688_v3 }
  0xbe   : > { %5118 = vmatprep.mubr.msk.bf16.mxu0 %vm493_vm2, %v5287_v47  ;;  %v6625_v47 = vsel %vm967_vm3, %v7688_v3, %v3511_v33 }
  0xc4   : > { %5085 = vmatmul.mubr.msk.bf16.vlgmr.msra.gmra.mxu1 %vm493_vm2, %v7677_v58  ;;  %v7689_v58 = vpack.c.bf16 %v6360_v43, %v6354_v44  ;;  %v3091_v43 = vrot.slane %v2993_v35, 1  ;;  %v3092_v44 = vrot.slane %v2994_v59, 1 }
  0xc5   : > { %5119 = vmatmul.mubr.msk.bf16.vlgmr.msra.gmra.mxu0 %vm493_vm2, %v5288_v48  ;;  %5151 = vmatpush3.bf16.msra.mxu1 %v3265_v27  ;;  %v5300_v48 = vld [vmem:[%s5401_s25 + $0xb4] sm:$0xff]   ;;  %v3478_v27 = vunpack.c.l.bf16 %v4580_v28 }
  0xc6   : > { %5185 = vmatpush3.bf16.msra.mxu0 %v3687_v2  ;;  %5122 = vmatprep.mubr.msk.bf16.mxu0 %vm493_vm2, %v5289_v5  ;;  %v4718_v5 = vunpack.c.h.bf16 %v4752_v0  ;;  %v2998_v2 = vunpack.c.l.bf16 %v4521_v7  ;;  %v6659_v12 = vsel %vm362_vm1, %v3091_v43, %v3092_v44 }
  0xc7   : > { %5088 = vmatprep.mubr.msk.bf16.mxu1 %vm493_vm2, %v7678_v9 }
  0xc8   : > { %v3097_v50 = vrot.slane %v4718_v5, 1  ;;  %v3521_v56 = vrot.slane %v2998_v2, 2 }
  0xcc   : > { %5089 = vmatmul.mubr.msk.bf16.gmra.mxu1 %vm493_vm2, %v7679_v18  ;;  %v4524_v18 = vld [vmem:[%s5401_s25 + $0x44] sm:$0x1] }
  0xcd   : > { %5123 = vmatmul.mubr.msk.bf16.gmra.mxu0 %vm493_vm2, %v5290_v20  ;;  %5092 = vmatprep.mubr.msk.bf16.mxu1 %vm493_vm2, %v7680_v24  ;;  %v5301_v20 = vld [vmem:[%s5401_s25 + $0xc0] sm:$0xff]   ;;  %v3001_v8 = vunpack.c.l.bf16 %v4524_v18 }
  0xce   : > { %5126 = vmatprep.mubr.msk.bf16.mxu0 %vm493_vm2, %v5291_v6  ;;  %v4522_v6 = vld [vmem:[%s5401_s25 + $0x3c] sm:$0xff]  }
  0xcf   : > { %v2999_v45 = vunpack.c.l.bf16 %v4522_v6  ;;  %v3000_v33 = vunpack.c.h.bf16 %v4522_v6  ;;  %v3104_v43 = vrot.slane %v3001_v8, 1 }
  0xd1   : > { %v3101_v18 = vrot.slane %v2999_v45, 1 }
  0xd4   : > { %5093 = vmatmul.mubr.msk.bf16.gmra.mxu1 %vm493_vm2, %v7681_v49  ;;  %v3094_v49 = vrot.slane %v2995_v54, 1 }
  0xd5   : > { %5127 = vmatmul.mubr.msk.bf16.gmra.mxu0 %vm493_vm2, %v5292_v63  ;;  %5096 = vmatprep.mubr.msk.bf16.mxu1 %vm493_vm2, %v7682_v46  ;;  %v7691_v63 = vpack.c.bf16 %v6375_v22, %v6382_v32  ;;  %v4581_v46 = vld [vmem:[%s5401_s25 + $0x3c] sm:$0xe]  ;;  %v3099_v22 = vrot.slane %v2998_v2, 1  ;;  %v3518_v32 = vrot.slane %v3478_v27, 2 }
  0xd6   : > { %5130 = vmatprep.mubr.msk.bf16.mxu0 %vm493_vm2, %v5293_v13  ;;  %v3620_v13 = vpack.c.bf16 %v6625_v47, %v6621_v19  ;;  %v6662_v51 = vsel %vm362_vm1, %v3092_v44, %v3094_v49  ;;  %v3479_v0 = vunpack.c.l.bf16 %v4581_v46  ;;  %v4528_v44 = vld [vmem:[%s5401_s25 + $0x54] sm:$0xff]   ;;  %v4530_v49 = vld [vmem:[%s5401_s25 + $0x5c] sm:$0x1] }
  0xd7   : > { %v6680_v2 = vsel %vm362_vm1, %v3097_v50, %v3099_v22  ;;  %v3006_v45 = vunpack.c.h.bf16 %v4528_v44 }
  0xdc   : > { %5097 = vmatmul.mubr.msk.bf16.gmra.mxu1 %vm493_vm2, %v7683_v37  ;;  %v3513_v37 = vrot.slane %v3477_v30, 2 }
  0xdd   : > { %5131 = vmatmul.mubr.msk.bf16.gmra.mxu0 %vm493_vm2, %v5294_v26  ;;  %5100 = vmatprep.mubr.msk.bf16.mxu1 %vm493_vm2, %v7684_v60  ;;  %v4753_v26 = vld [vmem:[%s5401_s25 + $0x48] sm:$0xff]   ;;  %v3514_v60 = vrot.slane %v2994_v59, 2 }
  0xde   : > { %5134 = vmatprep.mubr.msk.bf16.mxu0 %vm493_vm2, %v5295_v36  ;;  %v4721_v7 = vunpack.c.l.bf16 %v4753_v26  ;;  %v4722_v59 = vunpack.c.h.bf16 %v4753_v26  ;;  %v7697_v26 = vpack.c.bf16 %v6403_v21, %v6413_v29  ;;  %v3007_v21 = vunpack.c.l.bf16 %v4530_v49 }
  0xdf   : > { %v6574_v34 = vpop.f32.mrf.mxu0  ;;  %v6668_v35 = vsel %vm967_vm3, %v3513_v37, %v3514_v60  ;;  %v3526_v37 = vrot.slane %v3001_v8, 2  ;;  %v4585_v8 = vld [vmem:[%s5401_s25 + $0x6c] sm:$0xe] }
  0xe0   : > { %v3114_v49 = vrot.slane %v3007_v21, 1 }
  0xe1   : > { %v6577_v40 = vpop.f32.mrf.mxu1  ;;  %v6580_v41 = vpop.f32.mrf.mxu0 }
  0xe3   : > { %v6582_v1 = vpop.f32.mrf.mxu1  ;;  %v6585_v14 = vpop.f32.mrf.mxu0 }
  0xe4   : > { %5101 = vmatmul.mubr.msk.bf16.gmra.mxu1 %vm493_vm2, %v7685_v17  ;;  %v3519_v17 = vrot.slane %v4718_v5, 2 }
  0xe5   : > { %5135 = vmatmul.mubr.msk.bf16.gmra.mxu0 %vm493_vm2, %v5296_v55  ;;  %v6591_v38 = vpop.f32.mrf.mxu1  ;;  %v6593_v16 = vpop.f32.mrf.mxu0  ;;  %5104 = vmatprep.mubr.msk.bf16.mxu1 %vm493_vm2, %v7686_v42  ;;  %v3516_v55 = vrot.slane %v2995_v54, 2  ;;  %v4582_v42 = vld [vmem:[%s5401_s25 + $0x48] sm:$0xe]  ;;  %v3004_v54 = vunpack.c.l.bf16 %v4527_v10  ;;  %v3107_v10 = vrot.slane %v4722_v59, 1 }
  0xe6   : > { %5138 = vmatprep.mubr.msk.bf16.mxu0 %vm493_vm2, %v5297_v62  ;;  %v3096_v62 = vrot.slane %v4717_v25, 1  ;;  %v3480_v3 = vunpack.c.l.bf16 %v4582_v42  ;;  %v5302_v25 = vld [vmem:[%s5401_s25 + $0xcc] sm:$0xff]   ;;  %v6683_v27 = vsel %vm967_vm3, %v3518_v32, %v3519_v17  ;;  %v6692_v6 = vsel %vm967_vm3, %v3519_v17, %v3521_v56 }
  0xe7   : > { %v6600_v39 = vpop.f32.mrf.mxu1  ;;  %v3529_v32 = vrot.slane %v4722_v59, 2  ;;  %v3531_v42 = vrot.slane %v3004_v54, 2  ;;  %v3005_v56 = vunpack.c.l.bf16 %v4528_v44 }
  0xe8   : > { %v6607_v61 = vpop.f32.mrf.mxu0  ;;  %v6677_v5 = vsel %vm362_vm1, %v3096_v62, %v3097_v50  ;;  %v3109_v50 = vrot.slane %v3004_v54, 1  ;;  %v3528_v22 = vrot.slane %v3480_v3, 2  ;;  %v3622_v54 = vpack.c.bf16 %v6692_v6, %v6683_v27 }
  0xe9   : > { %v6751_v19 = vsel %vm967_vm3, %v3529_v32, %v3531_v42  ;;  %v3111_v47 = vrot.slane %v3005_v56, 1  ;;  %v7704_v42 = vld [vmem:[#allocation3_spill] sm:$0xff] }
  0xea   : > { %v6614_v53 = vpop.f32.mrf.mxu0  ;;  %v6616_v23 = vpop.f32.mrf.mxu1  ;;  %v6741_v6 = vsel %vm362_vm1, %v3107_v10, %v3109_v50  ;;  %v3536_v50 = vrot.slane %v3007_v21, 2 }
  0xec   : > { %v6627_v4 = vpop.f32.mrf.mxu0  ;;  %5105 = vmatmul.mubr.msk.bf16.gmra.mxu1 %vm493_vm2, %v7689_v58  ;;  %v6634_v9 = vpop.f32.mrf.mxu1  ;;  %v7695_v58 = vpack.c.bf16 %v6385_v11, %v6397_v52  ;;  %v3523_v11 = vrot.slane %v3479_v0, 2  ;;  %v3524_v52 = vrot.slane %v3000_v33, 2 }
  0xed   : > { %5139 = vmatmul.mubr.msk.bf16.gmra.mxu0 %vm493_vm2, %v5298_v31  ;;  %7690 = vst [vmem:[#allocation4_spill] sm:$0xff] %v6634_v9  ;;  %5108 = vmatprep.mubr.msk.bf16.mxu1 %vm493_vm2, %v7691_v63  ;;  %v3102_v63 = vrot.slane %v3000_v33, 1  ;;  %v4586_v9 = vld [vmem:[%s5401_s25 + $0x78] sm:$0xe] }
  0xee   : > { %5142 = vmatprep.mubr.msk.bf16.mxu0 %vm493_vm2, %v5299_v15  ;;  %v6639_v24 = vpop.f32.mrf.mxu0  ;;  %v6649_v36 = vpop.f32.mrf.mxu1 }
  0xef   : > { %7692 = vst [vmem:[#allocation2_spill] sm:$0xff] %v6649_v36  ;;  %v6721_v3 = vsel %vm362_vm1, %v3101_v18, %v3102_v63  ;;  %v6744_v18 = vsel %vm967_vm3, %v3528_v22, %v3529_v32  ;;  %v7703_v32 = vld [vmem:[#allocation5_spill] sm:$0xff] }
  0xf0   : > { %v6653_v31 = vpop.f32.mrf.mxu1  ;;  %v7705_v56 = vpack.c.bf16 %v7703_v32, %v7704_v42 }
  0xf1   : > { %7693 = vst [vmem:[#allocation7_spill] sm:$0xff] %v6653_v31  ;;  %v6655_v15 = vpop.f32.mrf.mxu0 }
  0xf3   : > { %v6664_v28 = vpop.f32.mrf.mxu0  ;;  %v6670_v30 = vpop.f32.mrf.mxu1 }
  0xf4   : > { %7694 = vst [vmem:[#allocation6_spill] sm:$0xff] %v6670_v30  ;;  %5109 = vmatmul.mubr.msk.bf16.gmra.mxu1 %vm493_vm2, %v7695_v58  ;;  %v4754_v58 = vld [vmem:[%s5401_s25 + $0x60] sm:$0xff]  }
  0xf5   : > { %5143 = vmatmul.mubr.msk.bf16.gmra.mxu0 %vm493_vm2, %v5300_v48  ;;  %v6674_v48 = vsel %vm967_vm3, %v3514_v60, %v3516_v55  ;;  %v6696_v46 = vpop.f32.mrf.mxu1  ;;  %5112 = vmatprep.mubr.msk.bf16.mxu1 %vm493_vm2, %v7697_v26  ;;  %v3106_v60 = vrot.slane %v4721_v7, 1  ;;  %v4583_v55 = vld [vmem:[%s5401_s25 + $0x54] sm:$0xe]  ;;  %v4534_v26 = vld [vmem:[%s5401_s25 + $0x6c] sm:$0xff]   ;;  %v4725_v22 = vunpack.c.l.bf16 %v4754_v58 }
  0xf6   : > { %5146 = vmatprep.mubr.msk.bf16.mxu0 %vm493_vm2, %v5301_v20  ;;  %v6689_v20 = vpop.f32.mrf.mxu0  ;;  %7696 = vst [vmem:[#allocation9_spill] sm:$0xff] %v6696_v46  ;;  %v3621_v33 = vpack.c.bf16 %v6674_v48, %v6668_v35  ;;  %v3481_v0 = vunpack.c.l.bf16 %v4583_v55  ;;  %v6724_v35 = vsel %vm362_vm1, %v3102_v63, %v3104_v43  ;;  %v6727_v48 = vsel %vm967_vm3, %v3523_v11, %v3524_v52  ;;  %v4533_v63 = vld [vmem:[%s5401_s25 + $0x68] sm:$0x1]  ;;  %v4584_v43 = vld [vmem:[%s5401_s25 + $0x60] sm:$0xe] }
  0xf7   : > { %v6705_v17 = vpop.f32.mrf.mxu1  ;;  %v6738_v27 = vsel %vm362_vm1, %v3106_v60, %v3107_v10  ;;  %v4536_v11 = vld [vmem:[%s5401_s25 + $0x74] sm:$0x1]  ;;  %v3534_v10 = vrot.slane %v3006_v45, 2  ;;  %v3011_v21 = vunpack.c.l.bf16 %v4534_v26  ;;  %v3116_v32 = vrot.slane %v4725_v22, 1 }
  0xf8   : > { %v6703_v62 = vpop.f32.mrf.mxu0  ;;  %7698 = vst [vmem:[#allocation8_spill] sm:$0xff] %v6705_v17  ;;  %v3533_v55 = vrot.slane %v3481_v0, 2  ;;  %v3010_v17 = vunpack.c.l.bf16 %v4533_v63  ;;  %v3012_v0 = vunpack.c.h.bf16 %v4534_v26 }
  0xf9   : > { %v6713_v7 = vpop.f32.mrf.mxu1 }
  0xfa   : > { %7699 = vst [vmem:[#allocation11_spill] sm:$0xff] %v6713_v7  ;;  %v6715_v59 = vpop.f32.mrf.mxu0  ;;  %v4726_v7 = vunpack.c.h.bf16 %v4754_v58  ;;  %v6789_v26 = vsel %vm967_vm3, %v3533_v55, %v3534_v10  ;;  %v3121_v55 = vrot.slane %v3011_v21, 1  ;;  %v3544_v31 = vrot.slane %v3012_v0, 2 }
  0xfc   : > { %v6748_v44 = vpop.f32.mrf.mxu0 }
  0xfd   : > { %5147 = vmatmul.mubr.msk.bf16.gmra.mxu0 %vm493_vm2, %v5302_v25  ;;  %v6735_v25 = vsel %vm967_vm3, %v3524_v52, %v3526_v37  ;;  %v6755_v52 = vpop.f32.mrf.mxu1  ;;  %v7701_v37 = vld [vmem:[#allocation10_spill] sm:$0xff] }
  0xfe   : > { %5186 = vmatprep.mubr.msk.bf16.mxu0 %vm493_vm2, %v3620_v13  ;;  %v3112_v13 = vrot.slane %v3006_v45, 1  ;;  %7700 = vst [vmem:[#allocation12_spill] sm:$0xff] %v6755_v52  ;;  %v7702_v60 = vpack.c.bf16 %v6423_v57, %v7701_v37  ;;  %v6762_v29 = vpop.f32.mrf.mxu0  ;;  %v3482_v57 = vunpack.c.l.bf16 %v4584_v43  ;;  %v3483_v43 = vunpack.c.l.bf16 %v4585_v8  ;;  %v6795_v52 = vld [vmem:[%s5401_s25 + $0x78] sm:$0xff]  }
  0xff   : > { %v6770_v37 = vpop.f32.mrf.mxu1  ;;  %v3119_v8 = vrot.slane %v3010_v17, 1  ;;  %v4730_v21 = vunpack.c.h.bf16 %v6795_v52 }
 0x100   : > { %5113 = vmatmul.mubr.msk.bf16.gmra.mxu1 %vm493_vm2, %v7702_v60  ;;  %7706 = vst [vmem:[#allocation10_spill] sm:$0xff] %v6770_v37  ;;  %v3013_v60 = vunpack.c.l.bf16 %v4536_v11  ;;  %v6774_v46 = vpop.f32.mrf.mxu0  ;;  %v6781_v63 = vsel %vm362_vm1, %v3111_v47, %v3112_v13  ;;  %v6792_v11 = vsel %vm967_vm3, %v3534_v10, %v3536_v50  ;;  %v3117_v47 = vrot.slane %v4726_v7, 1  ;;  %v6799_v37 = vld [vmem:[%s5401_s25 + $0x80] sm:$0x1] }
 0x101   : > { %5152 = vmatprep.mubr.msk.bf16.mxu1 %vm493_vm2, %v7705_v56  ;;  %v6783_v42 = vpop.f32.mrf.mxu1  ;;  %v6786_v56 = vsel %vm362_vm1, %v3112_v13, %v3114_v49  ;;  %v3538_v58 = vrot.slane %v3482_v57, 2  ;;  %v3541_v49 = vrot.slane %v3010_v17, 2  ;;  %v3122_v10 = vrot.slane %v3012_v0, 1 }
 0x102   : > { %7707 = vst [vmem:[#allocation5_spill] sm:$0xff] %v6783_v42  ;;  %v4984_v45 = vpop.f32.mrf.mxu0  ;;  %v3539_v42 = vrot.slane %v4726_v7, 2  ;;  %v3124_v50 = vrot.slane %v3013_v60, 1  ;;  %v3546_v36 = vrot.slane %v3013_v60, 2  ;;  %v7708_v7 = vpack.c.bf16 %v6662_v51, %v6659_v12 }
 0x103   : > { %v6801_v13 = vpop.f32.mrf.mxu1  ;;  %v3016_v30 = vunpack.c.l.bf16 %v6799_v37  ;;  %v6822_v12 = vsel %vm362_vm1, %v3116_v32, %v3117_v47  ;;  %v6825_v51 = vsel %vm362_vm1, %v3117_v47, %v3119_v8 }
 0x104   : > { %v1183_v22 = vpop.f32.mrf.mxu0  ;;  %v6831_v37 = vsel %vm967_vm3, %v3539_v42, %v3541_v49  ;;  %v4542_v49 = vld [vmem:[%s5401_s25 + $0x8c] sm:$0x1] }
 0x105   : > { %5187 = vmatmul.mubr.msk.bf16.vlgmr.msra.gmra.mxu0 %vm493_vm2, %v3621_v33  ;;  %v3543_v33 = vrot.slane %v3483_v43, 2  ;;  %v4950_v57 = vpop.f32.mrf.mxu1  ;;  %v7709_v43 = vpack.c.bf16 %v6680_v2, %v6677_v5  ;;  %v6837_v5 = vsel %vm362_vm1, %v3122_v10, %v3124_v50  ;;  %v3484_v2 = vunpack.c.l.bf16 %v4586_v9 }
 0x106   : > { %5190 = vmatprep.mubr.msk.bf16.mxu0 %vm493_vm2, %v3622_v54  ;;  %v4729_v54 = vunpack.c.l.bf16 %v6795_v52  ;;  %v801_v0 = vadd.f32 %v4950_v57, %v6574_v34  ;;  %v4985_v60 = vpop.f32.mrf.mxu0  ;;  %v6834_v34 = vsel %vm362_vm1, %v3121_v55, %v3122_v10  ;;  %v4540_v57 = vld [vmem:[%s5401_s25 + $0x84] sm:$0xff]   ;;  %v3127_v9 = vrot.slane %v4730_v21, 1 }
 0x107   : > { %v792_v52 = vpop.f32.mrf.mxu1 }
 0x108   : > { %5153 = vmatmul.mubr.msk.bf16.vlgmr.msra.gmra.mxu1 %vm493_vm2, %v7708_v7  ;;  %v6828_v7 = vsel %vm967_vm3, %v3538_v58, %v3539_v42  ;;  %v6840_v32 = vadd.f32 %v4984_v45, %v801_v0  ;;  %v793_v47 = vadd.f32 %v792_v52, %v6580_v41  ;;  %v1186_v8 = vpop.f32.mrf.mxu0  ;;  %v6844_v58 = vsel %vm967_vm3, %v3543_v33, %v3544_v31  ;;  %v4587_v52 = vld [vmem:[%s5401_s25 + $0x84] sm:$0xe] }
 0x109   : > { %5156 = vmatprep.mubr.msk.bf16.mxu1 %vm493_vm2, %v7709_v43  ;;  %v6847_v42 = vsel %vm967_vm3, %v3544_v31, %v3546_v36  ;;  %v4951_v55 = vpop.f32.mrf.mxu1  ;;  %v3126_v50 = vrot.slane %v4729_v54, 1  ;;  %v3129_v43 = vrot.slane %v3016_v30, 1  ;;  %v7710_v33 = vpack.c.bf16 %v6735_v25, %v6727_v48 }
 0x10a   : > { %v6852_v45 = vadd.f32 %v1183_v22, %v793_v47  ;;  %v804_v41 = vadd.f32 %v4951_v55, %v6585_v14  ;;  %v4988_v0 = vpop.f32.mrf.mxu0  ;;  %v3017_v36 = vunpack.c.l.bf16 %v4540_v57  ;;  %v3018_v31 = vunpack.c.h.bf16 %v4540_v57 }
 0x10b   : > { %v795_v17 = vpop.f32.mrf.mxu1  ;;  %v7711_v54 = vpack.c.bf16 %v6751_v19, %v6744_v18  ;;  %v3626_v14 = vpack.c.bf16 %v6831_v37, %v6828_v7  ;;  %v3019_v25 = vunpack.c.l.bf16 %v4542_v49  ;;  %v3549_v18 = vrot.slane %v4730_v21, 2  ;;  %v4756_v19 = vld [vmem:[%s5401_s25 + $0x90] sm:$0xff]  }
 0x10c   : > { %v6870_v47 = vadd.f32 %v4985_v60, %v804_v41  ;;  %v796_v57 = vadd.f32 %v795_v17, %v6593_v16  ;;  %v1199_v55 = vpop.f32.mrf.mxu0  ;;  %v7712_v7 = vpack.c.bf16 %v6724_v35, %v6721_v3  ;;  %v6880_v37 = vsel %vm362_vm1, %v3126_v50, %v3127_v9  ;;  %v4588_v16 = vld [vmem:[%s5401_s25 + $0x90] sm:$0xe] }
 0x10d   : > { %5191 = vmatmul.mubr.msk.bf16.gmra.mxu0 %vm493_vm2, %v7710_v33  ;;  %v3548_v33 = vrot.slane %v3484_v2, 2  ;;  %v4954_v10 = vpop.f32.mrf.mxu1  ;;  %v6883_v49 = vsel %vm362_vm1, %v3127_v9, %v3129_v43  ;;  %v3551_v60 = vrot.slane %v3016_v30, 2  ;;  %v3485_v41 = vunpack.c.l.bf16 %v4587_v52 }
 0x10e   : > { %5194 = vmatprep.mubr.msk.bf16.mxu0 %vm493_vm2, %v7711_v54  ;;  %v4545_v54 = vld [vmem:[%s5401_s25 + $0x98] sm:$0x1]  ;;  %v6886_v17 = vadd.f32 %v1186_v8, %v796_v57  ;;  %v817_v21 = vadd.f32 %v4954_v10, %v6607_v61  ;;  %v4989_v2 = vpop.f32.mrf.mxu0  ;;  %v7713_v22 = vpack.c.bf16 %v6741_v6, %v6738_v27  ;;  %v3131_v3 = vrot.slane %v3017_v36, 1 }
 0x10f   : > { %v3132_v35 = vrot.slane %v3018_v31, 1  ;;  %v808_v50 = vpop.f32.mrf.mxu1  ;;  %v4733_v48 = vunpack.c.l.bf16 %v4756_v19  ;;  %v4734_v9 = vunpack.c.h.bf16 %v4756_v19  ;;  %v3022_v43 = vunpack.c.l.bf16 %v4545_v54 }
 0x110   : > { %5157 = vmatmul.mubr.msk.bf16.gmra.mxu1 %vm493_vm2, %v7712_v7  ;;  %v3134_v7 = vrot.slane %v3019_v25, 1  ;;  %v6893_v30 = vadd.f32 %v4988_v0, %v817_v21  ;;  %v809_v8 = vadd.f32 %v808_v50, %v6614_v53  ;;  %v1202_v61 = vpop.f32.mrf.mxu0  ;;  %v3206_v10 = vpack.c.bf16 %v6883_v49, %v6880_v37  ;;  %v4546_v50 = vld [vmem:[%s5401_s25 + $0x9c] sm:$0xff]  }
 0x111   : > { %5160 = vmatprep.mubr.msk.bf16.mxu1 %vm493_vm2, %v7713_v22  ;;  %v3486_v27 = vunpack.c.l.bf16 %v4588_v16  ;;  %v4955_v6 = vpop.f32.mrf.mxu1  ;;  %v3550_v36 = vsel %vm967_vm3, %v3548_v33, %v3549_v18  ;;  %v3552_v52 = vsel %vm967_vm3, %v3549_v18, %v3551_v60  ;;  %v3553_v22 = vrot.slane %v3485_v41, 2  ;;  %v6912_v33 = vld [vmem:[%s5401_s25 + $0xa4] sm:$0x1] }
 0x112   : > { %v3554_v57 = vrot.slane %v3018_v31, 2  ;;  %v6900_v19 = vadd.f32 %v1199_v55, %v809_v8  ;;  %v820_v0 = vadd.f32 %v4955_v6, %v6627_v4  ;;  %v4992_v54 = vpop.f32.mrf.mxu0  ;;  %v7714_v53 = vpack.c.bf16 %v6792_v11, %v6789_v26 }
 0x113   : > { %v6908_v21 = vsel %vm362_vm1, %v3131_v3, %v3132_v35  ;;  %v3556_v16 = vrot.slane %v3019_v25, 2  ;;  %v811_v18 = vpop.f32.mrf.mxu1  ;;  %v6916_v31 = vsel %vm362_vm1, %v3132_v35, %v3134_v7  ;;  %v3136_v4 = vrot.slane %v4733_v48, 1 }
 0x114   : > { %v3137_v55 = vrot.slane %v4734_v9, 1  ;;  %v3139_v60 = vrot.slane %v3022_v43, 1  ;;  %v6918_v26 = vadd.f32 %v4989_v2, %v820_v0  ;;  %v812_v11 = vadd.f32 %v811_v18, %v6639_v24  ;;  %v1215_v41 = vpop.f32.mrf.mxu0  ;;  %v4551_v18 = vld [vmem:[%s5401_s25 + $0xb0] sm:$0x1] }
 0x115   : > { %5195 = vmatmul.mubr.msk.bf16.gmra.mxu0 %vm493_vm2, %v7714_v53  ;;  %v3558_v3 = vrot.slane %v3486_v27, 2  ;;  %v3559_v25 = vrot.slane %v4734_v9, 2  ;;  %v4958_v8 = vpop.f32.mrf.mxu1  ;;  %v7715_v6 = vpack.c.bf16 %v6786_v56, %v6781_v63  ;;  %v3023_v35 = vunpack.c.l.bf16 %v4546_v50  ;;  %v4589_v53 = vld [vmem:[%s5401_s25 + $0x9c] sm:$0xe] }
 0x116   : > { %5198 = vmatprep.mubr.msk.bf16.mxu0 %vm493_vm2, %v3626_v14  ;;  %v3561_v14 = vrot.slane %v3022_v43, 2  ;;  %v3024_v7 = vunpack.c.h.bf16 %v4546_v50  ;;  %v3025_v48 = vunpack.c.l.bf16 %v6912_v33  ;;  %v6927_v2 = vadd.f32 %v1202_v61, %v812_v11  ;;  %v4993_v27 = vpop.f32.mrf.mxu0  ;;  %v4590_v11 = vld [vmem:[%s5401_s25 + $0xa8] sm:$0xe] }
 0x117   : > { %v833_v24 = vadd.f32 %v4958_v8, %v6655_v15  ;;  %v7716_v9 = vpack.c.bf16 %v6825_v51, %v6822_v12  ;;  %v3628_v63 = vpack.c.bf16 %v3552_v52, %v3550_v36  ;;  %v3207_v56 = vpack.c.bf16 %v6916_v31, %v6908_v21  ;;  %v824_v43 = vpop.f32.mrf.mxu1  ;;  %v4757_v12 = vld [vmem:[%s5401_s25 + $0xa8] sm:$0xff]  }
 0x118   : > { %5161 = vmatmul.mubr.msk.bf16.gmra.mxu1 %vm493_vm2, %v7715_v6  ;;  %v6937_v0 = vsel %vm967_vm3, %v3553_v22, %v3554_v57  ;;  %v6940_v61 = vsel %vm967_vm3, %v3554_v57, %v3556_v16  ;;  %v6943_v15 = vsel %vm362_vm1, %v3136_v4, %v3137_v55  ;;  %v6946_v50 = vsel %vm362_vm1, %v3137_v55, %v3139_v60  ;;  %v1218_v52 = vpop.f32.mrf.mxu0 }
 0x119   : > { %5164 = vmatprep.mubr.msk.bf16.mxu1 %vm493_vm2, %v7716_v9  ;;  %v6949_v51 = vadd.f32 %v4992_v54, %v833_v24  ;;  %v825_v36 = vadd.f32 %v824_v43, %v6664_v28  ;;  %v6953_v33 = vsel %vm967_vm3, %v3558_v3, %v3559_v25  ;;  %v3487_v22 = vunpack.c.l.bf16 %v4589_v53  ;;  %v4959_v57 = vpop.f32.mrf.mxu1 }
 0x11a   : > { %v3562_v16 = vsel %vm967_vm3, %v3559_v25, %v3561_v14  ;;  %v3141_v4 = vrot.slane %v3023_v35, 1  ;;  %v3142_v8 = vrot.slane %v3024_v7, 1  ;;  %v3144_v6 = vrot.slane %v3025_v48, 1  ;;  %v4996_v60 = vpop.f32.mrf.mxu0 }
 0x11b   : > { %v6958_v55 = vadd.f32 %v1215_v41, %v825_v36  ;;  %v836_v54 = vadd.f32 %v4959_v57, %v6689_v20  ;;  %v7717_v28 = vpack.c.bf16 %v6847_v42, %v6844_v58  ;;  %v4737_v3 = vunpack.c.l.bf16 %v4757_v12  ;;  %v827_v24 = vpop.f32.mrf.mxu1  ;;  %v4552_v36 = vld [vmem:[%s5401_s25 + $0xb4] sm:$0xff]  }
 0x11c   : > { %v4738_v53 = vunpack.c.h.bf16 %v4757_v12  ;;  %v3629_v25 = vpack.c.bf16 %v6940_v61, %v6937_v0  ;;  %v3208_v41 = vpack.c.bf16 %v6946_v50, %v6943_v15  ;;  %v3028_v14 = vunpack.c.l.bf16 %v4551_v18  ;;  %v1231_v42 = vpop.f32.mrf.mxu0  ;;  %v4560_v50 = vld [vmem:[%s5401_s25 + $0xd4] sm:$0x1] }
 0x11d   : > { %5199 = vmatmul.mubr.msk.bf16.gmra.mxu0 %vm493_vm2, %v7717_v28  ;;  %v3488_v20 = vunpack.c.l.bf16 %v4590_v11  ;;  %v6970_v35 = vadd.f32 %v4993_v27, %v836_v54  ;;  %v828_v58 = vadd.f32 %v827_v24, %v6703_v62  ;;  %v3563_v9 = vrot.slane %v3487_v22, 2  ;;  %v4962_v12 = vpop.f32.mrf.mxu1  ;;  %v4591_v11 = vld [vmem:[%s5401_s25 + $0xb4] sm:$0xe] }
 0x11e   : > { %5202 = vmatprep.mubr.msk.bf16.mxu0 %vm493_vm2, %v3628_v63  ;;  %v3564_v43 = vrot.slane %v3024_v7, 2  ;;  %v7718_v63 = vpack.c.bf16 %v6837_v5, %v6834_v34  ;;  %v3630_v0 = vpack.c.bf16 %v3562_v16, %v6953_v33  ;;  %v6979_v61 = vsel %vm362_vm1, %v3141_v4, %v3142_v8  ;;  %v4997_v22 = vpop.f32.mrf.mxu0  ;;  %v6993_v33 = vld [vmem:[%s5401_s25 + $0xbc] sm:$0x1] }
 0x11f   : > { %v6982_v27 = vsel %vm362_vm1, %v3142_v8, %v3144_v6  ;;  %v3566_v62 = vrot.slane %v3025_v48, 2  ;;  %v6985_v18 = vadd.f32 %v1218_v52, %v828_v58  ;;  %v849_v7 = vadd.f32 %v4962_v12, %v6715_v59  ;;  %v840_v57 = vpop.f32.mrf.mxu1  ;;  %v4592_v6 = vld [vmem:[%s5401_s25 + $0xc0] sm:$0xe] }
 0x120   : > { %5165 = vmatmul.mubr.msk.bf16.gmra.mxu1 %vm493_vm2, %v7718_v63  ;;  %v3146_v34 = vrot.slane %v4737_v3, 1  ;;  %v3147_v5 = vrot.slane %v4738_v53, 1  ;;  %v3149_v48 = vrot.slane %v3028_v14, 1  ;;  %v3568_v52 = vrot.slane %v3488_v20, 2  ;;  %v1234_v37 = vpop.f32.mrf.mxu0 }
 0x121   : > { %5168 = vmatprep.mubr.msk.bf16.mxu1 %vm493_vm2, %v3206_v10  ;;  %v3569_v16 = vrot.slane %v4738_v53, 2  ;;  %v3571_v4 = vrot.slane %v3028_v14, 2  ;;  %v6996_v59 = vadd.f32 %v4996_v60, %v849_v7  ;;  %v841_v8 = vadd.f32 %v840_v57, %v6748_v44  ;;  %v4963_v54 = vpop.f32.mrf.mxu1  ;;  %v4758_v53 = vld [vmem:[%s5401_s25 + $0xc0] sm:$0xff]   ;;  %v4557_v14 = vld [vmem:[%s5401_s25 + $0xc8] sm:$0x1] }
 0x122   : > { %v3209_v49 = vpack.c.bf16 %v6982_v27, %v6979_v61  ;;  %v3565_v10 = vsel %vm967_vm3, %v3563_v9, %v3564_v43  ;;  %v3567_v28 = vsel %vm967_vm3, %v3564_v43, %v3566_v62  ;;  %v3030_v3 = vunpack.c.h.bf16 %v4552_v36  ;;  %v5000_v58 = vpop.f32.mrf.mxu0 }
 0x123   : > { %v3031_v24 = vunpack.c.l.bf16 %v6993_v33  ;;  %v3489_v20 = vunpack.c.l.bf16 %v4591_v11  ;;  %v7007_v60 = vadd.f32 %v1231_v42, %v841_v8  ;;  %v852_v44 = vadd.f32 %v4963_v54, %v6762_v29  ;;  %v843_v63 = vpop.f32.mrf.mxu1 }
 0x124   : > { %v7012_v12 = vsel %vm362_vm1, %v3146_v34, %v3147_v5  ;;  %v3029_v9 = vunpack.c.l.bf16 %v4552_v36  ;;  %v7016_v43 = vsel %vm362_vm1, %v3147_v5, %v3149_v48  ;;  %v3570_v62 = vsel %vm967_vm3, %v3568_v52, %v3569_v16 }
 0x125   : > { %5203 = vmatmul.mubr.msk.bf16.gmra.mxu0 %vm493_vm2, %v3629_v25  ;;  %v3572_v42 = vsel %vm967_vm3, %v3569_v16, %v3571_v4  ;;  %v3490_v7 = vunpack.c.l.bf16 %v4592_v6  ;;  %v7020_v33 = vadd.f32 %v4997_v22, %v852_v44  ;;  %v844_v29 = vadd.f32 %v843_v63, %v6774_v46  ;;  %v1247_v25 = vpop.f32.mrf.mxu0  ;;  %v4966_v57 = vpop.f32.mrf.mxu1  ;;  %v4558_v6 = vld [vmem:[%s5401_s25 + $0xcc] sm:$0xff]  }
 0x126   : > { %5206 = vmatprep.mubr.msk.bf16.mxu0 %vm493_vm2, %v3630_v0  ;;  %v4742_v11 = vunpack.c.h.bf16 %v4758_v53  ;;  %v3034_v34 = vunpack.c.l.bf16 %v4557_v14  ;;  %v3573_v0 = vrot.slane %v3489_v20, 2  ;;  %v3574_v36 = vrot.slane %v3030_v3, 2  ;;  %v4593_v14 = vld [vmem:[%s5401_s25 + $0xcc] sm:$0xe] }
 0x127   : > { %v3576_v5 = vrot.slane %v3031_v24, 2  ;;  %v4741_v48 = vunpack.c.l.bf16 %v4758_v53  ;;  %v7027_v52 = vadd.f32 %v1234_v37, %v844_v29  ;;  %v865_v22 = vadd.f32 %v4966_v57, %v6577_v40  ;;  %v5001_v46 = vpop.f32.mrf.mxu0 }
 0x128   : > { %5169 = vmatmul.mubr.msk.bf16.gmra.mxu1 %vm493_vm2, %v3207_v56  ;;  %v3631_v21 = vpack.c.bf16 %v3567_v28, %v3565_v10  ;;  %v3210_v31 = vpack.c.bf16 %v7016_v43, %v7012_v12  ;;  %v856_v56 = vpop.f32.mrf.mxu1  ;;  %v3632_v16 = vpack.c.bf16 %v3572_v42, %v3570_v62  ;;  %v3151_v4 = vrot.slane %v3029_v9, 1 }
 0x129   : > { %5172 = vmatprep.mubr.msk.bf16.mxu1 %vm493_vm2, %v3208_v41  ;;  %v3152_v8 = vrot.slane %v3030_v3, 1  ;;  %v3578_v37 = vrot.slane %v3490_v7, 2  ;;  %v7037_v54 = vadd.f32 %v5000_v58, %v865_v22  ;;  %v857_v40 = vadd.f32 %v856_v56, %v6582_v1  ;;  %v1250_v20 = vpop.f32.mrf.mxu0 }
 0x12a   : > { %v3579_v53 = vrot.slane %v4742_v11, 2  ;;  %v3581_v15 = vrot.slane %v3034_v34, 2  ;;  %v4967_v41 = vpop.f32.mrf.mxu1  ;;  %v3154_v10 = vrot.slane %v3031_v24, 1  ;;  %v3575_v28 = vsel %vm967_vm3, %v3573_v0, %v3574_v36 }
 0x12b   : > { %v3577_v44 = vsel %vm967_vm3, %v3574_v36, %v3576_v5  ;;  %v3156_v12 = vrot.slane %v4741_v48, 1  ;;  %v7044_v9 = vadd.f32 %v1247_v25, %v857_v40  ;;  %v868_v3 = vadd.f32 %v4967_v41, %v6591_v38  ;;  %v5004_v58 = vpop.f32.mrf.mxu0 }
 0x12c   : > { %v3157_v1 = vrot.slane %v4742_v11, 1  ;;  %v3159_v63 = vrot.slane %v3034_v34, 1  ;;  %v859_v43 = vpop.f32.mrf.mxu1  ;;  %v3036_v62 = vunpack.c.h.bf16 %v4558_v6  ;;  %v3037_v42 = vunpack.c.l.bf16 %v4560_v50 }
 0x12d   : > { %5207 = vmatmul.mubr.msk.bf16.gmra.mxu0 %vm493_vm2, %v3631_v21  ;;  %v3491_v24 = vunpack.c.l.bf16 %v4593_v14  ;;  %v7049_v7 = vadd.f32 %v5001_v46, %v868_v3  ;;  %v860_v29 = vadd.f32 %v859_v43, %v6600_v39  ;;  %v1263_v57 = vpop.f32.mrf.mxu0  ;;  %v3580_v25 = vsel %vm967_vm3, %v3578_v37, %v3579_v53 }
 0x12e   : > { %5210 = vmatprep.mubr.msk.bf16.mxu0 %vm493_vm2, %v3632_v16  ;;  %v3582_v38 = vsel %vm967_vm3, %v3579_v53, %v3581_v15  ;;  %v4970_v0 = vpop.f32.mrf.mxu1  ;;  %v3153_v11 = vsel %vm362_vm1, %v3151_v4, %v3152_v8  ;;  %v3155_v34 = vsel %vm362_vm1, %v3152_v8, %v3154_v10  ;;  %v3633_v36 = vpack.c.bf16 %v3577_v44, %v3575_v28  ;;  %v7719_v8 = vld [vmem:[#allocation4_spill] sm:$0xff] }
 0x12f   : > { %v3035_v5 = vunpack.c.l.bf16 %v4558_v6  ;;  %v7060_v48 = vadd.f32 %v1250_v20, %v860_v29  ;;  %v881_v39 = vadd.f32 %v4970_v0, %v6616_v23  ;;  %v5005_v22 = vpop.f32.mrf.mxu0  ;;  %v3158_v46 = vsel %vm362_vm1, %v3156_v12, %v3157_v1 }
 0x130   : > { %5173 = vmatmul.mubr.msk.bf16.gmra.mxu1 %vm493_vm2, %v3209_v49  ;;  %v3160_v21 = vsel %vm362_vm1, %v3157_v1, %v3159_v63  ;;  %v872_v61 = vpop.f32.mrf.mxu1  ;;  %v3634_v27 = vpack.c.bf16 %v3582_v38, %v3580_v25  ;;  %v3583_v49 = vrot.slane %v3491_v24, 2  ;;  %v3584_v56 = vrot.slane %v3036_v62, 2 }
 0x131   : > { %5176 = vmatprep.mubr.msk.bf16.mxu1 %vm493_vm2, %v3210_v31  ;;  %v3586_v16 = vrot.slane %v3037_v42, 2  ;;  %v7066_v4 = vadd.f32 %v5004_v58, %v881_v39  ;;  %v873_v37 = vadd.f32 %v872_v61, %v7719_v8  ;;  %v1266_v6 = vpop.f32.mrf.mxu0  ;;  %v3211_v20 = vpack.c.bf16 %v3155_v34, %v3153_v11  ;;  %v7720_v31 = vld [vmem:[#allocation2_spill] sm:$0xff]  ;;  %v7721_v58 = vld [vmem:[#allocation7_spill] sm:$0xff]  ;;  %v7723_v34 = vld [vmem:[#allocation9_spill] sm:$0xff] }
 0x132   : > { %v4971_v40 = vpop.f32.mrf.mxu1  ;;  %v3161_v23 = vrot.slane %v3035_v5, 1  ;;  %v3162_v53 = vrot.slane %v3036_v62, 1  ;;  %v3212_v41 = vpack.c.bf16 %v3160_v21, %v3158_v46  ;;  %v3164_v10 = vrot.slane %v3037_v42, 1  ;;  %v7722_v42 = vld [vmem:[#allocation6_spill] sm:$0xff]  ;;  %v7724_v21 = vld [vmem:[#allocation8_spill] sm:$0xff] }
 0x133   : > { %v7069_v15 = vadd.f32 %v1263_v57, %v873_v37  ;;  %v884_v50 = vadd.f32 %v4971_v40, %v7720_v31  ;;  %v5008_v14 = vpop.f32.mrf.mxu0  ;;  %v3585_v44 = vsel %vm967_vm3, %v3583_v49, %v3584_v56  ;;  %v3587_v12 = vsel %vm967_vm3, %v3584_v56, %v3586_v16  ;;  %v7725_v16 = vld [vmem:[#allocation11_spill] sm:$0xff] }
 0x134   : > { %v875_v28 = vpop.f32.mrf.mxu1  ;;  %v3163_v62 = vsel %vm362_vm1, %v3161_v23, %v3162_v53  ;;  %v3165_v25 = vsel %vm362_vm1, %v3162_v53, %v3164_v10  ;;  %v3635_v38 = vpack.c.bf16 %v3587_v12, %v3585_v44  ;;  %v7728_v12 = vld [vmem:[#allocation5_spill] sm:$0xff] }
 0x135   : > { %5211 = vmatmul.mubr.msk.bf16.gmra.mxu0 %vm493_vm2, %v3633_v36  ;;  %v7076_v3 = vadd.f32 %v5005_v22, %v884_v50  ;;  %v876_v1 = vadd.f32 %v875_v28, %v7721_v58  ;;  %v1279_v63 = vpop.f32.mrf.mxu0  ;;  %v3213_v22 = vpack.c.bf16 %v3165_v25, %v3163_v62 }
 0x136   : > { %5214 = vmatprep.mubr.msk.bf16.mxu0 %vm493_vm2, %v3634_v27  ;;  %v4974_v43 = vpop.f32.mrf.mxu1 }
 0x137   : > { %v7081_v24 = vadd.f32 %v1266_v6, %v876_v1  ;;  %v897_v29 = vadd.f32 %v4974_v43, %v7722_v42  ;;  %v5009_v57 = vpop.f32.mrf.mxu0 }
 0x138   : > { %5177 = vmatmul.mubr.msk.bf16.gmra.mxu1 %vm493_vm2, %v3211_v20  ;;  %v888_v0 = vpop.f32.mrf.mxu1  ;;  %v7726_v20 = vld [vmem:[#allocation12_spill] sm:$0xff] }
 0x139   : > { %5180 = vmatprep.mubr.msk.bf16.mxu1 %vm493_vm2, %v3212_v41  ;;  %v7086_v11 = vadd.f32 %v5008_v14, %v897_v29  ;;  %v889_v36 = vadd.f32 %v888_v0, %v7723_v34  ;;  %v1282_v5 = vpop.f32.mrf.mxu0  ;;  %v7727_v14 = vld [vmem:[#allocation10_spill] sm:$0xff] }
 0x13a   : > { %v4975_v39 = vpop.f32.mrf.mxu1 }
 0x13b   : > { %v7089_v46 = vadd.f32 %v1279_v63, %v889_v36  ;;  %v900_v61 = vadd.f32 %v4975_v39, %v7724_v21  ;;  %v5012_v27 = vpop.f32.mrf.mxu0 }
 0x13c   : > { %v891_v49 = vpop.f32.mrf.mxu1 }
 0x13d   : > { %5215 = vmatmul.mubr.msk.bf16.gmra.mxu0 %vm493_vm2, %v3635_v38  ;;  %v7093_v56 = vadd.f32 %v5009_v57, %v900_v61  ;;  %v892_v8 = vadd.f32 %v891_v49, %v7725_v16  ;;  %v1295_v37 = vpop.f32.mrf.mxu0 }
 0x13e   : > { %v4978_v6 = vpop.f32.mrf.mxu1 }
 0x13f   : > { %v7097_v40 = vadd.f32 %v1282_v5, %v892_v8  ;;  %v913_v23 = vadd.f32 %v4978_v6, %v7726_v20  ;;  %v5013_v53 = vpop.f32.mrf.mxu0 }
 0x140   : > { %5181 = vmatmul.mubr.msk.bf16.gmra.mxu1 %vm493_vm2, %v3213_v22  ;;  %v904_v31 = vpop.f32.mrf.mxu1 }
 0x141   : > { %v7100_v50 = vadd.f32 %v5012_v27, %v913_v23  ;;  %v905_v41 = vadd.f32 %v904_v31, %v7727_v14  ;;  %v1298_v10 = vpop.f32.mrf.mxu0 }
 0x142   : > { %v4979_v28 = vpop.f32.mrf.mxu1 }
 0x143   : > { %v7103_v44 = vadd.f32 %v1295_v37, %v905_v41  ;;  %v916_v58 = vadd.f32 %v4979_v28, %v7728_v12  ;;  %v5052_v1 = vpop.f32.mrf.mxu0 }
 0x144   : > { %v907_v63 = vpop.f32.mrf.mxu1 }
 0x145   : > { %v7106_v43 = vadd.f32 %v5013_v53, %v916_v58  ;;  %v908_v62 = vadd.f32 %v907_v63, %v6801_v13  ;;  %v2031_v42 = vpop.f32.mrf.mxu0 }
 0x146   : > { %v5018_v29 = vpop.f32.mrf.mxu1 }
 0x147   : > { %v7109_v57 = vadd.f32 %v1298_v10, %v908_v62  ;;  %v1642_v25 = vadd.f32 %v5018_v29, %v6840_v32  ;;  %v5053_v38 = vpop.f32.mrf.mxu0 }
 0x148   : > { %v1513_v0 = vpop.f32.mrf.mxu1 }
 0x149   : > { %v7112_v34 = vadd.f32 %v5052_v1, %v1642_v25  ;;  %v1640_v36 = vadd.f32 %v1513_v0, %v6852_v45  ;;  %v2034_v5 = vpop.f32.mrf.mxu0 }
 0x14a   : > { %v5019_v39 = vpop.f32.mrf.mxu1 }
 0x14b   : > { %v7115_v22 = vadd.f32 %v2031_v42, %v1640_v36  ;;  %v1643_v21 = vadd.f32 %v5019_v39, %v6870_v47  ;;  %v5056_v61 = vpop.f32.mrf.mxu0 }
 0x14c   : > { %v1516_v13 = vpop.f32.mrf.mxu1 }
 0x14d   : > { %v7118_v27 = vadd.f32 %v5053_v38, %v1643_v21  ;;  %v1641_v49 = vadd.f32 %v1516_v13, %v6886_v17  ;;  %v2047_v16 = vpop.f32.mrf.mxu0 }
 0x14e   : > { %v5022_v32 = vpop.f32.mrf.mxu1 }
 0x14f   : > { %v7121_v8 = vadd.f32 %v2034_v5, %v1641_v49  ;;  %v1646_v37 = vadd.f32 %v5022_v32, %v6893_v30  ;;  %v5057_v6 = vpop.f32.mrf.mxu0 }
 0x150   : > { %v1529_v45 = vpop.f32.mrf.mxu1 }
 0x151   : > { %v7124_v20 = vadd.f32 %v5056_v61, %v1646_v37  ;;  %v1644_v23 = vadd.f32 %v1529_v45, %v6900_v19  ;;  %v2050_v53 = vpop.f32.mrf.mxu0 }
 0x152   : > { %v5023_v47 = vpop.f32.mrf.mxu1 }
 0x153   : > { %v7127_v31 = vadd.f32 %v2047_v16, %v1644_v23  ;;  %v1647_v14 = vadd.f32 %v5023_v47, %v6918_v26 }
 0x154   : > { %v1532_v17 = vpop.f32.mrf.mxu1 }
 0x155   : > { %v5060_v41 = vpop.f32.mrf.mxu0  ;;  %v7130_v10 = vadd.f32 %v5057_v6, %v1647_v14  ;;  %v1645_v28 = vadd.f32 %v1532_v17, %v6927_v2 }
 0x156   : > { %v5026_v30 = vpop.f32.mrf.mxu1 }
 0x157   : > { %v2063_v12 = vpop.f32.mrf.mxu0  ;;  %v7133_v58 = vadd.f32 %v2050_v53, %v1645_v28  ;;  %v1650_v1 = vadd.f32 %v5026_v30, %v6949_v51 }
 0x158   : > { %v1545_v19 = vpop.f32.mrf.mxu1 }
 0x159   : > { %v5061_v63 = vpop.f32.mrf.mxu0  ;;  %v7136_v62 = vadd.f32 %v5060_v41, %v1650_v1  ;;  %v1648_v42 = vadd.f32 %v1545_v19, %v6958_v55 }
 0x15a   : > { %v5027_v26 = vpop.f32.mrf.mxu1 }
 0x15b   : > { %v2066_v29 = vpop.f32.mrf.mxu0  ;;  %v7139_v25 = vadd.f32 %v2063_v12, %v1648_v42  ;;  %v1651_v38 = vadd.f32 %v5027_v26, %v6970_v35 }
 0x15c   : > { %v1548_v2 = vpop.f32.mrf.mxu1 }
 0x15d   : > { %v5064_v0 = vpop.f32.mrf.mxu0  ;;  %v7142_v36 = vadd.f32 %v5061_v63, %v1651_v38  ;;  %v1649_v5 = vadd.f32 %v1548_v2, %v6985_v18 }
 0x15e   : > { %v5030_v51 = vpop.f32.mrf.mxu1 }
 0x15f   : > { %v2079_v39 = vpop.f32.mrf.mxu0  ;;  %v7145_v21 = vadd.f32 %v2066_v29, %v1649_v5  ;;  %v1654_v61 = vadd.f32 %v5030_v51, %v6996_v59 }
 0x160   : > { %v1561_v55 = vpop.f32.mrf.mxu1 }
 0x161   : > { %v5065_v13 = vpop.f32.mrf.mxu0  ;;  %v7148_v49 = vadd.f32 %v5064_v0, %v1654_v61  ;;  %v1652_v16 = vadd.f32 %v1561_v55, %v7007_v60 }
 0x162   : > { %v5031_v35 = vpop.f32.mrf.mxu1 }
 0x163   : > { %v2082_v32 = vpop.f32.mrf.mxu0  ;;  %v7151_v37 = vadd.f32 %v2079_v39, %v1652_v16  ;;  %v1655_v6 = vadd.f32 %v5031_v35, %v7020_v33 }
 0x164   : > { %v1564_v18 = vpop.f32.mrf.mxu1 }
 0x165   : > { %v5068_v45 = vpop.f32.mrf.mxu0  ;;  %v7154_v23 = vadd.f32 %v5065_v13, %v1655_v6  ;;  %v1653_v53 = vadd.f32 %v1564_v18, %v7027_v52 }
 0x166   : > { %v5034_v59 = vpop.f32.mrf.mxu1 }
 0x167   : > { %v2095_v47 = vpop.f32.mrf.mxu0  ;;  %v7157_v14 = vadd.f32 %v2082_v32, %v1653_v53  ;;  %v1658_v41 = vadd.f32 %v5034_v59, %v7037_v54 }
 0x168   : > { %v1577_v60 = vpop.f32.mrf.mxu1 }
 0x169   : > { %v5069_v17 = vpop.f32.mrf.mxu0  ;;  %v7160_v28 = vadd.f32 %v5068_v45, %v1658_v41  ;;  %v1656_v12 = vadd.f32 %v1577_v60, %v7044_v9 }
 0x16a   : > { %v5035_v33 = vpop.f32.mrf.mxu1 }
 0x16b   : > { %v2098_v30 = vpop.f32.mrf.mxu0  ;;  %v7163_v1 = vadd.f32 %v2095_v47, %v1656_v12  ;;  %v1659_v63 = vadd.f32 %v5035_v33, %v7049_v7 }
 0x16c   : > { %v1580_v52 = vpop.f32.mrf.mxu1 }
 0x16d   : > { %v5072_v19 = vpop.f32.mrf.mxu0  ;;  %v7166_v42 = vadd.f32 %v5069_v17, %v1659_v63  ;;  %v1657_v29 = vadd.f32 %v1580_v52, %v7060_v48 }
 0x16e   : > { %v5038_v54 = vpop.f32.mrf.mxu1 }
 0x16f   : > { %7729 = vst [vmem:[#allocation3_spill] sm:$0xff] %v7166_v42  ;;  %v2111_v26 = vpop.f32.mrf.mxu0  ;;  %v7169_v38 = vadd.f32 %v2098_v30, %v1657_v29  ;;  %v1662_v0 = vadd.f32 %v5038_v54, %v7066_v4 }
 0x170   : > { %v1593_v9 = vpop.f32.mrf.mxu1 }
 0x171   : > { %7730 = vst [vmem:[#allocation4_spill] sm:$0xff] %v7169_v38  ;;  %v5073_v2 = vpop.f32.mrf.mxu0  ;;  %v7172_v5 = vadd.f32 %v5072_v19, %v1662_v0  ;;  %v1660_v39 = vadd.f32 %v1593_v9, %v7069_v15 }
 0x172   : > { %v5039_v7 = vpop.f32.mrf.mxu1 }
 0x173   : > { %7731 = vst [vmem:[#allocation2_spill] sm:$0xff] %v7172_v5  ;;  %v2114_v51 = vpop.f32.mrf.mxu0  ;;  %v7175_v61 = vadd.f32 %v2111_v26, %v1660_v39  ;;  %v1663_v13 = vadd.f32 %v5039_v7, %v7076_v3 }
 0x174   : > { %v1596_v48 = vpop.f32.mrf.mxu1 }
 0x175   : > { %7732 = vst [vmem:[#allocation7_spill] sm:$0xff] %v7175_v61  ;;  %v5076_v55 = vpop.f32.mrf.mxu0  ;;  %v7178_v16 = vadd.f32 %v5073_v2, %v1663_v13  ;;  %v1661_v32 = vadd.f32 %v1596_v48, %v7081_v24 }
 0x176   : > { %v5042_v4 = vpop.f32.mrf.mxu1 }
 0x177   : > { %7733 = vst [vmem:[#allocation6_spill] sm:$0xff] %v7178_v16  ;;  %v2127_v35 = vpop.f32.mrf.mxu0  ;;  %v7181_v6 = vadd.f32 %v2114_v51, %v1661_v32  ;;  %v1666_v45 = vadd.f32 %v5042_v4, %v7086_v11 }
 0x178   : > { %v1609_v15 = vpop.f32.mrf.mxu1 }
 0x179   : > { %7734 = vst [vmem:[#allocation9_spill] sm:$0xff] %v7181_v6  ;;  %v5077_v18 = vpop.f32.mrf.mxu0  ;;  %v7184_v53 = vadd.f32 %v5076_v55, %v1666_v45  ;;  %v1664_v47 = vadd.f32 %v1609_v15, %v7089_v46 }
 0x17a   : > { %v5043_v3 = vpop.f32.mrf.mxu1 }
 0x17b   : > { %7735 = vst [vmem:[#allocation8_spill] sm:$0xff] %v7184_v53  ;;  %v2130_v59 = vpop.f32.mrf.mxu0  ;;  %v7187_v41 = vadd.f32 %v2127_v35, %v1664_v47  ;;  %v1667_v17 = vadd.f32 %v5043_v3, %v7093_v56 }
 0x17c   : > { %v1612_v24 = vpop.f32.mrf.mxu1 }
 0x17d   : > { %7736 = vst [vmem:[#allocation11_spill] sm:$0xff] %v7187_v41  ;;  %v5080_v60 = vpop.f32.mrf.mxu0  ;;  %v7190_v12 = vadd.f32 %v5077_v18, %v1667_v17  ;;  %v1665_v30 = vadd.f32 %v1612_v24, %v7097_v40 }
 0x17e   : > { %v5046_v11 = vpop.f32.mrf.mxu1 }
 0x17f   : > { %7737 = vst [vmem:[#allocation12_spill] sm:$0xff] %v7190_v12  ;;  %v2143_v33 = vpop.f32.mrf.mxu0  ;;  %v7193_v63 = vadd.f32 %v2130_v59, %v1665_v30  ;;  %v1670_v19 = vadd.f32 %v5046_v11, %v7100_v50 }
 0x180   : > { %v1625_v46 = vpop.f32.mrf.mxu1 }
 0x181   : > { %7738 = vst [vmem:[#allocation10_spill] sm:$0xff] %v7193_v63  ;;  %v5081_v52 = vpop.f32.mrf.mxu0  ;;  %v7196_v29 = vadd.f32 %v5080_v60, %v1670_v19  ;;  %v1668_v26 = vadd.f32 %v1625_v46, %v7103_v44 }
 0x182   : > { %v5047_v56 = vpop.f32.mrf.mxu1 }
 0x183   : > { %7739 = vst [vmem:[#allocation5_spill] sm:$0xff] %v7196_v29  ;;  %v2146_v54 = vpop.f32.mrf.mxu0  ;;  %v7199_v0 = vadd.f32 %v2143_v33, %v1668_v26  ;;  %v1671_v2 = vadd.f32 %v5047_v56, %v7106_v43 }
 0x184   : > { %v1628_v40 = vpop.f32.mrf.mxu1 }
 0x185   : > { %7740 = vst [vmem:[#allocation13_spill] sm:$0xff] %v7199_v0  ;;  %v7202_v9 = vpop.f32.mrf.mxu0  ;;  %v7204_v39 = vadd.f32 %v5081_v52, %v1671_v2  ;;  %v1669_v51 = vadd.f32 %v1628_v40, %v7109_v57 }
 0x186   : > { %v5086_v7 = vpop.f32.mrf.mxu1 }
 0x187   : > { %7741 = vst [vmem:[#allocation14_spill] sm:$0xff] %v7204_v39  ;;  %v7207_v50 = vpop.f32.mrf.mxu0  ;;  %v7209_v13 = vadd.f32 %v2146_v54, %v1669_v51 }
 0x188   : > { %v2453_v44 = vpop.f32.mrf.mxu1 }
 0x189   : > { %7742 = vst [vmem:[#allocation15_spill] sm:$0xff] %v7209_v13  ;;  %v7211_v55 = vpop.f32.mrf.mxu0 }
 0x18a   : > { %v5087_v32 = vpop.f32.mrf.mxu1 }
 0x18b   : > { %v7213_v48 = vpop.f32.mrf.mxu0 }
 0x18c   : > { %v7217_v43 = vpop.f32.mrf.mxu1 }
 0x18d   : > { %v7215_v35 = vpop.f32.mrf.mxu0 }
 0x18e   : > { %v7221_v45 = vpop.f32.mrf.mxu1 }
 0x18f   : > { %v7219_v4 = vpop.f32.mrf.mxu0 }
 0x190   : > { %v7225_v18 = vpop.f32.mrf.mxu1 }
 0x191   : > { %v7223_v57 = vpop.f32.mrf.mxu0 }
 0x192   : > { %v7229_v47 = vpop.f32.mrf.mxu1 }
 0x193   : > { %v7227_v15 = vpop.f32.mrf.mxu0 }
 0x194   : > { %v7233_v3 = vpop.f32.mrf.mxu1 }
 0x195   : > { %v7231_v59 = vpop.f32.mrf.mxu0 }
 0x196   : > { %v7237_v60 = vpop.f32.mrf.mxu1 }
 0x197   : > { %v7235_v17 = vpop.f32.mrf.mxu0 }
 0x198   : > { %v7241_v30 = vpop.f32.mrf.mxu1 }
 0x199   : > { %v7239_v24 = vpop.f32.mrf.mxu0 }
 0x19a   : > { %v7245_v11 = vpop.f32.mrf.mxu1 }
 0x19b   : > { %v7243_v33 = vpop.f32.mrf.mxu0 }
 0x19c   : > { %v7249_v52 = vpop.f32.mrf.mxu1 }
 0x19d   : > { %v7247_v19 = vpop.f32.mrf.mxu0 }
 0x19e   : > { %v7253_v26 = vpop.f32.mrf.mxu1 }
 0x19f   : > { %v7251_v46 = vpop.f32.mrf.mxu0 }
 0x1a0   : > { %v7257_v56 = vpop.f32.mrf.mxu1 }
 0x1a1   : > { %v7255_v54 = vpop.f32.mrf.mxu0 }
 0x1a2   : > { %v7261_v40 = vpop.f32.mrf.mxu1 }
 0x1a3   : > { %v7259_v2 = vpop.f32.mrf.mxu0 }
 0x1a4   : > { %v7265_v13 = vpop.f32.mrf.mxu1 }
 0x1a5   : > { %v7263_v51 = vpop.f32.mrf.mxu0 }
 0x1a6   : > { %v7269_v0 = vpop.f32.mrf.mxu1 }
 0x1a7   : > { %v7267_v39 = vpop.f32.mrf.mxu0 }
 0x1a8   : > { %7743 = vst [vmem:[#allocation16_spill] sm:$0xff] %v7267_v39  ;;  %v7273_v63 = vpop.f32.mrf.mxu1 }
 0x1a9   : > { %v7271_v29 = vpop.f32.mrf.mxu0 }
 0x1aa   : > { %7744 = vst [vmem:[#allocation17_spill] sm:$0xff] %v7271_v29  ;;  %v7277_v41 = vpop.f32.mrf.mxu1 }
 0x1ab   : > { %v7275_v12 = vpop.f32.mrf.mxu0  ;;  %7746 = vst [vmem:[#allocation19_spill] sm:$0xff] %v7277_v41 }
 0x1ac   : > { %7745 = vst [vmem:[#allocation18_spill] sm:$0xff] %v7275_v12  ;;  %v7281_v6 = vpop.f32.mrf.mxu1 }
 0x1ad   : > { %v7279_v53 = vpop.f32.mrf.mxu0  ;;  %7748 = vst [vmem:[#allocation21_spill] sm:$0xff] %v7281_v6 }
 0x1ae   : > { %7747 = vst [vmem:[#allocation20_spill] sm:$0xff] %v7279_v53  ;;  %v7285_v61 = vpop.f32.mrf.mxu1 }
 0x1af   : > { %v7283_v16 = vpop.f32.mrf.mxu0  ;;  %7750 = vst [vmem:[#allocation23_spill] sm:$0xff] %v7285_v61 }
 0x1b0   : > { %7749 = vst [vmem:[#allocation22_spill] sm:$0xff] %v7283_v16  ;;  %v7289_v38 = vpop.f32.mrf.mxu1 }
 0x1b1   : > { %v7287_v5 = vpop.f32.mrf.mxu0  ;;  %7752 = vst [vmem:[#allocation25_spill] sm:$0xff] %v7289_v38 }
 0x1b2   : > { %7751 = vst [vmem:[#allocation24_spill] sm:$0xff] %v7287_v5  ;;  %v7293_v29 = vpop.f32.mrf.mxu1 }
 0x1b3   : > { %v7291_v39 = vpop.f32.mrf.mxu0  ;;  %7754 = vst [vmem:[#allocation27_spill] sm:$0xff] %v7293_v29 }
 0x1b4   : > { %7753 = vst [vmem:[#allocation26_spill] sm:$0xff] %v7291_v39  ;;  %v7297_v12 = vpop.f32.mrf.mxu1 }
 0x1b5   : > { %v7295_v42 = vpop.f32.mrf.mxu0  ;;  %7756 = vst [vmem:[#allocation29_spill] sm:$0xff] %v7297_v12 }
 0x1b6   : > { %7755 = vst [vmem:[#allocation28_spill] sm:$0xff] %v7295_v42  ;;  %v7301_v53 = vpop.f32.mrf.mxu1 }
 0x1b7   : > { %v7299_v41 = vpop.f32.mrf.mxu0  ;;  %7758 = vst [vmem:[#allocation31_spill] sm:$0xff] %v7301_v53 }
 0x1b8   : > { %7757 = vst [vmem:[#allocation30_spill] sm:$0xff] %v7299_v41  ;;  %v7305_v16 = vpop.f32.mrf.mxu1 }
 0x1b9   : > { %v7303_v6 = vpop.f32.mrf.mxu0  ;;  %7760 = vst [vmem:[#allocation33_spill] sm:$0xff] %v7305_v16 }
 0x1ba   : > { %7759 = vst [vmem:[#allocation32_spill] sm:$0xff] %v7303_v6  ;;  %v7309_v5 = vpop.f32.mrf.mxu1  ;;  %v2582_v6 = vadd.f32 %v5086_v7, %v7112_v34  ;;  %v2581_v34 = vadd.f32 %v7217_v43, %v7121_v8 }
 0x1bb   : > { %v7307_v61 = vpop.f32.mrf.mxu0  ;;  %7762 = vst [vmem:[#allocation35_spill] sm:$0xff] %v7309_v5 }
 0x1bc   : > { %7761 = vst [vmem:[#allocation34_spill] sm:$0xff] %v7307_v61  ;;  %v7313_v39 = vpop.f32.mrf.mxu1  ;;  %v2580_v61 = vadd.f32 %v2453_v44, %v7115_v22  ;;  %v7339_v22 = vld [vmem:[%s7540_s2] ss:$0 sm:$0xff] }
 0x1bd   : > { %v7311_v38 = vpop.f32.mrf.mxu0  ;;  %7764 = vst [vmem:[#allocation37_spill] sm:$0xff] %v7313_v39  ;;  %v2912_v39 = vadd.f32 %v7202_v9, %v2582_v6 }
 0x1be   : > { %7763 = vst [vmem:[#allocation36_spill] sm:$0xff] %v7311_v38 }
 0x1bf   : > { %v7315_v29 = vpop.f32.mrf.mxu0 }
 0x1c0   : > { %7765 = vst [vmem:[#allocation38_spill] sm:$0xff] %v7315_v29  ;;  %v7317_v42 = vpop.f32.mrf.mxu1  ;;  %v2583_v29 = vadd.f32 %v5087_v32, %v7118_v27 }
 0x1c1   : > { %7766 = vst [vmem:[#allocation39_spill] sm:$0xff] %v7317_v42  ;;  %v7319_v12 = vpop.f32.mrf.mxu0 }
 0x1c2   : > { %7767 = vst [vmem:[#allocation40_spill] sm:$0xff] %v7319_v12  ;;  %v7321_v41 = vpop.f32.mrf.mxu1  ;;  %v2913_v6 = vadd.f32 %v7211_v55, %v2583_v29 }
 0x1c3   : > { %7768 = vst [vmem:[#allocation41_spill] sm:$0xff] %v7321_v41  ;;  %v7324_v53 = vpop.f32.mrf.mxu0  ;;  %v2910_v41 = vadd.f32 %v7207_v50, %v2580_v61  ;;  %v2584_v61 = vadd.f32 %v7225_v18, %v7127_v31  ;;  %v2585_v18 = vadd.f32 %v7233_v3, %v7133_v58  ;;  %v2590_v58 = vadd.f32 %v7237_v60, %v7136_v62 }
 0x1c4   : > { %7769 = vst [vmem:[#allocation42_spill] sm:$0xff] %v7324_v53  ;;  %v7326_v16 = vpop.f32.mrf.mxu1 }
 0x1c5   : > { %7770 = vst [vmem:[#allocation43_spill] sm:$0xff] %v7326_v16  ;;  %v5188_v5 = vpop.f32.mrf.mxu0 }
 0x1c6   : > { %v7329_v38 = vpop.f32.mrf.mxu1 }
 0x1c7   : > { %7771 = vst [vmem:[#allocation44_spill] sm:$0xff] %v7329_v38  ;;  %v3723_v42 = vpop.f32.mrf.mxu0  ;;  %v2586_v38 = vadd.f32 %v7221_v45, %v7124_v20 }
 0x1c8   : > { %v5154_v12 = vpop.f32.mrf.mxu1 }
 0x1c9   : > { %v3430_v7 = vadd.f32 %v5154_v12, %v2912_v39  ;;  %v5189_v53 = vpop.f32.mrf.mxu0  ;;  %v2911_v12 = vadd.f32 %v7213_v48, %v2581_v34  ;;  %v2916_v31 = vadd.f32 %v7215_v35, %v2586_v38  ;;  %v2914_v48 = vadd.f32 %v7219_v4, %v2584_v61 }
 0x1ca   : > { %v3301_v44 = vpop.f32.mrf.mxu1 }
 0x1cb   : > { %v3852_v9 = vadd.f32 %v5188_v5, %v3430_v7  ;;  %v3428_v27 = vadd.f32 %v3301_v44, %v2910_v41  ;;  %v3726_v32 = vpop.f32.mrf.mxu0  ;;  %v2587_v5 = vadd.f32 %v7229_v47, %v7130_v10 }
 0x1cc   : > { %v5155_v8 = vpop.f32.mrf.mxu1 }
 0x1cd   : > { %v3891_v39 = vadd.f32 %v7339_v22, %v3852_v9  ;;  %v3850_v50 = vadd.f32 %v3723_v42, %v3428_v27  ;;  %v3431_v43 = vadd.f32 %v5155_v8, %v2913_v6  ;;  %v5192_v16 = vpop.f32.mrf.mxu0  ;;  %v2917_v35 = vadd.f32 %v7223_v57, %v2587_v5 }
 0x1ce   : > { %v3304_v41 = vpop.f32.mrf.mxu1  ;;  %v2915_v8 = vadd.f32 %v7227_v15, %v2585_v18  ;;  %v2588_v5 = vadd.f32 %v7241_v30, %v7139_v25 }
 0x1cf   : > { %v3923_v29 = vmax.f32 %v3891_v39, 0.0  ;;  %v3889_v55 = vadd.f32 %v7339_v22, %v3850_v50  ;;  %v3853_v20 = vadd.f32 %v5189_v53, %v3431_v43  ;;  %v3429_v45 = vadd.f32 %v3304_v41, %v2911_v12  ;;  %v3739_v7 = vpop.f32.mrf.mxu0 }
 0x1d0   : > { %v5158_v10 = vpop.f32.mrf.mxu1  ;;  %v2920_v43 = vadd.f32 %v7231_v59, %v2590_v58  ;;  %v2591_v41 = vadd.f32 %v7245_v11, %v7142_v36  ;;  %v2589_v59 = vadd.f32 %v7249_v52, %v7145_v21 }
 0x1d1   : > { %v4649_v42 = vpack.c.bf16 %v3923_v29, %v3923_v29  ;;  %v3921_v47 = vmax.f32 %v3889_v55, 0.0  ;;  %v3892_v53 = vadd.f32 %v7339_v22, %v3853_v20  ;;  %v3851_v34 = vadd.f32 %v3726_v32, %v3429_v45  ;;  %v5193_v38 = vpop.f32.mrf.mxu0 }
 0x1d2   : > { %v3434_v4 = vadd.f32 %v5158_v10, %v2916_v31  ;;  %v3317_v3 = vpop.f32.mrf.mxu1  ;;  %v2918_v10 = vadd.f32 %v7235_v17, %v2588_v5 }
 0x1d3   : > { %4084 = vst.msk [vmem:[%s7359_s19 + $0x8] sm:$0xf] %vm4081_vm4, %v4649_v42  ;;  %v4647_v44 = vpack.c.bf16 %v3921_v47, %v3921_v47  ;;  %v3924_v6 = vmax.f32 %v3892_v53, 0.0  ;;  %v3890_v9 = vadd.f32 %v7339_v22, %v3851_v34  ;;  %v3432_v27 = vadd.f32 %v3317_v3, %v2914_v48  ;;  %v3742_v61 = vpop.f32.mrf.mxu0 }
 0x1d4   : > { %v3856_v32 = vadd.f32 %v5192_v16, %v3434_v4  ;;  %v5159_v12 = vpop.f32.mrf.mxu1  ;;  %v2921_v42 = vadd.f32 %v7239_v24, %v2591_v41  ;;  %v2594_v47 = vadd.f32 %v7253_v26, %v7148_v49  ;;  %v2919_v4 = vadd.f32 %v7243_v33, %v2589_v59 }
 0x1d5   : > { %4082 = vst.msk [vmem:[%s7359_s19] sm:$0xf] %vm4081_vm4, %v4647_v44  ;;  %v4650_v57 = vpack.c.bf16 %v3924_v6, %v3924_v6  ;;  %v3922_v39 = vmax.f32 %v3890_v9, 0.0  ;;  %v3854_v62 = vadd.f32 %v3739_v7, %v3432_v27  ;;  %v3435_v60 = vadd.f32 %v5159_v12, %v2917_v35  ;;  %v5196_v50 = vpop.f32.mrf.mxu0 }
 0x1d6   : > { %v3895_v15 = vadd.f32 %v7339_v22, %v3856_v32  ;;  %v3320_v16 = vpop.f32.mrf.mxu1  ;;  %v2592_v3 = vadd.f32 %v7257_v56, %v7151_v37  ;;  %v2924_v27 = vadd.f32 %v7247_v19, %v2594_v47 }
 0x1d7   : > { %4085 = vst.msk [vmem:[%s7359_s19 + $0xc] sm:$0xf] %vm4081_vm4, %v4650_v57  ;;  %v4648_v29 = vpack.c.bf16 %v3922_v39, %v3922_v39  ;;  %v3893_v55 = vadd.f32 %v7339_v22, %v3854_v62  ;;  %v3857_v20 = vadd.f32 %v5193_v38, %v3435_v60  ;;  %v3433_v45 = vadd.f32 %v3320_v16, %v2915_v8  ;;  %v3755_v7 = vpop.f32.mrf.mxu0 }
 0x1d8   : > { %v3927_v31 = vmax.f32 %v3895_v15, 0.0  ;;  %v5162_v48 = vpop.f32.mrf.mxu1  ;;  %v2922_v57 = vadd.f32 %v7251_v46, %v2592_v3  ;;  %v2595_v39 = vadd.f32 %v7261_v40, %v7154_v23  ;;  %v2593_v62 = vadd.f32 %v7265_v13, %v7157_v14 }
 0x1d9   : > { %4083 = vst.msk [vmem:[%s7359_s19 + $0x4] sm:$0xf] %vm4081_vm4, %v4648_v29  ;;  %v3925_v25 = vmax.f32 %v3893_v55, 0.0  ;;  %v3896_v36 = vadd.f32 %v7339_v22, %v3857_v20  ;;  %v3855_v30 = vadd.f32 %v3742_v61, %v3433_v45  ;;  %v3438_v11 = vadd.f32 %v5162_v48, %v2920_v43  ;;  %v5197_v18 = vpop.f32.mrf.mxu0 }
 0x1da   : > { %v4653_v21 = vpack.c.bf16 %v3927_v31, %v3927_v31  ;;  %v3333_v52 = vpop.f32.mrf.mxu1  ;;  %v2598_v46 = vadd.f32 %v7269_v0, %v7160_v28  ;;  %v2925_v20 = vadd.f32 %v7255_v54, %v2595_v39  ;;  %v2923_v45 = vadd.f32 %v7259_v2, %v2593_v62  ;;  %v7781_v39 = vld [vmem:[#allocation25_spill] sm:$0xff] }
 0x1db   : > { %v4651_v53 = vpack.c.bf16 %v3925_v25, %v3925_v25  ;;  %v3928_v34 = vmax.f32 %v3896_v36, 0.0  ;;  %v3894_v38 = vadd.f32 %v7339_v22, %v3855_v30  ;;  %v3860_v35 = vadd.f32 %v5196_v50, %v3438_v11  ;;  %v3758_v58 = vpop.f32.mrf.mxu0  ;;  %v7772_v11 = vld [vmem:[#allocation3_spill] sm:$0xff] }
 0x1dc   : > { %4088 = vst.msk [vmem:[%s7359_s19 + $0x18] sm:$0xf] %vm4081_vm4, %v4653_v21  ;;  %v3436_v17 = vadd.f32 %v3333_v52, %v2918_v10  ;;  %v5163_v24 = vpop.f32.mrf.mxu1  ;;  %v2928_v30 = vadd.f32 %v7263_v51, %v2598_v46  ;;  %v7774_v52 = vld [vmem:[#allocation16_spill] sm:$0xff]  ;;  %v7782_v46 = vld [vmem:[#allocation18_spill] sm:$0xff] }
 0x1dd   : > { %4086 = vst.msk [vmem:[%s7359_s19 + $0x10] sm:$0xf] %vm4081_vm4, %v4651_v53  ;;  %v4654_v49 = vpack.c.bf16 %v3928_v34, %v3928_v34  ;;  %v3926_v26 = vmax.f32 %v3894_v38, 0.0  ;;  %v3899_v44 = vadd.f32 %v7339_v22, %v3860_v35  ;;  %v3439_v6 = vadd.f32 %v5163_v24, %v2921_v42  ;;  %v5200_v9 = vpop.f32.mrf.mxu0 }
 0x1de   : > { %v3858_v61 = vadd.f32 %v3755_v7, %v3436_v17  ;;  %v3336_v33 = vpop.f32.mrf.mxu1  ;;  %v2596_v7 = vadd.f32 %v7273_v63, %v7163_v1  ;;  %v7775_v17 = vld [vmem:[#allocation17_spill] sm:$0xff] }
 0x1df   : > { %4089 = vst.msk [vmem:[%s7359_s19 + $0x1c] sm:$0xf] %vm4081_vm4, %v4654_v49  ;;  %v4652_v37 = vpack.c.bf16 %v3926_v26, %v3926_v26  ;;  %v3931_v56 = vmax.f32 %v3899_v44, 0.0  ;;  %v3861_v8 = vadd.f32 %v5197_v18, %v3439_v6  ;;  %v3437_v32 = vadd.f32 %v3336_v33, %v2919_v4  ;;  %v3771_v12 = vpop.f32.mrf.mxu0  ;;  %v7773_v18 = vld [vmem:[#allocation19_spill] sm:$0xff]  ;;  %v7776_v49 = vld [vmem:[#allocation4_spill] sm:$0xff]  ;;  %v7777_v26 = vld [vmem:[#allocation21_spill] sm:$0xff] }
 0x1e0   : > { %v3897_v19 = vadd.f32 %v7339_v22, %v3858_v61  ;;  %v5166_v60 = vpop.f32.mrf.mxu1  ;;  %v2599_v10 = vadd.f32 %v7773_v18, %v7772_v11  ;;  %v2926_v53 = vadd.f32 %v7774_v52, %v2596_v7  ;;  %v2597_v44 = vadd.f32 %v7777_v26, %v7776_v49  ;;  %v7778_v6 = vld [vmem:[#allocation2_spill] sm:$0xff]  ;;  %v7793_v49 = vld [vmem:[#allocation11_spill] sm:$0xff]  ;;  %v7794_v26 = vld [vmem:[#allocation33_spill] sm:$0xff] }
 0x1e1   : > { %4087 = vst.msk [vmem:[%s7359_s19 + $0x14] sm:$0xf] %vm4081_vm4, %v4652_v37  ;;  %v4657_v50 = vpack.c.bf16 %v3931_v56, %v3931_v56  ;;  %v3900_v43 = vadd.f32 %v7339_v22, %v3861_v8  ;;  %v3859_v5 = vadd.f32 %v3758_v58, %v3437_v32  ;;  %v3442_v41 = vadd.f32 %v5166_v60, %v2924_v27  ;;  %v5201_v15 = vpop.f32.mrf.mxu0 }
 0x1e2   : > { %v3929_v16 = vmax.f32 %v3897_v19, 0.0  ;;  %v3349_v29 = vpop.f32.mrf.mxu1  ;;  %v2929_v24 = vadd.f32 %v7775_v17, %v2599_v10  ;;  %v7792_v17 = vld [vmem:[#allocation31_spill] sm:$0xff] }
 0x1e3   : > { %4092 = vst.msk [vmem:[%s7359_s19 + $0x28] sm:$0xf] %vm4081_vm4, %v4657_v50  ;;  %v3932_v23 = vmax.f32 %v3900_v43, 0.0  ;;  %v3898_v14 = vadd.f32 %v7339_v22, %v3859_v5  ;;  %v3864_v13 = vadd.f32 %v5200_v9, %v3442_v41  ;;  %v3440_v40 = vadd.f32 %v3349_v29, %v2922_v57  ;;  %v3774_v55 = vpop.f32.mrf.mxu0  ;;  %v7779_v9 = vld [vmem:[#allocation23_spill] sm:$0xff]  ;;  %v7783_v29 = vld [vmem:[#allocation20_spill] sm:$0xff] }
 0x1e4   : > { %v4655_v28 = vpack.c.bf16 %v3929_v16, %v3929_v16  ;;  %v5167_v0 = vpop.f32.mrf.mxu1  ;;  %v2602_v27 = vadd.f32 %v7779_v9, %v7778_v6  ;;  %v7780_v57 = vld [vmem:[#allocation7_spill] sm:$0xff]  ;;  %v2927_v16 = vadd.f32 %v7782_v46, %v2597_v44  ;;  %v2604_v44 = vadd.f32 %v7794_v26, %v7793_v49 }
 0x1e5   : > { %v4658_v59 = vpack.c.bf16 %v3932_v23, %v3932_v23  ;;  %v3930_v31 = vmax.f32 %v3898_v14, 0.0  ;;  %v3903_v48 = vadd.f32 %v7339_v22, %v3864_v13  ;;  %v3862_v25 = vadd.f32 %v3771_v12, %v3440_v40  ;;  %v5204_v36 = vpop.f32.mrf.mxu0  ;;  %v7784_v14 = vld [vmem:[#allocation6_spill] sm:$0xff]  ;;  %v7785_v13 = vld [vmem:[#allocation27_spill] sm:$0xff] }
 0x1e6   : > { %4090 = vst.msk [vmem:[%s7359_s19 + $0x20] sm:$0xf] %vm4081_vm4, %v4655_v28  ;;  %v3443_v54 = vadd.f32 %v5167_v0, %v2925_v20  ;;  %v3352_v2 = vpop.f32.mrf.mxu1  ;;  %v2600_v62 = vadd.f32 %v7781_v39, %v7780_v57  ;;  %v2932_v23 = vadd.f32 %v7783_v29, %v2602_v27  ;;  %v2603_v40 = vadd.f32 %v7785_v13, %v7784_v14  ;;  %v7800_v29 = vld [vmem:[#allocation37_spill] sm:$0xff] }
 0x1e7   : > { %4093 = vst.msk [vmem:[%s7359_s19 + $0x2c] sm:$0xf] %vm4081_vm4, %v4658_v59  ;;  %v4656_v1 = vpack.c.bf16 %v3930_v31, %v3930_v31  ;;  %v3935_v63 = vmax.f32 %v3903_v48, 0.0  ;;  %v3901_v42 = vadd.f32 %v7339_v22, %v3862_v25  ;;  %v3441_v47 = vadd.f32 %v3352_v2, %v2923_v45  ;;  %v3787_v21 = vpop.f32.mrf.mxu0  ;;  %v7786_v31 = vld [vmem:[#allocation22_spill] sm:$0xff]  ;;  %v7787_v25 = vld [vmem:[#allocation9_spill] sm:$0xff] }
 0x1e8   : > { %v3865_v34 = vadd.f32 %v5201_v15, %v3443_v54  ;;  %v5170_v51 = vpop.f32.mrf.mxu1  ;;  %v2930_v48 = vadd.f32 %v7786_v31, %v2600_v62  ;;  %v7803_v31 = vld [vmem:[#allocation39_spill] sm:$0xff] }
 0x1e9   : > { %4091 = vst.msk [vmem:[%s7359_s19 + $0x24] sm:$0xf] %vm4081_vm4, %v4656_v1  ;;  %v4661_v38 = vpack.c.bf16 %v3935_v63, %v3935_v63  ;;  %v3933_v35 = vmax.f32 %v3901_v42, 0.0  ;;  %v3863_v58 = vadd.f32 %v3774_v55, %v3441_v47  ;;  %v3446_v4 = vadd.f32 %v5170_v51, %v2928_v30  ;;  %v5205_v3 = vpop.f32.mrf.mxu0  ;;  %v7789_v42 = vld [vmem:[#allocation24_spill] sm:$0xff] }
 0x1ea   : > { %v3904_v61 = vadd.f32 %v7339_v22, %v3865_v34  ;;  %v3365_v33 = vpop.f32.mrf.mxu1  ;;  %v2933_v47 = vadd.f32 %v7789_v42, %v2603_v40 }
 0x1eb   : > { %4096 = vst.msk [vmem:[%s7359_s19 + $0x38] sm:$0xf] %vm4081_vm4, %v4661_v38  ;;  %v4659_v37 = vpack.c.bf16 %v3933_v35, %v3933_v35  ;;  %v3902_v56 = vadd.f32 %v7339_v22, %v3863_v58  ;;  %v3868_v8 = vadd.f32 %v5204_v36, %v3446_v4  ;;  %v3444_v32 = vadd.f32 %v3365_v33, %v2926_v53  ;;  %v3790_v12 = vpop.f32.mrf.mxu0  ;;  %v7788_v36 = vld [vmem:[#allocation29_spill] sm:$0xff]  ;;  %v7790_v58 = vld [vmem:[#allocation26_spill] sm:$0xff] }
 0x1ec   : > { %v3936_v19 = vmax.f32 %v3904_v61, 0.0  ;;  %v5171_v60 = vpop.f32.mrf.mxu1  ;;  %v2601_v30 = vadd.f32 %v7788_v36, %v7787_v25 }
 0x1ed   : > { %4094 = vst.msk [vmem:[%s7359_s19 + $0x30] sm:$0xf] %vm4081_vm4, %v4659_v37  ;;  %v3934_v50 = vmax.f32 %v3902_v56, 0.0  ;;  %v3907_v43 = vadd.f32 %v7339_v22, %v3868_v8  ;;  %v3866_v5 = vadd.f32 %v3787_v21, %v3444_v32  ;;  %v3447_v41 = vadd.f32 %v5171_v60, %v2929_v24  ;;  %v5208_v15 = vpop.f32.mrf.mxu0  ;;  %v7795_v8 = vld [vmem:[#allocation12_spill] sm:$0xff]  ;;  %v7796_v32 = vld [vmem:[#allocation35_spill] sm:$0xff] }
 0x1ee   : > { %v4662_v55 = vpack.c.bf16 %v3936_v19, %v3936_v19  ;;  %v3368_v20 = vpop.f32.mrf.mxu1  ;;  %v2931_v4 = vadd.f32 %v7790_v58, %v2601_v30  ;;  %v7807_v58 = vld [vmem:[#allocation41_spill] sm:$0xff] }
 0x1ef   : > { %v4660_v45 = vpack.c.bf16 %v3934_v50, %v3934_v50  ;;  %v3939_v7 = vmax.f32 %v3907_v43, 0.0  ;;  %v3905_v28 = vadd.f32 %v7339_v22, %v3866_v5  ;;  %v3869_v0 = vadd.f32 %v5205_v3, %v3447_v41  ;;  %v3803_v59 = vpop.f32.mrf.mxu0  ;;  %v7791_v3 = vld [vmem:[#allocation8_spill] sm:$0xff] }
 0x1f0   : > { %4097 = vst.msk [vmem:[%s7359_s19 + $0x3c] sm:$0xf] %vm4081_vm4, %v4662_v55  ;;  %v3445_v11 = vadd.f32 %v3368_v20, %v2927_v16  ;;  %v5174_v18 = vpop.f32.mrf.mxu1  ;;  %v2606_v24 = vadd.f32 %v7792_v17, %v7791_v3  ;;  %v7797_v5 = vld [vmem:[#allocation28_spill] sm:$0xff]  ;;  %v7799_v16 = vld [vmem:[#allocation10_spill] sm:$0xff]  ;;  %v7809_v17 = vld [vmem:[#allocation43_spill] sm:$0xff] }
 0x1f1   : > { %4095 = vst.msk [vmem:[%s7359_s19 + $0x34] sm:$0xf] %vm4081_vm4, %v4660_v45  ;;  %v4665_v10 = vpack.c.bf16 %v3939_v7, %v3939_v7  ;;  %v3937_v54 = vmax.f32 %v3905_v28, 0.0  ;;  %v3908_v2 = vadd.f32 %v7339_v22, %v3869_v0  ;;  %v3450_v1 = vadd.f32 %v5174_v18, %v2932_v23  ;;  %v5209_v63 = vpop.f32.mrf.mxu0  ;;  %v7801_v28 = vld [vmem:[#allocation32_spill] sm:$0xff]  ;;  %v7808_v3 = vld [vmem:[#allocation14_spill] sm:$0xff] }
 0x1f2   : > { %v3867_v21 = vadd.f32 %v3790_v12, %v3445_v11  ;;  %v3381_v52 = vpop.f32.mrf.mxu1  ;;  %v2607_v12 = vadd.f32 %v7796_v32, %v7795_v8  ;;  %v2936_v41 = vadd.f32 %v7797_v5, %v2606_v24  ;;  %v2605_v23 = vadd.f32 %v7800_v29, %v7799_v16 }
 0x1f3   : > { %4100 = vst.msk [vmem:[%s7359_s19 + $0x48] sm:$0xf] %vm4081_vm4, %v4665_v10  ;;  %v4663_v53 = vpack.c.bf16 %v3937_v54, %v3937_v54  ;;  %v3940_v34 = vmax.f32 %v3908_v2, 0.0  ;;  %v3872_v51 = vadd.f32 %v5208_v15, %v3450_v1  ;;  %v3448_v38 = vadd.f32 %v3381_v52, %v2930_v48  ;;  %v3806_v35 = vpop.f32.mrf.mxu0  ;;  %v7798_v15 = vld [vmem:[#allocation30_spill] sm:$0xff] }
 0x1f4   : > { %v3906_v6 = vadd.f32 %v7339_v22, %v3867_v21  ;;  %v5175_v9 = vpop.f32.mrf.mxu1  ;;  %v2934_v46 = vadd.f32 %v7798_v15, %v2604_v44  ;;  %v2937_v0 = vadd.f32 %v7801_v28, %v2607_v12  ;;  %v7804_v2 = vld [vmem:[#allocation34_spill] sm:$0xff]  ;;  %v2611_v24 = vadd.f32 %v7809_v17, %v7808_v3 }
 0x1f5   : > { %4098 = vst.msk [vmem:[%s7359_s19 + $0x40] sm:$0xf] %vm4081_vm4, %v4663_v53  ;;  %v4666_v27 = vpack.c.bf16 %v3940_v34, %v3940_v34  ;;  %v3911_v61 = vadd.f32 %v7339_v22, %v3872_v51  ;;  %v3870_v33 = vadd.f32 %v3803_v59, %v3448_v38  ;;  %v3451_v37 = vadd.f32 %v5175_v9, %v2933_v47  ;;  %v5212_v56 = vpop.f32.mrf.mxu0  ;;  %v7802_v59 = vld [vmem:[#allocation5_spill] sm:$0xff]  ;;  %v7805_v51 = vld [vmem:[#allocation36_spill] sm:$0xff] }
 0x1f6   : > { %v3938_v57 = vmax.f32 %v3906_v6, 0.0  ;;  %v3384_v39 = vpop.f32.mrf.mxu1  ;;  %v2610_v48 = vadd.f32 %v7803_v31, %v7802_v59  ;;  %v2935_v1 = vadd.f32 %v7804_v2, %v2605_v23  ;;  %v7814_v23 = vld [vmem:[#allocation42_spill] sm:$0xff] }
 0x1f7   : > { %4101 = vst.msk [vmem:[%s7359_s19 + $0x4c] sm:$0xf] %vm4081_vm4, %v4666_v27  ;;  %v3943_v62 = vmax.f32 %v3911_v61, 0.0  ;;  %v3909_v19 = vadd.f32 %v7339_v22, %v3870_v33  ;;  %v3873_v60 = vadd.f32 %v5209_v63, %v3451_v37  ;;  %v3449_v50 = vadd.f32 %v3384_v39, %v2931_v4  ;;  %v3819_v43 = vpop.f32.mrf.mxu0  ;;  %v7810_v61 = vld [vmem:[#allocation15_spill] sm:$0xff]  ;;  %v7811_v33 = vld [vmem:[#allocation44_spill] sm:$0xff] }
 0x1f8   : > { %v4664_v14 = vpack.c.bf16 %v3938_v57, %v3938_v57  ;;  %v5178_v13 = vpop.f32.mrf.mxu1  ;;  %v2940_v38 = vadd.f32 %v7805_v51, %v2610_v48  ;;  %v2609_v37 = vadd.f32 %v7811_v33, %v7810_v61 }
 0x1f9   : > { %v4669_v40 = vpack.c.bf16 %v3943_v62, %v3943_v62  ;;  %v3941_v55 = vmax.f32 %v3909_v19, 0.0  ;;  %v3912_v20 = vadd.f32 %v7339_v22, %v3873_v60  ;;  %v3871_v45 = vadd.f32 %v3806_v35, %v3449_v50  ;;  %v5213_v7 = vpop.f32.mrf.mxu0  ;;  %v7806_v35 = vld [vmem:[#allocation13_spill] sm:$0xff]  ;;  %v7812_v19 = vld [vmem:[#allocation38_spill] sm:$0xff]  ;;  %v7813_v50 = vld [vmem:[#allocation40_spill] sm:$0xff] }
 0x1fa   : > { %4099 = vst.msk [vmem:[%s7359_s19 + $0x44] sm:$0xf] %vm4081_vm4, %v4664_v14  ;;  %v3454_v25 = vadd.f32 %v5178_v13, %v2936_v41  ;;  %v3397_v36 = vpop.f32.mrf.mxu1  ;;  %v2608_v4 = vadd.f32 %v7807_v58, %v7806_v35  ;;  %v2939_v14 = vadd.f32 %v7814_v23, %v2609_v37 }
 0x1fb   : > { %4104 = vst.msk [vmem:[%s7359_s19 + $0x58] sm:$0xf] %vm4081_vm4, %v4669_v40  ;;  %v4667_v30 = vpack.c.bf16 %v3941_v55, %v3941_v55  ;;  %v3944_v11 = vmax.f32 %v3912_v20, 0.0  ;;  %v3910_v18 = vadd.f32 %v7339_v22, %v3871_v45  ;;  %v3452_v10 = vadd.f32 %v3397_v36, %v2934_v46  ;;  %v3822_v54 = vpop.f32.mrf.mxu0 }
 0x1fc   : > { %v3876_v63 = vadd.f32 %v5212_v56, %v3454_v25  ;;  %v5179_v42 = vpop.f32.mrf.mxu1  ;;  %v2938_v60 = vadd.f32 %v7812_v19, %v2608_v4 }
 0x1fd   : > { %4102 = vst.msk [vmem:[%s7359_s19 + $0x50] sm:$0xf] %vm4081_vm4, %v4667_v30  ;;  %v4670_v47 = vpack.c.bf16 %v3944_v11, %v3944_v11  ;;  %v3942_v21 = vmax.f32 %v3910_v18, 0.0  ;;  %v3874_v52 = vadd.f32 %v3819_v43, %v3452_v10  ;;  %v3455_v53 = vadd.f32 %v5179_v42, %v2937_v0  ;;  %v5216_v34 = vpop.f32.mrf.mxu0 }
 0x1fe   : > { %v3915_v49 = vadd.f32 %v7339_v22, %v3876_v63  ;;  %v3400_v26 = vpop.f32.mrf.mxu1  ;;  %v2941_v43 = vadd.f32 %v7813_v50, %v2611_v24 }
 0x1ff   : > { %4105 = vst.msk [vmem:[%s7359_s19 + $0x5c] sm:$0xf] %vm4081_vm4, %v4670_v47  ;;  %v4668_v44 = vpack.c.bf16 %v3942_v21, %v3942_v21  ;;  %v3913_v6 = vadd.f32 %v7339_v22, %v3874_v52  ;;  %v3877_v9 = vadd.f32 %v5213_v7, %v3455_v53  ;;  %v3453_v27 = vadd.f32 %v3400_v26, %v2935_v1  ;;  %v3835_v32 = vpop.f32.mrf.mxu0 }
 0x200   : > { %v3947_v56 = vmax.f32 %v3915_v49, 0.0  ;;  %v5182_v8 = vpop.f32.mrf.mxu1 }
 0x201   : > { %4103 = vst.msk [vmem:[%s7359_s19 + $0x54] sm:$0xf] %vm4081_vm4, %v4668_v44  ;;  %v3945_v12 = vmax.f32 %v3913_v6, 0.0  ;;  %v3916_v57 = vadd.f32 %v7339_v22, %v3877_v9  ;;  %v3875_v39 = vadd.f32 %v3822_v54, %v3453_v27  ;;  %v3458_v62 = vadd.f32 %v5182_v8, %v2940_v38  ;;  %v5217_v55 = vpop.f32.mrf.mxu0 }
 0x202   : > { %v4673_v5 = vpack.c.bf16 %v3947_v56, %v3947_v56  ;;  %v3413_v41 = vpop.f32.mrf.mxu1 }
 0x203   : > { %v4671_v15 = vpack.c.bf16 %v3945_v12, %v3945_v12  ;;  %v3948_v46 = vmax.f32 %v3916_v57, 0.0  ;;  %v3914_v16 = vadd.f32 %v7339_v22, %v3875_v39  ;;  %v3880_v29 = vadd.f32 %v5216_v34, %v3458_v62  ;;  %v3838_v11 = vpop.f32.mrf.mxu0 }
 0x204   : > { %4108 = vst.msk [vmem:[%s7359_s19 + $0x68] sm:$0xf] %vm4081_vm4, %v4673_v5  ;;  %v3456_v13 = vadd.f32 %v3413_v41, %v2938_v60  ;;  %v5183_v40 = vpop.f32.mrf.mxu1 }
 0x205   : > { %4106 = vst.msk [vmem:[%s7359_s19 + $0x60] sm:$0xf] %vm4081_vm4, %v4671_v15  ;;  %v4674_v20 = vpack.c.bf16 %v3948_v46, %v3948_v46  ;;  %v3946_v45 = vmax.f32 %v3914_v16, 0.0  ;;  %v3919_v7 = vadd.f32 %v7339_v22, %v3880_v29  ;;  %v3459_v28 = vadd.f32 %v5183_v40, %v2941_v43 }
 0x206   : > { %v3878_v0 = vadd.f32 %v3835_v32, %v3456_v13  ;;  %v3416_v59 = vpop.f32.mrf.mxu1 }
 0x207   : > { %4109 = vst.msk [vmem:[%s7359_s19 + $0x6c] sm:$0xf] %vm4081_vm4, %v4674_v20  ;;  %v4672_v31 = vpack.c.bf16 %v3946_v45, %v3946_v45  ;;  %v3951_v48 = vmax.f32 %v3919_v7, 0.0  ;;  %v3881_v25 = vadd.f32 %v5217_v55, %v3459_v28  ;;  %v3457_v36 = vadd.f32 %v3416_v59, %v2939_v14 }
 0x208   : > { %v3917_v30 = vadd.f32 %v7339_v22, %v3878_v0 }
 0x209   : > { %4107 = vst.msk [vmem:[%s7359_s19 + $0x64] sm:$0xf] %vm4081_vm4, %v4672_v31  ;;  %v4677_v18 = vpack.c.bf16 %v3951_v48, %v3951_v48  ;;  %v3920_v10 = vadd.f32 %v7339_v22, %v3881_v25  ;;  %v3879_v54 = vadd.f32 %v3838_v11, %v3457_v36 }
 0x20a   : > { %v3949_v2 = vmax.f32 %v3917_v30, 0.0 }
 0x20b   : > { %4112 = vst.msk [vmem:[%s7359_s19 + $0x78] sm:$0xf] %vm4081_vm4, %v4677_v18  ;;  %v3952_v1 = vmax.f32 %v3920_v10, 0.0  ;;  %v3918_v63 = vadd.f32 %v7339_v22, %v3879_v54 }
 0x20c   : > { %v4675_v42 = vpack.c.bf16 %v3949_v2, %v3949_v2 }
 0x20d   : > { %v4678_v47 = vpack.c.bf16 %v3952_v1, %v3952_v1  ;;  %v3950_v21 = vmax.f32 %v3918_v63, 0.0 }
 0x20e   : > { %4110 = vst.msk [vmem:[%s7359_s19 + $0x70] sm:$0xf] %vm4081_vm4, %v4675_v42 }
 0x20f   : > { %4113 = vst.msk [vmem:[%s7359_s19 + $0x7c] sm:$0xf] %vm4081_vm4, %v4678_v47  ;;  %v4676_v52 = vpack.c.bf16 %v3950_v21, %v3950_v21 }
 0x211   : > { %4111 = vst.msk [vmem:[%s7359_s19 + $0x74] sm:$0xf] %vm4081_vm4, %v4676_v52 }
 0x212 PF: > { %s13_s14 = sadd.s32 1, %s5341_s14   ;;  %s7815_s12 = smov %s5337_s13 }
 0x213   : > { %p10_p5 = scmp.ge.s32.totalorder %s13_s14, 4   ;;  %s7816_s13 = smov %s7818_s15 }
 0x215   :  { %12 = sbr.rel (!%p10_p5) target bundleno = 2 (0x2), region = 73 }

// kernel: _lambda_.9
= control target key start
LH: loop header
LB: loop body
LE: loop exit
PB: predicated region body
PF: predicated region fallthrough
CT: control target
= control target key end

     0   :  { %s5549_s12 = smov 0   ;;  %s5551_s13 = smov 0   ;;  %s7716_s0 = inlined_call_operand.vmem [shape: bf16[2,18,18,32], index: 0, kind: input, shape index: {}]   ;;  %s7717_s1 = inlined_call_operand.vmem [shape: bf16[9,32,32], index: 1, kind: input, shape index: {}]   ;;  %s7718_s2 = inlined_call_operand.vmem [shape: f32[1,32], index: 2, kind: input, shape index: {}]   ;;  %s7719_s3 = inlined_call_operand.vmem [shape: bf16[2,16,16,32], index: 3, kind: output, shape index: {}]  }
   0x1   :  { %s5553_s14 = smov 0  }
   0x2 LB: > { %s25_s15 = sadd.s32 1, %s5523_s13  ;;  %p4322_p0 = scmp.ge.s32.totalorder %s5527_s14, 1  ;;  %s5527_s14 = sphi %s5553_s14, %s13_s14   ;;  %s5523_s13 = sphi %s5551_s13, %s7971_s13   ;;  %s5519_s12 = sphi %s5549_s12, %s7970_s12  }
   0x3   : > { %p27_p1 = scmp.ge.s32.totalorder %s25_s15, 2  ;;  %p151_p2 = scmp.lt.s32.totalorder %s5527_s14, 3 }
   0x5   : > { %s7973_s15 = smov (%p27_p1, %s25_s15), 0  ;;  %p152_p3 = pnand %p4322_p0, %p151_p2 }
   0x7   : > { %155 = sbr.rel (%p152_p3) target bundleno = 528 (0x210), region = 32 }
   0xc   : > { %v5423_v0 = vld [vmem:[%s7717_s1 + $0x18] sm:$0xff]   ;;  %p180_p4 = scmp.lt.s32.totalorder %s5519_s12, 1  ;;  %v5424_v1 = vld [vmem:[%s7717_s1 + $0x10] sm:$0xff]   ;;  %v5578_v2 = vld [vmem:[%s7717_s1 + $0x8] sm:$0xff]   ;;  %vm365_vm0 = vcmask 1046528   ;;  %vm511_vm1 = vcmask 261120  }
   0xd   : > { %5394 = vmatprep.subr.bf16.mxu1 %v5423_v0  ;;  %5070 = vmatprep.subr.bf16.mxu0 %v5423_v0  ;;  %v5584_v3 = vld [vmem:[%s7717_s1 + $0x28] sm:$0xff]   ;;  %v5429_v62 = vld [vmem:[%s7717_s1 + $0x20] sm:$0xff]   ;;  %vm990_vm2 = vcmask 1045504   ;;  %vm4188_vm3 = vcmask 257024  }
   0xe   : > { %s7975_s12 = smov (!%p180_p4, %s5519_s12), 1  ;;  %5396 = vmatpush3.bf16.msra.mxu1 %v5423_v0  ;;  %5071 = vmatpush3.bf16.msra.mxu0 %v5423_v0 }
   0xf   : > { %5395 = vmatprep.subr.bf16.mxu1 %v5424_v1  ;;  %5072 = vmatprep.subr.bf16.mxu0 %v5424_v1  ;;  %s5398_s22 = smul.u32 216, %s7975_s12  ;;  %s4795_s8 = sshll.u32 %s7975_s12, 7 }
  0x10   : > { %s7537_s10 = scalar_lea.vmem %s7719_s3, %s4795_s8 }
  0x11   : > { %s5589_s27 = scalar_lea.vmem %s7716_s0, %s5398_s22 }
  0x12   : > { %5397 = vmatpush3.bf16.msra.mxu1 %v5424_v1  ;;  %5073 = vmatpush3.bf16.msra.mxu0 %v5424_v1  ;;  %v5592_v4 = vld [vmem:[%s5589_s27] sm:$0xff]   ;;  %v285_v5 = vld [vmem:[%s5589_s27 + $0x8] sm:$0x1]  ;;  %v5606_v12 = vld [vmem:[%s5589_s27 + $0xc] sm:$0xff]  }
  0x13   : > { %v5596_v6 = vld [vmem:[%s5589_s27 + $0x60] sm:$0xff]   ;;  %v233_v7 = vunpack.c.l.bf16 %v5592_v4  ;;  %v234_v8 = vunpack.c.h.bf16 %v5592_v4  ;;  %v301_v9 = vunpack.c.l.bf16 %v285_v5  ;;  %v5602_v11 = vld [vmem:[%s5589_s27 + $0x68] sm:$0x1]  ;;  %5106 = vmatprep.subr.bf16.mxu1 %v5578_v2  ;;  %5142 = vmatprep.subr.bf16.mxu0 %v5584_v3  ;;  %v235_v15 = vunpack.c.l.bf16 %v5606_v12  ;;  %v5618_v23 = vld [vmem:[%s5589_s27 + $0x14] sm:$0x1] }
  0x14   : > { %v249_v10 = vunpack.c.l.bf16 %v5596_v6  ;;  %v250_v13 = vunpack.c.h.bf16 %v5596_v6  ;;  %v309_v14 = vunpack.c.l.bf16 %v5602_v11  ;;  %v236_v19 = vunpack.c.h.bf16 %v5606_v12  ;;  %v5623_v26 = vld [vmem:[%s5589_s27 + $0x6c] sm:$0xff]   ;;  %v5626_v27 = vld [vmem:[%s5589_s27 + $0x74] sm:$0x1]  ;;  %v5633_v32 = vld [vmem:[%s5589_s27 + $0x18] sm:$0xff]  }
  0x15   : > { %v366_v16 = vrot.slane %v233_v7, 1  ;;  %v367_v17 = vrot.slane %v234_v8, 1  ;;  %v369_v18 = vrot.slane %v301_v9, 1  ;;  %v5628_v29 = vrot.slane %v234_v8, 2  ;;  %v5643_v41 = vld [vmem:[%s5589_s27 + $0x20] sm:$0x1] }
  0x16   : > { %v406_v20 = vrot.slane %v249_v10, 1  ;;  %v407_v21 = vrot.slane %v250_v13, 1  ;;  %v409_v22 = vrot.slane %v309_v14, 1  ;;  %v302_v34 = vunpack.c.l.bf16 %v5618_v23  ;;  %v5646_v42 = vld [vmem:[%s5589_s27 + $0x78] sm:$0xff]   ;;  %v5661_v51 = vld [vmem:[%s5589_s27 + $0x80] sm:$0x1] }
  0x17   : > { %v368_v24 = vsel %vm365_vm0, %v366_v16, %v367_v17  ;;  %v370_v25 = vsel %vm365_vm0, %v367_v17, %v369_v18  ;;  %v371_v35 = vrot.slane %v235_v15, 1  ;;  %v372_v36 = vrot.slane %v236_v19, 1  ;;  %v5667_v56 = vld [vmem:[%s5589_s27 + $0x24] sm:$0xff]   ;;  %v5674_v61 = vld [vmem:[%s5589_s27 + $0x2c] sm:$0x1] }
  0x18   : > { %v478_v28 = vpack.c.bf16 %v370_v25, %v368_v24  ;;  %v408_v30 = vsel %vm365_vm0, %v406_v20, %v407_v21  ;;  %v410_v31 = vsel %vm365_vm0, %v407_v21, %v409_v22  ;;  %v5637_v37 = vrot.slane %v301_v9, 2  ;;  %v5684_v7 = vld [vmem:[%s5589_s27 + $0x84] sm:$0xff]   ;;  %v5702_v21 = vld [vmem:[%s5589_s27 + $0x8c] sm:$0x1] }
  0x19   : > { %v486_v33 = vpack.c.bf16 %v410_v31, %v408_v30  ;;  %v251_v38 = vunpack.c.l.bf16 %v5623_v26  ;;  %v7729_v39 = vunpack.c.h.bf16 %v5623_v26  ;;  %v7728_v40 = vunpack.c.l.bf16 %v5626_v27  ;;  %v5428_v8 = vld [vmem:[%s7717_s1] sm:$0xff]   ;;  %v5712_v30 = vld [vmem:[%s5589_s27 + $0x38] sm:$0x1]  ;;  %v5922_v11 = vld [vmem:[%s7717_s1 + $0x68] sm:$0xff]  }
  0x1a   : > { %5074 = vmatprep.mubr.msk.bf16.mxu0 %vm511_vm1, %v478_v28  ;;  %v373_v43 = vsel %vm365_vm0, %v371_v35, %v372_v36  ;;  %v374_v44 = vrot.slane %v302_v34, 1  ;;  %v5652_v45 = vrot.slane %v236_v19, 2  ;;  %v237_v46 = vunpack.c.l.bf16 %v5633_v32  ;;  %v5709_v28 = vld [vmem:[%s5589_s27 + $0x30] sm:$0xff]  }
  0x1b   : > { %5090 = vmatprep.mubr.msk.bf16.mxu1 %vm511_vm1, %v486_v33  ;;  %v411_v47 = vrot.slane %v251_v38, 1  ;;  %v412_v48 = vrot.slane %v7729_v39, 1  ;;  %v414_v49 = vrot.slane %v7728_v40, 1  ;;  %v238_v50 = vunpack.c.h.bf16 %v5633_v32  ;;  %v5725_v38 = vld [vmem:[%s7717_s1 + $0x38] sm:$0xff]  }
  0x1c   : > { %v375_v52 = vsel %vm365_vm0, %v372_v36, %v374_v44  ;;  %v303_v53 = vunpack.c.l.bf16 %v5643_v41  ;;  %v376_v54 = vrot.slane %v237_v46, 1  ;;  %v253_v55 = vunpack.c.l.bf16 %v5646_v42  ;;  %v5720_v36 = vld [vmem:[%s5589_s27 + $0x90] sm:$0xff]  }
  0x1d   : > { %v479_v57 = vpack.c.bf16 %v375_v52, %v373_v43  ;;  %v413_v58 = vsel %vm365_vm0, %v411_v47, %v412_v48  ;;  %v415_v59 = vsel %vm365_vm0, %v412_v48, %v414_v49  ;;  %v377_v60 = vrot.slane %v238_v50, 1  ;;  %v5730_v43 = vld [vmem:[%s7717_s1 + $0x48] sm:$0xff]  }
  0x1e   : > { %v487_v63 = vpack.c.bf16 %v415_v59, %v413_v58  ;;  %v379_v0 = vrot.slane %v303_v53, 1  ;;  %v7724_v1 = vunpack.c.h.bf16 %v5646_v42  ;;  %v7722_v5 = vunpack.c.l.bf16 %v5661_v51 }
  0x1f   : > { %5075 = vmatmul.mubr.msk.bf16.vlgmr.msra.gmra.mxu0 %vm511_vm1, %v479_v57  ;;  %v378_v9 = vsel %vm365_vm0, %v376_v54, %v377_v60  ;;  %v416_v10 = vrot.slane %v253_v55, 1  ;;  %v239_v15 = vunpack.c.l.bf16 %v5667_v56  ;;  %v240_v16 = vunpack.c.h.bf16 %v5667_v56  ;;  %v5741_v57 = vld [vmem:[%s5589_s27 + $0x98] sm:$0x1] }
  0x20   : > { %5091 = vmatmul.mubr.msk.bf16.vlgmr.msra.gmra.mxu1 %vm511_vm1, %v487_v63  ;;  %5143 = vmatpush3.bf16.msra.mxu0 %v5584_v3  ;;  %v380_v17 = vsel %vm365_vm0, %v377_v60, %v379_v0  ;;  %v417_v18 = vrot.slane %v7724_v1, 1  ;;  %v419_v19 = vrot.slane %v7722_v5, 1  ;;  %v304_v20 = vunpack.c.l.bf16 %v5674_v61  ;;  %v5749_v0 = vld [vmem:[%s5589_s27 + $0x3c] sm:$0xff]  }
  0x21   : > { %5107 = vmatpush3.bf16.msra.mxu1 %v5578_v2  ;;  %v480_v22 = vpack.c.bf16 %v380_v17, %v378_v9  ;;  %v381_v24 = vrot.slane %v239_v15, 1  ;;  %v382_v3 = vrot.slane %v240_v16, 1  ;;  %v255_v25 = vunpack.c.l.bf16 %v5684_v7  ;;  %5144 = vmatprep.subr.bf16.mxu0 %v5429_v62  ;;  %v5756_v17 = vld [vmem:[%s5589_s27 + $0x44] sm:$0x1] }
  0x22   : > { %v418_v31 = vsel %vm365_vm0, %v416_v10, %v417_v18  ;;  %v420_v33 = vsel %vm365_vm0, %v417_v18, %v419_v19  ;;  %v384_v2 = vrot.slane %v304_v20, 1  ;;  %v7727_v35 = vunpack.c.h.bf16 %v5684_v7  ;;  %5108 = vmatprep.subr.bf16.mxu1 %v5428_v8 }
  0x23   : > { %5078 = vmatprep.mubr.msk.bf16.mxu0 %vm511_vm1, %v480_v22  ;;  %v488_v44 = vpack.c.bf16 %v420_v33, %v418_v31  ;;  %v383_v46 = vsel %vm365_vm0, %v381_v24, %v382_v3  ;;  %v7725_v47 = vunpack.c.l.bf16 %v5702_v21  ;;  %v421_v48 = vrot.slane %v255_v25, 1  ;;  %v5766_v24 = vld [vmem:[%s5589_s27 + $0x9c] sm:$0xff]  }
  0x24   : > { %v385_v49 = vsel %vm365_vm0, %v382_v3, %v384_v2  ;;  %v422_v52 = vrot.slane %v7727_v35, 1  ;;  %v241_v54 = vunpack.c.l.bf16 %v5709_v28  ;;  %v242_v55 = vunpack.c.h.bf16 %v5709_v28  ;;  %5145 = vmatpush3.bf16.msra.mxu0 %v5429_v62  ;;  %v5773_v2 = vld [vmem:[%s5589_s27 + $0xa4] sm:$0x1] }
  0x25   : > { %5094 = vmatprep.mubr.msk.bf16.mxu1 %vm511_vm1, %v488_v44  ;;  %v481_v58 = vpack.c.bf16 %v385_v49, %v383_v46  ;;  %v424_v59 = vrot.slane %v7725_v47, 1  ;;  %v305_v60 = vunpack.c.l.bf16 %v5712_v30  ;;  %v257_v63 = vunpack.c.l.bf16 %v5720_v36  ;;  %5109 = vmatpush3.bf16.msra.mxu1 %v5428_v8 }
  0x26   : > { %v423_v9 = vsel %vm365_vm0, %v421_v48, %v422_v52  ;;  %v386_v10 = vrot.slane %v241_v54, 1  ;;  %v387_v62 = vrot.slane %v242_v55, 1  ;;  %v7721_v15 = vunpack.c.h.bf16 %v5720_v36  ;;  %5178 = vmatprep.subr.bf16.mxu1 %v5725_v38  ;;  %5214 = vmatprep.subr.bf16.mxu0 %v5730_v43  ;;  %v5784_v54 = vld [vmem:[%s5589_s27 + $0x50] sm:$0x1] }
  0x27   : > { %5079 = vmatmul.mubr.msk.bf16.gmra.mxu0 %vm511_vm1, %v481_v58  ;;  %v425_v8 = vsel %vm365_vm0, %v422_v52, %v424_v59  ;;  %v389_v18 = vrot.slane %v305_v60, 1  ;;  %v7720_v19 = vunpack.c.l.bf16 %v5741_v57  ;;  %v426_v22 = vrot.slane %v257_v63, 1  ;;  %v5781_v52 = vld [vmem:[%s5589_s27 + $0x48] sm:$0xff]  }
  0x28   : > { %v489_v3 = vpack.c.bf16 %v425_v8, %v423_v9  ;;  %v388_v25 = vsel %vm365_vm0, %v386_v10, %v387_v62  ;;  %v427_v31 = vrot.slane %v7721_v15, 1  ;;  %v243_v33 = vunpack.c.l.bf16 %v5749_v0 }
  0x29   : > { %v390_v44 = vsel %vm365_vm0, %v387_v62, %v389_v18  ;;  %v429_v46 = vrot.slane %v7720_v19, 1  ;;  %v7735_v48 = vunpack.c.h.bf16 %v5749_v0  ;;  %v7732_v49 = vunpack.c.l.bf16 %v5756_v17 }
  0x2a   : > { %5095 = vmatmul.mubr.msk.bf16.gmra.mxu1 %vm511_vm1, %v489_v3  ;;  %v482_v58 = vpack.c.bf16 %v390_v44, %v388_v25  ;;  %v428_v59 = vsel %vm365_vm0, %v426_v22, %v427_v31  ;;  %v391_v63 = vrot.slane %v243_v33, 1  ;;  %v259_v9 = vunpack.c.l.bf16 %v5766_v24  ;;  %v5799_v44 = vld [vmem:[%s5589_s27 + $0xa8] sm:$0xff]  }
  0x2b   : > { %v430_v10 = vsel %vm365_vm0, %v427_v31, %v429_v46  ;;  %v392_v62 = vrot.slane %v7735_v48, 1  ;;  %v394_v8 = vrot.slane %v7732_v49, 1  ;;  %v7723_v18 = vunpack.c.h.bf16 %v5766_v24  ;;  %v5802_v31 = vld [vmem:[%s5589_s27 + $0xb0] sm:$0x1]  ;;  %v942_v49 = vld [vmem:[%s5589_s27] sm:$0xe] }
  0x2c   : > { %5082 = vmatprep.mubr.msk.bf16.mxu0 %vm511_vm1, %v482_v58  ;;  %v490_v3 = vpack.c.bf16 %v430_v10, %v428_v59  ;;  %v7726_v25 = vunpack.c.l.bf16 %v5773_v2  ;;  %v431_v22 = vrot.slane %v259_v9, 1  ;;  %v245_v33 = vunpack.c.l.bf16 %v5781_v52  ;;  %v5810_v59 = vld [vmem:[%s5589_s27 + $0x54] sm:$0xff]  }
  0x2d   : > { %v393_v46 = vsel %vm365_vm0, %v391_v63, %v392_v62  ;;  %v395_v19 = vsel %vm365_vm0, %v392_v62, %v394_v8  ;;  %v432_v15 = vrot.slane %v7723_v18, 1  ;;  %v7731_v58 = vunpack.c.h.bf16 %v5781_v52  ;;  %v5817_v62 = vld [vmem:[%s5589_s27 + $0x5c] sm:$0x1] }
  0x2e   : > { %5098 = vmatprep.mubr.msk.bf16.mxu1 %vm511_vm1, %v490_v3  ;;  %v483_v9 = vpack.c.bf16 %v395_v19, %v393_v46  ;;  %v434_v10 = vrot.slane %v7726_v25, 1  ;;  %v7730_v5 = vunpack.c.l.bf16 %v5784_v54  ;;  %v396_v63 = vrot.slane %v245_v33, 1 }
  0x2f   : > { %v433_v8 = vsel %vm365_vm0, %v431_v22, %v432_v15  ;;  %v397_v18 = vrot.slane %v7731_v58, 1  ;;  %v261_v1 = vunpack.c.l.bf16 %v5799_v44  ;;  %v7733_v47 = vunpack.c.h.bf16 %v5799_v44  ;;  %v5831_v22 = vld [vmem:[%s5589_s27 + $0xb4] sm:$0xff]  }
  0x30   : > { %5083 = vmatmul.mubr.msk.bf16.gmra.mxu0 %vm511_vm1, %v483_v9  ;;  %v435_v19 = vsel %vm365_vm0, %v432_v15, %v434_v10  ;;  %v399_v3 = vrot.slane %v7730_v5, 1  ;;  %v7734_v33 = vunpack.c.l.bf16 %v5802_v31  ;;  %v247_v46 = vunpack.c.l.bf16 %v5810_v59  ;;  %v5837_v9 = vld [vmem:[%s5589_s27 + $0xbc] sm:$0x1] }
  0x31   : > { %v491_v25 = vpack.c.bf16 %v435_v19, %v433_v8  ;;  %v398_v35 = vsel %vm365_vm0, %v396_v63, %v397_v18  ;;  %v436_v40 = vrot.slane %v261_v1, 1  ;;  %v437_v39 = vrot.slane %v7733_v47, 1  ;;  %v943_v47 = vld [vmem:[%s5589_s27 + $0xc] sm:$0xe] }
  0x32   : > { %v400_v15 = vsel %vm365_vm0, %v397_v18, %v399_v3  ;;  %v439_v10 = vrot.slane %v7734_v33, 1  ;;  %v7737_v5 = vunpack.c.h.bf16 %v5810_v59  ;;  %v7736_v58 = vunpack.c.l.bf16 %v5817_v62 }
  0x33   : > { %5099 = vmatmul.mubr.msk.bf16.gmra.mxu1 %vm511_vm1, %v491_v25  ;;  %v484_v63 = vpack.c.bf16 %v400_v15, %v398_v35  ;;  %v438_v1 = vsel %vm365_vm0, %v436_v40, %v437_v39  ;;  %v401_v8 = vrot.slane %v247_v46, 1  ;;  %v263_v19 = vunpack.c.l.bf16 %v5831_v22  ;;  %v944_v15 = vld [vmem:[%s5589_s27 + $0x18] sm:$0xe] }
  0x34   : > { %v440_v18 = vsel %vm365_vm0, %v437_v39, %v439_v10  ;;  %v402_v3 = vrot.slane %v7737_v5, 1  ;;  %v404_v33 = vrot.slane %v7736_v58, 1  ;;  %v264_v48 = vunpack.c.h.bf16 %v5831_v22 }
  0x35   : > { %v999_v25 = vrot.slane %v302_v34, 2  ;;  %5086 = vmatprep.mubr.msk.bf16.mxu0 %vm511_vm1, %v484_v63  ;;  %v492_v40 = vpack.c.bf16 %v440_v18, %v438_v1  ;;  %v316_v35 = vunpack.c.l.bf16 %v5837_v9  ;;  %v441_v46 = vrot.slane %v263_v19, 1 }
  0x36   : > { %v403_v39 = vsel %vm365_vm0, %v401_v8, %v402_v3  ;;  %v405_v10 = vsel %vm365_vm0, %v402_v3, %v404_v33  ;;  %v442_v58 = vrot.slane %v264_v48, 1  ;;  %v958_v5 = vunpack.c.l.bf16 %v942_v49  ;;  %v945_v33 = vld [vmem:[%s5589_s27 + $0x24] sm:$0xe] }
  0x37   : > { %5102 = vmatprep.mubr.msk.bf16.mxu1 %vm511_vm1, %v492_v40  ;;  %v485_v23 = vpack.c.bf16 %v405_v10, %v403_v39  ;;  %v444_v34 = vrot.slane %v316_v35, 1  ;;  %v959_v63 = vunpack.c.l.bf16 %v943_v47  ;;  %v995_v8 = vsel %vm990_vm2, %v5628_v29, %v5637_v37  ;;  %v946_v39 = vld [vmem:[%s5589_s27 + $0x30] sm:$0xe] }
  0x38   : > { %v443_v1 = vsel %vm365_vm0, %v441_v46, %v442_v58  ;;  %v991_v19 = vrot.slane %v958_v5, 2  ;;  %v960_v3 = vunpack.c.l.bf16 %v944_v15  ;;  %v1002_v40 = vrot.slane %v238_v50, 2 }
  0x39   : > { %5087 = vmatmul.mubr.msk.bf16.gmra.mxu0 %vm511_vm1, %v485_v23  ;;  %v445_v18 = vsel %vm365_vm0, %v442_v58, %v444_v34  ;;  %v996_v49 = vrot.slane %v959_v63, 2  ;;  %v1000_v46 = vsel %vm990_vm2, %v5652_v45, %v999_v25  ;;  %v1004_v37 = vrot.slane %v303_v53, 2  ;;  %v947_v25 = vld [vmem:[%s5589_s27 + $0x3c] sm:$0xe] }
  0x3a   : > { %v493_v47 = vpack.c.bf16 %v445_v18, %v443_v1  ;;  %v993_v5 = vsel %vm990_vm2, %v991_v19, %v5628_v29  ;;  %v1001_v15 = vrot.slane %v960_v3, 2  ;;  %v961_v23 = vunpack.c.l.bf16 %v945_v33  ;;  %v5442_v33 = vld [vmem:[%s7717_s1 + $0x40] sm:$0xff]   ;;  %v948_v18 = vld [vmem:[%s5589_s27 + $0x48] sm:$0xe] }
  0x3b   : > { %v1103_v10 = vpack.c.bf16 %v995_v8, %v993_v5  ;;  %v998_v58 = vsel %vm990_vm2, %v996_v49, %v5652_v45  ;;  %v1005_v50 = vsel %vm990_vm2, %v1002_v40, %v1004_v37  ;;  %v962_v53 = vunpack.c.l.bf16 %v946_v39  ;;  %v951_v39 = vld [vmem:[%s5589_s27 + $0x6c] sm:$0xe] }
  0x3c   : > { %5103 = vmatmul.mubr.msk.bf16.gmra.mxu1 %vm511_vm1, %v493_v47  ;;  %v1104_v29 = vpack.c.bf16 %v1000_v46, %v998_v58  ;;  %v1003_v41 = vsel %vm990_vm2, %v1001_v15, %v1002_v40  ;;  %v1006_v63 = vrot.slane %v961_v23, 2  ;;  %v1007_v45 = vrot.slane %v240_v16, 2  ;;  %v5932_v47 = vld [vmem:[%s7717_s1 + $0x58] sm:$0xff]  }
  0x3d   : > { %5110 = vmatprep.mubr.msk.bf16.mxu1 %vm511_vm1, %v5592_v4  ;;  %5146 = vmatprep.mubr.msk.bf16.mxu0 %vm511_vm1, %v1103_v10  ;;  %v1105_v34 = vpack.c.bf16 %v1005_v50, %v1003_v41  ;;  %v1009_v1 = vrot.slane %v304_v20, 2  ;;  %v1011_v19 = vrot.slane %v962_v53, 2  ;;  %v1012_v4 = vrot.slane %v242_v55, 2  ;;  %v950_v55 = vld [vmem:[%s5589_s27 + $0x60] sm:$0xe] }
  0x3e   : > { %v1014_v8 = vrot.slane %v305_v60, 2  ;;  %v1032_v49 = vrot.slane %v250_v13, 2  ;;  %v963_v61 = vunpack.c.l.bf16 %v947_v25  ;;  %v1034_v16 = vrot.slane %v309_v14, 2  ;;  %v5440_v13 = vld [vmem:[%s7717_s1 + $0x30] sm:$0xff]  }
  0x3f   : > { %v1008_v20 = vsel %vm990_vm2, %v1006_v63, %v1007_v45  ;;  %v1010_v30 = vsel %vm990_vm2, %v1007_v45, %v1009_v1  ;;  %v1013_v60 = vsel %vm990_vm2, %v1011_v19, %v1012_v4  ;;  %v964_v40 = vunpack.c.l.bf16 %v948_v18  ;;  %v953_v1 = vld [vmem:[%s5589_s27 + $0x84] sm:$0xe] }
  0x40   : > { %v1015_v3 = vsel %vm990_vm2, %v1012_v4, %v1014_v8  ;;  %v7756_v14 = vunpack.c.h.bf16 %v5749_v0  ;;  %v1106_v5 = vpack.c.bf16 %v1010_v30, %v1008_v20  ;;  %v1016_v46 = vrot.slane %v963_v61, 2 }
  0x41   : > { %5147 = vmatmul.mubr.msk.bf16.vlgmr.msra.gmra.mxu0 %vm511_vm1, %v1104_v29  ;;  %v7757_v37 = vunpack.c.l.bf16 %v5756_v17  ;;  %v966_v10 = vunpack.c.l.bf16 %v950_v55  ;;  %v1107_v58 = vpack.c.bf16 %v1015_v3, %v1013_v60  ;;  %v7758_v15 = vunpack.c.h.bf16 %v5781_v52 }
  0x42   : > { %5215 = vmatpush3.bf16.msra.mxu0 %v5730_v43  ;;  %5150 = vmatprep.mubr.msk.bf16.mxu0 %vm511_vm1, %v1105_v34  ;;  %v1017_v43 = vrot.slane %v7756_v14, 2  ;;  %v7759_v50 = vunpack.c.l.bf16 %v5784_v54  ;;  %v5944_v41 = vsel %vm990_vm2, %v1032_v49, %v1034_v16  ;;  %v967_v25 = vunpack.c.l.bf16 %v951_v39 }
  0x43   : > { %5216 = vmatprep.subr.bf16.mxu0 %v5442_v33  ;;  %v1022_v23 = vrot.slane %v7758_v15, 2  ;;  %v1031_v53 = vrot.slane %v966_v10, 2  ;;  %v7760_v17 = vunpack.c.h.bf16 %v5623_v26  ;;  %v7761_v63 = vunpack.c.l.bf16 %v5626_v27 }
  0x44   : > { %5111 = vmatmul.mubr.msk.bf16.vlgmr.msra.gmra.mxu1 %vm511_vm1, %v5606_v12  ;;  %v1019_v12 = vrot.slane %v7757_v37, 2  ;;  %v1024_v29 = vrot.slane %v7759_v50, 2  ;;  %v1018_v54 = vsel %vm990_vm2, %v1016_v46, %v1017_v43  ;;  %v1036_v8 = vrot.slane %v967_v25, 2  ;;  %v955_v50 = vld [vmem:[%s5589_s27 + $0x9c] sm:$0xe] }
  0x45   : > { %5179 = vmatpush3.bf16.msra.mxu1 %v5725_v38  ;;  %5114 = vmatprep.mubr.msk.bf16.mxu1 %vm511_vm1, %v5633_v32  ;;  %v1021_v32 = vrot.slane %v964_v40, 2  ;;  %v949_v38 = vld [vmem:[%s5589_s27 + $0x54] sm:$0xe]  ;;  %v1037_v34 = vrot.slane %v7760_v17, 2  ;;  %v1039_v45 = vrot.slane %v7761_v63, 2  ;;  %v1033_v4 = vsel %vm990_vm2, %v1031_v53, %v1032_v49 }
  0x46   : > { %5180 = vmatprep.subr.bf16.mxu1 %v5440_v13  ;;  %5217 = vmatpush3.bf16.msra.mxu0 %v5442_v33  ;;  %v1020_v19 = vsel %vm990_vm2, %v1017_v43, %v1019_v12  ;;  %v1025_v33 = vsel %vm990_vm2, %v1022_v23, %v1024_v29  ;;  %v965_v18 = vunpack.c.l.bf16 %v949_v38  ;;  %v1111_v61 = vpack.c.bf16 %v5944_v41, %v1033_v4  ;;  %v956_v53 = vld [vmem:[%s5589_s27 + $0xa8] sm:$0xe]  ;;  %v6013_v4 = vld [vmem:[%s5589_s27 + $0x14] sm:$0x1] }
  0x47   : > { %5286 = vmatprep.subr.bf16.mxu0 %v5922_v11  ;;  %v5961_v27 = vsel %vm990_vm2, %v1037_v34, %v1039_v45  ;;  %v1023_v16 = vsel %vm990_vm2, %v1021_v32, %v1022_v23  ;;  %v5966_v20 = vsel %vm990_vm2, %v1036_v8, %v1037_v34  ;;  %v969_v49 = vunpack.c.l.bf16 %v953_v1  ;;  %v954_v23 = vld [vmem:[%s5589_s27 + $0x90] sm:$0xe]  ;;  %v957_v45 = vld [vmem:[%s5589_s27 + $0xb4] sm:$0xe] }
  0x48   : > { %v7762_v30 = vunpack.c.h.bf16 %v5684_v7  ;;  %v7763_v60 = vunpack.c.l.bf16 %v5702_v21  ;;  %v1108_v40 = vpack.c.bf16 %v1020_v19, %v1018_v54  ;;  %v7764_v14 = vunpack.c.h.bf16 %v5810_v59  ;;  %v952_v21 = vld [vmem:[%s5589_s27 + $0x78] sm:$0xe]  ;;  %v6010_v19 = vld [vmem:[%s5589_s27 + $0xc] sm:$0xff]  }
  0x49   : > { %5151 = vmatmul.mubr.msk.bf16.gmra.mxu0 %vm511_vm1, %v1106_v5  ;;  %5181 = vmatpush3.bf16.msra.mxu1 %v5440_v13  ;;  %v1112_v13 = vpack.c.bf16 %v5961_v27, %v5966_v20  ;;  %v1046_v39 = vrot.slane %v969_v49, 2  ;;  %v1109_v5 = vpack.c.bf16 %v1025_v33, %v1023_v16  ;;  %v1026_v46 = vrot.slane %v965_v18, 2 }
  0x4a   : > { %5154 = vmatprep.mubr.msk.bf16.mxu0 %vm511_vm1, %v1107_v58  ;;  %5250 = vmatprep.subr.bf16.mxu1 %v5932_v47  ;;  %v1047_v55 = vrot.slane %v7762_v30, 2  ;;  %v1049_v3 = vrot.slane %v7763_v60, 2  ;;  %v1027_v43 = vrot.slane %v7764_v14, 2  ;;  %v968_v15 = vunpack.c.l.bf16 %v952_v21 }
  0x4b   : > { %v7766_v41 = vunpack.c.h.bf16 %v5646_v42  ;;  %v970_v38 = vunpack.c.l.bf16 %v954_v23  ;;  %v7767_v17 = vunpack.c.l.bf16 %v5661_v51  ;;  %v971_v63 = vunpack.c.l.bf16 %v955_v50 }
  0x4c   : > { %5115 = vmatmul.mubr.msk.bf16.gmra.mxu1 %vm511_vm1, %v5667_v56  ;;  %v7765_v56 = vunpack.c.l.bf16 %v5817_v62  ;;  %v5983_v12 = vsel %vm990_vm2, %v1047_v55, %v1049_v3  ;;  %v5987_v10 = vsel %vm990_vm2, %v1046_v39, %v1047_v55  ;;  %v1028_v58 = vsel %vm990_vm2, %v1026_v46, %v1027_v43 }
  0x4d   : > { %5118 = vmatprep.mubr.msk.bf16.mxu1 %vm511_vm1, %v5709_v28  ;;  %v1114_v28 = vpack.c.bf16 %v5983_v12, %v5987_v10  ;;  %v1042_v32 = vrot.slane %v7766_v41, 2  ;;  %v1041_v25 = vrot.slane %v968_v15, 2  ;;  %v1044_v34 = vrot.slane %v7767_v17, 2  ;;  %v6084_v17 = vld [vmem:[%s5589_s27 + $0x30] sm:$0xff]  }
  0x4e   : > { %v1029_v37 = vrot.slane %v7765_v56, 2  ;;  %v7768_v1 = vunpack.c.h.bf16 %v5720_v36  ;;  %v7769_v8 = vunpack.c.l.bf16 %v5741_v57  ;;  %v7770_v16 = vunpack.c.h.bf16 %v5766_v24  ;;  %v6037_v56 = vld [vmem:[%s5589_s27 + $0x18] sm:$0xff]  }
  0x4f   : > { %v1043_v51 = vsel %vm990_vm2, %v1041_v25, %v1042_v32  ;;  %v1045_v18 = vsel %vm990_vm2, %v1042_v32, %v1044_v34  ;;  %v7771_v30 = vunpack.c.l.bf16 %v5773_v2  ;;  %v1056_v60 = vrot.slane %v971_v63, 2 }
  0x50   : > { %v1030_v62 = vsel %vm990_vm2, %v1027_v43, %v1029_v37  ;;  %v1052_v54 = vrot.slane %v7768_v1, 2  ;;  %v1054_v33 = vrot.slane %v7769_v8, 2  ;;  %v1057_v49 = vrot.slane %v7770_v16, 2  ;;  %v6120_v16 = vld [vmem:[%s5589_s27 + $0x50] sm:$0x1] }
  0x51   : > { %5155 = vmatmul.mubr.msk.bf16.gmra.mxu0 %vm511_vm1, %v1108_v40  ;;  %v1110_v29 = vpack.c.bf16 %v1030_v62, %v1028_v58  ;;  %v1059_v55 = vrot.slane %v7771_v30, 2  ;;  %v7772_v3 = vunpack.c.h.bf16 %v5799_v44  ;;  %v7773_v57 = vunpack.c.l.bf16 %v5802_v31  ;;  %v6040_v31 = vld [vmem:[%s5589_s27 + $0x20] sm:$0x1]  ;;  %v6050_v62 = vld [vmem:[%s5589_s27 + $0x24] sm:$0xff]  }
  0x52   : > { %5158 = vmatprep.mubr.msk.bf16.mxu0 %vm511_vm1, %v1109_v5  ;;  %v973_v14 = vunpack.c.l.bf16 %v957_v45  ;;  %v1767_v39 = vunpack.c.l.bf16 %v6010_v19  ;;  %v1768_v5 = vunpack.c.h.bf16 %v6010_v19  ;;  %v1113_v2 = vpack.c.bf16 %v1045_v18, %v1043_v51  ;;  %v6117_v18 = vld [vmem:[%s5589_s27 + $0x48] sm:$0xff]  }
  0x53   : > { %v1062_v40 = vrot.slane %v7772_v3, 2  ;;  %v7750_v46 = vunpack.c.l.bf16 %v6013_v4  ;;  %v1055_v21 = vsel %vm990_vm2, %v1052_v54, %v1054_v33  ;;  %v1067_v58 = vrot.slane %v264_v48, 2 }
  0x54   : > { %5119 = vmatmul.mubr.msk.bf16.gmra.mxu1 %vm511_vm1, %v5749_v0  ;;  %v972_v0 = vunpack.c.l.bf16 %v956_v53  ;;  %v1066_v23 = vrot.slane %v973_v14, 2  ;;  %v1069_v50 = vrot.slane %v316_v35, 2  ;;  %v1863_v41 = vrot.slane %v1767_v39, 1  ;;  %v6133_v14 = vld [vmem:[%s5589_s27 + $0x5c] sm:$0x1] }
  0x55   : > { %5122 = vmatprep.mubr.msk.bf16.mxu1 %vm511_vm1, %v5781_v52  ;;  %v1051_v52 = vrot.slane %v970_v38, 2  ;;  %v1864_v48 = vrot.slane %v1768_v5, 1  ;;  %v4830_v32 = vunpack.c.l.bf16 %v6037_v56  ;;  %v1866_v9 = vrot.slane %v7750_v46, 1 }
  0x56   : > { %v1061_v43 = vrot.slane %v972_v0, 2  ;;  %v7749_v35 = vunpack.c.h.bf16 %v6037_v56  ;;  %v7747_v38 = vunpack.c.l.bf16 %v6040_v31  ;;  %v1773_v53 = vunpack.c.l.bf16 %v6050_v62  ;;  %v6101_v0 = vld [vmem:[%s5589_s27 + $0x3c] sm:$0xff]  }
  0x57   : > { %v1053_v37 = vsel %vm990_vm2, %v1051_v52, %v1052_v54  ;;  %v6089_v34 = vsel %vm990_vm2, %v1066_v23, %v1067_v58  ;;  %v6092_v63 = vsel %vm990_vm2, %v1067_v58, %v1069_v50  ;;  %v6095_v45 = vsel %vm365_vm0, %v1863_v41, %v1864_v48  ;;  %v6098_v54 = vld [vmem:[%s5589_s27 + $0x38] sm:$0x1]  ;;  %v6104_v52 = vld [vmem:[%s5589_s27 + $0x44] sm:$0x1] }
  0x58   : > { %v1115_v25 = vpack.c.bf16 %v1055_v21, %v1053_v37  ;;  %v1868_v1 = vrot.slane %v4830_v32, 1  ;;  %v1869_v8 = vrot.slane %v7749_v35, 1  ;;  %v1871_v33 = vrot.slane %v7747_v38, 1  ;;  %v6153_v41 = vld [vmem:[%s5589_s27 + $0x60] sm:$0xff]   ;;  %v6162_v32 = vld [vmem:[%s5589_s27 + $0x68] sm:$0x1] }
  0x59   : > { %5159 = vmatmul.mubr.msk.bf16.gmra.mxu0 %vm511_vm1, %v1110_v29  ;;  %v6061_v29 = vsel %vm990_vm2, %v1061_v43, %v1062_v40  ;;  %v7746_v51 = vunpack.c.h.bf16 %v6050_v62  ;;  %v1873_v30 = vrot.slane %v1773_v53, 1  ;;  %v7740_v3 = vunpack.c.l.bf16 %v6098_v54 }
  0x5a   : > { %5162 = vmatprep.mubr.msk.bf16.mxu0 %vm511_vm1, %v1111_v61  ;;  %v1064_v61 = vrot.slane %v7773_v57, 2  ;;  %v7742_v57 = vunpack.c.h.bf16 %v6101_v0  ;;  %v4838_v43 = vunpack.c.l.bf16 %v6117_v18  ;;  %v7743_v39 = vunpack.c.h.bf16 %v6117_v18 }
  0x5b   : > { %v6144_v21 = vsel %vm365_vm0, %v1868_v1, %v1869_v8  ;;  %v6147_v58 = vsel %vm365_vm0, %v1869_v8, %v1871_v33  ;;  %v1874_v23 = vrot.slane %v7746_v51, 1  ;;  %v1881_v53 = vrot.slane %v7740_v3, 1  ;;  %v6174_v33 = vld [vmem:[%s5589_s27 + $0x74] sm:$0x1] }
  0x5c   : > { %5123 = vmatmul.mubr.msk.bf16.gmra.mxu1 %vm511_vm1, %v5810_v59  ;;  %v6045_v59 = vsel %vm990_vm2, %v1057_v49, %v1059_v55  ;;  %v6056_v15 = vsel %vm990_vm2, %v1062_v40, %v1064_v61  ;;  %v4834_v55 = vunpack.c.l.bf16 %v6084_v17  ;;  %v1779_v40 = vunpack.c.l.bf16 %v6101_v0 }
  0x5d   : > { %5126 = vmatprep.mubr.msk.bf16.mxu1 %vm511_vm1, %v5596_v6  ;;  %v6053_v6 = vsel %vm990_vm2, %v1056_v60, %v1057_v49  ;;  %v1117_v20 = vpack.c.bf16 %v6056_v15, %v6061_v29  ;;  %v6123_v49 = vld [vmem:[%s5589_s27 + $0x54] sm:$0xff]   ;;  %v7738_v60 = vunpack.c.h.bf16 %v6084_v17  ;;  %v7741_v61 = vunpack.c.l.bf16 %v6104_v52 }
  0x5e   : > { %v1116_v27 = vpack.c.bf16 %v6045_v59, %v6053_v6  ;;  %v1785_v37 = vunpack.c.l.bf16 %v6123_v49  ;;  %v7745_v50 = vunpack.c.h.bf16 %v6123_v49  ;;  %v1878_v10 = vrot.slane %v4834_v55, 1 }
  0x5f   : > { %v1883_v1 = vrot.slane %v1779_v40, 1  ;;  %v1886_v8 = vrot.slane %v7741_v61, 1  ;;  %v1888_v55 = vrot.slane %v4838_v43, 1  ;;  %v4842_v61 = vunpack.c.l.bf16 %v6153_v41 }
  0x60   : > { %v1893_v3 = vrot.slane %v1785_v37, 1  ;;  %v1894_v40 = vrot.slane %v7745_v50, 1 }
  0x61   : > { %5163 = vmatmul.mubr.msk.bf16.gmra.mxu0 %vm511_vm1, %v1112_v13  ;;  %v6081_v13 = vld [vmem:[%s5589_s27 + $0x2c] sm:$0x1] }
  0x62   : > { %5166 = vmatprep.mubr.msk.bf16.mxu0 %vm511_vm1, %v1113_v2  ;;  %v7744_v2 = vunpack.c.l.bf16 %v6120_v16 }
  0x64   : > { %5127 = vmatmul.mubr.msk.bf16.gmra.mxu1 %vm511_vm1, %v5623_v26  ;;  %v6109_v26 = vsel %vm365_vm0, %v1864_v48, %v1866_v9  ;;  %v7748_v48 = vunpack.c.l.bf16 %v6133_v14  ;;  %v6165_v9 = vld [vmem:[%s5589_s27 + $0x6c] sm:$0xff]  }
  0x65   : > { %5130 = vmatprep.mubr.msk.bf16.mxu1 %vm511_vm1, %v5646_v42  ;;  %v7739_v42 = vunpack.c.l.bf16 %v6081_v13  ;;  %v7752_v37 = vunpack.c.h.bf16 %v6165_v9  ;;  %v1975_v15 = vpack.c.bf16 %v6109_v26, %v6095_v45  ;;  %v6290_v26 = vld [vmem:[%s5589_s27 + $0xa4] sm:$0x1]  ;;  %v4544_v45 = vld [vmem:[%s5589_s27 + $0xc] sm:$0xe] }
  0x66   : > { %v1896_v43 = vrot.slane %v7748_v48, 1 }
  0x67   : > { %v1876_v12 = vrot.slane %v7739_v42, 1  ;;  %v1891_v42 = vrot.slane %v7744_v2, 1  ;;  %v7751_v2 = vunpack.c.l.bf16 %v6174_v33 }
  0x68   : > { %v6237_v59 = vsel %vm365_vm0, %v1894_v40, %v1896_v43  ;;  %v6287_v43 = vld [vmem:[%s5589_s27 + $0x9c] sm:$0xff]  }
  0x69   : > { %5167 = vmatmul.mubr.msk.bf16.gmra.mxu0 %vm511_vm1, %v1114_v28  ;;  %v1879_v28 = vrot.slane %v7738_v60, 1  ;;  %v1889_v60 = vrot.slane %v7743_v39, 1  ;;  %v1791_v39 = vunpack.c.l.bf16 %v6165_v9  ;;  %v6198_v50 = vsel %vm365_vm0, %v1874_v23, %v1876_v12 }
  0x6a   : > { %5170 = vmatprep.mubr.msk.bf16.mxu0 %vm511_vm1, %v1115_v25  ;;  %v1884_v25 = vrot.slane %v7742_v57, 1  ;;  %v7754_v57 = vunpack.c.h.bf16 %v6153_v41  ;;  %v1898_v12 = vrot.slane %v4842_v61, 1  ;;  %v6255_v61 = vld [vmem:[%s5589_s27 + $0x84] sm:$0xff]  }
  0x6b   : > { %v6201_v51 = vsel %vm365_vm0, %v1878_v10, %v1879_v28  ;;  %v6204_v38 = vsel %vm365_vm0, %v1879_v28, %v1881_v53  ;;  %v6213_v46 = vsel %vm365_vm0, %v1888_v55, %v1889_v60  ;;  %v6230_v53 = vld [vmem:[%s5589_s27 + $0x78] sm:$0xff]   ;;  %v1903_v6 = vrot.slane %v1791_v39, 1  ;;  %v6267_v39 = vld [vmem:[%s5589_s27 + $0x8c] sm:$0x1] }
  0x6c   : > { %5131 = vmatmul.mubr.msk.bf16.gmra.mxu1 %vm511_vm1, %v5684_v7  ;;  %v7753_v7 = vunpack.c.l.bf16 %v6162_v32  ;;  %v6207_v48 = vsel %vm365_vm0, %v1883_v1, %v1884_v25  ;;  %v6210_v35 = vsel %vm365_vm0, %v1884_v25, %v1886_v8  ;;  %v1899_v10 = vrot.slane %v7754_v57, 1  ;;  %v6270_v1 = vld [vmem:[%s5589_s27 + $0x90] sm:$0xff]   ;;  %v6273_v25 = vld [vmem:[%s5589_s27 + $0x98] sm:$0x1] }
  0x6d   : > { %5134 = vmatprep.mubr.msk.bf16.mxu1 %vm511_vm1, %v5720_v36  ;;  %v6195_v36 = vsel %vm365_vm0, %v1873_v30, %v1874_v23  ;;  %v6216_v30 = vsel %vm365_vm0, %v1889_v60, %v1891_v42  ;;  %v6223_v23 = vsel %vm365_vm0, %v1893_v3, %v1894_v40  ;;  %v1906_v42 = vrot.slane %v7751_v2, 1  ;;  %v6252_v3 = vld [vmem:[%s5589_s27 + $0x80] sm:$0x1] }
  0x6e   : > { %v1901_v28 = vrot.slane %v7753_v7, 1  ;;  %v1118_v60 = vpack.c.bf16 %v6092_v63, %v6089_v34  ;;  %v6280_v8 = vsel %vm365_vm0, %v1898_v12, %v1899_v10  ;;  %v6305_v63 = vld [vmem:[%s5589_s27 + $0xb0] sm:$0x1]  ;;  %v4545_v34 = vld [vmem:[%s5589_s27 + $0x18] sm:$0xe]  ;;  %v6321_v7 = vld [vmem:[%s5589_s27 + $0xc0] sm:$0xff]   ;;  %v2265_v57 = vunpack.c.l.bf16 %v4544_v45 }
  0x6f   : > { %v6316_v12 = vld [vmem:[%s5589_s27 + $0xbc] sm:$0x1]  ;;  %v2298_v40 = vrot.slane %v1768_v5, 2  ;;  %v7778_v45 = vunpack.c.h.bf16 %v6037_v56  ;;  %v4548_v5 = vld [vmem:[%s5589_s27 + $0x3c] sm:$0xe] }
  0x70   : > { %v6283_v55 = vsel %vm365_vm0, %v1899_v10, %v1901_v28  ;;  %v6302_v28 = vld [vmem:[%s5589_s27 + $0xa8] sm:$0xff]   ;;  %v7777_v10 = vunpack.c.l.bf16 %v6013_v4 }
  0x71   : > { %5171 = vmatmul.mubr.msk.bf16.gmra.mxu0 %vm511_vm1, %v1116_v27  ;;  %v1904_v27 = vrot.slane %v7752_v37, 1  ;;  %7774 = vst [vmem:[#allocation2_spill] sm:$0xff] %v6283_v55  ;;  %v2266_v37 = vunpack.c.l.bf16 %v4545_v34  ;;  %v7779_v34 = vunpack.c.l.bf16 %v6040_v31  ;;  %v4547_v55 = vld [vmem:[%s5589_s27 + $0x30] sm:$0xe]  ;;  %v7785_v31 = vunpack.c.h.bf16 %v6101_v0  ;;  %v5461_v0 = vld [vmem:[%s5589_s27 + $0x78] sm:$0xff]  }
  0x72   : > { %5174 = vmatprep.mubr.msk.bf16.mxu0 %vm511_vm1, %v1117_v20  ;;  %v6330_v20 = vld [vmem:[%s5589_s27 + $0xc8] sm:$0x1]  ;;  %v2300_v29 = vrot.slane %v7777_v10, 2 }
  0x73   : > { %v2302_v4 = vrot.slane %v2266_v37, 2  ;;  %v2305_v10 = vrot.slane %v7779_v34, 2  ;;  %v7783_v34 = vunpack.c.h.bf16 %v6084_v17 }
  0x74   : > { %5135 = vmatmul.mubr.msk.bf16.gmra.mxu1 %vm511_vm1, %v5766_v24  ;;  %v6297_v24 = vsel %vm365_vm0, %v1904_v27, %v1906_v42  ;;  %v6313_v42 = vld [vmem:[%s5589_s27 + $0xb4] sm:$0xff]  }
  0x75   : > { %5138 = vmatprep.mubr.msk.bf16.mxu1 %vm511_vm1, %v5799_v44  ;;  %v6294_v44 = vsel %vm365_vm0, %v1903_v6, %v1904_v27  ;;  %7776 = vst [vmem:[#allocation4_spill] sm:$0xff] %v6297_v24  ;;  %v5449_v6 = vld [vmem:[%s5589_s27 + $0xc] sm:$0xff]   ;;  %v4546_v24 = vld [vmem:[%s5589_s27 + $0x24] sm:$0xe]  ;;  %v2303_v27 = vrot.slane %v7778_v45, 2  ;;  %v7780_v45 = vunpack.c.h.bf16 %v6050_v62  ;;  %v2318_v62 = vrot.slane %v7785_v31, 2 }
  0x76   : > { %7775 = vst [vmem:[#allocation3_spill] sm:$0xff] %v6294_v44  ;;  %v6342_v44 = vsel %vm990_vm2, %v2298_v40, %v2300_v29  ;;  %v2267_v56 = vunpack.c.l.bf16 %v4546_v24  ;;  %v7782_v29 = vunpack.c.l.bf16 %v6081_v13  ;;  %v4549_v24 = vld [vmem:[%s5589_s27 + $0x48] sm:$0xe]  ;;  %v7784_v13 = vunpack.c.l.bf16 %v6098_v54 }
  0x77   : > { %v2308_v2 = vrot.slane %v7780_v45, 2  ;;  %v6360_v37 = vsel %vm990_vm2, %v2302_v4, %v2303_v27  ;;  %v2313_v45 = vrot.slane %v7783_v34, 2  ;;  %v5462_v4 = vld [vmem:[%s7717_s1 + $0x60] sm:$0xff]   ;;  %v2270_v19 = vunpack.c.l.bf16 %v4549_v24 }
  0x78   : > { %7781 = vst [vmem:[#allocation5_spill] sm:$0xff] %v6360_v37  ;;  %v4550_v37 = vld [vmem:[%s5589_s27 + $0x54] sm:$0xe]  ;;  %v5453_v54 = vld [vmem:[%s5589_s27 + $0x24] sm:$0xff]   ;;  %v7788_v31 = vunpack.c.h.bf16 %v6117_v18  ;;  %v7789_v24 = vpack.c.bf16 %v6198_v50, %v6195_v36 }
  0x79   : > { %5175 = vmatmul.mubr.msk.bf16.gmra.mxu0 %vm511_vm1, %v1118_v60  ;;  %v2297_v60 = vrot.slane %v2265_v57, 2  ;;  %v2322_v18 = vrot.slane %v2270_v19, 2  ;;  %v6421_v50 = vld [vmem:[%s7717_s1 + $0x88] sm:$0xff]  }
  0x7a   : > { %5218 = vmatprep.mubr.msk.bf16.mxu0 %vm511_vm1, %v1975_v15  ;;  %v5451_v15 = vld [vmem:[%s5589_s27 + $0x18] sm:$0xff]  }
  0x7b   : > { %v6351_v57 = vsel %vm990_vm2, %v2297_v60, %v2298_v40  ;;  %v2310_v40 = vrot.slane %v7782_v29, 2  ;;  %v2307_v60 = vrot.slane %v2267_v56, 2  ;;  %v2269_v29 = vunpack.c.l.bf16 %v4548_v5 }
  0x7c   : > { %5139 = vmatmul.mubr.msk.bf16.gmra.mxu1 %vm511_vm1, %v5831_v22  ;;  %v6363_v22 = vsel %vm990_vm2, %v2303_v27, %v2305_v10  ;;  %v2315_v10 = vrot.slane %v7784_v13, 2  ;;  %v7786_v56 = vunpack.c.l.bf16 %v6104_v52  ;;  %v2323_v52 = vrot.slane %v7788_v31, 2  ;;  %v4551_v13 = vld [vmem:[%s5589_s27 + $0x60] sm:$0xe] }
  0x7d   : > { %5182 = vmatprep.mubr.msk.bf16.mxu1 %vm511_vm1, %v5449_v6  ;;  %v2268_v6 = vunpack.c.l.bf16 %v4547_v55  ;;  %v6376_v27 = vsel %vm990_vm2, %v2308_v2, %v2310_v40  ;;  %v6384_v55 = vsel %vm990_vm2, %v2307_v60, %v2308_v2  ;;  %v7787_v40 = vpack.c.bf16 %v6147_v58, %v6144_v21  ;;  %v5460_v21 = vld [vmem:[%s7717_s1 + $0x50] sm:$0xff]  }
  0x7e   : > { %v2320_v34 = vrot.slane %v7786_v56, 2  ;;  %v6397_v5 = vsel %vm990_vm2, %v2313_v45, %v2315_v10  ;;  %v2317_v2 = vrot.slane %v2269_v29, 2  ;;  %v2271_v10 = vunpack.c.l.bf16 %v4550_v37 }
  0x7f   : > { %v2312_v17 = vrot.slane %v2268_v6, 2  ;;  %v7790_v6 = vunpack.c.l.bf16 %v6120_v16  ;;  %v7791_v29 = vunpack.c.h.bf16 %v6123_v49  ;;  %v6435_v56 = vsel %vm990_vm2, %v2322_v18, %v2323_v52  ;;  %v5456_v49 = vld [vmem:[%s5589_s27 + $0x48] sm:$0xff]   ;;  %v4559_v16 = vld [vmem:[%s5589_s27 + $0xc0] sm:$0xe] }
  0x80   : > { %v6413_v60 = vsel %vm990_vm2, %v2318_v62, %v2320_v34  ;;  %v2272_v37 = vunpack.c.l.bf16 %v4551_v13  ;;  %v7793_v31 = vunpack.c.h.bf16 %v6153_v41  ;;  %v7796_v13 = vunpack.c.l.bf16 %v6174_v33  ;;  %v5455_v33 = vld [vmem:[%s5589_s27 + $0x3c] sm:$0xff]  }
  0x81   : > { %5219 = vmatmul.mubr.msk.bf16.vlgmr.msra.gmra.mxu0 %vm511_vm1, %v7787_v40  ;;  %v6410_v58 = vsel %vm990_vm2, %v2312_v17, %v2313_v45  ;;  %v6426_v45 = vsel %vm990_vm2, %v2317_v2, %v2318_v62  ;;  %v2328_v19 = vrot.slane %v7791_v29, 2  ;;  %v4552_v17 = vld [vmem:[%s5589_s27 + $0x6c] sm:$0xe]  ;;  %v7792_v40 = vunpack.c.l.bf16 %v6133_v14  ;;  %v4553_v2 = vld [vmem:[%s5589_s27 + $0x78] sm:$0xe] }
  0x82   : > { %5287 = vmatpush3.bf16.msra.mxu0 %v5922_v11  ;;  %5222 = vmatprep.mubr.msk.bf16.mxu0 %vm511_vm1, %v7789_v24  ;;  %v2325_v11 = vrot.slane %v7790_v6, 2  ;;  %v2333_v24 = vrot.slane %v7793_v31, 2  ;;  %v6452_v14 = vld [vmem:[%s7717_s1 + $0x78] sm:$0xff]   ;;  %v2273_v18 = vunpack.c.l.bf16 %v4552_v17  ;;  %v7795_v6 = vunpack.c.h.bf16 %v6165_v9 }
  0x83   : > { %5288 = vmatprep.subr.bf16.mxu0 %v5462_v4  ;;  %v2330_v62 = vrot.slane %v7792_v40, 2  ;;  %v2274_v29 = vunpack.c.l.bf16 %v4553_v2  ;;  %v4554_v40 = vld [vmem:[%s5589_s27 + $0x84] sm:$0xe]  ;;  %v7797_v31 = vunpack.c.h.bf16 %v6230_v53 }
  0x84   : > { %5183 = vmatmul.mubr.msk.bf16.vlgmr.msra.gmra.mxu1 %vm511_vm1, %v5451_v15  ;;  %v6438_v34 = vsel %vm990_vm2, %v2323_v52, %v2325_v11  ;;  %v2327_v15 = vrot.slane %v2271_v10, 2  ;;  %v2338_v11 = vrot.slane %v7795_v6, 2  ;;  %v2340_v10 = vrot.slane %v7796_v13, 2  ;;  %v4555_v6 = vld [vmem:[%s5589_s27 + $0x90] sm:$0xe] }
  0x85   : > { %5251 = vmatpush3.bf16.msra.mxu1 %v5932_v47  ;;  %5186 = vmatprep.mubr.msk.bf16.mxu1 %vm511_vm1, %v5453_v54  ;;  %v6455_v47 = vsel %vm990_vm2, %v2328_v19, %v2330_v62  ;;  %v7794_v54 = vunpack.c.l.bf16 %v6162_v32  ;;  %v5454_v62 = vld [vmem:[%s5589_s27 + $0x30] sm:$0xff]   ;;  %v2337_v9 = vrot.slane %v2273_v18, 2  ;;  %v7800_v13 = vpack.c.bf16 %v6210_v35, %v6207_v48 }
  0x86   : > { %5252 = vmatprep.subr.bf16.mxu1 %v5460_v21  ;;  %5289 = vmatpush3.bf16.msra.mxu0 %v5462_v4  ;;  %v6463_v41 = vsel %vm990_vm2, %v2327_v15, %v2328_v19  ;;  %v2332_v4 = vrot.slane %v2272_v37, 2  ;;  %v2343_v19 = vrot.slane %v7797_v31, 2  ;;  %v7798_v15 = vpack.c.bf16 %v6204_v38, %v6201_v51  ;;  %v4558_v38 = vld [vmem:[%s5589_s27 + $0xb4] sm:$0xe] }
  0x87   : > { %v2335_v52 = vrot.slane %v7794_v54, 2  ;;  %5358 = vmatprep.subr.bf16.mxu0 %v6421_v50  ;;  %v6485_v37 = vsel %vm990_vm2, %v2338_v11, %v2340_v10  ;;  %v2342_v54 = vrot.slane %v2274_v29, 2  ;;  %v6498_v51 = vsel %vm990_vm2, %v2337_v9, %v2338_v11  ;;  %v4556_v10 = vld [vmem:[%s5589_s27 + $0x9c] sm:$0xe]  ;;  %v4557_v11 = vld [vmem:[%s5589_s27 + $0xa8] sm:$0xe] }
  0x88   : > { %v6482_v2 = vsel %vm990_vm2, %v2332_v4, %v2333_v24  ;;  %v7802_v31 = vunpack.c.l.bf16 %v6267_v39  ;;  %v7807_v32 = vunpack.c.h.bf16 %v6302_v28 }
  0x89   : > { %v6472_v17 = vsel %vm990_vm2, %v2333_v24, %v2335_v52  ;;  %5223 = vmatmul.mubr.msk.bf16.gmra.mxu0 %vm511_vm1, %v7798_v15  ;;  %5253 = vmatpush3.bf16.msra.mxu1 %v5460_v21  ;;  %v7799_v52 = vunpack.c.l.bf16 %v6252_v3  ;;  %v2275_v21 = vunpack.c.l.bf16 %v4554_v40  ;;  %v7801_v24 = vunpack.c.h.bf16 %v6255_v61 }
  0x8a   : > { %5226 = vmatprep.mubr.msk.bf16.mxu0 %vm511_vm1, %v7800_v13  ;;  %5322 = vmatprep.subr.bf16.mxu1 %v6452_v14  ;;  %v6506_v35 = vsel %vm990_vm2, %v2342_v54, %v2343_v19  ;;  %v2350_v15 = vrot.slane %v7802_v31, 2  ;;  %v7803_v13 = vunpack.c.h.bf16 %v6270_v1  ;;  %v2277_v31 = vunpack.c.l.bf16 %v4556_v10 }
  0x8b   : > { %v2345_v18 = vrot.slane %v7799_v52, 2  ;;  %v2348_v4 = vrot.slane %v7801_v24, 2  ;;  %v2347_v9 = vrot.slane %v2275_v21, 2  ;;  %v2276_v52 = vunpack.c.l.bf16 %v4555_v6 }
  0x8c   : > { %5187 = vmatmul.mubr.msk.bf16.gmra.mxu1 %vm511_vm1, %v5454_v62  ;;  %v2353_v54 = vrot.slane %v7803_v13, 2  ;;  %v7805_v62 = vunpack.c.h.bf16 %v6287_v43  ;;  %v7806_v13 = vunpack.c.l.bf16 %v6290_v26  ;;  %v2357_v10 = vrot.slane %v2277_v31, 2  ;;  %v5457_v31 = vld [vmem:[%s5589_s27 + $0x54] sm:$0xff]  }
  0x8d   : > { %v6509_v48 = vsel %vm990_vm2, %v2343_v19, %v2345_v18  ;;  %5190 = vmatprep.mubr.msk.bf16.mxu1 %vm511_vm1, %v5455_v33  ;;  %v6521_v19 = vsel %vm990_vm2, %v2348_v4, %v2350_v15  ;;  %v7804_v18 = vunpack.c.l.bf16 %v6273_v25  ;;  %v6528_v21 = vsel %vm990_vm2, %v2347_v9, %v2348_v4 }
  0x8e   : > { %v2358_v29 = vrot.slane %v7805_v62, 2  ;;  %v2352_v6 = vrot.slane %v2276_v52, 2  ;;  %v2360_v40 = vrot.slane %v7806_v13, 2  ;;  %v2278_v33 = vunpack.c.l.bf16 %v4557_v11 }
  0x8f   : > { %v2355_v24 = vrot.slane %v7804_v18, 2  ;;  %v2363_v62 = vrot.slane %v7807_v32, 2  ;;  %v7808_v11 = vunpack.c.l.bf16 %v6305_v63  ;;  %v2280_v32 = vunpack.c.l.bf16 %v4559_v16 }
  0x90   : > { %v6542_v4 = vsel %vm990_vm2, %v2352_v6, %v2353_v54  ;;  %v6545_v9 = vsel %vm990_vm2, %v2358_v29, %v2360_v40  ;;  %v2362_v52 = vrot.slane %v2278_v33, 2  ;;  %v2279_v6 = vunpack.c.l.bf16 %v4558_v38 }
  0x91   : > { %v6536_v18 = vsel %vm990_vm2, %v2353_v54, %v2355_v24  ;;  %v2365_v13 = vrot.slane %v7808_v11, 2  ;;  %v7809_v24 = vpack.c.bf16 %v6216_v30, %v6213_v46  ;;  %v6558_v54 = vsel %vm990_vm2, %v2357_v10, %v2358_v29  ;;  %v7819_v46 = vld [vmem:[#allocation4_spill] sm:$0xff] }
  0x92   : > { %v7810_v40 = vunpack.c.h.bf16 %v6313_v42  ;;  %v7811_v11 = vpack.c.bf16 %v6237_v59, %v6223_v23  ;;  %v6569_v30 = vsel %vm990_vm2, %v2362_v52, %v2363_v62  ;;  %v7812_v29 = vunpack.c.l.bf16 %v6316_v12 }
  0x93   : > { %5227 = vmatmul.mubr.msk.bf16.gmra.mxu0 %vm511_vm1, %v7809_v24  ;;  %v6572_v24 = vsel %vm990_vm2, %v2363_v62, %v2365_v13  ;;  %v7813_v23 = vunpack.c.h.bf16 %v6321_v7  ;;  %v7815_v13 = vunpack.c.l.bf16 %v6330_v20  ;;  %v7820_v15 = vunpack.c.l.bf16 %v6252_v3  ;;  %v5458_v3 = vld [vmem:[%s5589_s27 + $0x60] sm:$0xff]  }
  0x94   : > { %v2368_v33 = vrot.slane %v7810_v40, 2  ;;  %5230 = vmatprep.mubr.msk.bf16.mxu0 %vm511_vm1, %v7811_v11  ;;  %v2370_v38 = vrot.slane %v7812_v29, 2  ;;  %v2367_v40 = vrot.slane %v2279_v6, 2  ;;  %5191 = vmatmul.mubr.msk.bf16.gmra.mxu1 %vm511_vm1, %v5456_v49  ;;  %v7814_v11 = vld [vmem:[#allocation2_spill] sm:$0xff]  ;;  %v7816_v6 = vunpack.c.l.bf16 %v6230_v53 }
  0x95   : > { %v2373_v59 = vrot.slane %v7813_v23, 2  ;;  %v1982_v52 = vpack.c.bf16 %v7814_v11, %v6280_v8  ;;  %v2375_v29 = vrot.slane %v7815_v13, 2  ;;  %5194 = vmatprep.mubr.msk.bf16.mxu1 %vm511_vm1, %v5457_v31  ;;  %v7817_v23 = vunpack.c.h.bf16 %v6230_v53  ;;  %v7818_v11 = vld [vmem:[#allocation3_spill] sm:$0xff] }
  0x96   : > { %v6584_v62 = vsel %vm990_vm2, %v2368_v33, %v2370_v38  ;;  %v1908_v16 = vrot.slane %v7816_v6, 1  ;;  %v6594_v49 = vsel %vm990_vm2, %v2367_v40, %v2368_v33  ;;  %v2372_v8 = vrot.slane %v2280_v32, 2 }
  0x97   : > { %v1909_v10 = vrot.slane %v7817_v23, 1  ;;  %v1983_v38 = vpack.c.bf16 %v7819_v46, %v7818_v11  ;;  %v1911_v36 = vrot.slane %v7820_v15, 1  ;;  %v6603_v13 = vsel %vm990_vm2, %v2373_v59, %v2375_v29  ;;  %v5459_v29 = vld [vmem:[%s5589_s27 + $0x6c] sm:$0xff]  }
  0x98   : > { %v7821_v6 = vunpack.c.l.bf16 %v6255_v61  ;;  %v7822_v23 = vunpack.c.h.bf16 %v6255_v61  ;;  %v7823_v32 = vunpack.c.l.bf16 %v6267_v39  ;;  %v6612_v46 = vsel %vm990_vm2, %v2372_v8, %v2373_v59 }
  0x99   : > { %v1910_v11 = vsel %vm365_vm0, %v1908_v16, %v1909_v10  ;;  %v1912_v61 = vsel %vm365_vm0, %v1909_v10, %v1911_v36  ;;  %v4850_v39 = vunpack.c.l.bf16 %v6270_v1  ;;  %v7824_v16 = vunpack.c.h.bf16 %v6270_v1 }
  0x9a   : > { %v1913_v53 = vrot.slane %v7821_v6, 1  ;;  %v1914_v33 = vrot.slane %v7822_v23, 1  ;;  %v1916_v40 = vrot.slane %v7823_v32, 1  ;;  %v1803_v6 = vunpack.c.l.bf16 %v6287_v43 }
  0x9b   : > { %5231 = vmatmul.mubr.msk.bf16.gmra.mxu0 %vm511_vm1, %v1982_v52  ;;  %v1984_v52 = vpack.c.bf16 %v1912_v61, %v1910_v11  ;;  %v1918_v23 = vrot.slane %v4850_v39, 1  ;;  %v1919_v32 = vrot.slane %v7824_v16, 1  ;;  %v7825_v36 = vunpack.c.l.bf16 %v6273_v25 }
  0x9c   : > { %5234 = vmatprep.mubr.msk.bf16.mxu0 %vm511_vm1, %v1983_v38  ;;  %v1915_v59 = vsel %vm365_vm0, %v1913_v53, %v1914_v33  ;;  %v1917_v8 = vsel %vm365_vm0, %v1914_v33, %v1916_v40  ;;  %5195 = vmatmul.mubr.msk.bf16.gmra.mxu1 %vm511_vm1, %v5458_v3  ;;  %v1923_v15 = vrot.slane %v1803_v6, 1  ;;  %v7826_v53 = vunpack.c.h.bf16 %v6287_v43  ;;  %v5463_v3 = vld [vmem:[%s5589_s27 + $0x84] sm:$0xff]  }
  0x9d   : > { %5198 = vmatprep.mubr.msk.bf16.mxu1 %vm511_vm1, %v5459_v29  ;;  %v1985_v38 = vpack.c.bf16 %v1917_v8, %v1915_v59  ;;  %v1921_v10 = vrot.slane %v7825_v36, 1  ;;  %v7827_v33 = vunpack.c.l.bf16 %v6290_v26  ;;  %v1920_v29 = vsel %vm365_vm0, %v1918_v23, %v1919_v32  ;;  %v5464_v36 = vld [vmem:[%s5589_s27 + $0x90] sm:$0xff]  }
  0x9e   : > { %v1924_v31 = vrot.slane %v7826_v53, 1  ;;  %v4854_v25 = vunpack.c.l.bf16 %v6302_v28  ;;  %v1809_v26 = vunpack.c.l.bf16 %v6313_v42  ;;  %v7828_v8 = vunpack.c.h.bf16 %v6302_v28 }
  0x9f   : > { %v1926_v40 = vrot.slane %v7827_v33, 1  ;;  %v1922_v1 = vsel %vm365_vm0, %v1919_v32, %v1921_v10  ;;  %v4858_v10 = vunpack.c.l.bf16 %v6321_v7 }
  0xa0   : > { %v1925_v43 = vsel %vm365_vm0, %v1923_v15, %v1924_v31  ;;  %v1986_v61 = vpack.c.bf16 %v1922_v1, %v1920_v29  ;;  %v1928_v59 = vrot.slane %v4854_v25, 1  ;;  %v1929_v6 = vrot.slane %v7828_v8, 1  ;;  %v5471_v8 = vld [vmem:[%s5589_s27 + $0x24] sm:$0xff]  }
  0xa1   : > { %v1927_v11 = vsel %vm365_vm0, %v1924_v31, %v1926_v40  ;;  %v1933_v23 = vrot.slane %v1809_v26, 1  ;;  %v7830_v15 = vunpack.c.h.bf16 %v6313_v42  ;;  %v7831_v31 = vunpack.c.l.bf16 %v6316_v12 }
  0xa2   : > { %v1987_v39 = vpack.c.bf16 %v1927_v11, %v1925_v43  ;;  %v1930_v28 = vsel %vm365_vm0, %v1928_v59, %v1929_v6  ;;  %v1938_v40 = vrot.slane %v4858_v10, 1  ;;  %v7833_v1 = vunpack.c.l.bf16 %v6330_v20  ;;  %v5466_v43 = vld [vmem:[%s5589_s27 + $0xa8] sm:$0xff]   ;;  %v5467_v11 = vld [vmem:[%s5589_s27 + $0xb4] sm:$0xff]   ;;  %v5468_v20 = vld [vmem:[%s5589_s27 + $0xc0] sm:$0xff]  }
  0xa3   : > { %5235 = vmatmul.mubr.msk.bf16.gmra.mxu0 %vm511_vm1, %v1984_v52  ;;  %v7829_v52 = vunpack.c.l.bf16 %v6305_v63  ;;  %v1934_v16 = vrot.slane %v7830_v15, 1  ;;  %v1936_v32 = vrot.slane %v7831_v31, 1  ;;  %v7834_v59 = vpack.c.bf16 %v6342_v44, %v6351_v57  ;;  %v5480_v44 = vld [vmem:[%s7717_s1 + $0x70] sm:$0xff]   ;;  %v7835_v57 = vld [vmem:[#allocation5_spill] sm:$0xff]  ;;  %v5475_v15 = vld [vmem:[%s5589_s27 + $0x48] sm:$0xff]  }
  0xa4   : > { %5238 = vmatprep.mubr.msk.bf16.mxu0 %vm511_vm1, %v1985_v38  ;;  %5199 = vmatmul.mubr.msk.bf16.gmra.mxu1 %vm511_vm1, %v5461_v0  ;;  %v5465_v0 = vld [vmem:[%s5589_s27 + $0x9c] sm:$0xff]   ;;  %v1941_v25 = vrot.slane %v7833_v1, 1  ;;  %v5485_v1 = vld [vmem:[%s5589_s27 + $0xa8] sm:$0xff]  }
  0xa5   : > { %5202 = vmatprep.mubr.msk.bf16.mxu1 %vm511_vm1, %v5463_v3  ;;  %v1931_v38 = vrot.slane %v7829_v52, 1  ;;  %v1935_v42 = vsel %vm365_vm0, %v1933_v23, %v1934_v16  ;;  %v1937_v53 = vsel %vm365_vm0, %v1934_v16, %v1936_v32  ;;  %v7832_v3 = vunpack.c.h.bf16 %v6321_v7  ;;  %v5482_v52 = vld [vmem:[%s7717_s1 + $0x80] sm:$0xff]  }
  0xa6   : > { %v1989_v33 = vpack.c.bf16 %v1937_v53, %v1935_v42  ;;  %v7837_v23 = vpack.c.bf16 %v6376_v27, %v6384_v55  ;;  %v7839_v27 = vpack.c.bf16 %v6413_v60, %v6426_v45  ;;  %v5476_v55 = vld [vmem:[%s5589_s27 + $0x54] sm:$0xff]   ;;  %v5478_v60 = vld [vmem:[%s5589_s27 + $0x6c] sm:$0xff]   ;;  %v7842_v16 = vpack.c.bf16 %v6472_v17, %v6482_v2  ;;  %v4654_v31 = vld [vmem:[%s5589_s27 + $0x20] sm:$0x1] }
  0xa7   : > { %v1932_v63 = vsel %vm365_vm0, %v1929_v6, %v1931_v38  ;;  %v1939_v29 = vrot.slane %v7832_v3, 1  ;;  %v5473_v6 = vld [vmem:[%s5589_s27 + $0x30] sm:$0xff]   ;;  %v7836_v38 = vpack.c.bf16 %v6363_v22, %v7835_v57  ;;  %v7838_v22 = vpack.c.bf16 %v6397_v5, %v6410_v58  ;;  %v5479_v45 = vld [vmem:[%s5589_s27 + $0x78] sm:$0xff]  }
  0xa8   : > { %v1988_v12 = vpack.c.bf16 %v1932_v63, %v1930_v28  ;;  %v7840_v5 = vpack.c.bf16 %v6438_v34, %v6435_v56  ;;  %v7841_v58 = vpack.c.bf16 %v6455_v47, %v6463_v41  ;;  %v7843_v56 = vpack.c.bf16 %v6485_v37, %v6498_v51  ;;  %v5481_v34 = vld [vmem:[%s5589_s27 + $0x84] sm:$0xff]   ;;  %v4900_v47 = vld [vmem:[%s5589_s27 + $0x18] sm:$0xff]   ;;  %v5483_v41 = vld [vmem:[%s5589_s27 + $0x90] sm:$0xff]  }
  0xa9   : > { %v1940_v26 = vsel %vm365_vm0, %v1938_v40, %v1939_v29  ;;  %v4862_v28 = vunpack.c.l.bf16 %v4900_v47  ;;  %v4863_v17 = vunpack.c.h.bf16 %v4900_v47  ;;  %v3075_v37 = vunpack.c.l.bf16 %v4654_v31  ;;  %v4663_v47 = vld [vmem:[%s5589_s27 + $0x44] sm:$0x1] }
  0xaa   : > { %v7844_v42 = vpack.c.bf16 %v6509_v48, %v6506_v35  ;;  %v7845_v3 = vpack.c.bf16 %v6521_v19, %v6528_v21  ;;  %v4660_v19 = vld [vmem:[%s5589_s27 + $0x38] sm:$0x1]  ;;  %v4724_v21 = vld [vmem:[%s5589_s27 + $0x30] sm:$0xe]  ;;  %v7848_v31 = vpack.c.bf16 %v6545_v9, %v6558_v54 }
  0xab   : > { %5239 = vmatmul.mubr.msk.bf16.gmra.mxu0 %vm511_vm1, %v1986_v61  ;;  %v1942_v61 = vsel %vm365_vm0, %v1939_v29, %v1941_v25  ;;  %v5484_v29 = vld [vmem:[%s5589_s27 + $0x9c] sm:$0xff]   ;;  %v3172_v35 = vrot.slane %v3075_v37, 1 }
  0xac   : > { %5242 = vmatprep.mubr.msk.bf16.mxu0 %vm511_vm1, %v1987_v39  ;;  %5203 = vmatmul.mubr.msk.bf16.gmra.mxu1 %vm511_vm1, %v5464_v36  ;;  %v1990_v7 = vpack.c.bf16 %v1942_v61, %v1940_v26  ;;  %v5469_v39 = vld [vmem:[%s5589_s27 + $0x18] sm:$0xff]   ;;  %v4655_v26 = vld [vmem:[%s5589_s27 + $0x24] sm:$0xff]   ;;  %v4657_v61 = vld [vmem:[%s5589_s27 + $0x2c] sm:$0x1] }
  0xad   : > { %5206 = vmatprep.mubr.msk.bf16.mxu1 %vm511_vm1, %v5465_v0  ;;  %v4722_v36 = vld [vmem:[%s5589_s27 + $0x18] sm:$0xe]  ;;  %v3078_v57 = vunpack.c.l.bf16 %v4657_v61 }
  0xae   : > { %v3571_v63 = vunpack.c.l.bf16 %v4722_v36 }
  0xb0   : > { %v3603_v25 = vrot.slane %v3571_v63, 2 }
  0xb3   : > { %5243 = vmatmul.mubr.msk.bf16.gmra.mxu0 %vm511_vm1, %v1988_v12  ;;  %v3169_v12 = vrot.slane %v4862_v28, 1  ;;  %v3177_v28 = vrot.slane %v3078_v57, 1 }
  0xb4   : > { %5246 = vmatprep.mubr.msk.bf16.mxu0 %vm511_vm1, %v1989_v33  ;;  %5207 = vmatmul.mubr.msk.bf16.gmra.mxu1 %vm511_vm1, %v5466_v43  ;;  %v3170_v33 = vrot.slane %v4863_v17, 1  ;;  %v3604_v43 = vrot.slane %v4863_v17, 2  ;;  %v4725_v17 = vld [vmem:[%s5589_s27 + $0x3c] sm:$0xe] }
  0xb5   : > { %5210 = vmatprep.mubr.msk.bf16.mxu1 %vm511_vm1, %v5467_v11  ;;  %v3606_v11 = vrot.slane %v3075_v37, 2  ;;  %v4902_v37 = vld [vmem:[%s5589_s27 + $0x48] sm:$0xff]  }
  0xbb   : > { %5247 = vmatmul.mubr.msk.bf16.gmra.mxu0 %vm511_vm1, %v1990_v7 }
  0xbc   : > { %5290 = vmatprep.mubr.msk.bf16.mxu0 %vm511_vm1, %v5469_v39  ;;  %5211 = vmatmul.mubr.msk.bf16.gmra.mxu1 %vm511_vm1, %v5468_v20  ;;  %v4723_v39 = vld [vmem:[%s5589_s27 + $0x24] sm:$0xe]  ;;  %v4901_v20 = vld [vmem:[%s5589_s27 + $0x30] sm:$0xff]  }
  0xbd   : > { %5254 = vmatprep.mubr.msk.bf16.mxu1 %vm511_vm1, %v7834_v59  ;;  %v6784_v59 = vsel %vm365_vm0, %v3169_v12, %v3170_v33 }
  0xc3   : > { %5291 = vmatmul.mubr.msk.bf16.vlgmr.msra.gmra.mxu0 %vm511_vm1, %v5471_v8 }
  0xc4   : > { %5359 = vmatpush3.bf16.msra.mxu0 %v6421_v50  ;;  %5294 = vmatprep.mubr.msk.bf16.mxu0 %vm511_vm1, %v5473_v6  ;;  %v5474_v50 = vld [vmem:[%s5589_s27 + $0x3c] sm:$0xff]   ;;  %v6792_v6 = vsel %vm365_vm0, %v3170_v33, %v3172_v35  ;;  %v3611_v33 = vrot.slane %v3078_v57, 2 }
  0xc5   : > { %5360 = vmatprep.subr.bf16.mxu0 %v5482_v52  ;;  %5255 = vmatmul.mubr.msk.bf16.vlgmr.msra.gmra.mxu1 %vm511_vm1, %v7836_v38 }
  0xc6   : > { %5323 = vmatpush3.bf16.msra.mxu1 %v6452_v14  ;;  %5258 = vmatprep.mubr.msk.bf16.mxu1 %vm511_vm1, %v7837_v23  ;;  %v5477_v14 = vld [vmem:[%s5589_s27 + $0x60] sm:$0xff]   ;;  %v6798_v23 = vsel %vm990_vm2, %v3603_v25, %v3604_v43  ;;  %v4726_v25 = vld [vmem:[%s5589_s27 + $0x48] sm:$0xe] }
  0xc7   : > { %5324 = vmatprep.subr.bf16.mxu1 %v5480_v44 }
  0xc8   : > { %5361 = vmatpush3.bf16.msra.mxu0 %v5482_v52  ;;  %v3076_v52 = vunpack.c.l.bf16 %v4655_v26 }
  0xca   : > { %5325 = vmatpush3.bf16.msra.mxu1 %v5480_v44  ;;  %v3077_v44 = vunpack.c.h.bf16 %v4655_v26 }
  0xcb   : > { %5295 = vmatmul.mubr.msk.bf16.gmra.mxu0 %vm511_vm1, %v5474_v50  ;;  %v6801_v50 = vsel %vm990_vm2, %v3604_v43, %v3606_v11 }
  0xcc   : > { %5298 = vmatprep.mubr.msk.bf16.mxu0 %vm511_vm1, %v5475_v15  ;;  %v3572_v15 = vunpack.c.l.bf16 %v4723_v39  ;;  %v3175_v36 = vrot.slane %v3077_v44, 1  ;;  %v3609_v12 = vrot.slane %v3077_v44, 2  ;;  %v4870_v44 = vunpack.c.l.bf16 %v4902_v37 }
  0xcd   : > { %5259 = vmatmul.mubr.msk.bf16.gmra.mxu1 %vm511_vm1, %v7838_v22  ;;  %v4866_v22 = vunpack.c.l.bf16 %v4901_v20 }
  0xce   : > { %5262 = vmatprep.mubr.msk.bf16.mxu1 %vm511_vm1, %v7839_v27 }
  0xd3   : > { %5299 = vmatmul.mubr.msk.bf16.gmra.mxu0 %vm511_vm1, %v5476_v55  ;;  %v5486_v55 = vld [vmem:[%s5589_s27 + $0xb4] sm:$0xff]  }
  0xd4   : > { %5302 = vmatprep.mubr.msk.bf16.mxu0 %vm511_vm1, %v5477_v14  ;;  %v4867_v14 = vunpack.c.h.bf16 %v4901_v20  ;;  %v3084_v20 = vunpack.c.l.bf16 %v4663_v47 }
  0xd5   : > { %5263 = vmatmul.mubr.msk.bf16.gmra.mxu1 %vm511_vm1, %v7840_v5  ;;  %v3081_v5 = vunpack.c.l.bf16 %v4660_v19 }
  0xd6   : > { %5266 = vmatprep.mubr.msk.bf16.mxu1 %vm511_vm1, %v7841_v58  ;;  %v3573_v58 = vunpack.c.l.bf16 %v4724_v21  ;;  %v3614_v35 = vrot.slane %v4867_v14, 2  ;;  %v6840_v21 = vsel %vm365_vm0, %v3175_v36, %v3177_v28 }
  0xd7   : > { %v3182_v9 = vrot.slane %v3081_v5, 1  ;;  %v3616_v26 = vrot.slane %v3081_v5, 2 }
  0xd8   : > { %v3613_v54 = vrot.slane %v3573_v58, 2  ;;  %v5488_v58 = vld [vmem:[%s5589_s27 + $0xcc] sm:$0xff]  }
  0xdb   : > { %5303 = vmatmul.mubr.msk.bf16.gmra.mxu0 %vm511_vm1, %v5478_v60  ;;  %v7846_v60 = vpack.c.bf16 %v6536_v18, %v6542_v4  ;;  %v3174_v4 = vrot.slane %v3076_v52, 1  ;;  %v3574_v52 = vunpack.c.l.bf16 %v4725_v17 }
  0xdc   : > { %5306 = vmatprep.mubr.msk.bf16.mxu0 %vm511_vm1, %v5479_v45 }
  0xdd   : > { %5267 = vmatmul.mubr.msk.bf16.gmra.mxu1 %vm511_vm1, %v7842_v16  ;;  %v5487_v16 = vld [vmem:[%s5589_s27 + $0xc0] sm:$0xff]   ;;  %v6837_v19 = vsel %vm365_vm0, %v3174_v4, %v3175_v36  ;;  %v6870_v36 = vsel %vm990_vm2, %v3614_v35, %v3616_v26 }
  0xde   : > { %5270 = vmatprep.mubr.msk.bf16.mxu1 %vm511_vm1, %v7843_v56 }
  0xdf   : > { %v6748_v32 = vpop.f32.mrf.mxu0 }
  0xe0   : > { %v6751_v0 = vpop.f32.mrf.mxu1 }
  0xe1   : > { %v6754_v2 = vpop.f32.mrf.mxu0 }
  0xe2   : > { %v6756_v51 = vpop.f32.mrf.mxu1 }
  0xe3   : > { %5307 = vmatmul.mubr.msk.bf16.gmra.mxu0 %vm511_vm1, %v5481_v34  ;;  %v6759_v10 = vpop.f32.mrf.mxu0  ;;  %v4661_v34 = vld [vmem:[%s5589_s27 + $0x3c] sm:$0xff]  }
  0xe4   : > { %5310 = vmatprep.mubr.msk.bf16.mxu0 %vm511_vm1, %v5483_v41  ;;  %v6765_v53 = vpop.f32.mrf.mxu1  ;;  %v3082_v61 = vunpack.c.l.bf16 %v4661_v34  ;;  %v3083_v39 = vunpack.c.h.bf16 %v4661_v34 }
  0xe5   : > { %5271 = vmatmul.mubr.msk.bf16.gmra.mxu1 %vm511_vm1, %v7844_v42  ;;  %v6767_v40 = vpop.f32.mrf.mxu0  ;;  %v3608_v42 = vrot.slane %v3572_v15, 2 }
  0xe6   : > { %5274 = vmatprep.mubr.msk.bf16.mxu1 %vm511_vm1, %v7845_v3  ;;  %v6775_v48 = vpop.f32.mrf.mxu1  ;;  %v3179_v3 = vrot.slane %v4866_v22, 1  ;;  %v4871_v22 = vunpack.c.h.bf16 %v4902_v37  ;;  %v3184_v28 = vrot.slane %v3082_v61, 1  ;;  %v3185_v17 = vrot.slane %v3083_v39, 1 }
  0xe7   : > { %v6779_v7 = vpop.f32.mrf.mxu0  ;;  %v6846_v15 = vsel %vm990_vm2, %v3608_v42, %v3609_v12  ;;  %v3187_v37 = vrot.slane %v3084_v20, 1  ;;  %v4667_v42 = vld [vmem:[%s5589_s27 + $0x54] sm:$0xff]  }
  0xe8   : > { %v3624_v61 = vrot.slane %v4871_v22, 2  ;;  %v3088_v18 = vunpack.c.l.bf16 %v4667_v42 }
  0xe9   : > { %v6789_v8 = vpop.f32.mrf.mxu0 }
  0xea   : > { %v6794_v38 = vpop.f32.mrf.mxu1 }
  0xeb   : > { %5311 = vmatmul.mubr.msk.bf16.gmra.mxu0 %vm511_vm1, %v5484_v29  ;;  %v6803_v27 = vpop.f32.mrf.mxu0  ;;  %v4666_v29 = vld [vmem:[%s5589_s27 + $0x50] sm:$0x1] }
  0xec   : > { %5314 = vmatprep.mubr.msk.bf16.mxu0 %vm511_vm1, %v5485_v1  ;;  %v6810_v45 = vpop.f32.mrf.mxu1  ;;  %v3180_v1 = vrot.slane %v4867_v14, 1  ;;  %v3087_v14 = vunpack.c.l.bf16 %v4666_v29  ;;  %v3621_v29 = vrot.slane %v3084_v20, 2 }
  0xed   : > { %5275 = vmatmul.mubr.msk.bf16.gmra.mxu1 %vm511_vm1, %v7846_v60  ;;  %7847 = vst [vmem:[#allocation2_spill] sm:$0xff] %v6810_v45  ;;  %v6817_v41 = vpop.f32.mrf.mxu0  ;;  %v6852_v60 = vsel %vm990_vm2, %v3609_v12, %v3611_v33  ;;  %v4669_v12 = vld [vmem:[%s5589_s27 + $0x5c] sm:$0x1]  ;;  %v4730_v45 = vld [vmem:[%s5589_s27 + $0x78] sm:$0xe] }
  0xee   : > { %5278 = vmatprep.mubr.msk.bf16.mxu1 %vm511_vm1, %v7848_v31  ;;  %v6827_v63 = vpop.f32.mrf.mxu1  ;;  %v6855_v34 = vsel %vm365_vm0, %v3179_v3, %v3180_v1  ;;  %v6858_v47 = vsel %vm365_vm0, %v3180_v1, %v3182_v9  ;;  %v7852_v31 = vpack.c.bf16 %v6572_v24, %v6569_v30  ;;  %v7854_v3 = vpack.c.bf16 %v6584_v62, %v6594_v49  ;;  %v4727_v9 = vld [vmem:[%s5589_s27 + $0x54] sm:$0xe]  ;;  %v4729_v49 = vld [vmem:[%s5589_s27 + $0x6c] sm:$0xe] }
  0xef   : > { %7849 = vst [vmem:[#allocation3_spill] sm:$0xff] %v6827_v63  ;;  %v3618_v30 = vrot.slane %v3574_v52, 2  ;;  %v3619_v24 = vrot.slane %v3083_v39, 2  ;;  %v3189_v1 = vrot.slane %v4870_v44, 1  ;;  %v3626_v56 = vrot.slane %v3087_v14, 2 }
  0xf0   : > { %v6831_v43 = vpop.f32.mrf.mxu1  ;;  %v6833_v11 = vpop.f32.mrf.mxu0  ;;  %v3090_v62 = vunpack.c.l.bf16 %v4669_v12  ;;  %v3716_v39 = vpack.c.bf16 %v6852_v60, %v6846_v15  ;;  %v3576_v52 = vunpack.c.l.bf16 %v4727_v9  ;;  %v6902_v15 = vsel %vm365_vm0, %v3185_v17, %v3187_v37  ;;  %v4728_v37 = vld [vmem:[%s5589_s27 + $0x60] sm:$0xe] }
  0xf1   : > { %7850 = vst [vmem:[#allocation4_spill] sm:$0xff] %v6831_v43  ;;  %v6905_v60 = vsel %vm990_vm2, %v3618_v30, %v3619_v24  ;;  %v7857_v12 = vpack.c.bf16 %v6801_v50, %v6798_v23  ;;  %v6929_v23 = vsel %vm990_vm2, %v3624_v61, %v3626_v56  ;;  %v3194_v50 = vrot.slane %v3088_v18, 1  ;;  %v6973_v18 = vld [vmem:[%s5589_s27 + $0x78] sm:$0xff]  }
  0xf2   : > { %v6842_v57 = vpop.f32.mrf.mxu0  ;;  %v7860_v56 = vpack.c.bf16 %v6792_v6, %v6784_v59 }
  0xf3   : > { %5315 = vmatmul.mubr.msk.bf16.gmra.mxu0 %vm511_vm1, %v5486_v55  ;;  %v3575_v55 = vunpack.c.l.bf16 %v4726_v25  ;;  %v6848_v5 = vpop.f32.mrf.mxu1  ;;  %v3192_v25 = vrot.slane %v3087_v14, 1 }
  0xf4   : > { %5318 = vmatprep.mubr.msk.bf16.mxu0 %vm511_vm1, %v5487_v16  ;;  %7851 = vst [vmem:[#allocation5_spill] sm:$0xff] %v6848_v5  ;;  %v6861_v16 = vsel %vm990_vm2, %v3613_v54, %v3614_v35  ;;  %v6867_v4 = vpop.f32.mrf.mxu0  ;;  %v3190_v35 = vrot.slane %v4871_v22, 1 }
  0xf5   : > { %5279 = vmatmul.mubr.msk.bf16.gmra.mxu1 %vm511_vm1, %v7852_v31  ;;  %v6874_v33 = vpop.f32.mrf.mxu1  ;;  %v3623_v26 = vrot.slane %v3575_v55, 2  ;;  %v3717_v14 = vpack.c.bf16 %v6870_v36, %v6861_v16  ;;  %v6899_v55 = vsel %vm365_vm0, %v3184_v28, %v3185_v17  ;;  %v4672_v17 = vld [vmem:[%s5589_s27 + $0x68] sm:$0x1] }
  0xf6   : > { %7853 = vst [vmem:[#allocation6_spill] sm:$0xff] %v6874_v33  ;;  %5282 = vmatprep.mubr.msk.bf16.mxu1 %vm511_vm1, %v7854_v3  ;;  %v6881_v54 = vpop.f32.mrf.mxu0  ;;  %v3089_v33 = vunpack.c.h.bf16 %v4667_v42  ;;  %v4903_v42 = vld [vmem:[%s5589_s27 + $0x60] sm:$0xff]   ;;  %v6916_v16 = vsel %vm365_vm0, %v3189_v1, %v3190_v35  ;;  %v6919_v36 = vsel %vm365_vm0, %v3190_v35, %v3192_v25  ;;  %v4675_v1 = vld [vmem:[%s5589_s27 + $0x74] sm:$0x1]  ;;  %v7859_v35 = vpack.c.bf16 %v6603_v13, %v6612_v46 }
  0xf7   : > { %v6883_v31 = vpop.f32.mrf.mxu1  ;;  %v6922_v28 = vsel %vm990_vm2, %v3623_v26, %v3624_v61  ;;  %v3628_v25 = vrot.slane %v3576_v52, 2  ;;  %v4874_v20 = vunpack.c.l.bf16 %v4903_v42  ;;  %v4875_v61 = vunpack.c.h.bf16 %v4903_v42 }
  0xf8   : > { %7855 = vst [vmem:[#allocation7_spill] sm:$0xff] %v6883_v31  ;;  %v3195_v30 = vrot.slane %v3089_v33, 1  ;;  %v3629_v26 = vrot.slane %v3089_v33, 2  ;;  %v3577_v13 = vunpack.c.l.bf16 %v4728_v37 }
  0xf9   : > { %v6891_v44 = vpop.f32.mrf.mxu1  ;;  %v6893_v22 = vpop.f32.mrf.mxu0  ;;  %v3199_v59 = vrot.slane %v4874_v20, 1 }
  0xfa   : > { %7856 = vst [vmem:[#allocation8_spill] sm:$0xff] %v6891_v44  ;;  %v6959_v42 = vsel %vm365_vm0, %v3194_v50, %v3195_v30  ;;  %v3200_v50 = vrot.slane %v4875_v61, 1  ;;  %v3633_v6 = vrot.slane %v3577_v13, 2 }
  0xfb   : > { %5319 = vmatmul.mubr.msk.bf16.gmra.mxu0 %vm511_vm1, %v5488_v58  ;;  %v6913_v58 = vsel %vm990_vm2, %v3619_v24, %v3621_v29  ;;  %v6926_v3 = vpop.f32.mrf.mxu0  ;;  %v3197_v24 = vrot.slane %v3090_v62, 1  ;;  %v4673_v29 = vld [vmem:[%s5589_s27 + $0x6c] sm:$0xff]  }
  0xfc   : > { %5362 = vmatprep.mubr.msk.bf16.mxu0 %vm511_vm1, %v7857_v12  ;;  %v6933_v9 = vpop.f32.mrf.mxu1  ;;  %v3631_v12 = vrot.slane %v3090_v62, 2  ;;  %v3094_v62 = vunpack.c.l.bf16 %v4673_v29  ;;  %v3095_v52 = vunpack.c.h.bf16 %v4673_v29  ;;  %v6967_v29 = vsel %vm990_vm2, %v3628_v25, %v3629_v26 }
  0xfd   : > { %7858 = vst [vmem:[#allocation9_spill] sm:$0xff] %v6933_v9  ;;  %5283 = vmatmul.mubr.msk.bf16.gmra.mxu1 %vm511_vm1, %v7859_v35  ;;  %v6940_v44 = vpop.f32.mrf.mxu0  ;;  %v3093_v9 = vunpack.c.l.bf16 %v4672_v17  ;;  %v3096_v35 = vunpack.c.l.bf16 %v4675_v1  ;;  %v3578_v17 = vunpack.c.l.bf16 %v4729_v49 }
  0xfe   : > { %5326 = vmatprep.mubr.msk.bf16.mxu1 %vm511_vm1, %v7860_v56  ;;  %v6948_v46 = vpop.f32.mrf.mxu1  ;;  %v6964_v56 = vsel %vm365_vm0, %v3195_v30, %v3197_v24  ;;  %v6970_v1 = vsel %vm990_vm2, %v3629_v26, %v3631_v12  ;;  %v3204_v25 = vrot.slane %v3094_v62, 1  ;;  %v3205_v26 = vrot.slane %v3095_v52, 1 }
  0xff   : > { %7861 = vst [vmem:[#allocation10_spill] sm:$0xff] %v6948_v46  ;;  %v6952_v31 = vpop.f32.mrf.mxu0  ;;  %v3202_v49 = vrot.slane %v3093_v9, 1  ;;  %v6977_v46 = vld [vmem:[%s5589_s27 + $0x80] sm:$0x1]  ;;  %v3636_v24 = vrot.slane %v3093_v9, 2  ;;  %v3207_v20 = vrot.slane %v3096_v35, 1  ;;  %v4878_v9 = vunpack.c.l.bf16 %v6973_v18 }
 0x100   : > { %v6961_v37 = vpop.f32.mrf.mxu1  ;;  %v3639_v43 = vrot.slane %v3095_v52, 2  ;;  %v3641_v63 = vrot.slane %v3096_v35, 2  ;;  %v4879_v62 = vunpack.c.h.bf16 %v6973_v18  ;;  %v3099_v5 = vunpack.c.l.bf16 %v6977_v46 }
 0x101   : > { %7862 = vst [vmem:[#allocation11_spill] sm:$0xff] %v6961_v37  ;;  %v5148_v33 = vpop.f32.mrf.mxu0  ;;  %v3634_v37 = vrot.slane %v4875_v61, 2  ;;  %v7863_v61 = vpack.c.bf16 %v6840_v21, %v6837_v19  ;;  %v7000_v19 = vsel %vm365_vm0, %v3199_v59, %v3200_v50  ;;  %v7003_v21 = vsel %vm365_vm0, %v3200_v50, %v3202_v49 }
 0x102   : > { %v6979_v30 = vpop.f32.mrf.mxu1 }
 0x103   : > { %5363 = vmatmul.mubr.msk.bf16.vlgmr.msra.gmra.mxu0 %vm511_vm1, %v3716_v39  ;;  %v1218_v12 = vpop.f32.mrf.mxu0  ;;  %v3638_v39 = vrot.slane %v3578_v17, 2  ;;  %v7864_v17 = vpack.c.bf16 %v6858_v47, %v6855_v34  ;;  %v7009_v46 = vsel %vm990_vm2, %v3634_v37, %v3636_v24  ;;  %v7015_v34 = vsel %vm365_vm0, %v3205_v26, %v3207_v20  ;;  %v4681_v24 = vld [vmem:[%s5589_s27 + $0x8c] sm:$0x1] }
 0x104   : > { %5366 = vmatprep.mubr.msk.bf16.mxu0 %vm511_vm1, %v3717_v14  ;;  %v5112_v13 = vpop.f32.mrf.mxu1  ;;  %v3579_v47 = vunpack.c.l.bf16 %v4730_v45  ;;  %v3209_v20 = vrot.slane %v4878_v9, 1  ;;  %v3210_v45 = vrot.slane %v4879_v62, 1  ;;  %v7866_v9 = vpack.c.bf16 %v6929_v23, %v6922_v28  ;;  %v4905_v23 = vld [vmem:[%s5589_s27 + $0x90] sm:$0xff]  }
 0x105   : > { %5327 = vmatmul.mubr.msk.bf16.vlgmr.msra.gmra.mxu1 %vm511_vm1, %v7863_v61  ;;  %v824_v52 = vadd.f32 %v5112_v13, %v6748_v32  ;;  %v5149_v35 = vpop.f32.mrf.mxu0  ;;  %v7006_v61 = vsel %vm990_vm2, %v3633_v6, %v3634_v37  ;;  %v7012_v32 = vsel %vm365_vm0, %v3204_v25, %v3205_v26  ;;  %v4679_v13 = vld [vmem:[%s5589_s27 + $0x84] sm:$0xff]   ;;  %v7022_v6 = vsel %vm990_vm2, %v3638_v39, %v3639_v43 }
 0x106   : > { %5330 = vmatprep.mubr.msk.bf16.mxu1 %vm511_vm1, %v7864_v17  ;;  %v815_v18 = vpop.f32.mrf.mxu1  ;;  %v7025_v37 = vsel %vm990_vm2, %v3639_v43, %v3641_v63  ;;  %v3212_v17 = vrot.slane %v3099_v5, 1  ;;  %v7865_v39 = vpack.c.bf16 %v6913_v58, %v6905_v60  ;;  %v3100_v63 = vunpack.c.l.bf16 %v4679_v13 }
 0x107   : > { %v7018_v59 = vadd.f32 %v5148_v33, %v824_v52  ;;  %v816_v50 = vadd.f32 %v815_v18, %v6754_v2  ;;  %v1221_v49 = vpop.f32.mrf.mxu0  ;;  %v3101_v43 = vunpack.c.h.bf16 %v4679_v13  ;;  %v4731_v18 = vld [vmem:[%s5589_s27 + $0x84] sm:$0xe]  ;;  %v3102_v58 = vunpack.c.l.bf16 %v4681_v24 }
 0x108   : > { %v5113_v25 = vpop.f32.mrf.mxu1  ;;  %v3644_v28 = vrot.slane %v4879_v62, 2  ;;  %v7061_v24 = vsel %vm365_vm0, %v3210_v45, %v3212_v17  ;;  %v4882_v60 = vunpack.c.l.bf16 %v4905_v23 }
 0x109   : > { %v7030_v33 = vadd.f32 %v1218_v12, %v816_v50  ;;  %v827_v2 = vadd.f32 %v5113_v25, %v6759_v10  ;;  %v5152_v52 = vpop.f32.mrf.mxu0  ;;  %v3721_v10 = vpack.c.bf16 %v7009_v46, %v7006_v61  ;;  %v7867_v61 = vpack.c.bf16 %v6902_v15, %v6899_v55 }
 0x10a   : > { %v818_v14 = vpop.f32.mrf.mxu1  ;;  %v7058_v46 = vsel %vm365_vm0, %v3209_v20, %v3210_v45  ;;  %v7868_v12 = vpack.c.bf16 %v6919_v36, %v6916_v16  ;;  %v3214_v55 = vrot.slane %v3100_v63, 1  ;;  %v3215_v15 = vrot.slane %v3101_v43, 1 }
 0x10b   : > { %5367 = vmatmul.mubr.msk.bf16.gmra.mxu0 %vm511_vm1, %v7865_v39  ;;  %v7048_v50 = vadd.f32 %v5149_v35, %v827_v2  ;;  %v819_v13 = vadd.f32 %v818_v14, %v6767_v40  ;;  %v1234_v25 = vpop.f32.mrf.mxu0  ;;  %v3643_v39 = vrot.slane %v3579_v47, 2  ;;  %v3646_v35 = vrot.slane %v3099_v5, 2  ;;  %v4732_v40 = vld [vmem:[%s5589_s27 + $0x90] sm:$0xe] }
 0x10c   : > { %5370 = vmatprep.mubr.msk.bf16.mxu0 %vm511_vm1, %v7866_v9  ;;  %v4684_v9 = vld [vmem:[%s5589_s27 + $0x98] sm:$0x1]  ;;  %v5116_v26 = vpop.f32.mrf.mxu1  ;;  %v3580_v2 = vunpack.c.l.bf16 %v4731_v18  ;;  %v4883_v45 = vunpack.c.h.bf16 %v4905_v23  ;;  %v3581_v16 = vunpack.c.l.bf16 %v4732_v40  ;;  %v3651_v40 = vrot.slane %v3102_v58, 2 }
 0x10d   : > { %5331 = vmatmul.mubr.msk.bf16.gmra.mxu1 %vm511_vm1, %v7867_v61  ;;  %v7064_v14 = vadd.f32 %v1221_v49, %v819_v13  ;;  %v840_v62 = vadd.f32 %v5116_v26, %v6779_v7  ;;  %v5153_v47 = vpop.f32.mrf.mxu0  ;;  %v3217_v61 = vrot.slane %v3102_v58, 1  ;;  %v3105_v17 = vunpack.c.l.bf16 %v4684_v9 }
 0x10e   : > { %5334 = vmatprep.mubr.msk.bf16.mxu1 %vm511_vm1, %v7868_v12  ;;  %v831_v20 = vpop.f32.mrf.mxu1  ;;  %v3289_v26 = vpack.c.bf16 %v7061_v24, %v7058_v46  ;;  %v3645_v63 = vsel %vm990_vm2, %v3643_v39, %v3644_v28  ;;  %v3647_v18 = vsel %vm990_vm2, %v3644_v28, %v3646_v35  ;;  %v3648_v12 = vrot.slane %v3580_v2, 2  ;;  %v7090_v39 = vld [vmem:[%s5589_s27 + $0xa4] sm:$0x1] }
 0x10f   : > { %v7071_v5 = vadd.f32 %v5152_v52, %v840_v62  ;;  %v832_v49 = vadd.f32 %v831_v20, %v6789_v8  ;;  %v1237_v7 = vpop.f32.mrf.mxu0  ;;  %v3649_v13 = vrot.slane %v3101_v43, 2  ;;  %v7869_v8 = vpack.c.bf16 %v6970_v1, %v6967_v29  ;;  %v4685_v20 = vld [vmem:[%s5589_s27 + $0x9c] sm:$0xff]  }
 0x110   : > { %v5117_v36 = vpop.f32.mrf.mxu1  ;;  %v7086_v62 = vsel %vm365_vm0, %v3214_v55, %v3215_v15  ;;  %v7094_v43 = vsel %vm365_vm0, %v3215_v15, %v3217_v61  ;;  %v3222_v35 = vrot.slane %v3105_v17, 1  ;;  %v3653_v55 = vrot.slane %v3581_v16, 2 }
 0x111   : > { %v7078_v23 = vadd.f32 %v1234_v25, %v832_v49  ;;  %v843_v52 = vadd.f32 %v5117_v36, %v6803_v27  ;;  %v5156_v9 = vpop.f32.mrf.mxu0  ;;  %v3219_v27 = vrot.slane %v4882_v60, 1  ;;  %v3220_v25 = vrot.slane %v4883_v45, 1 }
 0x112   : > { %v834_v28 = vpop.f32.mrf.mxu1  ;;  %v3654_v58 = vrot.slane %v4883_v45, 2  ;;  %v7870_v36 = vpack.c.bf16 %v6964_v56, %v6959_v42  ;;  %v3106_v15 = vunpack.c.l.bf16 %v4685_v20  ;;  %v3107_v61 = vunpack.c.h.bf16 %v4685_v20 }
 0x113   : > { %5371 = vmatmul.mubr.msk.bf16.gmra.mxu0 %vm511_vm1, %v7869_v8  ;;  %v7096_v29 = vadd.f32 %v5153_v47, %v843_v52  ;;  %v835_v1 = vadd.f32 %v834_v28, %v6817_v41  ;;  %v1250_v2 = vpop.f32.mrf.mxu0  ;;  %v3108_v60 = vunpack.c.l.bf16 %v7090_v39  ;;  %v4733_v8 = vld [vmem:[%s5589_s27 + $0x9c] sm:$0xe]  ;;  %v7871_v45 = vpack.c.bf16 %v7003_v21, %v7000_v19  ;;  %v4906_v19 = vld [vmem:[%s5589_s27 + $0xa8] sm:$0xff]   ;;  %v4690_v28 = vld [vmem:[%s5589_s27 + $0xb0] sm:$0x1] }
 0x114   : > { %5374 = vmatprep.mubr.msk.bf16.mxu0 %vm511_vm1, %v3721_v10  ;;  %v5120_v49 = vpop.f32.mrf.mxu1  ;;  %v3656_v10 = vrot.slane %v3105_v17, 2  ;;  %v3723_v42 = vpack.c.bf16 %v3647_v18, %v3645_v63  ;;  %v3290_v56 = vpack.c.bf16 %v7094_v43, %v7086_v62  ;;  %v7115_v52 = vsel %vm990_vm2, %v3648_v12, %v3649_v13 }
 0x115   : > { %5335 = vmatmul.mubr.msk.bf16.gmra.mxu1 %vm511_vm1, %v7870_v36  ;;  %v7105_v47 = vadd.f32 %v1237_v7, %v835_v1  ;;  %v856_v41 = vadd.f32 %v5120_v49, %v6833_v11  ;;  %v5157_v16 = vpop.f32.mrf.mxu0  ;;  %v7118_v7 = vsel %vm990_vm2, %v3649_v13, %v3651_v40  ;;  %v7121_v11 = vsel %vm365_vm0, %v3219_v27, %v3220_v25  ;;  %v4734_v1 = vld [vmem:[%s5589_s27 + $0xa8] sm:$0xe] }
 0x116   : > { %5338 = vmatprep.mubr.msk.bf16.mxu1 %vm511_vm1, %v7871_v45  ;;  %v847_v17 = vpop.f32.mrf.mxu1  ;;  %v7124_v20 = vsel %vm365_vm0, %v3220_v25, %v3222_v35  ;;  %v7131_v39 = vsel %vm990_vm2, %v3653_v55, %v3654_v58  ;;  %v3582_v12 = vunpack.c.l.bf16 %v4733_v8  ;;  %v3657_v40 = vsel %vm990_vm2, %v3654_v58, %v3656_v10 }
 0x117   : > { %v7127_v21 = vadd.f32 %v5156_v9, %v856_v41  ;;  %v848_v63 = vadd.f32 %v847_v17, %v6842_v57  ;;  %v1253_v18 = vpop.f32.mrf.mxu0  ;;  %v3224_v27 = vrot.slane %v3106_v15, 1  ;;  %v3225_v49 = vrot.slane %v3107_v61, 1 }
 0x118   : > { %v5121_v13 = vpop.f32.mrf.mxu1  ;;  %v3227_v36 = vrot.slane %v3108_v60, 1  ;;  %v7872_v57 = vpack.c.bf16 %v7025_v37, %v7022_v6  ;;  %v4886_v55 = vunpack.c.l.bf16 %v4906_v19  ;;  %v4887_v8 = vunpack.c.h.bf16 %v4906_v19 }
 0x119   : > { %v7136_v25 = vadd.f32 %v1250_v2, %v848_v63  ;;  %v859_v9 = vadd.f32 %v5121_v13, %v6867_v4  ;;  %v5160_v35 = vpop.f32.mrf.mxu0  ;;  %v3724_v58 = vpack.c.bf16 %v7118_v7, %v7115_v52  ;;  %v3291_v2 = vpack.c.bf16 %v7124_v20, %v7121_v11  ;;  %v4691_v63 = vld [vmem:[%s5589_s27 + $0xb4] sm:$0xff]  }
 0x11a   : > { %v850_v41 = vpop.f32.mrf.mxu1  ;;  %v3111_v10 = vunpack.c.l.bf16 %v4690_v28  ;;  %v3583_v4 = vunpack.c.l.bf16 %v4734_v1  ;;  %v3658_v45 = vrot.slane %v3582_v12, 2  ;;  %v3659_v17 = vrot.slane %v3107_v61, 2  ;;  %v4735_v1 = vld [vmem:[%s5589_s27 + $0xb4] sm:$0xe]  ;;  %v4699_v20 = vld [vmem:[%s5589_s27 + $0xd4] sm:$0x1] }
 0x11b   : > { %5375 = vmatmul.mubr.msk.bf16.gmra.mxu0 %vm511_vm1, %v7872_v57  ;;  %v7148_v15 = vadd.f32 %v5157_v16, %v859_v9  ;;  %v851_v6 = vadd.f32 %v850_v41, %v6881_v54  ;;  %v1266_v37 = vpop.f32.mrf.mxu0  ;;  %v3725_v52 = vpack.c.bf16 %v3657_v40, %v7131_v39  ;;  %v7157_v7 = vsel %vm365_vm0, %v3224_v27, %v3225_v49  ;;  %v7171_v39 = vld [vmem:[%s5589_s27 + $0xbc] sm:$0x1] }
 0x11c   : > { %5378 = vmatprep.mubr.msk.bf16.mxu0 %vm511_vm1, %v3723_v42  ;;  %v5124_v19 = vpop.f32.mrf.mxu1  ;;  %v7873_v42 = vpack.c.bf16 %v7015_v34, %v7012_v32  ;;  %v7160_v16 = vsel %vm365_vm0, %v3225_v49, %v3227_v36  ;;  %v3661_v54 = vrot.slane %v3108_v60, 2  ;;  %v3229_v32 = vrot.slane %v4886_v55, 1  ;;  %v4736_v36 = vld [vmem:[%s5589_s27 + $0xc0] sm:$0xe] }
 0x11d   : > { %v7163_v28 = vadd.f32 %v1253_v18, %v851_v6  ;;  %v872_v61 = vadd.f32 %v5124_v19, %v6893_v22  ;;  %v5161_v12 = vpop.f32.mrf.mxu0  ;;  %v3230_v34 = vrot.slane %v4887_v8, 1  ;;  %v3232_v60 = vrot.slane %v3111_v10, 1 }
 0x11e   : > { %5339 = vmatmul.mubr.msk.bf16.gmra.mxu1 %vm511_vm1, %v7873_v42  ;;  %v863_v13 = vpop.f32.mrf.mxu1  ;;  %v3663_v18 = vrot.slane %v3583_v4, 2  ;;  %v3664_v40 = vrot.slane %v4887_v8, 2  ;;  %v3666_v27 = vrot.slane %v3111_v10, 2  ;;  %v3292_v24 = vpack.c.bf16 %v7160_v16, %v7157_v7  ;;  %v4907_v8 = vld [vmem:[%s5589_s27 + $0xc0] sm:$0xff]   ;;  %v4696_v10 = vld [vmem:[%s5589_s27 + $0xc8] sm:$0x1] }
 0x11f   : > { %5342 = vmatprep.mubr.msk.bf16.mxu1 %vm511_vm1, %v3289_v26  ;;  %v7174_v22 = vadd.f32 %v5160_v35, %v872_v61  ;;  %v864_v49 = vadd.f32 %v863_v13, %v6926_v3  ;;  %v1269_v46 = vpop.f32.mrf.mxu0  ;;  %v3660_v26 = vsel %vm990_vm2, %v3658_v45, %v3659_v17  ;;  %v3662_v57 = vsel %vm990_vm2, %v3659_v17, %v3661_v54 }
 0x120   : > { %v5125_v9 = vpop.f32.mrf.mxu1  ;;  %v3113_v55 = vunpack.c.h.bf16 %v4691_v63  ;;  %v3114_v41 = vunpack.c.l.bf16 %v7171_v39  ;;  %v3584_v4 = vunpack.c.l.bf16 %v4735_v1  ;;  %v7190_v19 = vsel %vm365_vm0, %v3229_v32, %v3230_v34 }
 0x121   : > { %v7185_v35 = vadd.f32 %v1266_v37, %v864_v49  ;;  %v875_v3 = vadd.f32 %v5125_v9, %v6940_v44  ;;  %v5164_v6 = vpop.f32.mrf.mxu0  ;;  %v3112_v45 = vunpack.c.l.bf16 %v4691_v63  ;;  %v7194_v17 = vsel %vm365_vm0, %v3230_v34, %v3232_v60 }
 0x122   : > { %v866_v42 = vpop.f32.mrf.mxu1  ;;  %v3665_v54 = vsel %vm990_vm2, %v3663_v18, %v3664_v40  ;;  %v3667_v37 = vsel %vm990_vm2, %v3664_v40, %v3666_v27  ;;  %v3585_v61 = vunpack.c.l.bf16 %v4736_v36  ;;  %v4891_v1 = vunpack.c.h.bf16 %v4907_v8  ;;  %v4697_v36 = vld [vmem:[%s5589_s27 + $0xcc] sm:$0xff]  }
 0x123   : > { %5379 = vmatmul.mubr.msk.bf16.gmra.mxu0 %vm511_vm1, %v3724_v58  ;;  %v7198_v39 = vadd.f32 %v5161_v12, %v875_v3  ;;  %v867_v44 = vadd.f32 %v866_v42, %v6952_v31  ;;  %v1282_v58 = vpop.f32.mrf.mxu0  ;;  %v3117_v32 = vunpack.c.l.bf16 %v4696_v10  ;;  %v3669_v63 = vrot.slane %v3113_v55, 2  ;;  %v4737_v10 = vld [vmem:[%s5589_s27 + $0xcc] sm:$0xe] }
 0x124   : > { %5382 = vmatprep.mubr.msk.bf16.mxu0 %vm511_vm1, %v3725_v52  ;;  %v5128_v13 = vpop.f32.mrf.mxu1  ;;  %v3668_v52 = vrot.slane %v3584_v4, 2  ;;  %v3671_v34 = vrot.slane %v3114_v41, 2  ;;  %v4890_v60 = vunpack.c.l.bf16 %v4907_v8  ;;  %v3726_v62 = vpack.c.bf16 %v3662_v57, %v3660_v26 }
 0x125   : > { %v7205_v18 = vadd.f32 %v1269_v46, %v867_v44  ;;  %v888_v12 = vadd.f32 %v5128_v13, %v6751_v0  ;;  %v5165_v31 = vpop.f32.mrf.mxu0  ;;  %v3293_v43 = vpack.c.bf16 %v7194_v17, %v7190_v19  ;;  %v3727_v40 = vpack.c.bf16 %v3667_v37, %v3665_v54 }
 0x126   : > { %5343 = vmatmul.mubr.msk.bf16.gmra.mxu1 %vm511_vm1, %v3290_v56  ;;  %v879_v56 = vpop.f32.mrf.mxu1  ;;  %v3234_v27 = vrot.slane %v3112_v45, 1  ;;  %v3235_v49 = vrot.slane %v3113_v55, 1  ;;  %v3673_v46 = vrot.slane %v3585_v61, 2  ;;  %v3674_v8 = vrot.slane %v4891_v1, 2 }
 0x127   : > { %5346 = vmatprep.mubr.msk.bf16.mxu1 %vm511_vm1, %v3291_v2  ;;  %v7215_v9 = vadd.f32 %v5164_v6, %v888_v12  ;;  %v880_v0 = vadd.f32 %v879_v56, %v6756_v51  ;;  %v1285_v4 = vpop.f32.mrf.mxu0  ;;  %v3676_v11 = vrot.slane %v3117_v32, 2  ;;  %v3237_v26 = vrot.slane %v3114_v41, 1 }
 0x128   : > { %v5129_v2 = vpop.f32.mrf.mxu1  ;;  %v3670_v57 = vsel %vm990_vm2, %v3668_v52, %v3669_v63  ;;  %v3672_v3 = vsel %vm990_vm2, %v3669_v63, %v3671_v34  ;;  %v3239_v19 = vrot.slane %v4890_v60, 1  ;;  %v3240_v51 = vrot.slane %v4891_v1, 1 }
 0x129   : > { %v7222_v45 = vadd.f32 %v1282_v58, %v880_v0  ;;  %v891_v55 = vadd.f32 %v5129_v2, %v6765_v53  ;;  %v5168_v6 = vpop.f32.mrf.mxu0  ;;  %v3242_v42 = vrot.slane %v3117_v32, 1  ;;  %v3119_v54 = vunpack.c.h.bf16 %v4697_v36 }
 0x12a   : > { %v882_v17 = vpop.f32.mrf.mxu1  ;;  %v3120_v37 = vunpack.c.l.bf16 %v4699_v20  ;;  %v3586_v41 = vunpack.c.l.bf16 %v4737_v10  ;;  %v3675_v58 = vsel %vm990_vm2, %v3673_v46, %v3674_v8  ;;  %v3677_v53 = vsel %vm990_vm2, %v3674_v8, %v3676_v11 }
 0x12b   : > { %5383 = vmatmul.mubr.msk.bf16.gmra.mxu0 %vm511_vm1, %v3726_v62  ;;  %v7227_v61 = vadd.f32 %v5165_v31, %v891_v55  ;;  %v883_v44 = vadd.f32 %v882_v17, %v6775_v48  ;;  %v1298_v13 = vpop.f32.mrf.mxu0  ;;  %v3236_v1 = vsel %vm365_vm0, %v3234_v27, %v3235_v49  ;;  %v3238_v32 = vsel %vm365_vm0, %v3235_v49, %v3237_v26  ;;  %v7874_v49 = vld [vmem:[#allocation2_spill] sm:$0xff] }
 0x12c   : > { %5386 = vmatprep.mubr.msk.bf16.mxu0 %vm511_vm1, %v3727_v40  ;;  %v5132_v52 = vpop.f32.mrf.mxu1  ;;  %v3728_v63 = vpack.c.bf16 %v3672_v3, %v3670_v57  ;;  %v3118_v34 = vunpack.c.l.bf16 %v4697_v36  ;;  %v3241_v31 = vsel %vm365_vm0, %v3239_v19, %v3240_v51  ;;  %v3243_v62 = vsel %vm365_vm0, %v3240_v51, %v3242_v42 }
 0x12d   : > { %v7238_v60 = vadd.f32 %v1285_v4, %v883_v44  ;;  %v904_v48 = vadd.f32 %v5132_v52, %v6794_v38  ;;  %v5169_v12 = vpop.f32.mrf.mxu0  ;;  %v3729_v16 = vpack.c.bf16 %v3677_v53, %v3675_v58  ;;  %v3679_v56 = vrot.slane %v3119_v54, 2 }
 0x12e   : > { %5347 = vmatmul.mubr.msk.bf16.gmra.mxu1 %vm511_vm1, %v3292_v24  ;;  %v895_v7 = vpop.f32.mrf.mxu1  ;;  %v3678_v24 = vrot.slane %v3586_v41, 2  ;;  %v3681_v40 = vrot.slane %v3120_v37, 2  ;;  %v3294_v4 = vpack.c.bf16 %v3238_v32, %v3236_v1  ;;  %v3244_v38 = vrot.slane %v3118_v34, 1  ;;  %v7878_v32 = vld [vmem:[#allocation6_spill] sm:$0xff] }
 0x12f   : > { %5350 = vmatprep.mubr.msk.bf16.mxu1 %vm511_vm1, %v3293_v43  ;;  %v7244_v27 = vadd.f32 %v5168_v6, %v904_v48  ;;  %v896_v46 = vadd.f32 %v895_v7, %v7874_v49  ;;  %v1301_v36 = vpop.f32.mrf.mxu0  ;;  %v3245_v8 = vrot.slane %v3119_v54, 1  ;;  %v7875_v43 = vld [vmem:[#allocation3_spill] sm:$0xff]  ;;  %v3295_v2 = vpack.c.bf16 %v3243_v62, %v3241_v31  ;;  %v7876_v6 = vld [vmem:[#allocation4_spill] sm:$0xff] }
 0x130   : > { %v5133_v0 = vpop.f32.mrf.mxu1  ;;  %v3247_v26 = vrot.slane %v3120_v37, 1  ;;  %v3680_v3 = vsel %vm990_vm2, %v3678_v24, %v3679_v56  ;;  %v3682_v19 = vsel %vm990_vm2, %v3679_v56, %v3681_v40  ;;  %v7877_v37 = vld [vmem:[#allocation5_spill] sm:$0xff]  ;;  %v7879_v62 = vld [vmem:[#allocation7_spill] sm:$0xff]  ;;  %v7880_v40 = vld [vmem:[#allocation8_spill] sm:$0xff] }
 0x131   : > { %v7247_v11 = vadd.f32 %v1298_v13, %v896_v46  ;;  %v907_v20 = vadd.f32 %v5133_v0, %v7875_v43  ;;  %v5172_v10 = vpop.f32.mrf.mxu0  ;;  %v3246_v54 = vsel %vm365_vm0, %v3244_v38, %v3245_v8  ;;  %v3730_v53 = vpack.c.bf16 %v3682_v19, %v3680_v3  ;;  %v7883_v19 = vld [vmem:[#allocation11_spill] sm:$0xff] }
 0x132   : > { %v898_v57 = vpop.f32.mrf.mxu1  ;;  %v3248_v58 = vsel %vm365_vm0, %v3245_v8, %v3247_v26 }
 0x133   : > { %5387 = vmatmul.mubr.msk.bf16.gmra.mxu0 %vm511_vm1, %v3728_v63  ;;  %v7254_v55 = vadd.f32 %v5169_v12, %v907_v20  ;;  %v899_v51 = vadd.f32 %v898_v57, %v7876_v6  ;;  %v1314_v42 = vpop.f32.mrf.mxu0  ;;  %v3296_v12 = vpack.c.bf16 %v3248_v58, %v3246_v54 }
 0x134   : > { %5390 = vmatprep.mubr.msk.bf16.mxu0 %vm511_vm1, %v3729_v16  ;;  %v5136_v17 = vpop.f32.mrf.mxu1 }
 0x135   : > { %v7259_v41 = vadd.f32 %v1301_v36, %v899_v51  ;;  %v920_v44 = vadd.f32 %v5136_v17, %v7877_v37  ;;  %v5173_v13 = vpop.f32.mrf.mxu0 }
 0x136   : > { %5351 = vmatmul.mubr.msk.bf16.gmra.mxu1 %vm511_vm1, %v3294_v4  ;;  %v911_v52 = vpop.f32.mrf.mxu1  ;;  %v7881_v4 = vld [vmem:[#allocation9_spill] sm:$0xff] }
 0x137   : > { %5354 = vmatprep.mubr.msk.bf16.mxu1 %vm511_vm1, %v3295_v2  ;;  %v7264_v1 = vadd.f32 %v5172_v10, %v920_v44  ;;  %v912_v63 = vadd.f32 %v911_v52, %v7878_v32  ;;  %v1317_v34 = vpop.f32.mrf.mxu0  ;;  %v7882_v10 = vld [vmem:[#allocation10_spill] sm:$0xff] }
 0x138   : > { %v5137_v48 = vpop.f32.mrf.mxu1 }
 0x139   : > { %v7267_v31 = vadd.f32 %v1314_v42, %v912_v63  ;;  %v923_v7 = vadd.f32 %v5137_v48, %v7879_v62  ;;  %v5176_v16 = vpop.f32.mrf.mxu0 }
 0x13a   : > { %v914_v24 = vpop.f32.mrf.mxu1 }
 0x13b   : > { %5391 = vmatmul.mubr.msk.bf16.gmra.mxu0 %vm511_vm1, %v3730_v53  ;;  %v7271_v56 = vadd.f32 %v5173_v13, %v923_v7  ;;  %v915_v49 = vadd.f32 %v914_v24, %v7880_v40  ;;  %v1330_v46 = vpop.f32.mrf.mxu0 }
 0x13c   : > { %v5140_v36 = vpop.f32.mrf.mxu1 }
 0x13d   : > { %v7275_v0 = vadd.f32 %v1317_v34, %v915_v49  ;;  %v936_v38 = vadd.f32 %v5140_v36, %v7881_v4  ;;  %v5177_v8 = vpop.f32.mrf.mxu0 }
 0x13e   : > { %5355 = vmatmul.mubr.msk.bf16.gmra.mxu1 %vm511_vm1, %v3296_v12  ;;  %v927_v43 = vpop.f32.mrf.mxu1 }
 0x13f   : > { %v7278_v20 = vadd.f32 %v5176_v16, %v936_v38  ;;  %v928_v2 = vadd.f32 %v927_v43, %v7882_v10  ;;  %v1333_v26 = vpop.f32.mrf.mxu0 }
 0x140   : > { %v5141_v57 = vpop.f32.mrf.mxu1 }
 0x141   : > { %v7281_v3 = vadd.f32 %v1330_v46, %v928_v2  ;;  %v939_v6 = vadd.f32 %v5141_v57, %v7883_v19  ;;  %v5220_v51 = vpop.f32.mrf.mxu0 }
 0x142   : > { %v930_v42 = vpop.f32.mrf.mxu1 }
 0x143   : > { %v7284_v17 = vadd.f32 %v5177_v8, %v939_v6  ;;  %v931_v54 = vadd.f32 %v930_v42, %v6979_v30  ;;  %v2090_v37 = vpop.f32.mrf.mxu0 }
 0x144   : > { %v5184_v44 = vpop.f32.mrf.mxu1 }
 0x145   : > { %v7287_v13 = vadd.f32 %v1333_v26, %v931_v54  ;;  %v1689_v58 = vadd.f32 %v5184_v44, %v7018_v59  ;;  %v5221_v53 = vpop.f32.mrf.mxu0 }
 0x146   : > { %v1560_v52 = vpop.f32.mrf.mxu1 }
 0x147   : > { %v7290_v32 = vadd.f32 %v5220_v51, %v1689_v58  ;;  %v1687_v63 = vadd.f32 %v1560_v52, %v7030_v33  ;;  %v2093_v34 = vpop.f32.mrf.mxu0 }
 0x148   : > { %v5185_v48 = vpop.f32.mrf.mxu1 }
 0x149   : > { %v7293_v12 = vadd.f32 %v2090_v37, %v1687_v63  ;;  %v1690_v62 = vadd.f32 %v5185_v48, %v7048_v50  ;;  %v5224_v7 = vpop.f32.mrf.mxu0 }
 0x14a   : > { %v1563_v30 = vpop.f32.mrf.mxu1 }
 0x14b   : > { %v7296_v16 = vadd.f32 %v5221_v53, %v1690_v62  ;;  %v1688_v24 = vadd.f32 %v1563_v30, %v7064_v14  ;;  %v2106_v40 = vpop.f32.mrf.mxu0 }
 0x14c   : > { %v5188_v59 = vpop.f32.mrf.mxu1 }
 0x14d   : > { %v7299_v49 = vadd.f32 %v2093_v34, %v1688_v24  ;;  %v1693_v46 = vadd.f32 %v5188_v59, %v7071_v5  ;;  %v5225_v36 = vpop.f32.mrf.mxu0 }
 0x14e   : > { %v1576_v33 = vpop.f32.mrf.mxu1 }
 0x14f   : > { %v7302_v4 = vadd.f32 %v5224_v7, %v1693_v46  ;;  %v1691_v38 = vadd.f32 %v1576_v33, %v7078_v23  ;;  %v2109_v8 = vpop.f32.mrf.mxu0 }
 0x150   : > { %v5189_v50 = vpop.f32.mrf.mxu1 }
 0x151   : > { %v7305_v43 = vadd.f32 %v2106_v40, %v1691_v38  ;;  %v1694_v10 = vadd.f32 %v5189_v50, %v7096_v29 }
 0x152   : > { %v1579_v14 = vpop.f32.mrf.mxu1 }
 0x153   : > { %v5228_v2 = vpop.f32.mrf.mxu0  ;;  %v7308_v26 = vadd.f32 %v5225_v36, %v1694_v10  ;;  %v1692_v57 = vadd.f32 %v1579_v14, %v7105_v47 }
 0x154   : > { %v5192_v5 = vpop.f32.mrf.mxu1 }
 0x155   : > { %v2122_v19 = vpop.f32.mrf.mxu0  ;;  %v7311_v6 = vadd.f32 %v2109_v8, %v1692_v57  ;;  %v1697_v51 = vadd.f32 %v5192_v5, %v7127_v21 }
 0x156   : > { %v1592_v23 = vpop.f32.mrf.mxu1 }
 0x157   : > { %v5229_v42 = vpop.f32.mrf.mxu0  ;;  %v7314_v54 = vadd.f32 %v5228_v2, %v1697_v51  ;;  %v1695_v37 = vadd.f32 %v1592_v23, %v7136_v25 }
 0x158   : > { %v5193_v29 = vpop.f32.mrf.mxu1 }
 0x159   : > { %v2125_v44 = vpop.f32.mrf.mxu0  ;;  %v7317_v58 = vadd.f32 %v2122_v19, %v1695_v37  ;;  %v1698_v53 = vadd.f32 %v5193_v29, %v7148_v15 }
 0x15a   : > { %v1595_v47 = vpop.f32.mrf.mxu1 }
 0x15b   : > { %v5232_v52 = vpop.f32.mrf.mxu0  ;;  %v7320_v63 = vadd.f32 %v5229_v42, %v1698_v53  ;;  %v1696_v34 = vadd.f32 %v1595_v47, %v7163_v28 }
 0x15c   : > { %v5196_v21 = vpop.f32.mrf.mxu1 }
 0x15d   : > { %v2138_v48 = vpop.f32.mrf.mxu0  ;;  %v7323_v62 = vadd.f32 %v2125_v44, %v1696_v34  ;;  %v1701_v7 = vadd.f32 %v5196_v21, %v7174_v22 }
 0x15e   : > { %v1608_v25 = vpop.f32.mrf.mxu1 }
 0x15f   : > { %v5233_v30 = vpop.f32.mrf.mxu0  ;;  %v7326_v24 = vadd.f32 %v5232_v52, %v1701_v7  ;;  %v1699_v40 = vadd.f32 %v1608_v25, %v7185_v35 }
 0x160   : > { %v5197_v15 = vpop.f32.mrf.mxu1 }
 0x161   : > { %v2141_v59 = vpop.f32.mrf.mxu0  ;;  %v7329_v46 = vadd.f32 %v2138_v48, %v1699_v40  ;;  %v1702_v36 = vadd.f32 %v5197_v15, %v7198_v39 }
 0x162   : > { %v1611_v28 = vpop.f32.mrf.mxu1 }
 0x163   : > { %v5236_v33 = vpop.f32.mrf.mxu0  ;;  %v7332_v38 = vadd.f32 %v5233_v30, %v1702_v36  ;;  %v1700_v8 = vadd.f32 %v1611_v28, %v7205_v18 }
 0x164   : > { %v5200_v22 = vpop.f32.mrf.mxu1 }
 0x165   : > { %v2154_v50 = vpop.f32.mrf.mxu0  ;;  %v7335_v10 = vadd.f32 %v2141_v59, %v1700_v8  ;;  %v1705_v2 = vadd.f32 %v5200_v22, %v7215_v9 }
 0x166   : > { %v1624_v35 = vpop.f32.mrf.mxu1 }
 0x167   : > { %v5237_v14 = vpop.f32.mrf.mxu0  ;;  %v7338_v57 = vadd.f32 %v5236_v33, %v1705_v2  ;;  %v1703_v19 = vadd.f32 %v1624_v35, %v7222_v45 }
 0x168   : > { %v5201_v39 = vpop.f32.mrf.mxu1 }
 0x169   : > { %v2157_v5 = vpop.f32.mrf.mxu0  ;;  %v7341_v51 = vadd.f32 %v2154_v50, %v1703_v19  ;;  %v1706_v42 = vadd.f32 %v5201_v39, %v7227_v61 }
 0x16a   : > { %v1627_v18 = vpop.f32.mrf.mxu1 }
 0x16b   : > { %v5240_v23 = vpop.f32.mrf.mxu0  ;;  %v7344_v37 = vadd.f32 %v5237_v14, %v1706_v42  ;;  %v1704_v44 = vadd.f32 %v1627_v18, %v7238_v60 }
 0x16c   : > { %v5204_v9 = vpop.f32.mrf.mxu1 }
 0x16d   : > { %7884 = vst [vmem:[#allocation2_spill] sm:$0xff] %v7344_v37  ;;  %v2170_v29 = vpop.f32.mrf.mxu0  ;;  %v7347_v53 = vadd.f32 %v2157_v5, %v1704_v44  ;;  %v1709_v52 = vadd.f32 %v5204_v9, %v7244_v27 }
 0x16e   : > { %v1640_v45 = vpop.f32.mrf.mxu1 }
 0x16f   : > { %7885 = vst [vmem:[#allocation3_spill] sm:$0xff] %v7347_v53  ;;  %v5241_v47 = vpop.f32.mrf.mxu0  ;;  %v7350_v34 = vadd.f32 %v5240_v23, %v1709_v52  ;;  %v1707_v48 = vadd.f32 %v1640_v45, %v7247_v11 }
 0x170   : > { %v5205_v61 = vpop.f32.mrf.mxu1 }
 0x171   : > { %7886 = vst [vmem:[#allocation4_spill] sm:$0xff] %v7350_v34  ;;  %v2173_v21 = vpop.f32.mrf.mxu0  ;;  %v7353_v7 = vadd.f32 %v2170_v29, %v1707_v48  ;;  %v1710_v30 = vadd.f32 %v5205_v61, %v7254_v55 }
 0x172   : > { %v1643_v60 = vpop.f32.mrf.mxu1 }
 0x173   : > { %7887 = vst [vmem:[#allocation5_spill] sm:$0xff] %v7353_v7  ;;  %v5244_v25 = vpop.f32.mrf.mxu0  ;;  %v7356_v40 = vadd.f32 %v5241_v47, %v1710_v30  ;;  %v1708_v59 = vadd.f32 %v1643_v60, %v7259_v41 }
 0x174   : > { %v5208_v27 = vpop.f32.mrf.mxu1 }
 0x175   : > { %7888 = vst [vmem:[#allocation6_spill] sm:$0xff] %v7356_v40  ;;  %v2186_v15 = vpop.f32.mrf.mxu0  ;;  %v7359_v36 = vadd.f32 %v2173_v21, %v1708_v59  ;;  %v1713_v33 = vadd.f32 %v5208_v27, %v7264_v1 }
 0x176   : > { %v1656_v11 = vpop.f32.mrf.mxu1 }
 0x177   : > { %7889 = vst [vmem:[#allocation7_spill] sm:$0xff] %v7359_v36  ;;  %v5245_v28 = vpop.f32.mrf.mxu0  ;;  %v7362_v8 = vadd.f32 %v5244_v25, %v1713_v33  ;;  %v1711_v50 = vadd.f32 %v1656_v11, %v7267_v31 }
 0x178   : > { %v5209_v55 = vpop.f32.mrf.mxu1 }
 0x179   : > { %7890 = vst [vmem:[#allocation8_spill] sm:$0xff] %v7362_v8  ;;  %v2189_v22 = vpop.f32.mrf.mxu0  ;;  %v7365_v2 = vadd.f32 %v2186_v15, %v1711_v50  ;;  %v1714_v14 = vadd.f32 %v5209_v55, %v7271_v56 }
 0x17a   : > { %v1659_v41 = vpop.f32.mrf.mxu1 }
 0x17b   : > { %7891 = vst [vmem:[#allocation9_spill] sm:$0xff] %v7365_v2  ;;  %v5248_v35 = vpop.f32.mrf.mxu0  ;;  %v7368_v19 = vadd.f32 %v5245_v28, %v1714_v14  ;;  %v1712_v5 = vadd.f32 %v1659_v41, %v7275_v0 }
 0x17c   : > { %v5212_v1 = vpop.f32.mrf.mxu1 }
 0x17d   : > { %7892 = vst [vmem:[#allocation10_spill] sm:$0xff] %v7368_v19  ;;  %v2202_v39 = vpop.f32.mrf.mxu0  ;;  %v7371_v42 = vadd.f32 %v2189_v22, %v1712_v5  ;;  %v1717_v23 = vadd.f32 %v5212_v1, %v7278_v20 }
 0x17e   : > { %v1672_v31 = vpop.f32.mrf.mxu1 }
 0x17f   : > { %7893 = vst [vmem:[#allocation11_spill] sm:$0xff] %v7371_v42  ;;  %v5249_v18 = vpop.f32.mrf.mxu0  ;;  %v7374_v44 = vadd.f32 %v5248_v35, %v1717_v23  ;;  %v1715_v29 = vadd.f32 %v1672_v31, %v7281_v3 }
 0x180   : > { %v5213_v56 = vpop.f32.mrf.mxu1 }
 0x181   : > { %7894 = vst [vmem:[#allocation12_spill] sm:$0xff] %v7374_v44  ;;  %v2205_v9 = vpop.f32.mrf.mxu0  ;;  %v7377_v52 = vadd.f32 %v2202_v39, %v1715_v29  ;;  %v1718_v47 = vadd.f32 %v5213_v56, %v7284_v17 }
 0x182   : > { %v1675_v0 = vpop.f32.mrf.mxu1 }
 0x183   : > { %7895 = vst [vmem:[#allocation13_spill] sm:$0xff] %v7377_v52  ;;  %v7380_v45 = vpop.f32.mrf.mxu0  ;;  %v7382_v48 = vadd.f32 %v5249_v18, %v1718_v47  ;;  %v1716_v21 = vadd.f32 %v1675_v0, %v7287_v13 }
 0x185   : > { %7896 = vst [vmem:[#allocation14_spill] sm:$0xff] %v7382_v48  ;;  %v7385_v20 = vpop.f32.mrf.mxu0  ;;  %v5256_v61 = vpop.f32.mrf.mxu1  ;;  %v7387_v30 = vadd.f32 %v2205_v9, %v1716_v21 }
 0x187   : > { %7897 = vst [vmem:[#allocation15_spill] sm:$0xff] %v7387_v30  ;;  %v7389_v25 = vpop.f32.mrf.mxu0  ;;  %v2524_v3 = vpop.f32.mrf.mxu1 }
 0x189   : > { %v7391_v60 = vpop.f32.mrf.mxu0  ;;  %v5257_v59 = vpop.f32.mrf.mxu1 }
 0x18b   : > { %v7393_v15 = vpop.f32.mrf.mxu0  ;;  %v7395_v17 = vpop.f32.mrf.mxu1 }
 0x18d   : > { %v7397_v27 = vpop.f32.mrf.mxu0  ;;  %v7399_v33 = vpop.f32.mrf.mxu1 }
 0x18f   : > { %v7401_v13 = vpop.f32.mrf.mxu0  ;;  %v7403_v28 = vpop.f32.mrf.mxu1 }
 0x191   : > { %v7405_v11 = vpop.f32.mrf.mxu0  ;;  %v7407_v50 = vpop.f32.mrf.mxu1 }
 0x193   : > { %v7409_v22 = vpop.f32.mrf.mxu0  ;;  %v7411_v55 = vpop.f32.mrf.mxu1 }
 0x195   : > { %v7413_v14 = vpop.f32.mrf.mxu0  ;;  %v7415_v35 = vpop.f32.mrf.mxu1 }
 0x197   : > { %v7417_v41 = vpop.f32.mrf.mxu0  ;;  %v7419_v5 = vpop.f32.mrf.mxu1 }
 0x199   : > { %v7421_v39 = vpop.f32.mrf.mxu0  ;;  %v7423_v1 = vpop.f32.mrf.mxu1 }
 0x19b   : > { %v7425_v23 = vpop.f32.mrf.mxu0  ;;  %v7427_v18 = vpop.f32.mrf.mxu1 }
 0x19d   : > { %v7429_v31 = vpop.f32.mrf.mxu0  ;;  %v7431_v29 = vpop.f32.mrf.mxu1 }
 0x19f   : > { %v7433_v9 = vpop.f32.mrf.mxu0  ;;  %v7435_v56 = vpop.f32.mrf.mxu1 }
 0x1a1   : > { %v7437_v47 = vpop.f32.mrf.mxu0  ;;  %v7439_v0 = vpop.f32.mrf.mxu1 }
 0x1a3   : > { %v7441_v21 = vpop.f32.mrf.mxu0  ;;  %v7443_v30 = vpop.f32.mrf.mxu1 }
 0x1a5   : > { %v7445_v48 = vpop.f32.mrf.mxu0  ;;  %v7447_v52 = vpop.f32.mrf.mxu1 }
 0x1a6   : > { %7898 = vst [vmem:[#allocation16_spill] sm:$0xff] %v7445_v48 }
 0x1a7   : > { %v7449_v44 = vpop.f32.mrf.mxu0  ;;  %v7451_v42 = vpop.f32.mrf.mxu1 }
 0x1a8   : > { %7899 = vst [vmem:[#allocation17_spill] sm:$0xff] %v7449_v44 }
 0x1a9   : > { %v7453_v19 = vpop.f32.mrf.mxu0  ;;  %v7455_v2 = vpop.f32.mrf.mxu1 }
 0x1aa   : > { %7900 = vst [vmem:[#allocation18_spill] sm:$0xff] %v7453_v19  ;;  %7901 = vst [vmem:[#allocation19_spill] sm:$0xff] %v7455_v2 }
 0x1ab   : > { %v7457_v8 = vpop.f32.mrf.mxu0  ;;  %v7459_v36 = vpop.f32.mrf.mxu1 }
 0x1ac   : > { %7902 = vst [vmem:[#allocation20_spill] sm:$0xff] %v7457_v8  ;;  %7903 = vst [vmem:[#allocation21_spill] sm:$0xff] %v7459_v36 }
 0x1ad   : > { %v7461_v40 = vpop.f32.mrf.mxu0  ;;  %v7463_v7 = vpop.f32.mrf.mxu1 }
 0x1ae   : > { %7904 = vst [vmem:[#allocation22_spill] sm:$0xff] %v7461_v40  ;;  %7905 = vst [vmem:[#allocation23_spill] sm:$0xff] %v7463_v7 }
 0x1af   : > { %v7465_v34 = vpop.f32.mrf.mxu0  ;;  %v7467_v53 = vpop.f32.mrf.mxu1 }
 0x1b0   : > { %7906 = vst [vmem:[#allocation24_spill] sm:$0xff] %v7465_v34  ;;  %7907 = vst [vmem:[#allocation25_spill] sm:$0xff] %v7467_v53 }
 0x1b1   : > { %v7469_v48 = vpop.f32.mrf.mxu0  ;;  %v7471_v44 = vpop.f32.mrf.mxu1 }
 0x1b2   : > { %7908 = vst [vmem:[#allocation26_spill] sm:$0xff] %v7469_v48  ;;  %7909 = vst [vmem:[#allocation27_spill] sm:$0xff] %v7471_v44 }
 0x1b3   : > { %v7473_v37 = vpop.f32.mrf.mxu0  ;;  %v7475_v19 = vpop.f32.mrf.mxu1 }
 0x1b4   : > { %7910 = vst [vmem:[#allocation28_spill] sm:$0xff] %v7473_v37  ;;  %7911 = vst [vmem:[#allocation29_spill] sm:$0xff] %v7475_v19 }
 0x1b5   : > { %v7477_v2 = vpop.f32.mrf.mxu0  ;;  %v7479_v8 = vpop.f32.mrf.mxu1 }
 0x1b6   : > { %7912 = vst [vmem:[#allocation30_spill] sm:$0xff] %v7477_v2  ;;  %7913 = vst [vmem:[#allocation31_spill] sm:$0xff] %v7479_v8 }
 0x1b7   : > { %v7481_v36 = vpop.f32.mrf.mxu0  ;;  %v7483_v40 = vpop.f32.mrf.mxu1 }
 0x1b8   : > { %7914 = vst [vmem:[#allocation32_spill] sm:$0xff] %v7481_v36  ;;  %7915 = vst [vmem:[#allocation33_spill] sm:$0xff] %v7483_v40  ;;  %v2653_v36 = vadd.f32 %v5256_v61, %v7290_v32  ;;  %v2652_v32 = vadd.f32 %v7395_v17, %v7299_v49 }
 0x1b9   : > { %v7485_v7 = vpop.f32.mrf.mxu0  ;;  %v7487_v34 = vpop.f32.mrf.mxu1 }
 0x1ba   : > { %7916 = vst [vmem:[#allocation34_spill] sm:$0xff] %v7485_v7  ;;  %7917 = vst [vmem:[#allocation35_spill] sm:$0xff] %v7487_v34  ;;  %v2651_v7 = vadd.f32 %v2524_v3, %v7293_v12  ;;  %v7517_v12 = vld [vmem:[%s7718_s2] ss:$0 sm:$0xff] }
 0x1bb   : > { %v7489_v53 = vpop.f32.mrf.mxu0  ;;  %v7491_v48 = vpop.f32.mrf.mxu1 }
 0x1bc   : > { %7918 = vst [vmem:[#allocation36_spill] sm:$0xff] %v7489_v53  ;;  %7919 = vst [vmem:[#allocation37_spill] sm:$0xff] %v7491_v48  ;;  %v2995_v48 = vadd.f32 %v7380_v45, %v2653_v36 }
 0x1bd   : > { %v7493_v44 = vpop.f32.mrf.mxu0  ;;  %v7495_v37 = vpop.f32.mrf.mxu1 }
 0x1be   : > { %7920 = vst [vmem:[#allocation38_spill] sm:$0xff] %v7493_v44  ;;  %7921 = vst [vmem:[#allocation39_spill] sm:$0xff] %v7495_v37  ;;  %v2654_v44 = vadd.f32 %v5257_v59, %v7296_v16 }
 0x1bf   : > { %v7497_v19 = vpop.f32.mrf.mxu0  ;;  %v7499_v2 = vpop.f32.mrf.mxu1 }
 0x1c0   : > { %7922 = vst [vmem:[#allocation40_spill] sm:$0xff] %v7497_v19  ;;  %7923 = vst [vmem:[#allocation41_spill] sm:$0xff] %v7499_v2  ;;  %v2993_v2 = vadd.f32 %v7385_v20, %v2651_v7  ;;  %v2996_v36 = vadd.f32 %v7389_v25, %v2654_v44  ;;  %v2655_v7 = vadd.f32 %v7403_v28, %v7305_v43 }
 0x1c1   : > { %v7502_v8 = vpop.f32.mrf.mxu0  ;;  %v7504_v40 = vpop.f32.mrf.mxu1  ;;  %v2656_v28 = vadd.f32 %v7411_v55, %v7311_v6  ;;  %v2661_v6 = vadd.f32 %v7415_v35, %v7314_v54 }
 0x1c2   : > { %7924 = vst [vmem:[#allocation42_spill] sm:$0xff] %v7502_v8  ;;  %7925 = vst [vmem:[#allocation43_spill] sm:$0xff] %v7504_v40 }
 0x1c3   : > { %v5364_v34 = vpop.f32.mrf.mxu0  ;;  %v7507_v53 = vpop.f32.mrf.mxu1 }
 0x1c4   : > { %7926 = vst [vmem:[#allocation44_spill] sm:$0xff] %v7507_v53  ;;  %v2657_v53 = vadd.f32 %v7399_v33, %v7302_v4 }
 0x1c5   : > { %v3830_v37 = vpop.f32.mrf.mxu0  ;;  %v5328_v19 = vpop.f32.mrf.mxu1 }
 0x1c6   : > { %v3525_v61 = vadd.f32 %v5328_v19, %v2995_v48  ;;  %v2994_v19 = vadd.f32 %v7391_v60, %v2652_v32  ;;  %v2999_v43 = vadd.f32 %v7393_v15, %v2657_v53  ;;  %v2997_v60 = vadd.f32 %v7397_v27, %v2655_v7 }
 0x1c7   : > { %v5365_v8 = vpop.f32.mrf.mxu0  ;;  %v3396_v3 = vpop.f32.mrf.mxu1 }
 0x1c8   : > { %v3959_v45 = vadd.f32 %v5364_v34, %v3525_v61  ;;  %v3523_v16 = vadd.f32 %v3396_v3, %v2993_v2  ;;  %v2658_v34 = vadd.f32 %v7407_v50, %v7308_v26 }
 0x1c9   : > { %v3833_v59 = vpop.f32.mrf.mxu0  ;;  %v5329_v49 = vpop.f32.mrf.mxu1 }
 0x1ca   : > { %v3998_v48 = vadd.f32 %v7517_v12, %v3959_v45  ;;  %v3957_v20 = vadd.f32 %v3830_v37, %v3523_v16  ;;  %v3526_v17 = vadd.f32 %v5329_v49, %v2996_v36  ;;  %v3000_v15 = vadd.f32 %v7401_v13, %v2658_v34 }
 0x1cb   : > { %v5368_v40 = vpop.f32.mrf.mxu0  ;;  %v3399_v2 = vpop.f32.mrf.mxu1  ;;  %v2998_v49 = vadd.f32 %v7405_v11, %v2656_v28  ;;  %v2659_v34 = vadd.f32 %v7419_v5, %v7317_v58 }
 0x1cc   : > { %v4030_v44 = vmax.f32 %v3998_v48, 0.0  ;;  %v3996_v25 = vadd.f32 %v7517_v12, %v3957_v20  ;;  %v3960_v4 = vadd.f32 %v5365_v8, %v3526_v17  ;;  %v3524_v33 = vadd.f32 %v3399_v2, %v2994_v19 }
 0x1cd   : > { %v3846_v61 = vpop.f32.mrf.mxu0  ;;  %v5332_v26 = vpop.f32.mrf.mxu1  ;;  %v3003_v17 = vadd.f32 %v7409_v22, %v2661_v6  ;;  %v2662_v2 = vadd.f32 %v7423_v1, %v7320_v63  ;;  %v2660_v22 = vadd.f32 %v7427_v18, %v7323_v62 }
 0x1ce   : > { %v4798_v37 = vpack.c.bf16 %v4030_v44, %v4030_v44  ;;  %v4028_v50 = vmax.f32 %v3996_v25, 0.0  ;;  %v3999_v8 = vadd.f32 %v7517_v12, %v3960_v4  ;;  %v3958_v32 = vadd.f32 %v3833_v59, %v3524_v33 }
 0x1cf   : > { %v5369_v53 = vpop.f32.mrf.mxu0  ;;  %v3529_v27 = vadd.f32 %v5332_v26, %v2999_v43  ;;  %v3412_v55 = vpop.f32.mrf.mxu1  ;;  %v3001_v26 = vadd.f32 %v7413_v14, %v2659_v34 }
 0x1d0   : > { %4191 = vst.msk [vmem:[%s7537_s10 + $0x8] sm:$0xf] %vm4188_vm3, %v4798_v37  ;;  %v4796_v3 = vpack.c.bf16 %v4028_v50, %v4028_v50  ;;  %v4031_v36 = vmax.f32 %v3999_v8, 0.0  ;;  %v3997_v45 = vadd.f32 %v7517_v12, %v3958_v32  ;;  %v3527_v16 = vadd.f32 %v3412_v55, %v2997_v60 }
 0x1d1   : > { %v3849_v7 = vpop.f32.mrf.mxu0  ;;  %v3963_v59 = vadd.f32 %v5368_v40, %v3529_v27  ;;  %v5333_v19 = vpop.f32.mrf.mxu1  ;;  %v3004_v37 = vadd.f32 %v7417_v41, %v2662_v2  ;;  %v2665_v50 = vadd.f32 %v7431_v29, %v7326_v24  ;;  %v3002_v27 = vadd.f32 %v7421_v39, %v2660_v22 }
 0x1d2   : > { %4189 = vst.msk [vmem:[%s7537_s10] sm:$0xf] %vm4188_vm3, %v4796_v3  ;;  %v4799_v13 = vpack.c.bf16 %v4031_v36, %v4031_v36  ;;  %v4029_v48 = vmax.f32 %v3997_v45, 0.0  ;;  %v3961_v54 = vadd.f32 %v3846_v61, %v3527_v16  ;;  %v3530_v35 = vadd.f32 %v5333_v19, %v3000_v15 }
 0x1d3   : > { %v5372_v20 = vpop.f32.mrf.mxu0  ;;  %v4002_v11 = vadd.f32 %v7517_v12, %v3963_v59  ;;  %v3415_v40 = vpop.f32.mrf.mxu1  ;;  %v2663_v55 = vadd.f32 %v7435_v56, %v7329_v46  ;;  %v3007_v16 = vadd.f32 %v7425_v23, %v2665_v50 }
 0x1d4   : > { %4192 = vst.msk [vmem:[%s7537_s10 + $0xc] sm:$0xf] %vm4188_vm3, %v4799_v13  ;;  %v4797_v44 = vpack.c.bf16 %v4029_v48, %v4029_v48  ;;  %v4000_v25 = vadd.f32 %v7517_v12, %v3961_v54  ;;  %v3964_v4 = vadd.f32 %v5369_v53, %v3530_v35  ;;  %v3528_v33 = vadd.f32 %v3415_v40, %v2998_v49 }
 0x1d5   : > { %v3862_v61 = vpop.f32.mrf.mxu0  ;;  %v4034_v43 = vmax.f32 %v4002_v11, 0.0  ;;  %v5336_v60 = vpop.f32.mrf.mxu1  ;;  %v3005_v13 = vadd.f32 %v7429_v31, %v2663_v55  ;;  %v2666_v48 = vadd.f32 %v7439_v0, %v7332_v38  ;;  %v2664_v54 = vadd.f32 %v7443_v30, %v7335_v10 }
 0x1d6   : > { %4190 = vst.msk [vmem:[%s7537_s10 + $0x4] sm:$0xf] %vm4188_vm3, %v4797_v44  ;;  %v4032_v58 = vmax.f32 %v4000_v25, 0.0  ;;  %v4003_v63 = vadd.f32 %v7517_v12, %v3964_v4  ;;  %v3962_v5 = vadd.f32 %v3849_v7, %v3528_v33  ;;  %v3533_v1 = vadd.f32 %v5336_v60, %v3003_v17 }
 0x1d7   : > { %v5373_v28 = vpop.f32.mrf.mxu0  ;;  %v4802_v62 = vpack.c.bf16 %v4034_v43, %v4034_v43  ;;  %v3428_v18 = vpop.f32.mrf.mxu1  ;;  %v2669_v31 = vadd.f32 %v7447_v52, %v7338_v57  ;;  %v3008_v4 = vadd.f32 %v7433_v9, %v2666_v48  ;;  %v3006_v33 = vadd.f32 %v7437_v47, %v2664_v54  ;;  %v7936_v48 = vld [vmem:[#allocation25_spill] sm:$0xff] }
 0x1d8   : > { %v4800_v8 = vpack.c.bf16 %v4032_v58, %v4032_v58  ;;  %v4035_v32 = vmax.f32 %v4003_v63, 0.0  ;;  %v4001_v53 = vadd.f32 %v7517_v12, %v3962_v5  ;;  %v3967_v15 = vadd.f32 %v5372_v20, %v3533_v1  ;;  %v7927_v1 = vld [vmem:[#allocation2_spill] sm:$0xff] }
 0x1d9   : > { %v3865_v6 = vpop.f32.mrf.mxu0  ;;  %4195 = vst.msk [vmem:[%s7537_s10 + $0x18] sm:$0xf] %vm4188_vm3, %v4802_v62  ;;  %v3531_v14 = vadd.f32 %v3428_v18, %v3001_v26  ;;  %v5337_v41 = vpop.f32.mrf.mxu1  ;;  %v3011_v5 = vadd.f32 %v7441_v21, %v2669_v31  ;;  %v7929_v18 = vld [vmem:[#allocation16_spill] sm:$0xff]  ;;  %v7937_v31 = vld [vmem:[#allocation18_spill] sm:$0xff] }
 0x1da   : > { %4193 = vst.msk [vmem:[%s7537_s10 + $0x10] sm:$0xf] %vm4188_vm3, %v4800_v8  ;;  %v4803_v24 = vpack.c.bf16 %v4035_v32, %v4035_v32  ;;  %v4033_v29 = vmax.f32 %v4001_v53, 0.0  ;;  %v4006_v3 = vadd.f32 %v7517_v12, %v3967_v15  ;;  %v3534_v36 = vadd.f32 %v5337_v41, %v3004_v37 }
 0x1db   : > { %v5376_v45 = vpop.f32.mrf.mxu0  ;;  %v3965_v7 = vadd.f32 %v3862_v61, %v3531_v14  ;;  %v3431_v39 = vpop.f32.mrf.mxu1  ;;  %v2667_v61 = vadd.f32 %v7451_v42, %v7341_v51  ;;  %v7930_v14 = vld [vmem:[#allocation17_spill] sm:$0xff] }
 0x1dc   : > { %4196 = vst.msk [vmem:[%s7537_s10 + $0x1c] sm:$0xf] %vm4188_vm3, %v4803_v24  ;;  %v4801_v46 = vpack.c.bf16 %v4033_v29, %v4033_v29  ;;  %v4038_v56 = vmax.f32 %v4006_v3, 0.0  ;;  %v3968_v49 = vadd.f32 %v5373_v28, %v3534_v36  ;;  %v3532_v59 = vadd.f32 %v3431_v39, %v3002_v27  ;;  %v7928_v28 = vld [vmem:[#allocation19_spill] sm:$0xff]  ;;  %v7932_v29 = vld [vmem:[#allocation21_spill] sm:$0xff]  ;;  %v7933_v36 = vld [vmem:[#allocation4_spill] sm:$0xff] }
 0x1dd   : > { %v3878_v19 = vpop.f32.mrf.mxu0  ;;  %v4004_v23 = vadd.f32 %v7517_v12, %v3965_v7  ;;  %v2670_v26 = vadd.f32 %v7928_v28, %v7927_v1  ;;  %v3009_v8 = vadd.f32 %v7929_v18, %v2667_v61  ;;  %v7931_v24 = vld [vmem:[#allocation3_spill] sm:$0xff] }
 0x1de   : > { %v5340_v35 = vpop.f32.mrf.mxu1  ;;  %4194 = vst.msk [vmem:[%s7537_s10 + $0x14] sm:$0xf] %vm4188_vm3, %v4801_v46  ;;  %v4806_v20 = vpack.c.bf16 %v4038_v56, %v4038_v56  ;;  %v4007_v17 = vadd.f32 %v7517_v12, %v3968_v49  ;;  %v3966_v34 = vadd.f32 %v3865_v6, %v3532_v59  ;;  %v2668_v3 = vadd.f32 %v7932_v29, %v7931_v24  ;;  %v7948_v24 = vld [vmem:[#allocation9_spill] sm:$0xff] }
 0x1df   : > { %v3537_v2 = vadd.f32 %v5340_v35, %v3007_v16  ;;  %v5377_v11 = vpop.f32.mrf.mxu0  ;;  %v4036_v40 = vmax.f32 %v4004_v23, 0.0  ;;  %v3012_v41 = vadd.f32 %v7930_v14, %v2670_v26  ;;  %v7947_v14 = vld [vmem:[#allocation31_spill] sm:$0xff]  ;;  %v7949_v29 = vld [vmem:[#allocation33_spill] sm:$0xff] }
 0x1e0   : > { %v3444_v44 = vpop.f32.mrf.mxu1  ;;  %4199 = vst.msk [vmem:[%s7537_s10 + $0x28] sm:$0xf] %vm4188_vm3, %v4806_v20  ;;  %v4039_v38 = vmax.f32 %v4007_v17, 0.0  ;;  %v4005_v10 = vadd.f32 %v7517_v12, %v3966_v34 }
 0x1e1   : > { %v3971_v30 = vadd.f32 %v5376_v45, %v3537_v2  ;;  %v3535_v0 = vadd.f32 %v3444_v44, %v3005_v13  ;;  %v3881_v25 = vpop.f32.mrf.mxu0  ;;  %v4804_v57 = vpack.c.bf16 %v4036_v40, %v4036_v40  ;;  %v7934_v45 = vld [vmem:[#allocation23_spill] sm:$0xff]  ;;  %v7935_v13 = vld [vmem:[#allocation5_spill] sm:$0xff]  ;;  %v3010_v40 = vadd.f32 %v7937_v31, %v2668_v3  ;;  %v7938_v44 = vld [vmem:[#allocation20_spill] sm:$0xff] }
 0x1e2   : > { %v5341_v52 = vpop.f32.mrf.mxu1  ;;  %v4807_v22 = vpack.c.bf16 %v4039_v38, %v4039_v38  ;;  %v4037_v43 = vmax.f32 %v4005_v10, 0.0  ;;  %v2673_v16 = vadd.f32 %v7934_v45, %v7933_v36  ;;  %v2671_v54 = vadd.f32 %v7936_v48, %v7935_v13  ;;  %v7939_v10 = vld [vmem:[#allocation6_spill] sm:$0xff] }
 0x1e3   : > { %v4010_v60 = vadd.f32 %v7517_v12, %v3971_v30  ;;  %v3969_v58 = vadd.f32 %v3878_v19, %v3535_v0  ;;  %v5380_v63 = vpop.f32.mrf.mxu0  ;;  %4197 = vst.msk [vmem:[%s7537_s10 + $0x20] sm:$0xf] %vm4188_vm3, %v4804_v57  ;;  %v3538_v9 = vadd.f32 %v5341_v52, %v3008_v4  ;;  %v7940_v30 = vld [vmem:[#allocation27_spill] sm:$0xff]  ;;  %v2675_v3 = vadd.f32 %v7949_v29, %v7948_v24 }
 0x1e4   : > { %v3447_v47 = vpop.f32.mrf.mxu1  ;;  %4200 = vst.msk [vmem:[%s7537_s10 + $0x2c] sm:$0xf] %vm4188_vm3, %v4807_v22  ;;  %v4805_v51 = vpack.c.bf16 %v4037_v43, %v4037_v43  ;;  %v3015_v38 = vadd.f32 %v7938_v44, %v2673_v16  ;;  %v2674_v0 = vadd.f32 %v7940_v30, %v7939_v10  ;;  %v7941_v43 = vld [vmem:[#allocation22_spill] sm:$0xff]  ;;  %v7955_v44 = vld [vmem:[#allocation37_spill] sm:$0xff] }
 0x1e5   : > { %v4042_v42 = vmax.f32 %v4010_v60, 0.0  ;;  %v4008_v37 = vadd.f32 %v7517_v12, %v3969_v58  ;;  %v3536_v50 = vadd.f32 %v3447_v47, %v3006_v33  ;;  %v3894_v62 = vpop.f32.mrf.mxu0  ;;  %v3972_v32 = vadd.f32 %v5377_v11, %v3538_v9  ;;  %v7942_v58 = vld [vmem:[#allocation7_spill] sm:$0xff] }
 0x1e6   : > { %v5344_v21 = vpop.f32.mrf.mxu1  ;;  %4198 = vst.msk [vmem:[%s7537_s10 + $0x24] sm:$0xf] %vm4188_vm3, %v4805_v51  ;;  %v3013_v60 = vadd.f32 %v7941_v43, %v2671_v54  ;;  %v7958_v43 = vld [vmem:[#allocation39_spill] sm:$0xff] }
 0x1e7   : > { %v4810_v53 = vpack.c.bf16 %v4042_v42, %v4042_v42  ;;  %v4040_v15 = vmax.f32 %v4008_v37, 0.0  ;;  %v3970_v6 = vadd.f32 %v3881_v25, %v3536_v50  ;;  %v3541_v27 = vadd.f32 %v5344_v21, %v3011_v5  ;;  %v5381_v55 = vpop.f32.mrf.mxu0  ;;  %v7944_v37 = vld [vmem:[#allocation24_spill] sm:$0xff] }
 0x1e8   : > { %v4011_v7 = vadd.f32 %v7517_v12, %v3972_v32  ;;  %v3460_v39 = vpop.f32.mrf.mxu1  ;;  %v3016_v50 = vadd.f32 %v7944_v37, %v2674_v0 }
 0x1e9   : > { %4203 = vst.msk [vmem:[%s7537_s10 + $0x38] sm:$0xf] %vm4188_vm3, %v4810_v53  ;;  %v4808_v46 = vpack.c.bf16 %v4040_v15, %v4040_v15  ;;  %v4009_v56 = vadd.f32 %v7517_v12, %v3970_v6  ;;  %v3975_v49 = vadd.f32 %v5380_v63, %v3541_v27  ;;  %v3539_v59 = vadd.f32 %v3460_v39, %v3009_v8  ;;  %v3897_v19 = vpop.f32.mrf.mxu0  ;;  %v7943_v63 = vld [vmem:[#allocation29_spill] sm:$0xff]  ;;  %v7945_v6 = vld [vmem:[#allocation26_spill] sm:$0xff] }
 0x1ea   : > { %v4043_v23 = vmax.f32 %v4011_v7, 0.0  ;;  %v5345_v35 = vpop.f32.mrf.mxu1  ;;  %v2672_v5 = vadd.f32 %v7943_v63, %v7942_v58 }
 0x1eb   : > { %4201 = vst.msk [vmem:[%s7537_s10 + $0x30] sm:$0xf] %vm4188_vm3, %v4808_v46  ;;  %v4041_v20 = vmax.f32 %v4009_v56, 0.0  ;;  %v4014_v17 = vadd.f32 %v7517_v12, %v3975_v49  ;;  %v3973_v34 = vadd.f32 %v3894_v62, %v3539_v59  ;;  %v3542_v2 = vadd.f32 %v5345_v35, %v3012_v41  ;;  %v5384_v11 = vpop.f32.mrf.mxu0  ;;  %v7950_v49 = vld [vmem:[#allocation10_spill] sm:$0xff]  ;;  %v7951_v59 = vld [vmem:[#allocation35_spill] sm:$0xff] }
 0x1ec   : > { %v4811_v25 = vpack.c.bf16 %v4043_v23, %v4043_v23  ;;  %v3463_v4 = vpop.f32.mrf.mxu1  ;;  %v3014_v27 = vadd.f32 %v7945_v6, %v2672_v5  ;;  %v7962_v6 = vld [vmem:[#allocation41_spill] sm:$0xff] }
 0x1ed   : > { %v4809_v33 = vpack.c.bf16 %v4041_v20, %v4041_v20  ;;  %v4046_v61 = vmax.f32 %v4014_v17, 0.0  ;;  %v4012_v57 = vadd.f32 %v7517_v12, %v3973_v34  ;;  %v3976_v52 = vadd.f32 %v5381_v55, %v3542_v2  ;;  %v3910_v22 = vpop.f32.mrf.mxu0  ;;  %v7946_v55 = vld [vmem:[#allocation8_spill] sm:$0xff] }
 0x1ee   : > { %4204 = vst.msk [vmem:[%s7537_s10 + $0x3c] sm:$0xf] %vm4188_vm3, %v4811_v25  ;;  %v3540_v1 = vadd.f32 %v3463_v4, %v3010_v40  ;;  %v5348_v28 = vpop.f32.mrf.mxu1  ;;  %v2677_v41 = vadd.f32 %v7947_v14, %v7946_v55  ;;  %v7952_v34 = vld [vmem:[#allocation28_spill] sm:$0xff]  ;;  %v7954_v40 = vld [vmem:[#allocation11_spill] sm:$0xff]  ;;  %v7963_v55 = vld [vmem:[#allocation14_spill] sm:$0xff] }
 0x1ef   : > { %4202 = vst.msk [vmem:[%s7537_s10 + $0x34] sm:$0xf] %vm4188_vm3, %v4809_v33  ;;  %v4814_v26 = vpack.c.bf16 %v4046_v61, %v4046_v61  ;;  %v4044_v9 = vmax.f32 %v4012_v57, 0.0  ;;  %v4015_v47 = vadd.f32 %v7517_v12, %v3976_v52  ;;  %v3545_v51 = vadd.f32 %v5348_v28, %v3015_v38  ;;  %v5385_v42 = vpop.f32.mrf.mxu0  ;;  %v7956_v57 = vld [vmem:[#allocation32_spill] sm:$0xff]  ;;  %v7964_v14 = vld [vmem:[#allocation43_spill] sm:$0xff] }
 0x1f0   : > { %v3974_v62 = vadd.f32 %v3897_v19, %v3540_v1  ;;  %v3476_v18 = vpop.f32.mrf.mxu1  ;;  %v2678_v19 = vadd.f32 %v7951_v59, %v7950_v49  ;;  %v3019_v2 = vadd.f32 %v7952_v34, %v2677_v41  ;;  %v2676_v38 = vadd.f32 %v7955_v44, %v7954_v40 }
 0x1f1   : > { %4207 = vst.msk [vmem:[%s7537_s10 + $0x48] sm:$0xf] %vm4188_vm3, %v4814_v26  ;;  %v4812_v8 = vpack.c.bf16 %v4044_v9, %v4044_v9  ;;  %v4047_v32 = vmax.f32 %v4015_v47, 0.0  ;;  %v3979_v21 = vadd.f32 %v5384_v11, %v3545_v51  ;;  %v3543_v53 = vadd.f32 %v3476_v18, %v3013_v60  ;;  %v3913_v15 = vpop.f32.mrf.mxu0  ;;  %v7953_v11 = vld [vmem:[#allocation30_spill] sm:$0xff] }
 0x1f2   : > { %v4013_v36 = vadd.f32 %v7517_v12, %v3974_v62  ;;  %v5349_v45 = vpop.f32.mrf.mxu1  ;;  %v3017_v31 = vadd.f32 %v7953_v11, %v2675_v3  ;;  %v3020_v52 = vadd.f32 %v7956_v57, %v2678_v19  ;;  %v7959_v47 = vld [vmem:[#allocation34_spill] sm:$0xff]  ;;  %v2682_v41 = vadd.f32 %v7964_v14, %v7963_v55 }
 0x1f3   : > { %4205 = vst.msk [vmem:[%s7537_s10 + $0x40] sm:$0xf] %vm4188_vm3, %v4812_v8  ;;  %v4815_v16 = vpack.c.bf16 %v4047_v32, %v4047_v32  ;;  %v4018_v7 = vadd.f32 %v7517_v12, %v3979_v21  ;;  %v3977_v39 = vadd.f32 %v3910_v22, %v3543_v53  ;;  %v3546_v46 = vadd.f32 %v5349_v45, %v3016_v50  ;;  %v5388_v56 = vpop.f32.mrf.mxu0  ;;  %v7957_v22 = vld [vmem:[#allocation12_spill] sm:$0xff] }
 0x1f4   : > { %v4045_v13 = vmax.f32 %v4013_v36, 0.0  ;;  %v3479_v48 = vpop.f32.mrf.mxu1  ;;  %v2681_v60 = vadd.f32 %v7958_v43, %v7957_v22  ;;  %v3018_v51 = vadd.f32 %v7959_v47, %v2676_v38  ;;  %v7960_v21 = vld [vmem:[#allocation36_spill] sm:$0xff]  ;;  %v7969_v38 = vld [vmem:[#allocation42_spill] sm:$0xff] }
 0x1f5   : > { %4208 = vst.msk [vmem:[%s7537_s10 + $0x4c] sm:$0xf] %vm4188_vm3, %v4815_v16  ;;  %v4050_v54 = vmax.f32 %v4018_v7, 0.0  ;;  %v4016_v23 = vadd.f32 %v7517_v12, %v3977_v39  ;;  %v3980_v35 = vadd.f32 %v5385_v42, %v3546_v46  ;;  %v3544_v20 = vadd.f32 %v3479_v48, %v3014_v27  ;;  %v3926_v17 = vpop.f32.mrf.mxu0  ;;  %v7965_v7 = vld [vmem:[#allocation15_spill] sm:$0xff]  ;;  %v7966_v39 = vld [vmem:[#allocation44_spill] sm:$0xff] }
 0x1f6   : > { %v4813_v10 = vpack.c.bf16 %v4045_v13, %v4045_v13  ;;  %v5352_v30 = vpop.f32.mrf.mxu1  ;;  %v3023_v53 = vadd.f32 %v7960_v21, %v2681_v60  ;;  %v2680_v46 = vadd.f32 %v7966_v39, %v7965_v7 }
 0x1f7   : > { %v4818_v0 = vpack.c.bf16 %v4050_v54, %v4050_v54  ;;  %v4048_v25 = vmax.f32 %v4016_v23, 0.0  ;;  %v4019_v4 = vadd.f32 %v7517_v12, %v3980_v35  ;;  %v3978_v33 = vadd.f32 %v3913_v15, %v3544_v20  ;;  %v5389_v61 = vpop.f32.mrf.mxu0  ;;  %v7961_v15 = vld [vmem:[#allocation13_spill] sm:$0xff]  ;;  %v7967_v23 = vld [vmem:[#allocation38_spill] sm:$0xff]  ;;  %v7968_v20 = vld [vmem:[#allocation40_spill] sm:$0xff] }
 0x1f8   : > { %4206 = vst.msk [vmem:[%s7537_s10 + $0x44] sm:$0xf] %vm4188_vm3, %v4813_v10  ;;  %v3549_v58 = vadd.f32 %v5352_v30, %v3019_v2  ;;  %v3492_v63 = vpop.f32.mrf.mxu1  ;;  %v2679_v27 = vadd.f32 %v7962_v6, %v7961_v15  ;;  %v3022_v10 = vadd.f32 %v7969_v38, %v2680_v46 }
 0x1f9   : > { %4211 = vst.msk [vmem:[%s7537_s10 + $0x58] sm:$0xf] %vm4188_vm3, %v4818_v0  ;;  %v4816_v5 = vpack.c.bf16 %v4048_v25, %v4048_v25  ;;  %v4051_v1 = vmax.f32 %v4019_v4, 0.0  ;;  %v4017_v28 = vadd.f32 %v7517_v12, %v3978_v33  ;;  %v3547_v26 = vadd.f32 %v3492_v63, %v3017_v31  ;;  %v3929_v9 = vpop.f32.mrf.mxu0 }
 0x1fa   : > { %v3983_v42 = vadd.f32 %v5388_v56, %v3549_v58  ;;  %v5353_v37 = vpop.f32.mrf.mxu1  ;;  %v3021_v35 = vadd.f32 %v7967_v23, %v2679_v27 }
 0x1fb   : > { %4209 = vst.msk [vmem:[%s7537_s10 + $0x50] sm:$0xf] %vm4188_vm3, %v4816_v5  ;;  %v4819_v50 = vpack.c.bf16 %v4051_v1, %v4051_v1  ;;  %v4049_v62 = vmax.f32 %v4017_v28, 0.0  ;;  %v3981_v18 = vadd.f32 %v3926_v17, %v3547_v26  ;;  %v3550_v8 = vadd.f32 %v5353_v37, %v3020_v52  ;;  %v5392_v32 = vpop.f32.mrf.mxu0 }
 0x1fc   : > { %v4022_v24 = vadd.f32 %v7517_v12, %v3983_v42  ;;  %v3495_v29 = vpop.f32.mrf.mxu1  ;;  %v3024_v17 = vadd.f32 %v7968_v20, %v2682_v41 }
 0x1fd   : > { %4212 = vst.msk [vmem:[%s7537_s10 + $0x5c] sm:$0xf] %vm4188_vm3, %v4819_v50  ;;  %v4817_v3 = vpack.c.bf16 %v4049_v62, %v4049_v62  ;;  %v4020_v36 = vadd.f32 %v7517_v12, %v3981_v18  ;;  %v3984_v45 = vadd.f32 %v5389_v61, %v3550_v8  ;;  %v3548_v16 = vadd.f32 %v3495_v29, %v3018_v51  ;;  %v3942_v59 = vpop.f32.mrf.mxu0 }
 0x1fe   : > { %v4054_v56 = vmax.f32 %v4022_v24, 0.0  ;;  %v5356_v49 = vpop.f32.mrf.mxu1 }
 0x1ff   : > { %4210 = vst.msk [vmem:[%s7537_s10 + $0x54] sm:$0xf] %vm4188_vm3, %v4817_v3  ;;  %v4052_v19 = vmax.f32 %v4020_v36, 0.0  ;;  %v4023_v13 = vadd.f32 %v7517_v12, %v3984_v45  ;;  %v3982_v48 = vadd.f32 %v3929_v9, %v3548_v16  ;;  %v3553_v54 = vadd.f32 %v5356_v49, %v3023_v53  ;;  %v5393_v25 = vpop.f32.mrf.mxu0 }
 0x200   : > { %v4822_v34 = vpack.c.bf16 %v4054_v56, %v4054_v56  ;;  %v3508_v2 = vpop.f32.mrf.mxu1 }
 0x201   : > { %v4820_v11 = vpack.c.bf16 %v4052_v19, %v4052_v19  ;;  %v4055_v31 = vmax.f32 %v4023_v13, 0.0  ;;  %v4021_v40 = vadd.f32 %v7517_v12, %v3982_v48  ;;  %v3987_v44 = vadd.f32 %v5392_v32, %v3553_v54  ;;  %v3945_v1 = vpop.f32.mrf.mxu0 }
 0x202   : > { %4215 = vst.msk [vmem:[%s7537_s10 + $0x68] sm:$0xf] %vm4188_vm3, %v4822_v34  ;;  %v3551_v30 = vadd.f32 %v3508_v2, %v3021_v35  ;;  %v5357_v0 = vpop.f32.mrf.mxu1 }
 0x203   : > { %4213 = vst.msk [vmem:[%s7537_s10 + $0x60] sm:$0xf] %vm4188_vm3, %v4820_v11  ;;  %v4823_v4 = vpack.c.bf16 %v4055_v31, %v4055_v31  ;;  %v4053_v33 = vmax.f32 %v4021_v40, 0.0  ;;  %v4026_v61 = vadd.f32 %v7517_v12, %v3987_v44  ;;  %v3554_v57 = vadd.f32 %v5357_v0, %v3024_v17 }
 0x204   : > { %v3985_v52 = vadd.f32 %v3942_v59, %v3551_v30  ;;  %v3511_v22 = vpop.f32.mrf.mxu1 }
 0x205   : > { %4216 = vst.msk [vmem:[%s7537_s10 + $0x6c] sm:$0xf] %vm4188_vm3, %v4823_v4  ;;  %v4821_v43 = vpack.c.bf16 %v4053_v33, %v4053_v33  ;;  %v4058_v60 = vmax.f32 %v4026_v61, 0.0  ;;  %v3988_v58 = vadd.f32 %v5393_v25, %v3554_v57  ;;  %v3552_v63 = vadd.f32 %v3511_v22, %v3022_v10 }
 0x206   : > { %v4024_v5 = vadd.f32 %v7517_v12, %v3985_v52 }
 0x207   : > { %4214 = vst.msk [vmem:[%s7537_s10 + $0x64] sm:$0xf] %vm4188_vm3, %v4821_v43  ;;  %v4826_v28 = vpack.c.bf16 %v4058_v60, %v4058_v60  ;;  %v4027_v26 = vadd.f32 %v7517_v12, %v3988_v58  ;;  %v3986_v9 = vadd.f32 %v3945_v1, %v3552_v63 }
 0x208   : > { %v4056_v47 = vmax.f32 %v4024_v5, 0.0 }
 0x209   : > { %4219 = vst.msk [vmem:[%s7537_s10 + $0x78] sm:$0xf] %vm4188_vm3, %v4826_v28  ;;  %v4059_v51 = vmax.f32 %v4027_v26, 0.0  ;;  %v4025_v42 = vadd.f32 %v7517_v12, %v3986_v9 }
 0x20a   : > { %v4824_v37 = vpack.c.bf16 %v4056_v47, %v4056_v47 }
 0x20b   : > { %v4827_v50 = vpack.c.bf16 %v4059_v51, %v4059_v51  ;;  %v4057_v62 = vmax.f32 %v4025_v42, 0.0 }
 0x20c   : > { %4217 = vst.msk [vmem:[%s7537_s10 + $0x70] sm:$0xf] %vm4188_vm3, %v4824_v37 }
 0x20d   : > { %4220 = vst.msk [vmem:[%s7537_s10 + $0x7c] sm:$0xf] %vm4188_vm3, %v4827_v50  ;;  %v4825_v18 = vpack.c.bf16 %v4057_v62, %v4057_v62 }
 0x20f   : > { %4218 = vst.msk [vmem:[%s7537_s10 + $0x74] sm:$0xf] %vm4188_vm3, %v4825_v18 }
 0x210 PF: > { %s13_s14 = sadd.s32 1, %s5527_s14   ;;  %s7970_s12 = smov %s5523_s13 }
 0x211   : > { %p10_p5 = scmp.ge.s32.totalorder %s13_s14, 4   ;;  %s7971_s13 = smov %s7973_s15 }
 0x213   :  { %12 = sbr.rel (!%p10_p5) target bundleno = 2 (0x2), region = 73 }

// kernel: _lambda_.13
= control target key start
LH: loop header
LB: loop body
LE: loop exit
PB: predicated region body
PF: predicated region fallthrough
CT: control target
= control target key end

     0   :  { %s2427_s12 = smov 0   ;;  %s2429_s13 = smov 0   ;;  %s2826_s0 = inlined_call_operand.vmem [shape: bf16[2,10,10,64], index: 0, kind: input, shape index: {}]   ;;  %s2827_s1 = inlined_call_operand.vmem [shape: bf16[9,64,64], index: 1, kind: input, shape index: {}]   ;;  %s2828_s2 = inlined_call_operand.vmem [shape: f32[1,64], index: 2, kind: input, shape index: {}]   ;;  %s2829_s3 = inlined_call_operand.vmem [shape: bf16[2,8,8,64], index: 3, kind: output, shape index: {}]  }
   0x1   :  { %s2431_s14 = smov 0  }
   0x2 LB: > { %s25_s15 = sadd.s32 1, %s2401_s13  ;;  %p1866_p0 = scmp.ge.s32.totalorder %s2405_s14, 1  ;;  %s2405_s14 = sphi %s2431_s14, %s13_s14   ;;  %s2401_s13 = sphi %s2429_s13, %s2833_s13   ;;  %s2397_s12 = sphi %s2427_s12, %s2832_s12  }
   0x3   : > { %p27_p1 = scmp.ge.s32.totalorder %s25_s15, 2  ;;  %p151_p2 = scmp.lt.s32.totalorder %s2405_s14, 3 }
   0x5   : > { %s2835_s15 = smov (%p27_p1, %s25_s15), 0  ;;  %p152_p3 = pnand %p1866_p0, %p151_p2 }
   0x7   : > { %155 = sbr.rel (%p152_p3) target bundleno = 302 (0x12e), region = 32 }
   0xc   : > { %v2335_v0 = vld [vmem:[%s2827_s1 + $0x38] sm:$0xff]   ;;  %p179_p4 = scmp.lt.s32.totalorder %s2397_s12, 1  ;;  %v2337_v2 = vld [vmem:[%s2827_s1 + $0x30] sm:$0xff]   ;;  %v2339_v4 = vld [vmem:[%s2827_s1 + $0x28] sm:$0xff]   ;;  %vm259_vm0 = vcmask 1046528   ;;  %vm329_vm1 = vcmask 523264  }
   0xd   : > { %v2336_v1 = vld [vmem:[%s2827_s1 + $0x18] sm:$0xff]   ;;  %2158 = vmatprep.subr.bf16.mxu0 %v2335_v0  ;;  %v2338_v3 = vld [vmem:[%s2827_s1 + $0x10] sm:$0xff]   ;;  %v2340_v5 = vld [vmem:[%s2827_s1 + $0x8] sm:$0xff]   ;;  %vm532_vm2 = vcmask 1045504   ;;  %vm1762_vm3 = vcmask 519168  }
   0xe   : > { %s2837_s12 = smov (!%p179_p4, %s2397_s12), 1  ;;  %2174 = vmatprep.subr.bf16.mxu1 %v2336_v1  ;;  %2159 = vmatpush3.bf16.msra.mxu0 %v2335_v0  ;;  %v2341_v6 = vld [vmem:[%s2827_s1 + $0x20] sm:$0xff]   ;;  %v2345_v30 = vld [vmem:[%s2827_s1 + $0x58] sm:$0xff]   ;;  %v2347_v42 = vld [vmem:[%s2827_s1 + $0x50] sm:$0xff]  }
   0xf   : > { %2175 = vmatpush3.bf16.msra.mxu1 %v2336_v1  ;;  %2160 = vmatprep.subr.bf16.mxu0 %v2337_v2  ;;  %s2310_s26 = smul.u32 80, %s2837_s12  ;;  %v2342_v7 = vld [vmem:[%s2827_s1] sm:$0xff]   ;;  %v2346_v31 = vld [vmem:[%s2827_s1 + $0x78] sm:$0xff]   ;;  %v2348_v43 = vld [vmem:[%s2827_s1 + $0x70] sm:$0xff]  }
  0x10   : > { %2176 = vmatprep.subr.bf16.mxu1 %v2338_v3 }
  0x11   : > { %s2472_s6 = scalar_lea.vmem %s2826_s0, %s2310_s26  ;;  %s2085_s26 = sshll.u32 %s2837_s12, 5 }
  0x12   : > { %2161 = vmatpush3.bf16.msra.mxu0 %v2337_v2  ;;  %v199_v8 = vld [vmem:[%s2472_s6] sm:$0xf]  ;;  %v200_v9 = vld [vmem:[%s2472_s6 + $0x8] sm:$0xf]  ;;  %v227_v10 = vld [vmem:[%s2472_s6 + $0x4] sm:$0x1]  ;;  %s2799_s29 = scalar_lea.vmem %s2829_s3, %s2085_s26 }
  0x13   : > { %2177 = vmatpush3.bf16.msra.mxu1 %v2338_v3  ;;  %2162 = vmatprep.subr.bf16.mxu0 %v2339_v4  ;;  %v207_v11 = vunpack.c.l.bf16 %v199_v8  ;;  %v208_v12 = vunpack.c.l.bf16 %v200_v9  ;;  %v228_v13 = vld [vmem:[%s2472_s6 + $0xc] sm:$0x1]  ;;  %v235_v14 = vunpack.c.l.bf16 %v227_v10  ;;  %v1870_v15 = vcombine.low %v199_v8, %v200_v9  ;;  %v201_v16 = vld [vmem:[%s2472_s6 + $0x10] sm:$0xf]  ;;  %v202_v17 = vld [vmem:[%s2472_s6 + $0x18] sm:$0xf] }
  0x14   : > { %2178 = vmatprep.subr.bf16.mxu1 %v2340_v5  ;;  %v236_v18 = vunpack.c.l.bf16 %v228_v13  ;;  %v209_v19 = vunpack.c.l.bf16 %v201_v16  ;;  %v210_v20 = vunpack.c.l.bf16 %v202_v17  ;;  %v229_v21 = vld [vmem:[%s2472_s6 + $0x14] sm:$0x1]  ;;  %v2485_v22 = vld [vmem:[%s2472_s6 + $0x1c] sm:$0x1]  ;;  %v1871_v41 = vcombine.low %v201_v16, %v202_v17  ;;  %v203_v46 = vld [vmem:[%s2472_s6 + $0x20] sm:$0xf] }
  0x15   : > { %v260_v23 = vrot.slane %v207_v11, 1  ;;  %v261_v24 = vrot.slane %v235_v14, 1  ;;  %v263_v25 = vrot.slane %v208_v12, 1  ;;  %2182 = vmatprep.mubr.msk.bf16.mxu1 %vm329_vm1, %v1870_v15  ;;  %v2488_v27 = vrot.slane %v235_v14, 2  ;;  %v204_v47 = vld [vmem:[%s2472_s6 + $0x28] sm:$0xf] }
  0x16   : > { %2163 = vmatpush3.bf16.msra.mxu0 %v2339_v4  ;;  %v264_v26 = vrot.slane %v236_v18, 1  ;;  %v237_v28 = vunpack.c.l.bf16 %v229_v21  ;;  %v238_v29 = vunpack.c.l.bf16 %v2485_v22  ;;  %v266_v33 = vrot.slane %v209_v19, 1  ;;  %v2516_v48 = vld [vmem:[%s2472_s6 + $0x24] sm:$0x1]  ;;  %v2520_v52 = vld [vmem:[%s2472_s6 + $0x2c] sm:$0x1] }
  0x17   : > { %2179 = vmatpush3.bf16.msra.mxu1 %v2340_v5  ;;  %2164 = vmatprep.subr.bf16.mxu0 %v2341_v6  ;;  %v262_v32 = vsel %vm259_vm0, %v260_v23, %v261_v24  ;;  %v269_v34 = vrot.slane %v210_v20, 1  ;;  %v2499_v36 = vrot.slane %v236_v18, 2  ;;  %v211_v50 = vunpack.c.l.bf16 %v203_v46  ;;  %v205_v54 = vld [vmem:[%s2472_s6 + $0x30] sm:$0xf]  ;;  %v206_v55 = vld [vmem:[%s2472_s6 + $0x38] sm:$0xf] }
  0x18   : > { %2180 = vmatprep.subr.bf16.mxu1 %v2342_v7  ;;  %v265_v35 = vsel %vm259_vm0, %v263_v25, %v264_v26  ;;  %v267_v37 = vrot.slane %v237_v28, 1  ;;  %v270_v38 = vrot.slane %v238_v29, 1  ;;  %v2503_v40 = vrot.slane %v237_v28, 2  ;;  %v2527_v60 = vld [vmem:[%s2472_s6 + $0x34] sm:$0x1]  ;;  %v2351_v8 = vld [vmem:[%s2827_s1 + $0x48] sm:$0xff]  }
  0x19   : > { %v292_v39 = vpack.c.bf16 %v265_v35, %v262_v32  ;;  %v212_v51 = vunpack.c.l.bf16 %v204_v47  ;;  %v239_v53 = vunpack.c.l.bf16 %v2516_v48  ;;  %v240_v56 = vunpack.c.l.bf16 %v2520_v52  ;;  %v2530_v61 = vld [vmem:[%s2472_s6 + $0x3c] sm:$0x1]  ;;  %v2352_v11 = vld [vmem:[%s2827_s1 + $0x68] sm:$0xff]   ;;  %v2353_v15 = vld [vmem:[%s2827_s1 + $0x40] sm:$0xff]  }
  0x1a   : > { %2165 = vmatpush3.bf16.msra.mxu0 %v2341_v6  ;;  %v268_v44 = vsel %vm259_vm0, %v266_v33, %v267_v37  ;;  %v271_v45 = vsel %vm259_vm0, %v269_v34, %v270_v38  ;;  %v1872_v57 = vcombine.low %v203_v46, %v204_v47  ;;  %v213_v58 = vunpack.c.l.bf16 %v205_v54  ;;  %v508_v16 = vld [vmem:[%s2472_s6] sm:$0xe]  ;;  %v509_v17 = vld [vmem:[%s2472_s6 + $0x8] sm:$0xe]  ;;  %v510_v25 = vld [vmem:[%s2472_s6 + $0x10] sm:$0xe] }
  0x1b   : > { %2181 = vmatpush3.bf16.msra.mxu1 %v2342_v7  ;;  %2190 = vmatprep.subr.bf16.mxu0 %v2345_v30  ;;  %v293_v49 = vpack.c.bf16 %v271_v45, %v268_v44  ;;  %v214_v59 = vunpack.c.l.bf16 %v206_v55  ;;  %v272_v62 = vrot.slane %v211_v50, 1  ;;  %v273_v63 = vrot.slane %v239_v53, 1  ;;  %v2354_v20 = vld [vmem:[%s2827_s1 + $0x60] sm:$0xff]   ;;  %v511_v26 = vld [vmem:[%s2472_s6 + $0x18] sm:$0xe]  ;;  %v2359_v45 = vld [vmem:[%s2827_s1 + $0x90] sm:$0xff]  }
  0x1c   : > { %2166 = vmatprep.mubr.msk.bf16.mxu0 %vm329_vm1, %v292_v39  ;;  %2206 = vmatprep.subr.bf16.mxu1 %v2346_v31  ;;  %v275_v0 = vrot.slane %v212_v51, 1  ;;  %v241_v1 = vunpack.c.l.bf16 %v2527_v60  ;;  %v276_v2 = vrot.slane %v240_v56, 1  ;;  %v242_v3 = vunpack.c.l.bf16 %v2530_v61  ;;  %v2357_v32 = vld [vmem:[%s2827_s1 + $0x98] sm:$0xff]   ;;  %v512_v46 = vld [vmem:[%s2472_s6 + $0x20] sm:$0xe]  ;;  %v2360_v48 = vld [vmem:[%s2827_s1 + $0xb0] sm:$0xff]  }
  0x1d   : > { %2167 = vmatmul.mubr.msk.bf16.vlgmr.msra.gmra.mxu0 %vm329_vm1, %v293_v49  ;;  %v278_v4 = vrot.slane %v213_v58, 1  ;;  %v281_v5 = vrot.slane %v214_v59, 1  ;;  %v274_v6 = vsel %vm259_vm0, %v272_v62, %v273_v63  ;;  %v1873_v14 = vcombine.low %v205_v54, %v206_v55  ;;  %v2356_v39 = vld [vmem:[%s2472_s6 + $0x18] ss:$8 sps:$4 sm:$0xff]   ;;  %v514_v52 = vld [vmem:[%s2472_s6 + $0x30] sm:$0xe] }
  0x1e   : > { %2183 = vmatmul.mubr.msk.bf16.vlgmr.msra.gmra.mxu1 %vm329_vm1, %v1871_v41  ;;  %2191 = vmatpush3.bf16.msra.mxu0 %v2345_v30  ;;  %v279_v7 = vrot.slane %v241_v1, 1  ;;  %v277_v9 = vsel %vm259_vm0, %v275_v0, %v276_v2  ;;  %v282_v10 = vrot.slane %v242_v3, 1  ;;  %v543_v18 = vrot.slane %v238_v29, 2  ;;  %v2355_v29 = vld [vmem:[%s2472_s6 + $0x8] ss:$8 sps:$4 sm:$0xff]   ;;  %v2358_v41 = vld [vmem:[%s2827_s1 + $0xb8] sm:$0xff]  }
  0x1f   : > { %2207 = vmatpush3.bf16.msra.mxu1 %v2346_v31  ;;  %2192 = vmatprep.subr.bf16.mxu0 %v2347_v42  ;;  %v294_v12 = vpack.c.bf16 %v277_v9, %v274_v6  ;;  %v516_v21 = vunpack.c.l.bf16 %v508_v16  ;;  %v517_v23 = vunpack.c.l.bf16 %v509_v17  ;;  %v518_v30 = vunpack.c.l.bf16 %v510_v25  ;;  %v2363_v59 = vld [vmem:[%s2827_s1 + $0x88] sm:$0xff]   ;;  %v2365_v6 = vld [vmem:[%s2827_s1 + $0x80] sm:$0xff]  }
  0x20   : > { %2208 = vmatprep.subr.bf16.mxu1 %v2348_v43  ;;  %2186 = vmatprep.mubr.msk.bf16.mxu1 %vm329_vm1, %v1872_v57  ;;  %v280_v13 = vsel %vm259_vm0, %v278_v4, %v279_v7  ;;  %v283_v19 = vsel %vm259_vm0, %v281_v5, %v282_v10  ;;  %v519_v31 = vunpack.c.l.bf16 %v511_v26  ;;  %v552_v47 = vrot.slane %v241_v1, 2  ;;  %v2364_v1 = vld [vmem:[%s2827_s1 + $0xa8] sm:$0xff]   ;;  %v2362_v4 = vld [vmem:[%s2472_s6 + $0x38] ss:$8 sps:$4 sm:$0xff]   ;;  %v1945_v10 = vld [vmem:[%s2472_s6 + $0x14] sm:$0x1] }
  0x21   : > { %2170 = vmatprep.mubr.msk.bf16.mxu0 %vm329_vm1, %v294_v12  ;;  %v295_v24 = vpack.c.bf16 %v283_v19, %v280_v13  ;;  %v533_v22 = vrot.slane %v516_v21, 2  ;;  %v536_v28 = vrot.slane %v517_v23, 2  ;;  %v539_v35 = vrot.slane %v518_v30, 2  ;;  %v2366_v7 = vld [vmem:[%s2827_s1 + $0xa0] sm:$0xff]   ;;  %v1943_v9 = vld [vmem:[%s2472_s6 + $0xc] sm:$0x1] }
  0x22   : > { %2193 = vmatpush3.bf16.msra.mxu0 %v2347_v42  ;;  %v542_v37 = vrot.slane %v519_v31, 2  ;;  %v520_v49 = vunpack.c.l.bf16 %v512_v46  ;;  %v555_v51 = vrot.slane %v242_v3, 2  ;;  %v522_v57 = vunpack.c.l.bf16 %v514_v52  ;;  %v1946_v19 = vld [vmem:[%s2472_s6 + $0x18] ss:$8 sps:$4 sm:$0xff]   ;;  %v1949_v21 = vld [vmem:[%s2472_s6 + $0x24] sm:$0x1] }
  0x23   : > { %2209 = vmatpush3.bf16.msra.mxu1 %v2348_v43  ;;  %2194 = vmatprep.subr.bf16.mxu0 %v2351_v8  ;;  %v535_v33 = vsel %vm532_vm2, %v533_v22, %v2488_v27  ;;  %v538_v34 = vsel %vm532_vm2, %v536_v28, %v2499_v36  ;;  %v541_v27 = vsel %vm532_vm2, %v539_v35, %v2503_v40  ;;  %v546_v36 = vrot.slane %v239_v53, 2  ;;  %v513_v40 = vld [vmem:[%s2472_s6 + $0x28] sm:$0xe]  ;;  %v515_v53 = vld [vmem:[%s2472_s6 + $0x38] sm:$0xe] }
  0x24   : > { %2210 = vmatprep.subr.bf16.mxu1 %v2352_v11  ;;  %v565_v38 = vpack.c.bf16 %v538_v34, %v535_v33  ;;  %v544_v42 = vsel %vm532_vm2, %v542_v37, %v543_v18  ;;  %v549_v43 = vrot.slane %v240_v56, 2  ;;  %v521_v50 = vunpack.c.l.bf16 %v513_v40  ;;  %v2361_v56 = vld [vmem:[%s2472_s6 + $0x28] ss:$8 sps:$4 sm:$0xff]   ;;  %v1976_v22 = vld [vmem:[%s2472_s6 + $0x18] sm:$0xe] }
  0x25   : > { %2171 = vmatmul.mubr.msk.bf16.gmra.mxu0 %vm329_vm1, %v295_v24  ;;  %v566_v44 = vpack.c.bf16 %v544_v42, %v541_v27  ;;  %v545_v54 = vrot.slane %v520_v49, 2  ;;  %v523_v58 = vunpack.c.l.bf16 %v515_v53  ;;  %v551_v62 = vrot.slane %v522_v57, 2  ;;  %v2369_v53 = vld [vmem:[%s2827_s1 + $0xd0] sm:$0xff]  }
  0x26   : > { %2187 = vmatmul.mubr.msk.bf16.gmra.mxu1 %vm329_vm1, %v1873_v14  ;;  %2195 = vmatpush3.bf16.msra.mxu0 %v2351_v8  ;;  %v548_v55 = vrot.slane %v521_v50, 2  ;;  %v1942_v8 = vld [vmem:[%s2472_s6 + $0x8] ss:$8 sps:$4 sm:$0xff]   ;;  %v846_v12 = vunpack.c.l.bf16 %v1943_v9  ;;  %v848_v16 = vunpack.c.l.bf16 %v1945_v10  ;;  %v849_v34 = vunpack.c.l.bf16 %v1946_v19  ;;  %v1957_v9 = vld [vmem:[%s2472_s6 + $0x44] sm:$0x1] }
  0x27   : > { %2211 = vmatpush3.bf16.msra.mxu1 %v2352_v11  ;;  %2196 = vmatprep.subr.bf16.mxu0 %v2353_v15  ;;  %v547_v60 = vsel %vm532_vm2, %v545_v54, %v546_v36  ;;  %v554_v63 = vrot.slane %v523_v58, 2  ;;  %v553_v2 = vsel %vm532_vm2, %v551_v62, %v552_v47  ;;  %v845_v11 = vunpack.c.l.bf16 %v1942_v8  ;;  %v1974_v14 = vld [vmem:[%s2472_s6 + $0x8] sm:$0xe]  ;;  %v2368_v36 = vld [vmem:[%s2827_s1 + $0xf8] sm:$0xff]   ;;  %v1951_v58 = vld [vmem:[%s2472_s6 + $0x2c] sm:$0x1] }
  0x28   : > { %2212 = vmatprep.subr.bf16.mxu1 %v2354_v20  ;;  %2214 = vmatprep.mubr.msk.bf16.mxu1 %vm329_vm1, %v2355_v29  ;;  %v550_v61 = vsel %vm532_vm2, %v548_v55, %v549_v43  ;;  %v847_v13 = vunpack.c.h.bf16 %v1942_v8  ;;  %v1039_v17 = vunpack.c.l.bf16 %v1974_v14  ;;  %v878_v24 = vrot.slane %v846_v12, 1  ;;  %v1950_v54 = vld [vmem:[%s2472_s6 + $0x28] ss:$8 sps:$4 sm:$0xff]   ;;  %v1955_v8 = vld [vmem:[%s2472_s6 + $0x3c] sm:$0x1] }
  0x29   : > { %2198 = vmatprep.mubr.msk.bf16.mxu0 %vm329_vm1, %v565_v38  ;;  %v567_v0 = vpack.c.bf16 %v550_v61, %v547_v60  ;;  %v556_v3 = vsel %vm532_vm2, %v554_v63, %v555_v51  ;;  %v877_v23 = vrot.slane %v845_v11, 1  ;;  %v1056_v26 = vrot.slane %v846_v12, 2  ;;  %v2367_v38 = vld [vmem:[%s2827_s1 + $0xd8] sm:$0xff]   ;;  %v2370_v11 = vld [vmem:[%s2827_s1 + $0xf0] sm:$0xff]  }
  0x2a   : > { %2197 = vmatpush3.bf16.msra.mxu0 %v2353_v15  ;;  %v568_v5 = vpack.c.bf16 %v556_v3, %v553_v2  ;;  %v1975_v15 = vld [vmem:[%s2472_s6 + $0x10] sm:$0xe]  ;;  %v880_v25 = vrot.slane %v847_v13, 1  ;;  %v881_v28 = vrot.slane %v848_v16, 1  ;;  %v1055_v29 = vrot.slane %v1039_v17, 2 }
  0x2b   : > { %2213 = vmatpush3.bf16.msra.mxu1 %v2354_v20  ;;  %2222 = vmatprep.subr.bf16.mxu0 %v2357_v32  ;;  %v1040_v18 = vunpack.c.l.bf16 %v1975_v15  ;;  %v1947_v20 = vld [vmem:[%s2472_s6 + $0x1c] sm:$0x1]  ;;  %v1059_v31 = vrot.slane %v848_v16, 2  ;;  %v879_v33 = vsel %vm259_vm0, %v877_v23, %v878_v24  ;;  %v851_v37 = vunpack.c.h.bf16 %v1946_v19  ;;  %v1979_v2 = vld [vmem:[%s2472_s6 + $0x30] sm:$0xe] }
  0x2c   : > { %2238 = vmatprep.subr.bf16.mxu1 %v2358_v41  ;;  %v850_v35 = vunpack.c.l.bf16 %v1947_v20  ;;  %v852_v42 = vunpack.c.l.bf16 %v1949_v21  ;;  %v853_v60 = vunpack.c.l.bf16 %v1950_v54  ;;  %v854_v62 = vunpack.c.l.bf16 %v1951_v58  ;;  %v1954_v3 = vld [vmem:[%s2472_s6 + $0x38] ss:$8 sps:$4 sm:$0xff]   ;;  %v2371_v21 = vld [vmem:[%s2827_s1 + $0xc8] sm:$0xff]  }
  0x2d   : > { %2199 = vmatmul.mubr.msk.bf16.vlgmr.msra.gmra.mxu0 %vm329_vm1, %v566_v44  ;;  %v1058_v30 = vrot.slane %v1040_v18, 2  ;;  %v886_v40 = vrot.slane %v851_v37, 1  ;;  %v855_v63 = vunpack.c.h.bf16 %v1950_v54  ;;  %v1980_v15 = vld [vmem:[%s2472_s6 + $0x38] sm:$0xe]  ;;  %v1044_v16 = vunpack.c.l.bf16 %v1979_v2  ;;  %v1981_v20 = vld [vmem:[%s2472_s6 + $0x40] sm:$0xe] }
  0x2e   : > { %2215 = vmatmul.mubr.msk.bf16.vlgmr.msra.gmra.mxu1 %vm329_vm1, %v2356_v39  ;;  %2223 = vmatpush3.bf16.msra.mxu0 %v2357_v32  ;;  %v1977_v32 = vld [vmem:[%s2472_s6 + $0x20] sm:$0xe]  ;;  %v882_v39 = vsel %vm259_vm0, %v880_v25, %v881_v28  ;;  %v884_v46 = vrot.slane %v850_v35, 1  ;;  %v887_v47 = vrot.slane %v852_v42, 1  ;;  %v1062_v51 = vrot.slane %v850_v35, 2 }
  0x2f   : > { %2239 = vmatpush3.bf16.msra.mxu1 %v2358_v41  ;;  %2224 = vmatprep.subr.bf16.mxu0 %v2359_v45  ;;  %v1057_v41 = vsel %vm532_vm2, %v1055_v29, %v1056_v26  ;;  %v1060_v27 = vsel %vm532_vm2, %v1058_v30, %v1059_v31  ;;  %v909_v43 = vpack.c.bf16 %v882_v39, %v879_v33  ;;  %v1042_v49 = vunpack.c.l.bf16 %v1977_v32  ;;  %v2372_v31 = vld [vmem:[%s2827_s1 + $0xe8] sm:$0xff]  }
  0x30   : > { %2240 = vmatprep.subr.bf16.mxu1 %v2360_v48  ;;  %2218 = vmatprep.mubr.msk.bf16.mxu1 %vm329_vm1, %v2361_v56  ;;  %v1087_v44 = vpack.c.bf16 %v1060_v27, %v1057_v41  ;;  %v1065_v52 = vrot.slane %v852_v42, 2  ;;  %v888_v55 = vsel %vm259_vm0, %v886_v40, %v887_v47  ;;  %v890_v12 = vrot.slane %v854_v62, 1  ;;  %v2026_v47 = vld [vmem:[%s2472_s6 + $0x10] ss:$8 sps:$4 sm:$0xff]  }
  0x31   : > { %2202 = vmatprep.mubr.msk.bf16.mxu0 %vm329_vm1, %v567_v0  ;;  %v1064_v57 = vrot.slane %v1042_v49, 2  ;;  %v892_v13 = vrot.slane %v855_v63, 1  ;;  %v1068_v18 = vrot.slane %v854_v62, 2  ;;  %v857_v25 = vunpack.c.l.bf16 %v1954_v3 }
  0x32   : > { %2225 = vmatpush3.bf16.msra.mxu0 %v2359_v45  ;;  %v883_v45 = vrot.slane %v849_v34, 1  ;;  %v858_v26 = vunpack.c.l.bf16 %v1955_v8  ;;  %v1070_v29 = vrot.slane %v1044_v16, 2  ;;  %v859_v30 = vunpack.c.h.bf16 %v1954_v3  ;;  %v2034_v16 = vld [vmem:[%s2472_s6 + $0x30] ss:$8 sps:$4 sm:$0xff]  }
  0x33   : > { %2241 = vmatpush3.bf16.msra.mxu1 %v2360_v48  ;;  %2226 = vmatprep.subr.bf16.mxu0 %v2363_v59  ;;  %v1041_v48 = vunpack.c.l.bf16 %v1976_v22  ;;  %v860_v32 = vunpack.c.l.bf16 %v1957_v9  ;;  %v895_v33 = vrot.slane %v857_v25, 1  ;;  %v1045_v35 = vunpack.c.l.bf16 %v1980_v15  ;;  %v2379_v25 = vld [vmem:[%s2472_s6 + $0x30] ss:$8 sps:$4 sm:$0xff]  }
  0x34   : > { %2242 = vmatprep.subr.bf16.mxu1 %v2364_v1  ;;  %v885_v50 = vsel %vm259_vm0, %v883_v45, %v884_v46  ;;  %v896_v34 = vrot.slane %v858_v26, 1  ;;  %v1046_v39 = vunpack.c.l.bf16 %v1981_v20  ;;  %v1074_v41 = vrot.slane %v858_v26, 2  ;;  %v2374_v45 = vld [vmem:[%s2827_s1 + $0xe0] sm:$0xff]   ;;  %v2037_v20 = vld [vmem:[%s2472_s6 + $0x3c] sm:$0x1] }
  0x35   : > { %2203 = vmatmul.mubr.msk.bf16.gmra.mxu0 %vm329_vm1, %v568_v5  ;;  %v1061_v56 = vrot.slane %v1041_v48, 2  ;;  %v910_v61 = vpack.c.bf16 %v888_v55, %v885_v50  ;;  %v1066_v5 = vsel %vm532_vm2, %v1064_v57, %v1065_v52  ;;  %v1077_v40 = vrot.slane %v860_v32, 2  ;;  %v2693_v48 = vld [vmem:[%s2472_s6 + $0x14] sm:$0x1] }
  0x36   : > { %2219 = vmatmul.mubr.msk.bf16.gmra.mxu1 %vm329_vm1, %v2362_v4  ;;  %2227 = vmatpush3.bf16.msra.mxu0 %v2363_v59  ;;  %v1953_v59 = vld [vmem:[%s2472_s6 + $0x34] sm:$0x1]  ;;  %v897_v42 = vsel %vm259_vm0, %v895_v33, %v896_v34  ;;  %v1076_v46 = vrot.slane %v1046_v39, 2  ;;  %v1367_v52 = vunpack.c.l.bf16 %v2026_v47  ;;  %v1369_v57 = vunpack.c.h.bf16 %v2026_v47  ;;  %v2041_v33 = vld [vmem:[%s2472_s6 + $0x4c] sm:$0x1] }
  0x37   : > { %2243 = vmatpush3.bf16.msra.mxu1 %v2364_v1  ;;  %2228 = vmatprep.subr.bf16.mxu0 %v2365_v6  ;;  %v856_v0 = vunpack.c.l.bf16 %v1953_v59  ;;  %v1978_v1 = vld [vmem:[%s2472_s6 + $0x28] sm:$0xe]  ;;  %v1063_v4 = vsel %vm532_vm2, %v1061_v56, %v1062_v51  ;;  %v2699_v51 = vld [vmem:[%s2472_s6 + $0x1c] sm:$0x1]  ;;  %v2375_v56 = vld [vmem:[%s2472_s6 + $0x10] ss:$8 sps:$4 sm:$0xff]  }
  0x38   : > { %2244 = vmatprep.subr.bf16.mxu1 %v2366_v7  ;;  %2230 = vmatprep.mubr.msk.bf16.mxu0 %vm329_vm1, %v909_v43  ;;  %v1088_v10 = vpack.c.bf16 %v1066_v5, %v1063_v4  ;;  %v1073_v43 = vrot.slane %v1045_v35, 2  ;;  %v1078_v55 = vsel %vm532_vm2, %v1076_v46, %v1077_v40  ;;  %v1370_v58 = vunpack.c.l.bf16 %v2699_v51  ;;  %v2030_v59 = vld [vmem:[%s2472_s6 + $0x20] ss:$8 sps:$4 sm:$0xff]   ;;  %v2058_v46 = vld [vmem:[%s2472_s6 + $0x10] sm:$0xe] }
  0x39   : > { %2246 = vmatprep.mubr.msk.bf16.mxu1 %vm329_vm1, %v1087_v44  ;;  %v893_v14 = vrot.slane %v856_v0, 1  ;;  %v1071_v19 = vrot.slane %v856_v0, 2  ;;  %v2373_v44 = vld [vmem:[%s2827_s1 + $0xc0] sm:$0xff]   ;;  %v1399_v62 = vrot.slane %v1367_v52, 1  ;;  %v2712_v0 = vld [vmem:[%s2472_s6 + $0x2c] sm:$0x1]  ;;  %v1373_v5 = vunpack.c.h.bf16 %v2030_v59 }
  0x3a   : > { %2229 = vmatpush3.bf16.msra.mxu0 %v2365_v6  ;;  %v889_v6 = vrot.slane %v853_v60, 1  ;;  %v1075_v50 = vsel %vm532_vm2, %v1073_v43, %v1074_v41  ;;  %v2707_v60 = vld [vmem:[%s2472_s6 + $0x24] sm:$0x1]  ;;  %v1402_v2 = vrot.slane %v1369_v57, 1  ;;  %v1403_v3 = vrot.slane %v1370_v58, 1  ;;  %v2381_v52 = vld [vmem:[%s2827_s1 + $0x108] sm:$0xff]  }
  0x3b   : > { %2245 = vmatpush3.bf16.msra.mxu1 %v2366_v7  ;;  %2254 = vmatprep.subr.bf16.mxu0 %v2367_v38  ;;  %v1043_v7 = vunpack.c.l.bf16 %v1978_v1  ;;  %v894_v24 = vsel %vm259_vm0, %v892_v13, %v893_v14  ;;  %v1072_v37 = vsel %vm532_vm2, %v1070_v29, %v1071_v19  ;;  %v1371_v1 = vunpack.c.l.bf16 %v2030_v59  ;;  %v2376_v14 = vld [vmem:[%s2472_s6 + $0x20] ss:$8 sps:$4 sm:$0xff]   ;;  %v2035_v19 = vld [vmem:[%s2472_s6 + $0x34] sm:$0x1]  ;;  %v2059_v40 = vld [vmem:[%s2472_s6 + $0x18] sm:$0xe] }
  0x3c   : > { %2270 = vmatprep.subr.bf16.mxu1 %v2368_v36  ;;  %v891_v23 = vsel %vm259_vm0, %v889_v6, %v890_v12  ;;  %v1372_v4 = vunpack.c.l.bf16 %v2707_v60  ;;  %v2377_v6 = vld [vmem:[%s2827_s1 + $0x118] sm:$0xff]   ;;  %v1374_v8 = vunpack.c.l.bf16 %v2712_v0  ;;  %v1408_v12 = vrot.slane %v1373_v5, 1  ;;  %v2061_v5 = vld [vmem:[%s2472_s6 + $0x28] sm:$0xe]  ;;  %v2382_v51 = vld [vmem:[%s2827_s1 + $0x100] sm:$0xff]  }
  0x3d   : > { %2231 = vmatmul.mubr.msk.bf16.vlgmr.msra.gmra.mxu0 %vm329_vm1, %v910_v61  ;;  %v1067_v17 = vrot.slane %v1043_v7, 2  ;;  %v911_v22 = vpack.c.bf16 %v894_v24, %v891_v23  ;;  %v1090_v61 = vpack.c.bf16 %v1078_v55, %v1075_v50  ;;  %v1405_v9 = vrot.slane %v1371_v1, 1  ;;  %v2063_v59 = vld [vmem:[%s2472_s6 + $0x38] sm:$0xe] }
  0x3e   : > { %2255 = vmatpush3.bf16.msra.mxu0 %v2367_v38  ;;  %2247 = vmatmul.mubr.msk.bf16.vlgmr.msra.gmra.mxu1 %vm329_vm1, %v1088_v10  ;;  %v898_v38 = vrot.slane %v859_v30, 1  ;;  %v1404_v10 = vsel %vm259_vm0, %v1402_v2, %v1403_v3  ;;  %v1409_v15 = vrot.slane %v1374_v8, 1  ;;  %v1377_v23 = vunpack.c.h.bf16 %v2034_v16 }
  0x3f   : > { %2256 = vmatprep.subr.bf16.mxu0 %v2369_v53  ;;  %2271 = vmatpush3.bf16.msra.mxu1 %v2368_v36  ;;  %v1069_v28 = vsel %vm532_vm2, %v1067_v17, %v1068_v18  ;;  %v899_v36 = vrot.slane %v860_v32, 1  ;;  %v2378_v18 = vld [vmem:[%s2827_s1 + $0x110] sm:$0xff]   ;;  %v1376_v26 = vunpack.c.l.bf16 %v2035_v19  ;;  %v2039_v32 = vld [vmem:[%s2472_s6 + $0x44] sm:$0x1]  ;;  %v1382_v41 = vunpack.c.l.bf16 %v2041_v33 }
  0x40   : > { %2272 = vmatprep.subr.bf16.mxu1 %v2370_v11  ;;  %2234 = vmatprep.mubr.msk.bf16.mxu0 %vm329_vm1, %v911_v22  ;;  %v1089_v27 = vpack.c.bf16 %v1072_v37, %v1069_v28  ;;  %v1410_v24 = vsel %vm259_vm0, %v1408_v12, %v1409_v15  ;;  %v1378_v22 = vunpack.c.l.bf16 %v2037_v20  ;;  %v2038_v28 = vld [vmem:[%s2472_s6 + $0x40] ss:$8 sps:$4 sm:$0xff]   ;;  %v1561_v55 = vunpack.c.l.bf16 %v2058_v46 }
  0x41   : > { %v900_v49 = vsel %vm259_vm0, %v898_v38, %v899_v36  ;;  %v1379_v34 = vunpack.c.l.bf16 %v2038_v28  ;;  %v1412_v35 = vrot.slane %v1376_v26, 1  ;;  %v1380_v38 = vunpack.c.l.bf16 %v2039_v32  ;;  %v2065_v15 = vld [vmem:[%s2472_s6 + $0x48] sm:$0xe] }
  0x42   : > { %2257 = vmatpush3.bf16.msra.mxu0 %v2369_v53  ;;  %2250 = vmatprep.mubr.msk.bf16.mxu1 %vm329_vm1, %v1089_v27  ;;  %v1368_v53 = vunpack.c.l.bf16 %v2693_v48  ;;  %v912_v54 = vpack.c.bf16 %v900_v49, %v897_v42  ;;  %v1415_v37 = vrot.slane %v1378_v22, 1  ;;  %v1381_v39 = vunpack.c.h.bf16 %v2038_v28 }
  0x43   : > { %2258 = vmatprep.subr.bf16.mxu0 %v2371_v21  ;;  %2273 = vmatpush3.bf16.msra.mxu1 %v2370_v11  ;;  %v1406_v11 = vrot.slane %v1372_v4, 1  ;;  %v1417_v27 = vrot.slane %v1379_v34, 1  ;;  %v1421_v48 = vrot.slane %v1382_v41, 1  ;;  %v1596_v49 = vrot.slane %v1380_v38, 2 }
  0x44   : > { %2274 = vmatprep.subr.bf16.mxu1 %v2372_v31  ;;  %v1400_v63 = vrot.slane %v1368_v53, 1  ;;  %v1578_v42 = vrot.slane %v1368_v53, 2  ;;  %v1599_v50 = vrot.slane %v1382_v41, 2  ;;  %v2062_v53 = vld [vmem:[%s2472_s6 + $0x30] sm:$0xe]  ;;  %v1581_v57 = vrot.slane %v1370_v58, 2 }
  0x45   : > { %2235 = vmatmul.mubr.msk.bf16.gmra.mxu0 %vm329_vm1, %v912_v54  ;;  %v1407_v17 = vsel %vm259_vm0, %v1405_v9, %v1406_v11  ;;  %v1565_v1 = vunpack.c.l.bf16 %v2062_v53  ;;  %v1566_v2 = vunpack.c.l.bf16 %v2063_v59  ;;  %v1590_v3 = vrot.slane %v1376_v26, 2 }
  0x46   : > { %2259 = vmatpush3.bf16.msra.mxu0 %v2371_v21  ;;  %2251 = vmatmul.mubr.msk.bf16.gmra.mxu1 %vm329_vm1, %v1090_v61  ;;  %v1401_v7 = vsel %vm259_vm0, %v1399_v62, %v1400_v63  ;;  %v1375_v21 = vunpack.c.l.bf16 %v2034_v16  ;;  %v1432_v29 = vpack.c.bf16 %v1410_v24, %v1407_v17  ;;  %v2060_v61 = vld [vmem:[%s2472_s6 + $0x20] sm:$0xe]  ;;  %v1577_v58 = vrot.slane %v1561_v55, 2 }
  0x47   : > { %2260 = vmatprep.subr.bf16.mxu0 %v2373_v44  ;;  %2275 = vmatpush3.bf16.msra.mxu1 %v2372_v31  ;;  %v1431_v13 = vpack.c.bf16 %v1404_v10, %v1401_v7  ;;  %v1414_v31 = vrot.slane %v1377_v23, 1  ;;  %v2380_v62 = vld [vmem:[%s2472_s6 + $0x40] ss:$8 sps:$4 sm:$0xff]   ;;  %v1593_v9 = vrot.slane %v1378_v22, 2  ;;  %v1589_v10 = vrot.slane %v1565_v1, 2 }
  0x48   : > { %2276 = vmatprep.subr.bf16.mxu1 %v2374_v45  ;;  %2262 = vmatprep.mubr.msk.bf16.mxu0 %vm329_vm1, %v2375_v56  ;;  %v1411_v30 = vrot.slane %v1375_v21, 1  ;;  %v1562_v56 = vunpack.c.l.bf16 %v2059_v40  ;;  %v1592_v11 = vrot.slane %v1566_v2, 2  ;;  %v1563_v12 = vunpack.c.l.bf16 %v2060_v61 }
  0x49   : > { %2278 = vmatprep.mubr.msk.bf16.mxu1 %vm329_vm1, %v1431_v13  ;;  %v1416_v43 = vsel %vm259_vm0, %v1414_v31, %v1415_v37  ;;  %v1564_v13 = vunpack.c.l.bf16 %v2061_v5  ;;  %v1579_v16 = vsel %vm532_vm2, %v1577_v58, %v1578_v42  ;;  %v1584_v19 = vrot.slane %v1372_v4, 2 }
  0x4a   : > { %2261 = vmatpush3.bf16.msra.mxu0 %v2373_v44  ;;  %v1413_v36 = vsel %vm259_vm0, %v1411_v30, %v1412_v35  ;;  %v1418_v44 = vrot.slane %v1380_v38, 1  ;;  %v1580_v7 = vrot.slane %v1562_v56, 2  ;;  %v1587_v20 = vrot.slane %v1374_v8, 2 }
  0x4b   : > { %2286 = vmatprep.subr.bf16.mxu0 %v2377_v6  ;;  %2277 = vmatpush3.bf16.msra.mxu1 %v2374_v45  ;;  %v1420_v45 = vrot.slane %v1381_v39, 1  ;;  %v1433_v47 = vpack.c.bf16 %v1416_v43, %v1413_v36  ;;  %v1591_v21 = vsel %vm532_vm2, %v1589_v10, %v1590_v3  ;;  %v1594_v23 = vsel %vm532_vm2, %v1592_v11, %v1593_v9 }
  0x4c   : > { %2302 = vmatprep.subr.bf16.mxu1 %v2377_v6  ;;  %v1419_v54 = vsel %vm259_vm0, %v1417_v27, %v1418_v44  ;;  %v1582_v17 = vsel %vm532_vm2, %v1580_v7, %v1581_v57  ;;  %v1583_v24 = vrot.slane %v1563_v12, 2  ;;  %v1586_v26 = vrot.slane %v1564_v13, 2 }
  0x4d   : > { %2263 = vmatmul.mubr.msk.bf16.vlgmr.msra.gmra.mxu0 %vm329_vm1, %v2376_v14  ;;  %v1422_v63 = vsel %vm259_vm0, %v1420_v45, %v1421_v48  ;;  %v2064_v14 = vld [vmem:[%s2472_s6 + $0x40] sm:$0xe]  ;;  %v1568_v28 = vunpack.c.l.bf16 %v2065_v15 }
  0x4e   : > { %2279 = vmatmul.mubr.msk.bf16.vlgmr.msra.gmra.mxu1 %vm329_vm1, %v1432_v29  ;;  %2287 = vmatpush3.bf16.msra.mxu0 %v2377_v6  ;;  %v1567_v22 = vunpack.c.l.bf16 %v2064_v14  ;;  %v1585_v60 = vsel %vm532_vm2, %v1583_v24, %v1584_v19  ;;  %v1588_v0 = vsel %vm532_vm2, %v1586_v26, %v1587_v20 }
  0x4f   : > { %2306 = vmatpush3.bf16.msra.mxu1 %v2377_v6  ;;  %2288 = vmatprep.subr.bf16.mxu0 %v2378_v18  ;;  %v1434_v6 = vpack.c.bf16 %v1422_v63, %v1419_v54  ;;  %v1598_v8 = vrot.slane %v1568_v28, 2  ;;  %v1610_v29 = vpack.c.bf16 %v1588_v0, %v1585_v60 }
  0x50   : > { %2303 = vmatprep.subr.bf16.mxu1 %v2378_v18  ;;  %2266 = vmatprep.mubr.msk.bf16.mxu0 %vm329_vm1, %v2379_v25  ;;  %v1611_v25 = vpack.c.bf16 %v1594_v23, %v1591_v21  ;;  %v1595_v4 = vrot.slane %v1567_v22, 2 }
  0x51   : > { %2282 = vmatprep.mubr.msk.bf16.mxu1 %vm329_vm1, %v1433_v47  ;;  %v1600_v31 = vsel %vm532_vm2, %v1598_v8, %v1599_v50 }
  0x52   : > { %2289 = vmatpush3.bf16.msra.mxu0 %v2378_v18  ;;  %v1597_v30 = vsel %vm532_vm2, %v1595_v4, %v1596_v49 }
  0x53   : > { %2307 = vmatpush3.bf16.msra.mxu1 %v2378_v18  ;;  %2290 = vmatprep.subr.bf16.mxu0 %v2381_v52  ;;  %v1609_v18 = vpack.c.bf16 %v1582_v17, %v1579_v16  ;;  %v1612_v32 = vpack.c.bf16 %v1600_v31, %v1597_v30 }
  0x54   : > { %2304 = vmatprep.subr.bf16.mxu1 %v2381_v52 }
  0x55   : > { %2267 = vmatmul.mubr.msk.bf16.gmra.mxu0 %vm329_vm1, %v2380_v62 }
  0x56   : > { %2283 = vmatmul.mubr.msk.bf16.gmra.mxu1 %vm329_vm1, %v1434_v6  ;;  %2291 = vmatpush3.bf16.msra.mxu0 %v2381_v52 }
  0x57   : > { %2308 = vmatpush3.bf16.msra.mxu1 %v2381_v52  ;;  %2292 = vmatprep.subr.bf16.mxu0 %v2382_v51 }
  0x58   : > { %2305 = vmatprep.subr.bf16.mxu1 %v2382_v51  ;;  %2294 = vmatprep.mubr.msk.bf16.mxu0 %vm329_vm1, %v1609_v18 }
  0x59   : > { %2298 = vmatprep.mubr.msk.bf16.mxu1 %vm329_vm1, %v1611_v25 }
  0x5a   : > { %2293 = vmatpush3.bf16.msra.mxu0 %v2382_v51 }
  0x5b   : > { %2309 = vmatpush3.bf16.msra.mxu1 %v2382_v51 }
  0x5d   : > { %2295 = vmatmul.mubr.msk.bf16.vlgmr.msra.gmra.mxu0 %vm329_vm1, %v1610_v29 }
  0x5e   : > { %2299 = vmatmul.mubr.msk.bf16.vlgmr.msra.gmra.mxu1 %vm329_vm1, %v1612_v32 }
  0xdd   : > { %v2168_v33 = vpop.f32.mrf.mxu0 }
  0xde   : > { %v2184_v34 = vpop.f32.mrf.mxu1 }
  0xdf   : > { %v376_v35 = vpop.f32.mrf.mxu0  ;;  %v486_v17 = vadd.f32 %v2184_v34, %v2168_v33 }
  0xe0   : > { %v477_v37 = vpop.f32.mrf.mxu1 }
  0xe1   : > { %v2169_v38 = vpop.f32.mrf.mxu0  ;;  %v478_v21 = vadd.f32 %v477_v37, %v376_v35 }
  0xe2   : > { %v2185_v39 = vpop.f32.mrf.mxu1 }
  0xe3   : > { %v379_v41 = vpop.f32.mrf.mxu0  ;;  %v489_v28 = vadd.f32 %v2185_v39, %v2169_v38 }
  0xe4   : > { %v480_v27 = vpop.f32.mrf.mxu1 }
  0xe5   : > { %v2172_v42 = vpop.f32.mrf.mxu0  ;;  %v481_v30 = vadd.f32 %v480_v27, %v379_v41 }
  0xe6   : > { %v2188_v36 = vpop.f32.mrf.mxu1 }
  0xe7   : > { %v392_v43 = vpop.f32.mrf.mxu0  ;;  %v502_v20 = vadd.f32 %v2188_v36, %v2172_v42 }
  0xe8   : > { %v493_v44 = vpop.f32.mrf.mxu1 }
  0xe9   : > { %v2173_v45 = vpop.f32.mrf.mxu0  ;;  %v494_v25 = vadd.f32 %v493_v44, %v392_v43 }
  0xea   : > { %v2189_v46 = vpop.f32.mrf.mxu1 }
  0xeb   : > { %v395_v40 = vpop.f32.mrf.mxu0  ;;  %v505_v4 = vadd.f32 %v2189_v46, %v2173_v45 }
  0xec   : > { %v496_v47 = vpop.f32.mrf.mxu1 }
  0xed   : > { %v2200_v48 = vpop.f32.mrf.mxu0  ;;  %v497_v33 = vadd.f32 %v496_v47, %v395_v40 }
  0xee   : > { %v2216_v49 = vpop.f32.mrf.mxu1  ;;  %v681_v23 = vadd.f32 %v2200_v48, %v486_v17 }
  0xef   : > { %v648_v50 = vpop.f32.mrf.mxu0 }
  0xf0   : > { %v790_v52 = vpop.f32.mrf.mxu1  ;;  %v679_v60 = vadd.f32 %v648_v50, %v478_v21  ;;  %v823_v31 = vadd.f32 %v2216_v49, %v681_v23 }
  0xf1   : > { %v2201_v53 = vpop.f32.mrf.mxu0 }
  0xf2   : > { %v2217_v54 = vpop.f32.mrf.mxu1  ;;  %v682_v32 = vadd.f32 %v2201_v53, %v489_v28  ;;  %v821_v35 = vadd.f32 %v790_v52, %v679_v60 }
  0xf3   : > { %v651_v55 = vpop.f32.mrf.mxu0 }
  0xf4   : > { %v793_v56 = vpop.f32.mrf.mxu1  ;;  %v680_v37 = vadd.f32 %v651_v55, %v481_v30  ;;  %v824_v50 = vadd.f32 %v2217_v54, %v682_v32 }
  0xf5   : > { %v2204_v57 = vpop.f32.mrf.mxu0 }
  0xf6   : > { %v2220_v59 = vpop.f32.mrf.mxu1  ;;  %v685_v26 = vadd.f32 %v2204_v57, %v502_v20  ;;  %v822_v49 = vadd.f32 %v793_v56, %v680_v37 }
  0xf7   : > { %v664_v61 = vpop.f32.mrf.mxu0 }
  0xf8   : > { %v806_v62 = vpop.f32.mrf.mxu1  ;;  %v683_v8 = vadd.f32 %v664_v61, %v494_v25  ;;  %v827_v34 = vadd.f32 %v2220_v59, %v685_v26 }
  0xf9   : > { %v2205_v63 = vpop.f32.mrf.mxu0 }
  0xfa   : > { %v2221_v1 = vpop.f32.mrf.mxu1  ;;  %v686_v42 = vadd.f32 %v2205_v63, %v505_v4  ;;  %v825_v44 = vadd.f32 %v806_v62, %v683_v8 }
  0xfb   : > { %v667_v2 = vpop.f32.mrf.mxu0 }
  0xfc   : > { %v809_v3 = vpop.f32.mrf.mxu1  ;;  %v684_v57 = vadd.f32 %v667_v2, %v497_v33  ;;  %v828_v61 = vadd.f32 %v2221_v1, %v686_v42 }
  0xfd   : > { %v2232_v5 = vpop.f32.mrf.mxu0 }
  0xfe   : > { %v2248_v6 = vpop.f32.mrf.mxu1  ;;  %v1025_v48 = vadd.f32 %v2232_v5, %v823_v31  ;;  %v826_v59 = vadd.f32 %v809_v3, %v684_v57 }
  0xff   : > { %v992_v51 = vpop.f32.mrf.mxu0 }
 0x100   : > { %v1170_v58 = vpop.f32.mrf.mxu1  ;;  %v1023_v45 = vadd.f32 %v992_v51, %v821_v35  ;;  %v1203_v53 = vadd.f32 %v2248_v6, %v1025_v48 }
 0x101   : > { %v2233_v7 = vpop.f32.mrf.mxu0 }
 0x102   : > { %v2249_v9 = vpop.f32.mrf.mxu1  ;;  %v1026_v40 = vadd.f32 %v2233_v7, %v824_v50  ;;  %v1201_v5 = vadd.f32 %v1170_v58, %v1023_v45 }
 0x103   : > { %v995_v10 = vpop.f32.mrf.mxu0 }
 0x104   : > { %v2789_v11 = vpop.f32.mrf.mxu1  ;;  %v1024_v17 = vadd.f32 %v995_v10, %v822_v49  ;;  %v1204_v21 = vadd.f32 %v2249_v9, %v1026_v40 }
 0x105   : > { %2830 = vst [vmem:[#allocation2_spill] sm:$0xff] %v2789_v11  ;;  %v2236_v12 = vpop.f32.mrf.mxu0 }
 0x106   : > { %v2252_v13 = vpop.f32.mrf.mxu1  ;;  %v1029_v38 = vadd.f32 %v2236_v12, %v827_v34 }
 0x107   : > { %v1008_v14 = vpop.f32.mrf.mxu0 }
 0x108   : > { %v1186_v15 = vpop.f32.mrf.mxu1  ;;  %v1027_v41 = vadd.f32 %v1008_v14, %v825_v44  ;;  %v1207_v63 = vadd.f32 %v2252_v13, %v1029_v38 }
 0x109   : > { %v2237_v16 = vpop.f32.mrf.mxu0 }
 0x10a   : > { %v2253_v19 = vpop.f32.mrf.mxu1  ;;  %v1030_v52 = vadd.f32 %v2237_v16, %v828_v61  ;;  %v1205_v12 = vadd.f32 %v1186_v15, %v1027_v41  ;;  %v2082_v15 = vld [vmem:[%s2828_s2] ss:$0 sm:$0xff] }
 0x10b   : > { %v1011_v18 = vpop.f32.mrf.mxu0 }
 0x10c   : > { %v1189_v24 = vpop.f32.mrf.mxu1  ;;  %v1028_v20 = vadd.f32 %v1011_v18, %v826_v59  ;;  %v1208_v23 = vadd.f32 %v2253_v19, %v1030_v52  ;;  %v2831_v7 = vld [vmem:[#allocation2_spill] sm:$0xff] }
 0x10d   : > { %v2264_v22 = vpop.f32.mrf.mxu0  ;;  %v1202_v25 = vadd.f32 %v2831_v7, %v1024_v17 }
 0x10e   : > { %v2280_v0 = vpop.f32.mrf.mxu1  ;;  %v1345_v62 = vadd.f32 %v2264_v22, %v1203_v53  ;;  %v1206_v58 = vadd.f32 %v1189_v24, %v1028_v20 }
 0x10f   : > { %v1312_v29 = vpop.f32.mrf.mxu0 }
 0x110   : > { %v1514_v11 = vpop.f32.mrf.mxu1  ;;  %v1343_v1 = vadd.f32 %v1312_v29, %v1201_v5  ;;  %v1547_v3 = vadd.f32 %v2280_v0, %v1345_v62 }
 0x111   : > { %v2265_v36 = vpop.f32.mrf.mxu0 }
 0x112   : > { %v2281_v43 = vpop.f32.mrf.mxu1  ;;  %v1346_v13 = vadd.f32 %v2265_v36, %v1204_v21  ;;  %v1545_v9 = vadd.f32 %v1514_v11, %v1343_v1 }
 0x113   : > { %v1315_v39 = vpop.f32.mrf.mxu0 }
 0x114   : > { %v1517_v46 = vpop.f32.mrf.mxu1  ;;  %v1344_v18 = vadd.f32 %v1315_v39, %v1202_v25  ;;  %v1548_v0 = vadd.f32 %v2281_v43, %v1346_v13 }
 0x115   : > { %v2268_v27 = vpop.f32.mrf.mxu0 }
 0x116   : > { %v2284_v47 = vpop.f32.mrf.mxu1  ;;  %v1349_v54 = vadd.f32 %v2268_v27, %v1207_v63  ;;  %v1546_v36 = vadd.f32 %v1517_v46, %v1344_v18 }
 0x117   : > { %v1328_v55 = vpop.f32.mrf.mxu0 }
 0x118   : > { %v1530_v2 = vpop.f32.mrf.mxu1  ;;  %v1347_v56 = vadd.f32 %v1328_v55, %v1205_v12  ;;  %v1551_v10 = vadd.f32 %v2284_v47, %v1349_v54 }
 0x119   : > { %v2269_v51 = vpop.f32.mrf.mxu0 }
 0x11a   : > { %v2285_v14 = vpop.f32.mrf.mxu1  ;;  %v1350_v26 = vadd.f32 %v2269_v51, %v1208_v23  ;;  %v1549_v60 = vadd.f32 %v1530_v2, %v1347_v56 }
 0x11b   : > { %v1331_v6 = vpop.f32.mrf.mxu0 }
 0x11c   : > { %v1533_v16 = vpop.f32.mrf.mxu1  ;;  %v1348_v4 = vadd.f32 %v1331_v6, %v1206_v58  ;;  %v1552_v32 = vadd.f32 %v2285_v14, %v1350_v26 }
 0x11d   : > { %v2296_v22 = vpop.f32.mrf.mxu0 }
 0x11e   : > { %v1725_v28 = vadd.f32 %v2296_v22, %v1547_v3  ;;  %v2300_v19 = vpop.f32.mrf.mxu1  ;;  %v1550_v44 = vadd.f32 %v1533_v16, %v1348_v4 }
 0x11f   : > { %v1729_v8 = vadd.f32 %v2300_v19, %v1551_v10  ;;  %v1692_v29 = vpop.f32.mrf.mxu0 }
 0x120   : > { %v1740_v30 = vadd.f32 %v2082_v15, %v1725_v28  ;;  %v1723_v31 = vadd.f32 %v1692_v29, %v1545_v9  ;;  %v1708_v24 = vpop.f32.mrf.mxu1 }
 0x121   : > { %v1744_v33 = vadd.f32 %v2082_v15, %v1729_v8  ;;  %v1727_v34 = vadd.f32 %v1708_v24, %v1549_v60  ;;  %v2297_v42 = vpop.f32.mrf.mxu0 }
 0x122   : > { %v1748_v35 = vmax.f32 %v1740_v30, 0.0  ;;  %v1738_v11 = vadd.f32 %v2082_v15, %v1723_v31  ;;  %v1726_v37 = vadd.f32 %v2297_v42, %v1548_v0  ;;  %v2301_v48 = vpop.f32.mrf.mxu1 }
 0x123   : > { %v1752_v43 = vmax.f32 %v1744_v33, 0.0  ;;  %v1742_v57 = vadd.f32 %v2082_v15, %v1727_v34  ;;  %v1730_v38 = vadd.f32 %v2301_v48, %v1552_v32  ;;  %v1695_v39 = vpop.f32.mrf.mxu0 }
 0x124   : > { %v1756_v50 = vpack.c.bf16 %v1748_v35, %v1748_v35  ;;  %v1746_v45 = vmax.f32 %v1738_v11, 0.0  ;;  %v1741_v46 = vadd.f32 %v2082_v15, %v1726_v37  ;;  %v1724_v61 = vadd.f32 %v1695_v39, %v1546_v36  ;;  %v1711_v41 = vpop.f32.mrf.mxu1 }
 0x125   : > { %v1760_v27 = vpack.c.bf16 %v1752_v43, %v1752_v43  ;;  %v1750_v49 = vmax.f32 %v1742_v57, 0.0  ;;  %v1745_v53 = vadd.f32 %v2082_v15, %v1730_v38  ;;  %v1728_v40 = vadd.f32 %v1711_v41, %v1550_v44 }
 0x126   : > { %1765 = vst.msk [vmem:[%s2799_s29 + $0x8] sm:$0xf] %vm1762_vm3, %v1756_v50  ;;  %v1754_v47 = vpack.c.bf16 %v1746_v45, %v1746_v45  ;;  %v1749_v59 = vmax.f32 %v1741_v46, 0.0  ;;  %v1739_v63 = vadd.f32 %v2082_v15, %v1724_v61 }
 0x127   : > { %1769 = vst.msk [vmem:[%s2799_s29 + $0x18] sm:$0xf] %vm1762_vm3, %v1760_v27  ;;  %v1758_v52 = vpack.c.bf16 %v1750_v49, %v1750_v49  ;;  %v1753_v55 = vmax.f32 %v1745_v53, 0.0  ;;  %v1743_v5 = vadd.f32 %v2082_v15, %v1728_v40 }
 0x128   : > { %1763 = vst.msk [vmem:[%s2799_s29] sm:$0xf] %vm1762_vm3, %v1754_v47  ;;  %v1757_v17 = vpack.c.bf16 %v1749_v59, %v1749_v59  ;;  %v1747_v62 = vmax.f32 %v1739_v63, 0.0 }
 0x129   : > { %1767 = vst.msk [vmem:[%s2799_s29 + $0x10] sm:$0xf] %vm1762_vm3, %v1758_v52  ;;  %v1761_v2 = vpack.c.bf16 %v1753_v55, %v1753_v55  ;;  %v1751_v12 = vmax.f32 %v1743_v5, 0.0 }
 0x12a   : > { %1766 = vst.msk [vmem:[%s2799_s29 + $0xc] sm:$0xf] %vm1762_vm3, %v1757_v17  ;;  %v1755_v20 = vpack.c.bf16 %v1747_v62, %v1747_v62 }
 0x12b   : > { %1770 = vst.msk [vmem:[%s2799_s29 + $0x1c] sm:$0xf] %vm1762_vm3, %v1761_v2  ;;  %v1759_v54 = vpack.c.bf16 %v1751_v12, %v1751_v12 }
 0x12c   : > { %1764 = vst.msk [vmem:[%s2799_s29 + $0x4] sm:$0xf] %vm1762_vm3, %v1755_v20 }
 0x12d   : > { %1768 = vst.msk [vmem:[%s2799_s29 + $0x14] sm:$0xf] %vm1762_vm3, %v1759_v54 }
 0x12e PF: > { %s13_s14 = sadd.s32 1, %s2405_s14   ;;  %s2832_s12 = smov %s2401_s13 }
 0x12f   : > { %p10_p5 = scmp.ge.s32.totalorder %s13_s14, 4   ;;  %s2833_s13 = smov %s2835_s15 }
 0x131   :  { %12 = sbr.rel (!%p10_p5) target bundleno = 2 (0x2), region = 73 }

// kernel: _lambda_.11
= control target key start
LH: loop header
LB: loop body
LE: loop exit
PB: predicated region body
PF: predicated region fallthrough
CT: control target
= control target key end

     0   :  { %vm262_vm0 = vcmask 261120   ;;  %s1466_s1 = inlined_call_operand.vmem [shape: bf16[32,32], index: 1, kind: input, shape index: {}]   ;;  %s1467_s0 = inlined_call_operand.vmem [shape: bf16[512,32], index: 0, kind: input, shape index: {}]   ;;  %s1468_s2 = inlined_call_operand.vmem [shape: f32[1,32], index: 2, kind: input, shape index: {}]   ;;  %s1469_s3 = inlined_call_operand.vmem [shape: f32[512,32], index: 3, kind: output, shape index: {}]  }
   0x1   :  { %v953_v0 = vld [vmem:[%s1466_s1 + $0x8] sm:$0xff]   ;;  %v954_v1 = vld [vmem:[%s1466_s1] sm:$0xff]   ;;  %v959_v6 = vld [vmem:[%s1467_s0 + $0x10] sm:$0xff]  }
   0x2   :  { %881 = vmatprep.subr.bf16.mxu0 %v953_v0  ;;  %949 = vmatprep.subr.bf16.mxu1 %v953_v0  ;;  %v955_v2 = vld [vmem:[%s1467_s0] sm:$0xff]   ;;  %v957_v4 = vld [vmem:[%s1467_s0 + $0x8] sm:$0xff]   ;;  %v960_v7 = vld [vmem:[%s1467_s0 + $0x90] sm:$0xff]  }
   0x3   :  { %882 = vmatpush3.bf16.msra.mxu0 %v953_v0  ;;  %951 = vmatpush3.bf16.msra.mxu1 %v953_v0  ;;  %v956_v3 = vld [vmem:[%s1467_s0 + $0x80] sm:$0xff]   ;;  %v958_v5 = vld [vmem:[%s1467_s0 + $0x88] sm:$0xff]   ;;  %v961_v8 = vld [vmem:[%s1467_s0 + $0x18] sm:$0xff]  }
   0x4   :  { %883 = vmatprep.subr.bf16.mxu0 %v954_v1  ;;  %950 = vmatprep.subr.bf16.mxu1 %v954_v1  ;;  %v962_v9 = vld [vmem:[%s1467_s0 + $0x98] sm:$0xff]   ;;  %v963_v10 = vld [vmem:[%s1467_s0 + $0x20] sm:$0xff]   ;;  %v965_v12 = vld [vmem:[%s1467_s0 + $0x28] sm:$0xff]  }
   0x5   :  { %885 = vmatprep.mubr.msk.bf16.mxu0 %vm262_vm0, %v955_v2  ;;  %917 = vmatprep.mubr.msk.bf16.mxu1 %vm262_vm0, %v956_v3  ;;  %v964_v11 = vld [vmem:[%s1467_s0 + $0xa0] sm:$0xff]   ;;  %v966_v13 = vld [vmem:[%s1467_s0 + $0xa8] sm:$0xff]   ;;  %v967_v14 = vld [vmem:[%s1467_s0 + $0x30] sm:$0xff]  }
   0x6   :  { %v968_v15 = vld [vmem:[%s1467_s0 + $0xb0] sm:$0xff]   ;;  %v969_v16 = vld [vmem:[%s1467_s0 + $0x38] sm:$0xff]   ;;  %v971_v18 = vld [vmem:[%s1467_s0 + $0x40] sm:$0xff]  }
   0x7   :  { %884 = vmatpush3.bf16.msra.mxu0 %v954_v1  ;;  %952 = vmatpush3.bf16.msra.mxu1 %v954_v1  ;;  %v970_v17 = vld [vmem:[%s1467_s0 + $0xb8] sm:$0xff]   ;;  %v972_v19 = vld [vmem:[%s1467_s0 + $0xc0] sm:$0xff]   ;;  %v973_v20 = vld [vmem:[%s1467_s0 + $0x48] sm:$0xff]  }
   0x8   :  { %v974_v21 = vld [vmem:[%s1467_s0 + $0xc8] sm:$0xff]   ;;  %v975_v22 = vld [vmem:[%s1467_s0 + $0x50] sm:$0xff]   ;;  %v977_v24 = vld [vmem:[%s1467_s0 + $0x58] sm:$0xff]  }
   0x9   :  { %v976_v23 = vld [vmem:[%s1467_s0 + $0xd0] sm:$0xff]   ;;  %v978_v25 = vld [vmem:[%s1467_s0 + $0xd8] sm:$0xff]   ;;  %v979_v26 = vld [vmem:[%s1467_s0 + $0x60] sm:$0xff]  }
   0xa   :  { %886 = vmatmul.mubr.msk.bf16.vlgmr.msra.gmra.mxu0 %vm262_vm0, %v957_v4  ;;  %918 = vmatmul.mubr.msk.bf16.vlgmr.msra.gmra.mxu1 %vm262_vm0, %v958_v5  ;;  %v980_v27 = vld [vmem:[%s1467_s0 + $0xe0] sm:$0xff]   ;;  %v981_v28 = vld [vmem:[%s1467_s0 + $0x68] sm:$0xff]   ;;  %v983_v30 = vld [vmem:[%s1467_s0 + $0x70] sm:$0xff]  }
   0xb   :  { %889 = vmatprep.mubr.msk.bf16.mxu0 %vm262_vm0, %v959_v6  ;;  %921 = vmatprep.mubr.msk.bf16.mxu1 %vm262_vm0, %v960_v7  ;;  %v982_v29 = vld [vmem:[%s1467_s0 + $0xe8] sm:$0xff]   ;;  %v984_v31 = vld [vmem:[%s1467_s0 + $0xf0] sm:$0xff]   ;;  %v985_v32 = vld [vmem:[%s1467_s0 + $0x78] sm:$0xff]  }
   0xc   :  { %v986_v33 = vld [vmem:[%s1467_s0 + $0xf8] sm:$0xff]   ;;  %v1144_v34 = vld [vmem:[%s1468_s2] ss:$0 sm:$0xff] }
  0x12   :  { %890 = vmatmul.mubr.msk.bf16.gmra.mxu0 %vm262_vm0, %v961_v8  ;;  %922 = vmatmul.mubr.msk.bf16.gmra.mxu1 %vm262_vm0, %v962_v9 }
  0x13   :  { %893 = vmatprep.mubr.msk.bf16.mxu0 %vm262_vm0, %v963_v10  ;;  %925 = vmatprep.mubr.msk.bf16.mxu1 %vm262_vm0, %v964_v11 }
  0x1a   :  { %894 = vmatmul.mubr.msk.bf16.gmra.mxu0 %vm262_vm0, %v965_v12  ;;  %926 = vmatmul.mubr.msk.bf16.gmra.mxu1 %vm262_vm0, %v966_v13 }
  0x1b   :  { %897 = vmatprep.mubr.msk.bf16.mxu0 %vm262_vm0, %v967_v14  ;;  %929 = vmatprep.mubr.msk.bf16.mxu1 %vm262_vm0, %v968_v15 }
  0x22   :  { %898 = vmatmul.mubr.msk.bf16.gmra.mxu0 %vm262_vm0, %v969_v16  ;;  %930 = vmatmul.mubr.msk.bf16.gmra.mxu1 %vm262_vm0, %v970_v17 }
  0x23   :  { %901 = vmatprep.mubr.msk.bf16.mxu0 %vm262_vm0, %v971_v18  ;;  %933 = vmatprep.mubr.msk.bf16.mxu1 %vm262_vm0, %v972_v19 }
  0x2a   :  { %902 = vmatmul.mubr.msk.bf16.gmra.mxu0 %vm262_vm0, %v973_v20  ;;  %934 = vmatmul.mubr.msk.bf16.gmra.mxu1 %vm262_vm0, %v974_v21 }
  0x2b   :  { %905 = vmatprep.mubr.msk.bf16.mxu0 %vm262_vm0, %v975_v22  ;;  %937 = vmatprep.mubr.msk.bf16.mxu1 %vm262_vm0, %v976_v23 }
  0x32   :  { %906 = vmatmul.mubr.msk.bf16.gmra.mxu0 %vm262_vm0, %v977_v24  ;;  %938 = vmatmul.mubr.msk.bf16.gmra.mxu1 %vm262_vm0, %v978_v25 }
  0x33   :  { %909 = vmatprep.mubr.msk.bf16.mxu0 %vm262_vm0, %v979_v26  ;;  %941 = vmatprep.mubr.msk.bf16.mxu1 %vm262_vm0, %v980_v27 }
  0x3a   :  { %910 = vmatmul.mubr.msk.bf16.gmra.mxu0 %vm262_vm0, %v981_v28  ;;  %942 = vmatmul.mubr.msk.bf16.gmra.mxu1 %vm262_vm0, %v982_v29 }
  0x3b   :  { %913 = vmatprep.mubr.msk.bf16.mxu0 %vm262_vm0, %v983_v30  ;;  %945 = vmatprep.mubr.msk.bf16.mxu1 %vm262_vm0, %v984_v31 }
  0x42   :  { %914 = vmatmul.mubr.msk.bf16.gmra.mxu0 %vm262_vm0, %v985_v32  ;;  %946 = vmatmul.mubr.msk.bf16.gmra.mxu1 %vm262_vm0, %v986_v33 }
  0xca   :  { %v887_v35 = vpop.f32.mrf.mxu0  ;;  %v919_v36 = vpop.f32.mrf.mxu1 }
  0xcb   :  { %v402_v37 = vadd.f32 %v887_v35, %v1144_v34  ;;  %v530_v38 = vadd.f32 %v919_v36, %v1144_v34 }
  0xcc   :  { %v393_v39 = vpop.f32.mrf.mxu0  ;;  %v521_v40 = vpop.f32.mrf.mxu1 }
  0xcd   :  { %v650_v41 = vmax.f32 %v402_v37, 0.0  ;;  %v682_v42 = vmax.f32 %v530_v38, 0.0  ;;  %v394_v43 = vadd.f32 %v1144_v34, %v393_v39  ;;  %v522_v44 = vadd.f32 %v1144_v34, %v521_v40 }
  0xce   :  { %v888_v45 = vpop.f32.mrf.mxu0  ;;  %v920_v46 = vpop.f32.mrf.mxu1 }
  0xcf   :  { %714 = vst.msk [vmem:[%s1469_s3 + $0x10] sm:$0xff] %vm262_vm0, %v650_v41  ;;  %746 = vst.msk [vmem:[%s1469_s3 + $0x110] sm:$0xff] %vm262_vm0, %v682_v42  ;;  %v648_v47 = vmax.f32 %v394_v43, 0.0  ;;  %v680_v48 = vmax.f32 %v522_v44, 0.0  ;;  %v405_v49 = vadd.f32 %v888_v45, %v1144_v34  ;;  %v533_v50 = vadd.f32 %v920_v46, %v1144_v34 }
  0xd0   :  { %v396_v51 = vpop.f32.mrf.mxu0  ;;  %v524_v52 = vpop.f32.mrf.mxu1 }
  0xd1   :  { %712 = vst.msk [vmem:[%s1469_s3] sm:$0xff] %vm262_vm0, %v648_v47  ;;  %744 = vst.msk [vmem:[%s1469_s3 + $0x100] sm:$0xff] %vm262_vm0, %v680_v48  ;;  %v651_v53 = vmax.f32 %v405_v49, 0.0  ;;  %v683_v54 = vmax.f32 %v533_v50, 0.0  ;;  %v397_v55 = vadd.f32 %v1144_v34, %v396_v51  ;;  %v525_v56 = vadd.f32 %v1144_v34, %v524_v52 }
  0xd2   :  { %v891_v57 = vpop.f32.mrf.mxu0  ;;  %v923_v58 = vpop.f32.mrf.mxu1 }
  0xd3   :  { %715 = vst.msk [vmem:[%s1469_s3 + $0x18] sm:$0xff] %vm262_vm0, %v651_v53  ;;  %747 = vst.msk [vmem:[%s1469_s3 + $0x118] sm:$0xff] %vm262_vm0, %v683_v54  ;;  %v649_v59 = vmax.f32 %v397_v55, 0.0  ;;  %v681_v60 = vmax.f32 %v525_v56, 0.0  ;;  %v418_v61 = vadd.f32 %v891_v57, %v1144_v34  ;;  %v546_v62 = vadd.f32 %v923_v58, %v1144_v34 }
  0xd4   :  { %v409_v63 = vpop.f32.mrf.mxu0  ;;  %v537_v0 = vpop.f32.mrf.mxu1 }
  0xd5   :  { %713 = vst.msk [vmem:[%s1469_s3 + $0x8] sm:$0xff] %vm262_vm0, %v649_v59  ;;  %745 = vst.msk [vmem:[%s1469_s3 + $0x108] sm:$0xff] %vm262_vm0, %v681_v60  ;;  %v654_v1 = vmax.f32 %v418_v61, 0.0  ;;  %v686_v2 = vmax.f32 %v546_v62, 0.0  ;;  %v410_v3 = vadd.f32 %v1144_v34, %v409_v63  ;;  %v538_v4 = vadd.f32 %v1144_v34, %v537_v0 }
  0xd6   :  { %v892_v5 = vpop.f32.mrf.mxu0  ;;  %v924_v6 = vpop.f32.mrf.mxu1 }
  0xd7   :  { %718 = vst.msk [vmem:[%s1469_s3 + $0x30] sm:$0xff] %vm262_vm0, %v654_v1  ;;  %750 = vst.msk [vmem:[%s1469_s3 + $0x130] sm:$0xff] %vm262_vm0, %v686_v2  ;;  %v652_v7 = vmax.f32 %v410_v3, 0.0  ;;  %v684_v8 = vmax.f32 %v538_v4, 0.0  ;;  %v421_v9 = vadd.f32 %v892_v5, %v1144_v34  ;;  %v549_v10 = vadd.f32 %v924_v6, %v1144_v34 }
  0xd8   :  { %v412_v11 = vpop.f32.mrf.mxu0  ;;  %v540_v12 = vpop.f32.mrf.mxu1 }
  0xd9   :  { %716 = vst.msk [vmem:[%s1469_s3 + $0x20] sm:$0xff] %vm262_vm0, %v652_v7  ;;  %748 = vst.msk [vmem:[%s1469_s3 + $0x120] sm:$0xff] %vm262_vm0, %v684_v8  ;;  %v655_v13 = vmax.f32 %v421_v9, 0.0  ;;  %v687_v14 = vmax.f32 %v549_v10, 0.0  ;;  %v413_v15 = vadd.f32 %v1144_v34, %v412_v11  ;;  %v541_v16 = vadd.f32 %v1144_v34, %v540_v12 }
  0xda   :  { %v895_v17 = vpop.f32.mrf.mxu0  ;;  %v927_v18 = vpop.f32.mrf.mxu1 }
  0xdb   :  { %719 = vst.msk [vmem:[%s1469_s3 + $0x38] sm:$0xff] %vm262_vm0, %v655_v13  ;;  %751 = vst.msk [vmem:[%s1469_s3 + $0x138] sm:$0xff] %vm262_vm0, %v687_v14  ;;  %v653_v19 = vmax.f32 %v413_v15, 0.0  ;;  %v685_v20 = vmax.f32 %v541_v16, 0.0  ;;  %v434_v21 = vadd.f32 %v895_v17, %v1144_v34  ;;  %v562_v22 = vadd.f32 %v927_v18, %v1144_v34 }
  0xdc   :  { %v425_v23 = vpop.f32.mrf.mxu0  ;;  %v553_v24 = vpop.f32.mrf.mxu1 }
  0xdd   :  { %717 = vst.msk [vmem:[%s1469_s3 + $0x28] sm:$0xff] %vm262_vm0, %v653_v19  ;;  %749 = vst.msk [vmem:[%s1469_s3 + $0x128] sm:$0xff] %vm262_vm0, %v685_v20  ;;  %v658_v25 = vmax.f32 %v434_v21, 0.0  ;;  %v690_v26 = vmax.f32 %v562_v22, 0.0  ;;  %v426_v27 = vadd.f32 %v1144_v34, %v425_v23  ;;  %v554_v28 = vadd.f32 %v1144_v34, %v553_v24 }
  0xde   :  { %v896_v29 = vpop.f32.mrf.mxu0  ;;  %v928_v30 = vpop.f32.mrf.mxu1 }
  0xdf   :  { %722 = vst.msk [vmem:[%s1469_s3 + $0x50] sm:$0xff] %vm262_vm0, %v658_v25  ;;  %754 = vst.msk [vmem:[%s1469_s3 + $0x150] sm:$0xff] %vm262_vm0, %v690_v26  ;;  %v656_v31 = vmax.f32 %v426_v27, 0.0  ;;  %v688_v32 = vmax.f32 %v554_v28, 0.0  ;;  %v437_v33 = vadd.f32 %v896_v29, %v1144_v34  ;;  %v565_v35 = vadd.f32 %v928_v30, %v1144_v34 }
  0xe0   :  { %v428_v36 = vpop.f32.mrf.mxu0  ;;  %v556_v37 = vpop.f32.mrf.mxu1 }
  0xe1   :  { %720 = vst.msk [vmem:[%s1469_s3 + $0x40] sm:$0xff] %vm262_vm0, %v656_v31  ;;  %752 = vst.msk [vmem:[%s1469_s3 + $0x140] sm:$0xff] %vm262_vm0, %v688_v32  ;;  %v659_v38 = vmax.f32 %v437_v33, 0.0  ;;  %v691_v39 = vmax.f32 %v565_v35, 0.0  ;;  %v429_v40 = vadd.f32 %v1144_v34, %v428_v36  ;;  %v557_v41 = vadd.f32 %v1144_v34, %v556_v37 }
  0xe2   :  { %v899_v42 = vpop.f32.mrf.mxu0  ;;  %v931_v43 = vpop.f32.mrf.mxu1 }
  0xe3   :  { %723 = vst.msk [vmem:[%s1469_s3 + $0x58] sm:$0xff] %vm262_vm0, %v659_v38  ;;  %755 = vst.msk [vmem:[%s1469_s3 + $0x158] sm:$0xff] %vm262_vm0, %v691_v39  ;;  %v657_v44 = vmax.f32 %v429_v40, 0.0  ;;  %v689_v45 = vmax.f32 %v557_v41, 0.0  ;;  %v450_v46 = vadd.f32 %v899_v42, %v1144_v34  ;;  %v578_v47 = vadd.f32 %v931_v43, %v1144_v34 }
  0xe4   :  { %v441_v48 = vpop.f32.mrf.mxu0  ;;  %v569_v49 = vpop.f32.mrf.mxu1 }
  0xe5   :  { %721 = vst.msk [vmem:[%s1469_s3 + $0x48] sm:$0xff] %vm262_vm0, %v657_v44  ;;  %753 = vst.msk [vmem:[%s1469_s3 + $0x148] sm:$0xff] %vm262_vm0, %v689_v45  ;;  %v662_v50 = vmax.f32 %v450_v46, 0.0  ;;  %v694_v51 = vmax.f32 %v578_v47, 0.0  ;;  %v442_v52 = vadd.f32 %v1144_v34, %v441_v48  ;;  %v570_v53 = vadd.f32 %v1144_v34, %v569_v49 }
  0xe6   :  { %v900_v54 = vpop.f32.mrf.mxu0  ;;  %v932_v55 = vpop.f32.mrf.mxu1 }
  0xe7   :  { %726 = vst.msk [vmem:[%s1469_s3 + $0x70] sm:$0xff] %vm262_vm0, %v662_v50  ;;  %758 = vst.msk [vmem:[%s1469_s3 + $0x170] sm:$0xff] %vm262_vm0, %v694_v51  ;;  %v660_v56 = vmax.f32 %v442_v52, 0.0  ;;  %v692_v57 = vmax.f32 %v570_v53, 0.0  ;;  %v453_v58 = vadd.f32 %v900_v54, %v1144_v34  ;;  %v581_v59 = vadd.f32 %v932_v55, %v1144_v34 }
  0xe8   :  { %v444_v60 = vpop.f32.mrf.mxu0  ;;  %v572_v61 = vpop.f32.mrf.mxu1 }
  0xe9   :  { %724 = vst.msk [vmem:[%s1469_s3 + $0x60] sm:$0xff] %vm262_vm0, %v660_v56  ;;  %756 = vst.msk [vmem:[%s1469_s3 + $0x160] sm:$0xff] %vm262_vm0, %v692_v57  ;;  %v663_v62 = vmax.f32 %v453_v58, 0.0  ;;  %v695_v63 = vmax.f32 %v581_v59, 0.0  ;;  %v445_v0 = vadd.f32 %v1144_v34, %v444_v60  ;;  %v573_v1 = vadd.f32 %v1144_v34, %v572_v61 }
  0xea   :  { %v903_v2 = vpop.f32.mrf.mxu0  ;;  %v935_v3 = vpop.f32.mrf.mxu1 }
  0xeb   :  { %727 = vst.msk [vmem:[%s1469_s3 + $0x78] sm:$0xff] %vm262_vm0, %v663_v62  ;;  %759 = vst.msk [vmem:[%s1469_s3 + $0x178] sm:$0xff] %vm262_vm0, %v695_v63  ;;  %v661_v4 = vmax.f32 %v445_v0, 0.0  ;;  %v693_v5 = vmax.f32 %v573_v1, 0.0  ;;  %v466_v6 = vadd.f32 %v903_v2, %v1144_v34  ;;  %v594_v7 = vadd.f32 %v935_v3, %v1144_v34 }
  0xec   :  { %v457_v8 = vpop.f32.mrf.mxu0  ;;  %v585_v9 = vpop.f32.mrf.mxu1 }
  0xed   :  { %725 = vst.msk [vmem:[%s1469_s3 + $0x68] sm:$0xff] %vm262_vm0, %v661_v4  ;;  %757 = vst.msk [vmem:[%s1469_s3 + $0x168] sm:$0xff] %vm262_vm0, %v693_v5  ;;  %v666_v10 = vmax.f32 %v466_v6, 0.0  ;;  %v698_v11 = vmax.f32 %v594_v7, 0.0  ;;  %v458_v12 = vadd.f32 %v1144_v34, %v457_v8  ;;  %v586_v13 = vadd.f32 %v1144_v34, %v585_v9 }
  0xee   :  { %v904_v14 = vpop.f32.mrf.mxu0  ;;  %v936_v15 = vpop.f32.mrf.mxu1 }
  0xef   :  { %730 = vst.msk [vmem:[%s1469_s3 + $0x90] sm:$0xff] %vm262_vm0, %v666_v10  ;;  %762 = vst.msk [vmem:[%s1469_s3 + $0x190] sm:$0xff] %vm262_vm0, %v698_v11  ;;  %v664_v16 = vmax.f32 %v458_v12, 0.0  ;;  %v696_v17 = vmax.f32 %v586_v13, 0.0  ;;  %v469_v18 = vadd.f32 %v904_v14, %v1144_v34  ;;  %v597_v19 = vadd.f32 %v936_v15, %v1144_v34 }
  0xf0   :  { %v460_v20 = vpop.f32.mrf.mxu0  ;;  %v588_v21 = vpop.f32.mrf.mxu1 }
  0xf1   :  { %728 = vst.msk [vmem:[%s1469_s3 + $0x80] sm:$0xff] %vm262_vm0, %v664_v16  ;;  %760 = vst.msk [vmem:[%s1469_s3 + $0x180] sm:$0xff] %vm262_vm0, %v696_v17  ;;  %v667_v22 = vmax.f32 %v469_v18, 0.0  ;;  %v699_v23 = vmax.f32 %v597_v19, 0.0  ;;  %v461_v24 = vadd.f32 %v1144_v34, %v460_v20  ;;  %v589_v25 = vadd.f32 %v1144_v34, %v588_v21 }
  0xf2   :  { %v907_v26 = vpop.f32.mrf.mxu0  ;;  %v939_v27 = vpop.f32.mrf.mxu1 }
  0xf3   :  { %731 = vst.msk [vmem:[%s1469_s3 + $0x98] sm:$0xff] %vm262_vm0, %v667_v22  ;;  %763 = vst.msk [vmem:[%s1469_s3 + $0x198] sm:$0xff] %vm262_vm0, %v699_v23  ;;  %v665_v28 = vmax.f32 %v461_v24, 0.0  ;;  %v697_v29 = vmax.f32 %v589_v25, 0.0  ;;  %v482_v30 = vadd.f32 %v907_v26, %v1144_v34  ;;  %v610_v31 = vadd.f32 %v939_v27, %v1144_v34 }
  0xf4   :  { %v473_v32 = vpop.f32.mrf.mxu0  ;;  %v601_v33 = vpop.f32.mrf.mxu1 }
  0xf5   :  { %729 = vst.msk [vmem:[%s1469_s3 + $0x88] sm:$0xff] %vm262_vm0, %v665_v28  ;;  %761 = vst.msk [vmem:[%s1469_s3 + $0x188] sm:$0xff] %vm262_vm0, %v697_v29  ;;  %v670_v35 = vmax.f32 %v482_v30, 0.0  ;;  %v702_v36 = vmax.f32 %v610_v31, 0.0  ;;  %v474_v37 = vadd.f32 %v1144_v34, %v473_v32  ;;  %v602_v38 = vadd.f32 %v1144_v34, %v601_v33 }
  0xf6   :  { %v908_v39 = vpop.f32.mrf.mxu0  ;;  %v940_v40 = vpop.f32.mrf.mxu1 }
  0xf7   :  { %734 = vst.msk [vmem:[%s1469_s3 + $0xb0] sm:$0xff] %vm262_vm0, %v670_v35  ;;  %766 = vst.msk [vmem:[%s1469_s3 + $0x1b0] sm:$0xff] %vm262_vm0, %v702_v36  ;;  %v668_v41 = vmax.f32 %v474_v37, 0.0  ;;  %v700_v42 = vmax.f32 %v602_v38, 0.0  ;;  %v485_v43 = vadd.f32 %v908_v39, %v1144_v34  ;;  %v613_v44 = vadd.f32 %v940_v40, %v1144_v34 }
  0xf8   :  { %v476_v45 = vpop.f32.mrf.mxu0  ;;  %v604_v46 = vpop.f32.mrf.mxu1 }
  0xf9   :  { %732 = vst.msk [vmem:[%s1469_s3 + $0xa0] sm:$0xff] %vm262_vm0, %v668_v41  ;;  %764 = vst.msk [vmem:[%s1469_s3 + $0x1a0] sm:$0xff] %vm262_vm0, %v700_v42  ;;  %v671_v47 = vmax.f32 %v485_v43, 0.0  ;;  %v703_v48 = vmax.f32 %v613_v44, 0.0  ;;  %v477_v49 = vadd.f32 %v1144_v34, %v476_v45  ;;  %v605_v50 = vadd.f32 %v1144_v34, %v604_v46 }
  0xfa   :  { %v911_v51 = vpop.f32.mrf.mxu0  ;;  %v943_v52 = vpop.f32.mrf.mxu1 }
  0xfb   :  { %735 = vst.msk [vmem:[%s1469_s3 + $0xb8] sm:$0xff] %vm262_vm0, %v671_v47  ;;  %767 = vst.msk [vmem:[%s1469_s3 + $0x1b8] sm:$0xff] %vm262_vm0, %v703_v48  ;;  %v669_v53 = vmax.f32 %v477_v49, 0.0  ;;  %v701_v54 = vmax.f32 %v605_v50, 0.0  ;;  %v498_v55 = vadd.f32 %v911_v51, %v1144_v34  ;;  %v626_v56 = vadd.f32 %v943_v52, %v1144_v34 }
  0xfc   :  { %v489_v57 = vpop.f32.mrf.mxu0  ;;  %v617_v58 = vpop.f32.mrf.mxu1 }
  0xfd   :  { %733 = vst.msk [vmem:[%s1469_s3 + $0xa8] sm:$0xff] %vm262_vm0, %v669_v53  ;;  %765 = vst.msk [vmem:[%s1469_s3 + $0x1a8] sm:$0xff] %vm262_vm0, %v701_v54  ;;  %v674_v59 = vmax.f32 %v498_v55, 0.0  ;;  %v706_v60 = vmax.f32 %v626_v56, 0.0  ;;  %v490_v61 = vadd.f32 %v1144_v34, %v489_v57  ;;  %v618_v62 = vadd.f32 %v1144_v34, %v617_v58 }
  0xfe   :  { %v912_v63 = vpop.f32.mrf.mxu0  ;;  %v944_v0 = vpop.f32.mrf.mxu1 }
  0xff   :  { %738 = vst.msk [vmem:[%s1469_s3 + $0xd0] sm:$0xff] %vm262_vm0, %v674_v59  ;;  %770 = vst.msk [vmem:[%s1469_s3 + $0x1d0] sm:$0xff] %vm262_vm0, %v706_v60  ;;  %v672_v1 = vmax.f32 %v490_v61, 0.0  ;;  %v704_v2 = vmax.f32 %v618_v62, 0.0  ;;  %v501_v3 = vadd.f32 %v912_v63, %v1144_v34  ;;  %v629_v4 = vadd.f32 %v944_v0, %v1144_v34 }
 0x100   :  { %v492_v5 = vpop.f32.mrf.mxu0  ;;  %v620_v6 = vpop.f32.mrf.mxu1 }
 0x101   :  { %736 = vst.msk [vmem:[%s1469_s3 + $0xc0] sm:$0xff] %vm262_vm0, %v672_v1  ;;  %768 = vst.msk [vmem:[%s1469_s3 + $0x1c0] sm:$0xff] %vm262_vm0, %v704_v2  ;;  %v675_v7 = vmax.f32 %v501_v3, 0.0  ;;  %v707_v8 = vmax.f32 %v629_v4, 0.0  ;;  %v493_v9 = vadd.f32 %v1144_v34, %v492_v5  ;;  %v621_v10 = vadd.f32 %v1144_v34, %v620_v6 }
 0x102   :  { %v915_v11 = vpop.f32.mrf.mxu0  ;;  %v947_v12 = vpop.f32.mrf.mxu1 }
 0x103   :  { %739 = vst.msk [vmem:[%s1469_s3 + $0xd8] sm:$0xff] %vm262_vm0, %v675_v7  ;;  %771 = vst.msk [vmem:[%s1469_s3 + $0x1d8] sm:$0xff] %vm262_vm0, %v707_v8  ;;  %v673_v13 = vmax.f32 %v493_v9, 0.0  ;;  %v705_v14 = vmax.f32 %v621_v10, 0.0  ;;  %v514_v15 = vadd.f32 %v915_v11, %v1144_v34  ;;  %v642_v16 = vadd.f32 %v947_v12, %v1144_v34 }
 0x104   :  { %v505_v17 = vpop.f32.mrf.mxu0  ;;  %v633_v18 = vpop.f32.mrf.mxu1 }
 0x105   :  { %737 = vst.msk [vmem:[%s1469_s3 + $0xc8] sm:$0xff] %vm262_vm0, %v673_v13  ;;  %769 = vst.msk [vmem:[%s1469_s3 + $0x1c8] sm:$0xff] %vm262_vm0, %v705_v14  ;;  %v678_v19 = vmax.f32 %v514_v15, 0.0  ;;  %v710_v20 = vmax.f32 %v642_v16, 0.0  ;;  %v506_v21 = vadd.f32 %v1144_v34, %v505_v17  ;;  %v634_v22 = vadd.f32 %v1144_v34, %v633_v18 }
 0x106   :  { %v916_v23 = vpop.f32.mrf.mxu0  ;;  %v948_v24 = vpop.f32.mrf.mxu1 }
 0x107   :  { %742 = vst.msk [vmem:[%s1469_s3 + $0xf0] sm:$0xff] %vm262_vm0, %v678_v19  ;;  %774 = vst.msk [vmem:[%s1469_s3 + $0x1f0] sm:$0xff] %vm262_vm0, %v710_v20  ;;  %v676_v25 = vmax.f32 %v506_v21, 0.0  ;;  %v708_v26 = vmax.f32 %v634_v22, 0.0  ;;  %v517_v27 = vadd.f32 %v916_v23, %v1144_v34  ;;  %v645_v28 = vadd.f32 %v948_v24, %v1144_v34 }
 0x108   :  { %v508_v29 = vpop.f32.mrf.mxu0  ;;  %v636_v30 = vpop.f32.mrf.mxu1 }
 0x109   :  { %740 = vst.msk [vmem:[%s1469_s3 + $0xe0] sm:$0xff] %vm262_vm0, %v676_v25  ;;  %772 = vst.msk [vmem:[%s1469_s3 + $0x1e0] sm:$0xff] %vm262_vm0, %v708_v26  ;;  %v679_v31 = vmax.f32 %v517_v27, 0.0  ;;  %v711_v32 = vmax.f32 %v645_v28, 0.0  ;;  %v509_v33 = vadd.f32 %v1144_v34, %v508_v29  ;;  %v637_v35 = vadd.f32 %v1144_v34, %v636_v30 }
 0x10b   :  { %743 = vst.msk [vmem:[%s1469_s3 + $0xf8] sm:$0xff] %vm262_vm0, %v679_v31  ;;  %775 = vst.msk [vmem:[%s1469_s3 + $0x1f8] sm:$0xff] %vm262_vm0, %v711_v32  ;;  %v677_v36 = vmax.f32 %v509_v33, 0.0  ;;  %v709_v37 = vmax.f32 %v637_v35, 0.0 }
 0x10d   :  { %741 = vst.msk [vmem:[%s1469_s3 + $0xe8] sm:$0xff] %vm262_vm0, %v677_v36  ;;  %773 = vst.msk [vmem:[%s1469_s3 + $0x1e8] sm:$0xff] %vm262_vm0, %v709_v37 }

</bundles_post_ra>
